<compile_context>
chip_gen: v6e
topology: v6e:2x2x1
jax: 0.10.0
libtpu: 0.0.40
codegen_flags: <defaults>
</compile_context>

<pallas_src>
import functools

import jax
import jax.numpy as jnp
import numpy as np
from jax import lax
from jax.experimental import pallas as pl
from jax.experimental.pallas import tpu as pltpu


def _gelu(v):
    # exact (erf-based) GELU, matching torch.nn.functional.gelu default
    return 0.5 * v * (1.0 + lax.erf(v * 0.7071067811865476))


# ---------------- fully fused forward kernel ----------------

def _ffno_fused_kernel(coords_ref, ffwd_ref,
                       fc0w_ref, fc0b_ref,
                       wr_exp_ref, wi_exp_ref, mask_ref, summat_ref,
                       w1s_ref, b1s_ref, w2s_ref, b2s_ref,
                       fc1w_ref, fc1b_ref, fc2w_ref, fc2b_ref,
                       out_ref, *, n_blocks, batch_tile, modes, n_points):
    f32 = jnp.float32
    M = modes
    N = n_points
    Bt = batch_tile

    x_in = coords_ref[0]          # (R, 2)  shifted point coordinates, R = Bt*N
    Wr_exp = wr_exp_ref[...]      # (C, M*C)  Wr_exp[i, m*C+o] = Wr[m, o, i]
    Wi_exp = wi_exp_ref[...]      # (C, M*C)
    mask = mask_ref[...]          # (Bt*4M, M*C) mode-selection mask
    summat = summat_ref[...]      # (M*C, C) lane-group collapse, 2/N folded in

    # fc0 on the VPU (a K=2 contraction wastes an MXU pass).
    h = (x_in[:, 0:1] * fc0w_ref[0:1, :]
         + x_in[:, 1:2] * fc0w_ref[1:2, :]
         + fc0b_ref[...])                                        # (R, C)

    # inverse transform = Ffwd^T @ Z, expressed as a transposed-LHS contraction
    inv_dims = (((0,), (0,)), ((), ()))

    for i in range(n_blocks):
        # ---- forward "DFT": per-batch dots (independent -> MRF overlap) ----
        gs = [jnp.dot(ffwd_ref[0, b], h[b * N:(b + 1) * N, :],
                      preferred_element_type=f32)
              for b in range(Bt)]                                 # Bt x (4M, C)
        g_all = jnp.concatenate(gs, axis=0) if Bt > 1 else gs[0]  # (Bt*4M, C)

        # ---- per-mode complex channel mixing (two independent MXU chains) ----
        gwr = jnp.dot(g_all, Wr_exp, preferred_element_type=f32)  # (Bt*4M, MC)
        gwi = jnp.dot(g_all, Wi_exp, preferred_element_type=f32)
        sr = jnp.dot(gwr * mask, summat, preferred_element_type=f32)  # (Bt*4M, C)
        si = jnp.dot(gwi * mask, summat, preferred_element_type=f32)

        # ---- recombine re/im and inverse-transform (collapse before inverse) ----
        x1_parts = []
        for b in range(Bt):
            o = b * 4 * M
            sr0, sr1 = sr[o:o + M], sr[o + M:o + 2 * M]
            sr2, sr3 = sr[o + 2 * M:o + 3 * M], sr[o + 3 * M:o + 4 * M]
            si0, si1 = si[o:o + M], si[o + M:o + 2 * M]
            si2, si3 = si[o + 2 * M:o + 3 * M], si[o + 3 * M:o + 4 * M]
            # Z = [Px; Qx; Py; Qy]  (signs of the inverse matrix folded here)
            z = jnp.concatenate(
                [sr0 - si1, sr1 + si0, sr2 - si3, sr3 + si2], axis=0)  # (4M, C)
            x1_parts.append(
                lax.dot_general(ffwd_ref[0, b], z, inv_dims,
                                preferred_element_type=f32))           # (N, C)
        x1 = jnp.concatenate(x1_parts, axis=0) if Bt > 1 else x1_parts[0]

        # ---- two kernel-size-1 convs + gelu + residual on stacked rows ----
        t = _gelu(jnp.dot(x1, w1s_ref[i], preferred_element_type=f32) + b1s_ref[i])
        t = jnp.dot(t, w2s_ref[i], preferred_element_type=f32) + b2s_ref[i]
        h = _gelu(t) + h

    # fc1 (MXU) -> gelu -> fc2 (VPU mul + XLU lane reduce) -> lane-dense store
    t = _gelu(jnp.dot(h, fc1w_ref[...], preferred_element_type=f32) + fc1b_ref[...])
    outv = jnp.sum(t * fc2w_ref[...], axis=-1)                        # (R,)
    out_ref[0] = (outv[None, :] + fc2b_ref[...]).astype(out_ref.dtype)  # (1, R)


def ffno_dse_forward(x, params, modes, n_blocks=4, batch_tile=None):
    B, N, _ = x.shape
    C = params['fc0_w'].shape[1]
    H = params['fc1_w'].shape[1]
    M = modes
    MC = M * C

    # batch stacking: fill >= 128 sublanes per matmul / grid step
    if batch_tile is None:
        batch_tile = min(B, max(1, 128 // max(N, 1)))
    while B % batch_tile:
        batch_tile -= 1
    Bt = batch_tile
    G = B // Bt
    R = Bt * N

    # FVFT.__init__ mutates its inputs in place (global min shift over batch
    # AND points), so fc0 sees the shifted coordinates.
    xpos = x[:, :, 0] - jnp.min(x[:, :, 0])
    ypos = x[:, :, 1] - jnp.min(x[:, :, 1])
    coords = jnp.stack([xpos, ypos], axis=-1).reshape(G, R, 2)
    xp = xpos * 6.28 / (jnp.max(xpos) + 1.0)
    yp = ypos * 6.28 / (jnp.max(ypos) + 1.0)
    m = jnp.arange(M, dtype=jnp.float32)
    angX = m[None, :, None] * xp[:, None, :]                    # (B, M, N)
    angY = m[None, :, None] * yp[:, None, :]
    cX, sX = jnp.cos(angX), jnp.sin(angX)
    cY, sY = jnp.cos(angY), jnp.sin(angY)
    # single stacked forward-DFT matrix per batch: rows [cX; -sX; cY; -sY]
    ffwd = jnp.concatenate([cX, -sX, cY, -sY], axis=1).reshape(G, Bt, 4 * M, N)

    # expanded spectral weights: Wexp[i, m*C + o] = W[m, o, i]
    def expand(W):
        return jnp.transpose(W, (2, 0, 1)).reshape(C, MC)
    wr_exp = expand(params['conv0_wr'])
    wi_exp = expand(params['conv0_wi'])

    # mode-selection mask (stacked over Bt batches) and lane-group collapse
    # matrix with the 2/N inverse-transform scale folded in.
    kmod = jnp.arange(Bt * 4 * M, dtype=jnp.int32) % M
    mgrp = jnp.repeat(jnp.arange(M, dtype=jnp.int32), C)
    mode_mask = (kmod[:, None] == mgrp[None, :]).astype(jnp.float32)   # (Bt*4M, MC)
    summat = (2.0 / N) * jnp.tile(jnp.eye(C, dtype=jnp.float32), (M, 1))  # (MC, C)

    # stacked 1x1-conv weights for the Fourier blocks
    w1s = jnp.stack([params[f'w{i}1_w'] for i in range(n_blocks)])             # (4, C, C)
    b1s = jnp.stack([params[f'w{i}1_b'].reshape(1, C) for i in range(n_blocks)])
    w2s = jnp.stack([params[f'w{i}2_w'] for i in range(n_blocks)])
    b2s = jnp.stack([params[f'w{i}2_b'].reshape(1, C) for i in range(n_blocks)])

    kernel = functools.partial(_ffno_fused_kernel, n_blocks=n_blocks,
                               batch_tile=Bt, modes=M, n_points=N)

    def bcast(shape):
        return pl.BlockSpec(shape, lambda g, _s=shape: tuple(0 for _ in _s))

    out = pl.pallas_call(
        kernel,
        out_shape=jax.ShapeDtypeStruct((G, 1, R), jnp.float32),
        grid_spec=pltpu.PrefetchScalarGridSpec(
            num_scalar_prefetch=0,
            grid=(G,),
            in_specs=[
                pl.BlockSpec((1, R, 2), lambda g: (g, 0, 0)),          # coords
                pl.BlockSpec((1, Bt, 4 * M, N), lambda g: (g, 0, 0, 0)),  # ffwd
                bcast((2, C)),            # fc0_w
                bcast((1, C)),            # fc0_b
                bcast((C, MC)),           # wr_exp
                bcast((C, MC)),           # wi_exp
                bcast((Bt * 4 * M, MC)),  # mode mask
                bcast((MC, C)),           # summat (2/N folded)
                bcast((n_blocks, C, C)),  # w1 stack
                bcast((n_blocks, 1, C)),  # b1 stack
                bcast((n_blocks, C, C)),  # w2 stack
                bcast((n_blocks, 1, C)),  # b2 stack
                bcast((C, H)),            # fc1_w
                bcast((1, H)),            # fc1_b
                bcast((1, H)),            # fc2_w (row layout for VPU reduce)
                bcast((1, 1)),            # fc2_b
            ],
            out_specs=pl.BlockSpec((1, 1, R), lambda g: (g, 0, 0)),
        ),
        compiler_params=pltpu.CompilerParams(
            dimension_semantics=("parallel",),
            vmem_limit_bytes=32 * 1024 * 1024),
    )(coords, ffwd,
      params['fc0_w'], params['fc0_b'].reshape(1, C),
      wr_exp, wi_exp, mode_mask, summat,
      w1s, b1s, w2s, b2s,
      params['fc1_w'], params['fc1_b'].reshape(1, H),
      params['fc2_w'].reshape(1, H), params['fc2_b'].reshape(1, 1))

    # lane-dense kernel output (G, 1, Bt*N) -> module layout (B, N, 1)
    return out.reshape(B, N, 1)


# ---------------- pure-JAX reference (complex arithmetic, like torch) ----------------

def reference_forward(x, params, modes):
    HI = jax.lax.Precision.HIGHEST
    B, N, _ = x.shape
    xpos = x[:, :, 0] - jnp.min(x[:, :, 0])
    ypos = x[:, :, 1] - jnp.min(x[:, :, 1])
    x_in = jnp.stack([xpos, ypos], axis=-1)
    xp = xpos * 6.28 / (jnp.max(xpos) + 1.0)
    yp = ypos * 6.28 / (jnp.max(ypos) + 1.0)
    m = jnp.arange(modes, dtype=jnp.float32)
    angX = m[None, :, None] * xp[:, None, :]
    angY = m[None, :, None] * yp[:, None, :]
    fwd_X = jnp.exp(-1j * angX.astype(jnp.complex64))
    fwd_Y = jnp.exp(-1j * angY.astype(jnp.complex64))
    inv_X = jnp.conj(fwd_X).transpose(0, 2, 1)
    inv_Y = jnp.conj(fwd_Y).transpose(0, 2, 1)
    Wc = params['conv0_wr'] + 1j * params['conv0_wi']     # (M, Cout, Cin)

    h = jnp.einsum('bnc,cd->bnd', x_in, params['fc0_w'], precision=HI) + params['fc0_b']
    for i in range(4):
        hc = h.astype(jnp.complex64)
        xft = jnp.einsum('bmn,bnc->bmc', fwd_X, hc, precision=HI)
        yft = jnp.einsum('bmn,bnc->bmc', fwd_Y, hc, precision=HI)
        ox = jnp.einsum('bmi,moi->bmo', xft, Wc, precision=HI)
        oy = jnp.einsum('bmi,moi->bmo', yft, Wc, precision=HI)
        invx = jnp.einsum('bnm,bmc->bnc', inv_X, ox, precision=HI)
        invy = jnp.einsum('bnm,bmc->bnc', inv_Y, oy, precision=HI)
        x1 = ((invx + invy) / N * 2).real
        x2 = jnp.einsum('bnc,cd->bnd', x1, params[f'w{i}1_w'], precision=HI) + params[f'w{i}1_b']
        x4 = jnp.einsum('bnc,cd->bnd', _gelu(x2), params[f'w{i}2_w'], precision=HI) + params[f'w{i}2_b']
        h = _gelu(x4) + h
    h = _gelu(jnp.einsum('bnc,cd->bnd', h, params['fc1_w'], precision=HI) + params['fc1_b'])
    return jnp.einsum('bnc,cd->bnd', h, params['fc2_w'], precision=HI) + params['fc2_b']


if __name__ == "__main__":
    B, N, width, modes, hidden = 2, 64, 32, 8, 128

    key = jax.random.PRNGKey(0)
    ks = jax.random.split(key, 16)
    scale = 1.0 / (width * width)
    params = {
        'fc0_w': jax.random.normal(ks[0], (2, width), jnp.float32) * 0.1,
        'fc0_b': jax.random.normal(ks[1], (width,), jnp.float32) * 0.1,
        # complex spectral weights, stored as (modes, out_ch, in_ch) real/imag
        'conv0_wr': jax.random.uniform(ks[2], (modes, width, width), jnp.float32) * scale,
        'conv0_wi': jax.random.uniform(ks[3], (modes, width, width), jnp.float32) * scale,
        'fc1_w': jax.random.normal(ks[4], (width, hidden), jnp.float32) * 0.05,
        'fc1_b': jax.random.normal(ks[5], (hidden,), jnp.float32) * 0.05,
        'fc2_w': jax.random.normal(ks[6], (hidden, 1), jnp.float32) * 0.05,
        'fc2_b': jax.random.normal(ks[7], (1,), jnp.float32) * 0.05,
    }
    for i in range(4):
        k1, k2, k3, k4 = jax.random.split(ks[8 + i], 4)
        params[f'w{i}1_w'] = jax.random.normal(k1, (width, width), jnp.float32) * 0.05
        params[f'w{i}1_b'] = jax.random.normal(k2, (width,), jnp.float32) * 0.05
        params[f'w{i}2_w'] = jax.random.normal(k3, (width, width), jnp.float32) * 0.05
        params[f'w{i}2_b'] = jax.random.normal(k4, (width,), jnp.float32) * 0.05

    # input: (B, N, 2) point coordinates
    x = jax.random.uniform(ks[15], (B, N, 2), jnp.float32)

    out = ffno_dse_forward(x, params, modes)
    out = jax.block_until_ready(out)

    ref = reference_forward(x, params, modes)
    np.testing.assert_allclose(np.asarray(out), np.asarray(ref), rtol=2e-2, atol=3e-3)

    print("KERNEL_OK")
</pallas_src>

<mosaic_0001>
module attributes {stable_mosaic.version = 11 : i64} {
  func.func @_ffno_fused_kernel(%arg0: i32, %arg1: memref<1x128x2xf32, #tpu.memory_space<vmem>>, %arg2: memref<1x2x32x64xf32, #tpu.memory_space<vmem>>, %arg3: memref<2x32xf32, #tpu.memory_space<vmem>>, %arg4: memref<1x32xf32, #tpu.memory_space<vmem>>, %arg5: memref<32x256xf32, #tpu.memory_space<vmem>>, %arg6: memref<32x256xf32, #tpu.memory_space<vmem>>, %arg7: memref<64x256xf32, #tpu.memory_space<vmem>>, %arg8: memref<256x32xf32, #tpu.memory_space<vmem>>, %arg9: memref<4x32x32xf32, #tpu.memory_space<vmem>>, %arg10: memref<4x1x32xf32, #tpu.memory_space<vmem>>, %arg11: memref<4x32x32xf32, #tpu.memory_space<vmem>>, %arg12: memref<4x1x32xf32, #tpu.memory_space<vmem>>, %arg13: memref<32x128xf32, #tpu.memory_space<vmem>>, %arg14: memref<1x128xf32, #tpu.memory_space<vmem>>, %arg15: memref<1x128xf32, #tpu.memory_space<vmem>>, %arg16: memref<1x1xf32, #tpu.memory_space<vmem>>, %arg17: memref<1x1x128xf32, #tpu.memory_space<vmem>>) attributes {dimension_semantics = [#tpu.dimension_semantics<parallel>], iteration_bounds = array<i64: 1>, scalar_prefetch = 0 : i64, scratch_operands = 0 : i64, tpu.core_type = #tpu.core_type<tc>, window_params = [{transform_indices = @transform_0, window_bounds = array<i64: 1, 128, 2>}, {transform_indices = @transform_1, window_bounds = array<i64: 1, 2, 32, 64>}, {pipeline_mode = #tpu.pipeline_mode<synchronous>, transform_indices = @transform_2, window_bounds = array<i64: 2, 32>}, {pipeline_mode = #tpu.pipeline_mode<synchronous>, transform_indices = @transform_3, window_bounds = array<i64: 1, 32>}, {pipeline_mode = #tpu.pipeline_mode<synchronous>, transform_indices = @transform_4, window_bounds = array<i64: 32, 256>}, {pipeline_mode = #tpu.pipeline_mode<synchronous>, transform_indices = @transform_5, window_bounds = array<i64: 32, 256>}, {pipeline_mode = #tpu.pipeline_mode<synchronous>, transform_indices = @transform_6, window_bounds = array<i64: 64, 256>}, {pipeline_mode = #tpu.pipeline_mode<synchronous>, transform_indices = @transform_7, window_bounds = array<i64: 256, 32>}, {pipeline_mode = #tpu.pipeline_mode<synchronous>, transform_indices = @transform_8, window_bounds = array<i64: 4, 32, 32>}, {pipeline_mode = #tpu.pipeline_mode<synchronous>, transform_indices = @transform_9, window_bounds = array<i64: 4, 1, 32>}, {pipeline_mode = #tpu.pipeline_mode<synchronous>, transform_indices = @transform_10, window_bounds = array<i64: 4, 32, 32>}, {pipeline_mode = #tpu.pipeline_mode<synchronous>, transform_indices = @transform_11, window_bounds = array<i64: 4, 1, 32>}, {pipeline_mode = #tpu.pipeline_mode<synchronous>, transform_indices = @transform_12, window_bounds = array<i64: 32, 128>}, {pipeline_mode = #tpu.pipeline_mode<synchronous>, transform_indices = @transform_13, window_bounds = array<i64: 1, 128>}, {pipeline_mode = #tpu.pipeline_mode<synchronous>, transform_indices = @transform_14, window_bounds = array<i64: 1, 128>}, {pipeline_mode = #tpu.pipeline_mode<synchronous>, transform_indices = @transform_15, window_bounds = array<i64: 1, 1>}, {transform_indices = @transform_16, window_bounds = array<i64: 1, 1, 128>}]} {
    %c0 = arith.constant 0 : index
    %c0_0 = arith.constant 0 : index
    %c0_1 = arith.constant 0 : index
    %0 = vector.load %arg1[%c0, %c0_0, %c0_1] : memref<1x128x2xf32, #tpu.memory_space<vmem>>, vector<1x128x2xf32>
    %1 = vector.shape_cast %0 : vector<1x128x2xf32> to vector<128x2xf32>
    %c0_2 = arith.constant 0 : index
    %c0_3 = arith.constant 0 : index
    %2 = vector.load %arg5[%c0_2, %c0_3] : memref<32x256xf32, #tpu.memory_space<vmem>>, vector<32x256xf32>
    %c0_4 = arith.constant 0 : index
    %c0_5 = arith.constant 0 : index
    %3 = vector.load %arg6[%c0_4, %c0_5] : memref<32x256xf32, #tpu.memory_space<vmem>>, vector<32x256xf32>
    %c0_6 = arith.constant 0 : index
    %c0_7 = arith.constant 0 : index
    %4 = vector.load %arg7[%c0_6, %c0_7] : memref<64x256xf32, #tpu.memory_space<vmem>>, vector<64x256xf32>
    %c0_8 = arith.constant 0 : index
    %c0_9 = arith.constant 0 : index
    %5 = vector.load %arg8[%c0_8, %c0_9] : memref<256x32xf32, #tpu.memory_space<vmem>>, vector<256x32xf32>
    %6 = vector.extract_strided_slice %1 {offsets = [0, 0], sizes = [128, 1], strides = [1, 1]} : vector<128x2xf32> to vector<128x1xf32>
    %c0_10 = arith.constant 0 : index
    %c0_11 = arith.constant 0 : index
    %7 = vector.load %arg3[%c0_10, %c0_11] : memref<2x32xf32, #tpu.memory_space<vmem>>, vector<1x32xf32>
    %8 = vector.broadcast %6 : vector<128x1xf32> to vector<128x32xf32>
    %9 = vector.broadcast %7 : vector<1x32xf32> to vector<128x32xf32>
    %10 = arith.mulf %8, %9 : vector<128x32xf32>
    %11 = vector.extract_strided_slice %1 {offsets = [0, 1], sizes = [128, 1], strides = [1, 1]} : vector<128x2xf32> to vector<128x1xf32>
    %c1 = arith.constant 1 : index
    %c0_12 = arith.constant 0 : index
    %12 = vector.load %arg3[%c1, %c0_12] : memref<2x32xf32, #tpu.memory_space<vmem>>, vector<1x32xf32>
    %13 = vector.broadcast %11 : vector<128x1xf32> to vector<128x32xf32>
    %14 = vector.broadcast %12 : vector<1x32xf32> to vector<128x32xf32>
    %15 = arith.mulf %13, %14 : vector<128x32xf32>
    %16 = arith.addf %10, %15 : vector<128x32xf32>
    %c0_13 = arith.constant 0 : index
    %c0_14 = arith.constant 0 : index
    %17 = vector.load %arg4[%c0_13, %c0_14] : memref<1x32xf32, #tpu.memory_space<vmem>>, vector<1x32xf32>
    %18 = vector.broadcast %17 : vector<1x32xf32> to vector<128x32xf32>
    %19 = arith.addf %16, %18 : vector<128x32xf32>
    %c0_15 = arith.constant 0 : index
    %c0_16 = arith.constant 0 : index
    %c0_17 = arith.constant 0 : index
    %c0_18 = arith.constant 0 : index
    %20 = vector.load %arg2[%c0_15, %c0_16, %c0_17, %c0_18] : memref<1x2x32x64xf32, #tpu.memory_space<vmem>>, vector<1x1x32x64xf32>
    %21 = vector.shape_cast %20 : vector<1x1x32x64xf32> to vector<32x64xf32>
    %22 = vector.extract_strided_slice %19 {offsets = [0, 0], sizes = [64, 32], strides = [1, 1]} : vector<128x32xf32> to vector<64x32xf32>
    %cst = arith.constant dense<0.000000e+00> : vector<32x32xf32>
    %23 = tpu.matmul %21, %22, %cst {dimension_numbers = #tpu.dot_dimension_numbers<[1], [0], [0], [1], [0, 0, 1, 1], [], []>} : vector<32x64xf32>, vector<64x32xf32>, vector<32x32xf32> -> vector<32x32xf32>
    %c0_19 = arith.constant 0 : index
    %c1_20 = arith.constant 1 : index
    %c0_21 = arith.constant 0 : index
    %c0_22 = arith.constant 0 : index
    %24 = vector.load %arg2[%c0_19, %c1_20, %c0_21, %c0_22] : memref<1x2x32x64xf32, #tpu.memory_space<vmem>>, vector<1x1x32x64xf32>
    %25 = vector.shape_cast %24 : vector<1x1x32x64xf32> to vector<32x64xf32>
    %26 = vector.extract_strided_slice %19 {offsets = [64, 0], sizes = [64, 32], strides = [1, 1]} : vector<128x32xf32> to vector<64x32xf32>
    %cst_23 = arith.constant dense<0.000000e+00> : vector<32x32xf32>
    %27 = tpu.matmul %25, %26, %cst_23 {dimension_numbers = #tpu.dot_dimension_numbers<[1], [0], [0], [1], [0, 0, 1, 1], [], []>} : vector<32x64xf32>, vector<64x32xf32>, vector<32x32xf32> -> vector<32x32xf32>
    %28 = tpu.concatenate %23, %27 in 0 : vector<32x32xf32>, vector<32x32xf32> -> vector<64x32xf32>
    %cst_24 = arith.constant dense<0.000000e+00> : vector<64x256xf32>
    %29 = tpu.matmul %28, %2, %cst_24 {dimension_numbers = #tpu.dot_dimension_numbers<[1], [0], [0], [1], [0, 0, 1, 1], [], []>} : vector<64x32xf32>, vector<32x256xf32>, vector<64x256xf32> -> vector<64x256xf32>
    %cst_25 = arith.constant dense<0.000000e+00> : vector<64x256xf32>
    %30 = tpu.matmul %28, %3, %cst_25 {dimension_numbers = #tpu.dot_dimension_numbers<[1], [0], [0], [1], [0, 0, 1, 1], [], []>} : vector<64x32xf32>, vector<32x256xf32>, vector<64x256xf32> -> vector<64x256xf32>
    %31 = arith.mulf %29, %4 : vector<64x256xf32>
    %cst_26 = arith.constant dense<0.000000e+00> : vector<64x32xf32>
    %32 = tpu.matmul %31, %5, %cst_26 {dimension_numbers = #tpu.dot_dimension_numbers<[1], [0], [0], [1], [0, 0, 1, 1], [], []>} : vector<64x256xf32>, vector<256x32xf32>, vector<64x32xf32> -> vector<64x32xf32>
    %33 = arith.mulf %30, %4 : vector<64x256xf32>
    %cst_27 = arith.constant dense<0.000000e+00> : vector<64x32xf32>
    %34 = tpu.matmul %33, %5, %cst_27 {dimension_numbers = #tpu.dot_dimension_numbers<[1], [0], [0], [1], [0, 0, 1, 1], [], []>} : vector<64x256xf32>, vector<256x32xf32>, vector<64x32xf32> -> vector<64x32xf32>
    %35 = vector.extract_strided_slice %32 {offsets = [0, 0], sizes = [8, 32], strides = [1, 1]} : vector<64x32xf32> to vector<8x32xf32>
    %36 = vector.extract_strided_slice %32 {offsets = [8, 0], sizes = [8, 32], strides = [1, 1]} : vector<64x32xf32> to vector<8x32xf32>
    %37 = vector.extract_strided_slice %32 {offsets = [16, 0], sizes = [8, 32], strides = [1, 1]} : vector<64x32xf32> to vector<8x32xf32>
    %38 = vector.extract_strided_slice %32 {offsets = [24, 0], sizes = [8, 32], strides = [1, 1]} : vector<64x32xf32> to vector<8x32xf32>
    %39 = vector.extract_strided_slice %34 {offsets = [0, 0], sizes = [8, 32], strides = [1, 1]} : vector<64x32xf32> to vector<8x32xf32>
    %40 = vector.extract_strided_slice %34 {offsets = [8, 0], sizes = [8, 32], strides = [1, 1]} : vector<64x32xf32> to vector<8x32xf32>
    %41 = vector.extract_strided_slice %34 {offsets = [16, 0], sizes = [8, 32], strides = [1, 1]} : vector<64x32xf32> to vector<8x32xf32>
    %42 = vector.extract_strided_slice %34 {offsets = [24, 0], sizes = [8, 32], strides = [1, 1]} : vector<64x32xf32> to vector<8x32xf32>
    %43 = arith.subf %35, %40 : vector<8x32xf32>
    %44 = arith.addf %36, %39 : vector<8x32xf32>
    %45 = arith.subf %37, %42 : vector<8x32xf32>
    %46 = arith.addf %38, %41 : vector<8x32xf32>
    %47 = tpu.concatenate %43, %44, %45, %46 in 0 : vector<8x32xf32>, vector<8x32xf32>, vector<8x32xf32>, vector<8x32xf32> -> vector<32x32xf32>
    %c0_28 = arith.constant 0 : index
    %c0_29 = arith.constant 0 : index
    %c0_30 = arith.constant 0 : index
    %c0_31 = arith.constant 0 : index
    %48 = vector.load %arg2[%c0_28, %c0_29, %c0_30, %c0_31] : memref<1x2x32x64xf32, #tpu.memory_space<vmem>>, vector<1x1x32x64xf32>
    %49 = vector.shape_cast %48 : vector<1x1x32x64xf32> to vector<32x64xf32>
    %cst_32 = arith.constant dense<0.000000e+00> : vector<64x32xf32>
    %50 = tpu.matmul %49, %47, %cst_32 {dimension_numbers = #tpu.dot_dimension_numbers<[0], [0], [1], [1], [0, 1, 1, 1], [], []>} : vector<32x64xf32>, vector<32x32xf32>, vector<64x32xf32> -> vector<64x32xf32>
    %51 = vector.extract_strided_slice %32 {offsets = [32, 0], sizes = [8, 32], strides = [1, 1]} : vector<64x32xf32> to vector<8x32xf32>
    %52 = vector.extract_strided_slice %32 {offsets = [40, 0], sizes = [8, 32], strides = [1, 1]} : vector<64x32xf32> to vector<8x32xf32>
    %53 = vector.extract_strided_slice %32 {offsets = [48, 0], sizes = [8, 32], strides = [1, 1]} : vector<64x32xf32> to vector<8x32xf32>
    %54 = vector.extract_strided_slice %32 {offsets = [56, 0], sizes = [8, 32], strides = [1, 1]} : vector<64x32xf32> to vector<8x32xf32>
    %55 = vector.extract_strided_slice %34 {offsets = [32, 0], sizes = [8, 32], strides = [1, 1]} : vector<64x32xf32> to vector<8x32xf32>
    %56 = vector.extract_strided_slice %34 {offsets = [40, 0], sizes = [8, 32], strides = [1, 1]} : vector<64x32xf32> to vector<8x32xf32>
    %57 = vector.extract_strided_slice %34 {offsets = [48, 0], sizes = [8, 32], strides = [1, 1]} : vector<64x32xf32> to vector<8x32xf32>
    %58 = vector.extract_strided_slice %34 {offsets = [56, 0], sizes = [8, 32], strides = [1, 1]} : vector<64x32xf32> to vector<8x32xf32>
    %59 = arith.subf %51, %56 : vector<8x32xf32>
    %60 = arith.addf %52, %55 : vector<8x32xf32>
    %61 = arith.subf %53, %58 : vector<8x32xf32>
    %62 = arith.addf %54, %57 : vector<8x32xf32>
    %63 = tpu.concatenate %59, %60, %61, %62 in 0 : vector<8x32xf32>, vector<8x32xf32>, vector<8x32xf32>, vector<8x32xf32> -> vector<32x32xf32>
    %c0_33 = arith.constant 0 : index
    %c1_34 = arith.constant 1 : index
    %c0_35 = arith.constant 0 : index
    %c0_36 = arith.constant 0 : index
    %64 = vector.load %arg2[%c0_33, %c1_34, %c0_35, %c0_36] : memref<1x2x32x64xf32, #tpu.memory_space<vmem>>, vector<1x1x32x64xf32>
    %65 = vector.shape_cast %64 : vector<1x1x32x64xf32> to vector<32x64xf32>
    %cst_37 = arith.constant dense<0.000000e+00> : vector<64x32xf32>
    %66 = tpu.matmul %65, %63, %cst_37 {dimension_numbers = #tpu.dot_dimension_numbers<[0], [0], [1], [1], [0, 1, 1, 1], [], []>} : vector<32x64xf32>, vector<32x32xf32>, vector<64x32xf32> -> vector<64x32xf32>
    %67 = tpu.concatenate %50, %66 in 0 : vector<64x32xf32>, vector<64x32xf32> -> vector<128x32xf32>
    %c0_38 = arith.constant 0 : index
    %c0_39 = arith.constant 0 : index
    %c0_40 = arith.constant 0 : index
    %68 = vector.load %arg9[%c0_38, %c0_39, %c0_40] : memref<4x32x32xf32, #tpu.memory_space<vmem>>, vector<1x32x32xf32>
    %69 = vector.shape_cast %68 : vector<1x32x32xf32> to vector<32x32xf32>
    %cst_41 = arith.constant dense<0.000000e+00> : vector<128x32xf32>
    %70 = tpu.matmul %67, %69, %cst_41 {dimension_numbers = #tpu.dot_dimension_numbers<[1], [0], [0], [1], [0, 0, 1, 1], [], []>} : vector<128x32xf32>, vector<32x32xf32>, vector<128x32xf32> -> vector<128x32xf32>
    %c0_42 = arith.constant 0 : index
    %c0_43 = arith.constant 0 : index
    %c0_44 = arith.constant 0 : index
    %71 = vector.load %arg10[%c0_42, %c0_43, %c0_44] : memref<4x1x32xf32, #tpu.memory_space<vmem>>, vector<1x1x32xf32>
    %72 = vector.shape_cast %71 : vector<1x1x32xf32> to vector<1x32xf32>
    %73 = vector.broadcast %72 : vector<1x32xf32> to vector<128x32xf32>
    %74 = arith.addf %70, %73 : vector<128x32xf32>
    %cst_45 = arith.constant 5.000000e-01 : f32
    %75 = vector.broadcast %cst_45 : f32 to vector<128x32xf32>
    %76 = arith.mulf %75, %74 : vector<128x32xf32>
    %cst_46 = arith.constant 0.707106769 : f32
    %77 = vector.broadcast %cst_46 : f32 to vector<128x32xf32>
    %78 = arith.mulf %74, %77 : vector<128x32xf32>
    %79 = math.erf %78 : vector<128x32xf32>
    %cst_47 = arith.constant 1.000000e+00 : f32
    %80 = vector.broadcast %cst_47 : f32 to vector<128x32xf32>
    %81 = arith.addf %80, %79 : vector<128x32xf32>
    %82 = arith.mulf %76, %81 : vector<128x32xf32>
    %c0_48 = arith.constant 0 : index
    %c0_49 = arith.constant 0 : index
    %c0_50 = arith.constant 0 : index
    %83 = vector.load %arg11[%c0_48, %c0_49, %c0_50] : memref<4x32x32xf32, #tpu.memory_space<vmem>>, vector<1x32x32xf32>
    %84 = vector.shape_cast %83 : vector<1x32x32xf32> to vector<32x32xf32>
    %cst_51 = arith.constant dense<0.000000e+00> : vector<128x32xf32>
    %85 = tpu.matmul %82, %84, %cst_51 {dimension_numbers = #tpu.dot_dimension_numbers<[1], [0], [0], [1], [0, 0, 1, 1], [], []>} : vector<128x32xf32>, vector<32x32xf32>, vector<128x32xf32> -> vector<128x32xf32>
    %c0_52 = arith.constant 0 : index
    %c0_53 = arith.constant 0 : index
    %c0_54 = arith.constant 0 : index
    %86 = vector.load %arg12[%c0_52, %c0_53, %c0_54] : memref<4x1x32xf32, #tpu.memory_space<vmem>>, vector<1x1x32xf32>
    %87 = vector.shape_cast %86 : vector<1x1x32xf32> to vector<1x32xf32>
    %88 = vector.broadcast %87 : vector<1x32xf32> to vector<128x32xf32>
    %89 = arith.addf %85, %88 : vector<128x32xf32>
    %cst_55 = arith.constant 5.000000e-01 : f32
    %90 = vector.broadcast %cst_55 : f32 to vector<128x32xf32>
    %91 = arith.mulf %90, %89 : vector<128x32xf32>
    %cst_56 = arith.constant 0.707106769 : f32
    %92 = vector.broadcast %cst_56 : f32 to vector<128x32xf32>
    %93 = arith.mulf %89, %92 : vector<128x32xf32>
    %94 = math.erf %93 : vector<128x32xf32>
    %cst_57 = arith.constant 1.000000e+00 : f32
    %95 = vector.broadcast %cst_57 : f32 to vector<128x32xf32>
    %96 = arith.addf %95, %94 : vector<128x32xf32>
    %97 = arith.mulf %91, %96 : vector<128x32xf32>
    %98 = arith.addf %97, %19 : vector<128x32xf32>
    %c0_58 = arith.constant 0 : index
    %c0_59 = arith.constant 0 : index
    %c0_60 = arith.constant 0 : index
    %c0_61 = arith.constant 0 : index
    %99 = vector.load %arg2[%c0_58, %c0_59, %c0_60, %c0_61] : memref<1x2x32x64xf32, #tpu.memory_space<vmem>>, vector<1x1x32x64xf32>
    %100 = vector.shape_cast %99 : vector<1x1x32x64xf32> to vector<32x64xf32>
    %101 = vector.extract_strided_slice %98 {offsets = [0, 0], sizes = [64, 32], strides = [1, 1]} : vector<128x32xf32> to vector<64x32xf32>
    %cst_62 = arith.constant dense<0.000000e+00> : vector<32x32xf32>
    %102 = tpu.matmul %100, %101, %cst_62 {dimension_numbers = #tpu.dot_dimension_numbers<[1], [0], [0], [1], [0, 0, 1, 1], [], []>} : vector<32x64xf32>, vector<64x32xf32>, vector<32x32xf32> -> vector<32x32xf32>
    %c0_63 = arith.constant 0 : index
    %c1_64 = arith.constant 1 : index
    %c0_65 = arith.constant 0 : index
    %c0_66 = arith.constant 0 : index
    %103 = vector.load %arg2[%c0_63, %c1_64, %c0_65, %c0_66] : memref<1x2x32x64xf32, #tpu.memory_space<vmem>>, vector<1x1x32x64xf32>
    %104 = vector.shape_cast %103 : vector<1x1x32x64xf32> to vector<32x64xf32>
    %105 = vector.extract_strided_slice %98 {offsets = [64, 0], sizes = [64, 32], strides = [1, 1]} : vector<128x32xf32> to vector<64x32xf32>
    %cst_67 = arith.constant dense<0.000000e+00> : vector<32x32xf32>
    %106 = tpu.matmul %104, %105, %cst_67 {dimension_numbers = #tpu.dot_dimension_numbers<[1], [0], [0], [1], [0, 0, 1, 1], [], []>} : vector<32x64xf32>, vector<64x32xf32>, vector<32x32xf32> -> vector<32x32xf32>
    %107 = tpu.concatenate %102, %106 in 0 : vector<32x32xf32>, vector<32x32xf32> -> vector<64x32xf32>
    %cst_68 = arith.constant dense<0.000000e+00> : vector<64x256xf32>
    %108 = tpu.matmul %107, %2, %cst_68 {dimension_numbers = #tpu.dot_dimension_numbers<[1], [0], [0], [1], [0, 0, 1, 1], [], []>} : vector<64x32xf32>, vector<32x256xf32>, vector<64x256xf32> -> vector<64x256xf32>
    %cst_69 = arith.constant dense<0.000000e+00> : vector<64x256xf32>
    %109 = tpu.matmul %107, %3, %cst_69 {dimension_numbers = #tpu.dot_dimension_numbers<[1], [0], [0], [1], [0, 0, 1, 1], [], []>} : vector<64x32xf32>, vector<32x256xf32>, vector<64x256xf32> -> vector<64x256xf32>
    %110 = arith.mulf %108, %4 : vector<64x256xf32>
    %cst_70 = arith.constant dense<0.000000e+00> : vector<64x32xf32>
    %111 = tpu.matmul %110, %5, %cst_70 {dimension_numbers = #tpu.dot_dimension_numbers<[1], [0], [0], [1], [0, 0, 1, 1], [], []>} : vector<64x256xf32>, vector<256x32xf32>, vector<64x32xf32> -> vector<64x32xf32>
    %112 = arith.mulf %109, %4 : vector<64x256xf32>
    %cst_71 = arith.constant dense<0.000000e+00> : vector<64x32xf32>
    %113 = tpu.matmul %112, %5, %cst_71 {dimension_numbers = #tpu.dot_dimension_numbers<[1], [0], [0], [1], [0, 0, 1, 1], [], []>} : vector<64x256xf32>, vector<256x32xf32>, vector<64x32xf32> -> vector<64x32xf32>
    %114 = vector.extract_strided_slice %111 {offsets = [0, 0], sizes = [8, 32], strides = [1, 1]} : vector<64x32xf32> to vector<8x32xf32>
    %115 = vector.extract_strided_slice %111 {offsets = [8, 0], sizes = [8, 32], strides = [1, 1]} : vector<64x32xf32> to vector<8x32xf32>
    %116 = vector.extract_strided_slice %111 {offsets = [16, 0], sizes = [8, 32], strides = [1, 1]} : vector<64x32xf32> to vector<8x32xf32>
    %117 = vector.extract_strided_slice %111 {offsets = [24, 0], sizes = [8, 32], strides = [1, 1]} : vector<64x32xf32> to vector<8x32xf32>
    %118 = vector.extract_strided_slice %113 {offsets = [0, 0], sizes = [8, 32], strides = [1, 1]} : vector<64x32xf32> to vector<8x32xf32>
    %119 = vector.extract_strided_slice %113 {offsets = [8, 0], sizes = [8, 32], strides = [1, 1]} : vector<64x32xf32> to vector<8x32xf32>
    %120 = vector.extract_strided_slice %113 {offsets = [16, 0], sizes = [8, 32], strides = [1, 1]} : vector<64x32xf32> to vector<8x32xf32>
    %121 = vector.extract_strided_slice %113 {offsets = [24, 0], sizes = [8, 32], strides = [1, 1]} : vector<64x32xf32> to vector<8x32xf32>
    %122 = arith.subf %114, %119 : vector<8x32xf32>
    %123 = arith.addf %115, %118 : vector<8x32xf32>
    %124 = arith.subf %116, %121 : vector<8x32xf32>
    %125 = arith.addf %117, %120 : vector<8x32xf32>
    %126 = tpu.concatenate %122, %123, %124, %125 in 0 : vector<8x32xf32>, vector<8x32xf32>, vector<8x32xf32>, vector<8x32xf32> -> vector<32x32xf32>
    %c0_72 = arith.constant 0 : index
    %c0_73 = arith.constant 0 : index
    %c0_74 = arith.constant 0 : index
    %c0_75 = arith.constant 0 : index
    %127 = vector.load %arg2[%c0_72, %c0_73, %c0_74, %c0_75] : memref<1x2x32x64xf32, #tpu.memory_space<vmem>>, vector<1x1x32x64xf32>
    %128 = vector.shape_cast %127 : vector<1x1x32x64xf32> to vector<32x64xf32>
    %cst_76 = arith.constant dense<0.000000e+00> : vector<64x32xf32>
    %129 = tpu.matmul %128, %126, %cst_76 {dimension_numbers = #tpu.dot_dimension_numbers<[0], [0], [1], [1], [0, 1, 1, 1], [], []>} : vector<32x64xf32>, vector<32x32xf32>, vector<64x32xf32> -> vector<64x32xf32>
    %130 = vector.extract_strided_slice %111 {offsets = [32, 0], sizes = [8, 32], strides = [1, 1]} : vector<64x32xf32> to vector<8x32xf32>
    %131 = vector.extract_strided_slice %111 {offsets = [40, 0], sizes = [8, 32], strides = [1, 1]} : vector<64x32xf32> to vector<8x32xf32>
    %132 = vector.extract_strided_slice %111 {offsets = [48, 0], sizes = [8, 32], strides = [1, 1]} : vector<64x32xf32> to vector<8x32xf32>
    %133 = vector.extract_strided_slice %111 {offsets = [56, 0], sizes = [8, 32], strides = [1, 1]} : vector<64x32xf32> to vector<8x32xf32>
    %134 = vector.extract_strided_slice %113 {offsets = [32, 0], sizes = [8, 32], strides = [1, 1]} : vector<64x32xf32> to vector<8x32xf32>
    %135 = vector.extract_strided_slice %113 {offsets = [40, 0], sizes = [8, 32], strides = [1, 1]} : vector<64x32xf32> to vector<8x32xf32>
    %136 = vector.extract_strided_slice %113 {offsets = [48, 0], sizes = [8, 32], strides = [1, 1]} : vector<64x32xf32> to vector<8x32xf32>
    %137 = vector.extract_strided_slice %113 {offsets = [56, 0], sizes = [8, 32], strides = [1, 1]} : vector<64x32xf32> to vector<8x32xf32>
    %138 = arith.subf %130, %135 : vector<8x32xf32>
    %139 = arith.addf %131, %134 : vector<8x32xf32>
    %140 = arith.subf %132, %137 : vector<8x32xf32>
    %141 = arith.addf %133, %136 : vector<8x32xf32>
    %142 = tpu.concatenate %138, %139, %140, %141 in 0 : vector<8x32xf32>, vector<8x32xf32>, vector<8x32xf32>, vector<8x32xf32> -> vector<32x32xf32>
    %c0_77 = arith.constant 0 : index
    %c1_78 = arith.constant 1 : index
    %c0_79 = arith.constant 0 : index
    %c0_80 = arith.constant 0 : index
    %143 = vector.load %arg2[%c0_77, %c1_78, %c0_79, %c0_80] : memref<1x2x32x64xf32, #tpu.memory_space<vmem>>, vector<1x1x32x64xf32>
    %144 = vector.shape_cast %143 : vector<1x1x32x64xf32> to vector<32x64xf32>
    %cst_81 = arith.constant dense<0.000000e+00> : vector<64x32xf32>
    %145 = tpu.matmul %144, %142, %cst_81 {dimension_numbers = #tpu.dot_dimension_numbers<[0], [0], [1], [1], [0, 1, 1, 1], [], []>} : vector<32x64xf32>, vector<32x32xf32>, vector<64x32xf32> -> vector<64x32xf32>
    %146 = tpu.concatenate %129, %145 in 0 : vector<64x32xf32>, vector<64x32xf32> -> vector<128x32xf32>
    %c1_82 = arith.constant 1 : index
    %c0_83 = arith.constant 0 : index
    %c0_84 = arith.constant 0 : index
    %147 = vector.load %arg9[%c1_82, %c0_83, %c0_84] : memref<4x32x32xf32, #tpu.memory_space<vmem>>, vector<1x32x32xf32>
    %148 = vector.shape_cast %147 : vector<1x32x32xf32> to vector<32x32xf32>
    %cst_85 = arith.constant dense<0.000000e+00> : vector<128x32xf32>
    %149 = tpu.matmul %146, %148, %cst_85 {dimension_numbers = #tpu.dot_dimension_numbers<[1], [0], [0], [1], [0, 0, 1, 1], [], []>} : vector<128x32xf32>, vector<32x32xf32>, vector<128x32xf32> -> vector<128x32xf32>
    %c1_86 = arith.constant 1 : index
    %c0_87 = arith.constant 0 : index
    %c0_88 = arith.constant 0 : index
    %150 = vector.load %arg10[%c1_86, %c0_87, %c0_88] : memref<4x1x32xf32, #tpu.memory_space<vmem>>, vector<1x1x32xf32>
    %151 = vector.shape_cast %150 : vector<1x1x32xf32> to vector<1x32xf32>
    %152 = vector.broadcast %151 : vector<1x32xf32> to vector<128x32xf32>
    %153 = arith.addf %149, %152 : vector<128x32xf32>
    %cst_89 = arith.constant 5.000000e-01 : f32
    %154 = vector.broadcast %cst_89 : f32 to vector<128x32xf32>
    %155 = arith.mulf %154, %153 : vector<128x32xf32>
    %cst_90 = arith.constant 0.707106769 : f32
    %156 = vector.broadcast %cst_90 : f32 to vector<128x32xf32>
    %157 = arith.mulf %153, %156 : vector<128x32xf32>
    %158 = math.erf %157 : vector<128x32xf32>
    %cst_91 = arith.constant 1.000000e+00 : f32
    %159 = vector.broadcast %cst_91 : f32 to vector<128x32xf32>
    %160 = arith.addf %159, %158 : vector<128x32xf32>
    %161 = arith.mulf %155, %160 : vector<128x32xf32>
    %c1_92 = arith.constant 1 : index
    %c0_93 = arith.constant 0 : index
    %c0_94 = arith.constant 0 : index
    %162 = vector.load %arg11[%c1_92, %c0_93, %c0_94] : memref<4x32x32xf32, #tpu.memory_space<vmem>>, vector<1x32x32xf32>
    %163 = vector.shape_cast %162 : vector<1x32x32xf32> to vector<32x32xf32>
    %cst_95 = arith.constant dense<0.000000e+00> : vector<128x32xf32>
    %164 = tpu.matmul %161, %163, %cst_95 {dimension_numbers = #tpu.dot_dimension_numbers<[1], [0], [0], [1], [0, 0, 1, 1], [], []>} : vector<128x32xf32>, vector<32x32xf32>, vector<128x32xf32> -> vector<128x32xf32>
    %c1_96 = arith.constant 1 : index
    %c0_97 = arith.constant 0 : index
    %c0_98 = arith.constant 0 : index
    %165 = vector.load %arg12[%c1_96, %c0_97, %c0_98] : memref<4x1x32xf32, #tpu.memory_space<vmem>>, vector<1x1x32xf32>
    %166 = vector.shape_cast %165 : vector<1x1x32xf32> to vector<1x32xf32>
    %167 = vector.broadcast %166 : vector<1x32xf32> to vector<128x32xf32>
    %168 = arith.addf %164, %167 : vector<128x32xf32>
    %cst_99 = arith.constant 5.000000e-01 : f32
    %169 = vector.broadcast %cst_99 : f32 to vector<128x32xf32>
    %170 = arith.mulf %169, %168 : vector<128x32xf32>
    %cst_100 = arith.constant 0.707106769 : f32
    %171 = vector.broadcast %cst_100 : f32 to vector<128x32xf32>
    %172 = arith.mulf %168, %171 : vector<128x32xf32>
    %173 = math.erf %172 : vector<128x32xf32>
    %cst_101 = arith.constant 1.000000e+00 : f32
    %174 = vector.broadcast %cst_101 : f32 to vector<128x32xf32>
    %175 = arith.addf %174, %173 : vector<128x32xf32>
    %176 = arith.mulf %170, %175 : vector<128x32xf32>
    %177 = arith.addf %176, %98 : vector<128x32xf32>
    %c0_102 = arith.constant 0 : index
    %c0_103 = arith.constant 0 : index
    %c0_104 = arith.constant 0 : index
    %c0_105 = arith.constant 0 : index
    %178 = vector.load %arg2[%c0_102, %c0_103, %c0_104, %c0_105] : memref<1x2x32x64xf32, #tpu.memory_space<vmem>>, vector<1x1x32x64xf32>
    %179 = vector.shape_cast %178 : vector<1x1x32x64xf32> to vector<32x64xf32>
    %180 = vector.extract_strided_slice %177 {offsets = [0, 0], sizes = [64, 32], strides = [1, 1]} : vector<128x32xf32> to vector<64x32xf32>
    %cst_106 = arith.constant dense<0.000000e+00> : vector<32x32xf32>
    %181 = tpu.matmul %179, %180, %cst_106 {dimension_numbers = #tpu.dot_dimension_numbers<[1], [0], [0], [1], [0, 0, 1, 1], [], []>} : vector<32x64xf32>, vector<64x32xf32>, vector<32x32xf32> -> vector<32x32xf32>
    %c0_107 = arith.constant 0 : index
    %c1_108 = arith.constant 1 : index
    %c0_109 = arith.constant 0 : index
    %c0_110 = arith.constant 0 : index
    %182 = vector.load %arg2[%c0_107, %c1_108, %c0_109, %c0_110] : memref<1x2x32x64xf32, #tpu.memory_space<vmem>>, vector<1x1x32x64xf32>
    %183 = vector.shape_cast %182 : vector<1x1x32x64xf32> to vector<32x64xf32>
    %184 = vector.extract_strided_slice %177 {offsets = [64, 0], sizes = [64, 32], strides = [1, 1]} : vector<128x32xf32> to vector<64x32xf32>
    %cst_111 = arith.constant dense<0.000000e+00> : vector<32x32xf32>
    %185 = tpu.matmul %183, %184, %cst_111 {dimension_numbers = #tpu.dot_dimension_numbers<[1], [0], [0], [1], [0, 0, 1, 1], [], []>} : vector<32x64xf32>, vector<64x32xf32>, vector<32x32xf32> -> vector<32x32xf32>
    %186 = tpu.concatenate %181, %185 in 0 : vector<32x32xf32>, vector<32x32xf32> -> vector<64x32xf32>
    %cst_112 = arith.constant dense<0.000000e+00> : vector<64x256xf32>
    %187 = tpu.matmul %186, %2, %cst_112 {dimension_numbers = #tpu.dot_dimension_numbers<[1], [0], [0], [1], [0, 0, 1, 1], [], []>} : vector<64x32xf32>, vector<32x256xf32>, vector<64x256xf32> -> vector<64x256xf32>
    %cst_113 = arith.constant dense<0.000000e+00> : vector<64x256xf32>
    %188 = tpu.matmul %186, %3, %cst_113 {dimension_numbers = #tpu.dot_dimension_numbers<[1], [0], [0], [1], [0, 0, 1, 1], [], []>} : vector<64x32xf32>, vector<32x256xf32>, vector<64x256xf32> -> vector<64x256xf32>
    %189 = arith.mulf %187, %4 : vector<64x256xf32>
    %cst_114 = arith.constant dense<0.000000e+00> : vector<64x32xf32>
    %190 = tpu.matmul %189, %5, %cst_114 {dimension_numbers = #tpu.dot_dimension_numbers<[1], [0], [0], [1], [0, 0, 1, 1], [], []>} : vector<64x256xf32>, vector<256x32xf32>, vector<64x32xf32> -> vector<64x32xf32>
    %191 = arith.mulf %188, %4 : vector<64x256xf32>
    %cst_115 = arith.constant dense<0.000000e+00> : vector<64x32xf32>
    %192 = tpu.matmul %191, %5, %cst_115 {dimension_numbers = #tpu.dot_dimension_numbers<[1], [0], [0], [1], [0, 0, 1, 1], [], []>} : vector<64x256xf32>, vector<256x32xf32>, vector<64x32xf32> -> vector<64x32xf32>
    %193 = vector.extract_strided_slice %190 {offsets = [0, 0], sizes = [8, 32], strides = [1, 1]} : vector<64x32xf32> to vector<8x32xf32>
    %194 = vector.extract_strided_slice %190 {offsets = [8, 0], sizes = [8, 32], strides = [1, 1]} : vector<64x32xf32> to vector<8x32xf32>
    %195 = vector.extract_strided_slice %190 {offsets = [16, 0], sizes = [8, 32], strides = [1, 1]} : vector<64x32xf32> to vector<8x32xf32>
    %196 = vector.extract_strided_slice %190 {offsets = [24, 0], sizes = [8, 32], strides = [1, 1]} : vector<64x32xf32> to vector<8x32xf32>
    %197 = vector.extract_strided_slice %192 {offsets = [0, 0], sizes = [8, 32], strides = [1, 1]} : vector<64x32xf32> to vector<8x32xf32>
    %198 = vector.extract_strided_slice %192 {offsets = [8, 0], sizes = [8, 32], strides = [1, 1]} : vector<64x32xf32> to vector<8x32xf32>
    %199 = vector.extract_strided_slice %192 {offsets = [16, 0], sizes = [8, 32], strides = [1, 1]} : vector<64x32xf32> to vector<8x32xf32>
    %200 = vector.extract_strided_slice %192 {offsets = [24, 0], sizes = [8, 32], strides = [1, 1]} : vector<64x32xf32> to vector<8x32xf32>
    %201 = arith.subf %193, %198 : vector<8x32xf32>
    %202 = arith.addf %194, %197 : vector<8x32xf32>
    %203 = arith.subf %195, %200 : vector<8x32xf32>
    %204 = arith.addf %196, %199 : vector<8x32xf32>
    %205 = tpu.concatenate %201, %202, %203, %204 in 0 : vector<8x32xf32>, vector<8x32xf32>, vector<8x32xf32>, vector<8x32xf32> -> vector<32x32xf32>
    %c0_116 = arith.constant 0 : index
    %c0_117 = arith.constant 0 : index
    %c0_118 = arith.constant 0 : index
    %c0_119 = arith.constant 0 : index
    %206 = vector.load %arg2[%c0_116, %c0_117, %c0_118, %c0_119] : memref<1x2x32x64xf32, #tpu.memory_space<vmem>>, vector<1x1x32x64xf32>
    %207 = vector.shape_cast %206 : vector<1x1x32x64xf32> to vector<32x64xf32>
    %cst_120 = arith.constant dense<0.000000e+00> : vector<64x32xf32>
    %208 = tpu.matmul %207, %205, %cst_120 {dimension_numbers = #tpu.dot_dimension_numbers<[0], [0], [1], [1], [0, 1, 1, 1], [], []>} : vector<32x64xf32>, vector<32x32xf32>, vector<64x32xf32> -> vector<64x32xf32>
    %209 = vector.extract_strided_slice %190 {offsets = [32, 0], sizes = [8, 32], strides = [1, 1]} : vector<64x32xf32> to vector<8x32xf32>
    %210 = vector.extract_strided_slice %190 {offsets = [40, 0], sizes = [8, 32], strides = [1, 1]} : vector<64x32xf32> to vector<8x32xf32>
    %211 = vector.extract_strided_slice %190 {offsets = [48, 0], sizes = [8, 32], strides = [1, 1]} : vector<64x32xf32> to vector<8x32xf32>
    %212 = vector.extract_strided_slice %190 {offsets = [56, 0], sizes = [8, 32], strides = [1, 1]} : vector<64x32xf32> to vector<8x32xf32>
    %213 = vector.extract_strided_slice %192 {offsets = [32, 0], sizes = [8, 32], strides = [1, 1]} : vector<64x32xf32> to vector<8x32xf32>
    %214 = vector.extract_strided_slice %192 {offsets = [40, 0], sizes = [8, 32], strides = [1, 1]} : vector<64x32xf32> to vector<8x32xf32>
    %215 = vector.extract_strided_slice %192 {offsets = [48, 0], sizes = [8, 32], strides = [1, 1]} : vector<64x32xf32> to vector<8x32xf32>
    %216 = vector.extract_strided_slice %192 {offsets = [56, 0], sizes = [8, 32], strides = [1, 1]} : vector<64x32xf32> to vector<8x32xf32>
    %217 = arith.subf %209, %214 : vector<8x32xf32>
    %218 = arith.addf %210, %213 : vector<8x32xf32>
    %219 = arith.subf %211, %216 : vector<8x32xf32>
    %220 = arith.addf %212, %215 : vector<8x32xf32>
    %221 = tpu.concatenate %217, %218, %219, %220 in 0 : vector<8x32xf32>, vector<8x32xf32>, vector<8x32xf32>, vector<8x32xf32> -> vector<32x32xf32>
    %c0_121 = arith.constant 0 : index
    %c1_122 = arith.constant 1 : index
    %c0_123 = arith.constant 0 : index
    %c0_124 = arith.constant 0 : index
    %222 = vector.load %arg2[%c0_121, %c1_122, %c0_123, %c0_124] : memref<1x2x32x64xf32, #tpu.memory_space<vmem>>, vector<1x1x32x64xf32>
    %223 = vector.shape_cast %222 : vector<1x1x32x64xf32> to vector<32x64xf32>
    %cst_125 = arith.constant dense<0.000000e+00> : vector<64x32xf32>
    %224 = tpu.matmul %223, %221, %cst_125 {dimension_numbers = #tpu.dot_dimension_numbers<[0], [0], [1], [1], [0, 1, 1, 1], [], []>} : vector<32x64xf32>, vector<32x32xf32>, vector<64x32xf32> -> vector<64x32xf32>
    %225 = tpu.concatenate %208, %224 in 0 : vector<64x32xf32>, vector<64x32xf32> -> vector<128x32xf32>
    %c2 = arith.constant 2 : index
    %c0_126 = arith.constant 0 : index
    %c0_127 = arith.constant 0 : index
    %226 = vector.load %arg9[%c2, %c0_126, %c0_127] : memref<4x32x32xf32, #tpu.memory_space<vmem>>, vector<1x32x32xf32>
    %227 = vector.shape_cast %226 : vector<1x32x32xf32> to vector<32x32xf32>
    %cst_128 = arith.constant dense<0.000000e+00> : vector<128x32xf32>
    %228 = tpu.matmul %225, %227, %cst_128 {dimension_numbers = #tpu.dot_dimension_numbers<[1], [0], [0], [1], [0, 0, 1, 1], [], []>} : vector<128x32xf32>, vector<32x32xf32>, vector<128x32xf32> -> vector<128x32xf32>
    %c2_129 = arith.constant 2 : index
    %c0_130 = arith.constant 0 : index
    %c0_131 = arith.constant 0 : index
    %229 = vector.load %arg10[%c2_129, %c0_130, %c0_131] : memref<4x1x32xf32, #tpu.memory_space<vmem>>, vector<1x1x32xf32>
    %230 = vector.shape_cast %229 : vector<1x1x32xf32> to vector<1x32xf32>
    %231 = vector.broadcast %230 : vector<1x32xf32> to vector<128x32xf32>
    %232 = arith.addf %228, %231 : vector<128x32xf32>
    %cst_132 = arith.constant 5.000000e-01 : f32
    %233 = vector.broadcast %cst_132 : f32 to vector<128x32xf32>
    %234 = arith.mulf %233, %232 : vector<128x32xf32>
    %cst_133 = arith.constant 0.707106769 : f32
    %235 = vector.broadcast %cst_133 : f32 to vector<128x32xf32>
    %236 = arith.mulf %232, %235 : vector<128x32xf32>
    %237 = math.erf %236 : vector<128x32xf32>
    %cst_134 = arith.constant 1.000000e+00 : f32
    %238 = vector.broadcast %cst_134 : f32 to vector<128x32xf32>
    %239 = arith.addf %238, %237 : vector<128x32xf32>
    %240 = arith.mulf %234, %239 : vector<128x32xf32>
    %c2_135 = arith.constant 2 : index
    %c0_136 = arith.constant 0 : index
    %c0_137 = arith.constant 0 : index
    %241 = vector.load %arg11[%c2_135, %c0_136, %c0_137] : memref<4x32x32xf32, #tpu.memory_space<vmem>>, vector<1x32x32xf32>
    %242 = vector.shape_cast %241 : vector<1x32x32xf32> to vector<32x32xf32>
    %cst_138 = arith.constant dense<0.000000e+00> : vector<128x32xf32>
    %243 = tpu.matmul %240, %242, %cst_138 {dimension_numbers = #tpu.dot_dimension_numbers<[1], [0], [0], [1], [0, 0, 1, 1], [], []>} : vector<128x32xf32>, vector<32x32xf32>, vector<128x32xf32> -> vector<128x32xf32>
    %c2_139 = arith.constant 2 : index
    %c0_140 = arith.constant 0 : index
    %c0_141 = arith.constant 0 : index
    %244 = vector.load %arg12[%c2_139, %c0_140, %c0_141] : memref<4x1x32xf32, #tpu.memory_space<vmem>>, vector<1x1x32xf32>
    %245 = vector.shape_cast %244 : vector<1x1x32xf32> to vector<1x32xf32>
    %246 = vector.broadcast %245 : vector<1x32xf32> to vector<128x32xf32>
    %247 = arith.addf %243, %246 : vector<128x32xf32>
    %cst_142 = arith.constant 5.000000e-01 : f32
    %248 = vector.broadcast %cst_142 : f32 to vector<128x32xf32>
    %249 = arith.mulf %248, %247 : vector<128x32xf32>
    %cst_143 = arith.constant 0.707106769 : f32
    %250 = vector.broadcast %cst_143 : f32 to vector<128x32xf32>
    %251 = arith.mulf %247, %250 : vector<128x32xf32>
    %252 = math.erf %251 : vector<128x32xf32>
    %cst_144 = arith.constant 1.000000e+00 : f32
    %253 = vector.broadcast %cst_144 : f32 to vector<128x32xf32>
    %254 = arith.addf %253, %252 : vector<128x32xf32>
    %255 = arith.mulf %249, %254 : vector<128x32xf32>
    %256 = arith.addf %255, %177 : vector<128x32xf32>
    %c0_145 = arith.constant 0 : index
    %c0_146 = arith.constant 0 : index
    %c0_147 = arith.constant 0 : index
    %c0_148 = arith.constant 0 : index
    %257 = vector.load %arg2[%c0_145, %c0_146, %c0_147, %c0_148] : memref<1x2x32x64xf32, #tpu.memory_space<vmem>>, vector<1x1x32x64xf32>
    %258 = vector.shape_cast %257 : vector<1x1x32x64xf32> to vector<32x64xf32>
    %259 = vector.extract_strided_slice %256 {offsets = [0, 0], sizes = [64, 32], strides = [1, 1]} : vector<128x32xf32> to vector<64x32xf32>
    %cst_149 = arith.constant dense<0.000000e+00> : vector<32x32xf32>
    %260 = tpu.matmul %258, %259, %cst_149 {dimension_numbers = #tpu.dot_dimension_numbers<[1], [0], [0], [1], [0, 0, 1, 1], [], []>} : vector<32x64xf32>, vector<64x32xf32>, vector<32x32xf32> -> vector<32x32xf32>
    %c0_150 = arith.constant 0 : index
    %c1_151 = arith.constant 1 : index
    %c0_152 = arith.constant 0 : index
    %c0_153 = arith.constant 0 : index
    %261 = vector.load %arg2[%c0_150, %c1_151, %c0_152, %c0_153] : memref<1x2x32x64xf32, #tpu.memory_space<vmem>>, vector<1x1x32x64xf32>
    %262 = vector.shape_cast %261 : vector<1x1x32x64xf32> to vector<32x64xf32>
    %263 = vector.extract_strided_slice %256 {offsets = [64, 0], sizes = [64, 32], strides = [1, 1]} : vector<128x32xf32> to vector<64x32xf32>
    %cst_154 = arith.constant dense<0.000000e+00> : vector<32x32xf32>
    %264 = tpu.matmul %262, %263, %cst_154 {dimension_numbers = #tpu.dot_dimension_numbers<[1], [0], [0], [1], [0, 0, 1, 1], [], []>} : vector<32x64xf32>, vector<64x32xf32>, vector<32x32xf32> -> vector<32x32xf32>
    %265 = tpu.concatenate %260, %264 in 0 : vector<32x32xf32>, vector<32x32xf32> -> vector<64x32xf32>
    %cst_155 = arith.constant dense<0.000000e+00> : vector<64x256xf32>
    %266 = tpu.matmul %265, %2, %cst_155 {dimension_numbers = #tpu.dot_dimension_numbers<[1], [0], [0], [1], [0, 0, 1, 1], [], []>} : vector<64x32xf32>, vector<32x256xf32>, vector<64x256xf32> -> vector<64x256xf32>
    %cst_156 = arith.constant dense<0.000000e+00> : vector<64x256xf32>
    %267 = tpu.matmul %265, %3, %cst_156 {dimension_numbers = #tpu.dot_dimension_numbers<[1], [0], [0], [1], [0, 0, 1, 1], [], []>} : vector<64x32xf32>, vector<32x256xf32>, vector<64x256xf32> -> vector<64x256xf32>
    %268 = arith.mulf %266, %4 : vector<64x256xf32>
    %cst_157 = arith.constant dense<0.000000e+00> : vector<64x32xf32>
    %269 = tpu.matmul %268, %5, %cst_157 {dimension_numbers = #tpu.dot_dimension_numbers<[1], [0], [0], [1], [0, 0, 1, 1], [], []>} : vector<64x256xf32>, vector<256x32xf32>, vector<64x32xf32> -> vector<64x32xf32>
    %270 = arith.mulf %267, %4 : vector<64x256xf32>
    %cst_158 = arith.constant dense<0.000000e+00> : vector<64x32xf32>
    %271 = tpu.matmul %270, %5, %cst_158 {dimension_numbers = #tpu.dot_dimension_numbers<[1], [0], [0], [1], [0, 0, 1, 1], [], []>} : vector<64x256xf32>, vector<256x32xf32>, vector<64x32xf32> -> vector<64x32xf32>
    %272 = vector.extract_strided_slice %269 {offsets = [0, 0], sizes = [8, 32], strides = [1, 1]} : vector<64x32xf32> to vector<8x32xf32>
    %273 = vector.extract_strided_slice %269 {offsets = [8, 0], sizes = [8, 32], strides = [1, 1]} : vector<64x32xf32> to vector<8x32xf32>
    %274 = vector.extract_strided_slice %269 {offsets = [16, 0], sizes = [8, 32], strides = [1, 1]} : vector<64x32xf32> to vector<8x32xf32>
    %275 = vector.extract_strided_slice %269 {offsets = [24, 0], sizes = [8, 32], strides = [1, 1]} : vector<64x32xf32> to vector<8x32xf32>
    %276 = vector.extract_strided_slice %271 {offsets = [0, 0], sizes = [8, 32], strides = [1, 1]} : vector<64x32xf32> to vector<8x32xf32>
    %277 = vector.extract_strided_slice %271 {offsets = [8, 0], sizes = [8, 32], strides = [1, 1]} : vector<64x32xf32> to vector<8x32xf32>
    %278 = vector.extract_strided_slice %271 {offsets = [16, 0], sizes = [8, 32], strides = [1, 1]} : vector<64x32xf32> to vector<8x32xf32>
    %279 = vector.extract_strided_slice %271 {offsets = [24, 0], sizes = [8, 32], strides = [1, 1]} : vector<64x32xf32> to vector<8x32xf32>
    %280 = arith.subf %272, %277 : vector<8x32xf32>
    %281 = arith.addf %273, %276 : vector<8x32xf32>
    %282 = arith.subf %274, %279 : vector<8x32xf32>
    %283 = arith.addf %275, %278 : vector<8x32xf32>
    %284 = tpu.concatenate %280, %281, %282, %283 in 0 : vector<8x32xf32>, vector<8x32xf32>, vector<8x32xf32>, vector<8x32xf32> -> vector<32x32xf32>
    %c0_159 = arith.constant 0 : index
    %c0_160 = arith.constant 0 : index
    %c0_161 = arith.constant 0 : index
    %c0_162 = arith.constant 0 : index
    %285 = vector.load %arg2[%c0_159, %c0_160, %c0_161, %c0_162] : memref<1x2x32x64xf32, #tpu.memory_space<vmem>>, vector<1x1x32x64xf32>
    %286 = vector.shape_cast %285 : vector<1x1x32x64xf32> to vector<32x64xf32>
    %cst_163 = arith.constant dense<0.000000e+00> : vector<64x32xf32>
    %287 = tpu.matmul %286, %284, %cst_163 {dimension_numbers = #tpu.dot_dimension_numbers<[0], [0], [1], [1], [0, 1, 1, 1], [], []>} : vector<32x64xf32>, vector<32x32xf32>, vector<64x32xf32> -> vector<64x32xf32>
    %288 = vector.extract_strided_slice %269 {offsets = [32, 0], sizes = [8, 32], strides = [1, 1]} : vector<64x32xf32> to vector<8x32xf32>
    %289 = vector.extract_strided_slice %269 {offsets = [40, 0], sizes = [8, 32], strides = [1, 1]} : vector<64x32xf32> to vector<8x32xf32>
    %290 = vector.extract_strided_slice %269 {offsets = [48, 0], sizes = [8, 32], strides = [1, 1]} : vector<64x32xf32> to vector<8x32xf32>
    %291 = vector.extract_strided_slice %269 {offsets = [56, 0], sizes = [8, 32], strides = [1, 1]} : vector<64x32xf32> to vector<8x32xf32>
    %292 = vector.extract_strided_slice %271 {offsets = [32, 0], sizes = [8, 32], strides = [1, 1]} : vector<64x32xf32> to vector<8x32xf32>
    %293 = vector.extract_strided_slice %271 {offsets = [40, 0], sizes = [8, 32], strides = [1, 1]} : vector<64x32xf32> to vector<8x32xf32>
    %294 = vector.extract_strided_slice %271 {offsets = [48, 0], sizes = [8, 32], strides = [1, 1]} : vector<64x32xf32> to vector<8x32xf32>
    %295 = vector.extract_strided_slice %271 {offsets = [56, 0], sizes = [8, 32], strides = [1, 1]} : vector<64x32xf32> to vector<8x32xf32>
    %296 = arith.subf %288, %293 : vector<8x32xf32>
    %297 = arith.addf %289, %292 : vector<8x32xf32>
    %298 = arith.subf %290, %295 : vector<8x32xf32>
    %299 = arith.addf %291, %294 : vector<8x32xf32>
    %300 = tpu.concatenate %296, %297, %298, %299 in 0 : vector<8x32xf32>, vector<8x32xf32>, vector<8x32xf32>, vector<8x32xf32> -> vector<32x32xf32>
    %c0_164 = arith.constant 0 : index
    %c1_165 = arith.constant 1 : index
    %c0_166 = arith.constant 0 : index
    %c0_167 = arith.constant 0 : index
    %301 = vector.load %arg2[%c0_164, %c1_165, %c0_166, %c0_167] : memref<1x2x32x64xf32, #tpu.memory_space<vmem>>, vector<1x1x32x64xf32>
    %302 = vector.shape_cast %301 : vector<1x1x32x64xf32> to vector<32x64xf32>
    %cst_168 = arith.constant dense<0.000000e+00> : vector<64x32xf32>
    %303 = tpu.matmul %302, %300, %cst_168 {dimension_numbers = #tpu.dot_dimension_numbers<[0], [0], [1], [1], [0, 1, 1, 1], [], []>} : vector<32x64xf32>, vector<32x32xf32>, vector<64x32xf32> -> vector<64x32xf32>
    %304 = tpu.concatenate %287, %303 in 0 : vector<64x32xf32>, vector<64x32xf32> -> vector<128x32xf32>
    %c3 = arith.constant 3 : index
    %c0_169 = arith.constant 0 : index
    %c0_170 = arith.constant 0 : index
    %305 = vector.load %arg9[%c3, %c0_169, %c0_170] : memref<4x32x32xf32, #tpu.memory_space<vmem>>, vector<1x32x32xf32>
    %306 = vector.shape_cast %305 : vector<1x32x32xf32> to vector<32x32xf32>
    %cst_171 = arith.constant dense<0.000000e+00> : vector<128x32xf32>
    %307 = tpu.matmul %304, %306, %cst_171 {dimension_numbers = #tpu.dot_dimension_numbers<[1], [0], [0], [1], [0, 0, 1, 1], [], []>} : vector<128x32xf32>, vector<32x32xf32>, vector<128x32xf32> -> vector<128x32xf32>
    %c3_172 = arith.constant 3 : index
    %c0_173 = arith.constant 0 : index
    %c0_174 = arith.constant 0 : index
    %308 = vector.load %arg10[%c3_172, %c0_173, %c0_174] : memref<4x1x32xf32, #tpu.memory_space<vmem>>, vector<1x1x32xf32>
    %309 = vector.shape_cast %308 : vector<1x1x32xf32> to vector<1x32xf32>
    %310 = vector.broadcast %309 : vector<1x32xf32> to vector<128x32xf32>
    %311 = arith.addf %307, %310 : vector<128x32xf32>
    %cst_175 = arith.constant 5.000000e-01 : f32
    %312 = vector.broadcast %cst_175 : f32 to vector<128x32xf32>
    %313 = arith.mulf %312, %311 : vector<128x32xf32>
    %cst_176 = arith.constant 0.707106769 : f32
    %314 = vector.broadcast %cst_176 : f32 to vector<128x32xf32>
    %315 = arith.mulf %311, %314 : vector<128x32xf32>
    %316 = math.erf %315 : vector<128x32xf32>
    %cst_177 = arith.constant 1.000000e+00 : f32
    %317 = vector.broadcast %cst_177 : f32 to vector<128x32xf32>
    %318 = arith.addf %317, %316 : vector<128x32xf32>
    %319 = arith.mulf %313, %318 : vector<128x32xf32>
    %c3_178 = arith.constant 3 : index
    %c0_179 = arith.constant 0 : index
    %c0_180 = arith.constant 0 : index
    %320 = vector.load %arg11[%c3_178, %c0_179, %c0_180] : memref<4x32x32xf32, #tpu.memory_space<vmem>>, vector<1x32x32xf32>
    %321 = vector.shape_cast %320 : vector<1x32x32xf32> to vector<32x32xf32>
    %cst_181 = arith.constant dense<0.000000e+00> : vector<128x32xf32>
    %322 = tpu.matmul %319, %321, %cst_181 {dimension_numbers = #tpu.dot_dimension_numbers<[1], [0], [0], [1], [0, 0, 1, 1], [], []>} : vector<128x32xf32>, vector<32x32xf32>, vector<128x32xf32> -> vector<128x32xf32>
    %c3_182 = arith.constant 3 : index
    %c0_183 = arith.constant 0 : index
    %c0_184 = arith.constant 0 : index
    %323 = vector.load %arg12[%c3_182, %c0_183, %c0_184] : memref<4x1x32xf32, #tpu.memory_space<vmem>>, vector<1x1x32xf32>
    %324 = vector.shape_cast %323 : vector<1x1x32xf32> to vector<1x32xf32>
    %325 = vector.broadcast %324 : vector<1x32xf32> to vector<128x32xf32>
    %326 = arith.addf %322, %325 : vector<128x32xf32>
    %cst_185 = arith.constant 5.000000e-01 : f32
    %327 = vector.broadcast %cst_185 : f32 to vector<128x32xf32>
    %328 = arith.mulf %327, %326 : vector<128x32xf32>
    %cst_186 = arith.constant 0.707106769 : f32
    %329 = vector.broadcast %cst_186 : f32 to vector<128x32xf32>
    %330 = arith.mulf %326, %329 : vector<128x32xf32>
    %331 = math.erf %330 : vector<128x32xf32>
    %cst_187 = arith.constant 1.000000e+00 : f32
    %332 = vector.broadcast %cst_187 : f32 to vector<128x32xf32>
    %333 = arith.addf %332, %331 : vector<128x32xf32>
    %334 = arith.mulf %328, %333 : vector<128x32xf32>
    %335 = arith.addf %334, %256 : vector<128x32xf32>
    %c0_188 = arith.constant 0 : index
    %c0_189 = arith.constant 0 : index
    %336 = vector.load %arg13[%c0_188, %c0_189] : memref<32x128xf32, #tpu.memory_space<vmem>>, vector<32x128xf32>
    %cst_190 = arith.constant dense<0.000000e+00> : vector<128x128xf32>
    %337 = tpu.matmul %335, %336, %cst_190 {dimension_numbers = #tpu.dot_dimension_numbers<[1], [0], [0], [1], [0, 0, 1, 1], [], []>} : vector<128x32xf32>, vector<32x128xf32>, vector<128x128xf32> -> vector<128x128xf32>
    %c0_191 = arith.constant 0 : index
    %c0_192 = arith.constant 0 : index
    %338 = vector.load %arg14[%c0_191, %c0_192] : memref<1x128xf32, #tpu.memory_space<vmem>>, vector<1x128xf32>
    %339 = vector.broadcast %338 : vector<1x128xf32> to vector<128x128xf32>
    %340 = arith.addf %337, %339 : vector<128x128xf32>
    %cst_193 = arith.constant 5.000000e-01 : f32
    %341 = vector.broadcast %cst_193 : f32 to vector<128x128xf32>
    %342 = arith.mulf %341, %340 : vector<128x128xf32>
    %cst_194 = arith.constant 0.707106769 : f32
    %343 = vector.broadcast %cst_194 : f32 to vector<128x128xf32>
    %344 = arith.mulf %340, %343 : vector<128x128xf32>
    %345 = math.erf %344 : vector<128x128xf32>
    %cst_195 = arith.constant 1.000000e+00 : f32
    %346 = vector.broadcast %cst_195 : f32 to vector<128x128xf32>
    %347 = arith.addf %346, %345 : vector<128x128xf32>
    %348 = arith.mulf %342, %347 : vector<128x128xf32>
    %c0_196 = arith.constant 0 : index
    %c0_197 = arith.constant 0 : index
    %349 = vector.load %arg15[%c0_196, %c0_197] : memref<1x128xf32, #tpu.memory_space<vmem>>, vector<1x128xf32>
    %350 = vector.broadcast %349 : vector<1x128xf32> to vector<128x128xf32>
    %351 = arith.mulf %348, %350 : vector<128x128xf32>
    %cst_198 = arith.constant dense<0.000000e+00> : vector<128xf32>
    %352 = vector.multi_reduction <add>, %351, %cst_198 [1] : vector<128x128xf32> to vector<128xf32>
    %353 = vector.shape_cast %352 : vector<128xf32> to vector<1x128xf32>
    %c0_199 = arith.constant 0 : index
    %c0_200 = arith.constant 0 : index
    %354 = vector.load %arg16[%c0_199, %c0_200] : memref<1x1xf32, #tpu.memory_space<vmem>>, vector<1x1xf32>
    %355 = vector.broadcast %354 : vector<1x1xf32> to vector<1x128xf32>
    %356 = arith.addf %353, %355 : vector<1x128xf32>
    %c0_201 = arith.constant 0 : index
    %c0_202 = arith.constant 0 : index
    %c0_203 = arith.constant 0 : index
    %357 = vector.load %arg17[%c0_201, %c0_202, %c0_203] : memref<1x1x128xf32, #tpu.memory_space<vmem>>, vector<1x1x128xf32>
    %358 = vector.shape_cast %357 : vector<1x1x128xf32> to vector<1x128xf32>
    %359 = vector.shape_cast %356 : vector<1x128xf32> to vector<1x1x128xf32>
    tpu.vector_store %arg17[%c0_201, %c0_202, %c0_203], %359 {strides = array<i32>} : memref<1x1x128xf32, #tpu.memory_space<vmem>>, vector<1x1x128xf32>,
    return
  }
  func.func @transform_0(%arg0: i32) -> (i32, i32, i32) {
    %c0_i32 = arith.constant 0 : i32
    %c0_i32_0 = arith.constant 0 : i32
    %c0_i32_1 = arith.constant 0 : i32
    return %arg0, %c0_i32, %c0_i32_0 : i32, i32, i32
  }
  func.func @transform_1(%arg0: i32) -> (i32, i32, i32, i32) {
    %c0_i32 = arith.constant 0 : i32
    %c0_i32_0 = arith.constant 0 : i32
    %c0_i32_1 = arith.constant 0 : i32
    %c0_i32_2 = arith.constant 0 : i32
    return %arg0, %c0_i32, %c0_i32_0, %c0_i32_1 : i32, i32, i32, i32
  }
  func.func @transform_2(%arg0: i32) -> (i32, i32) {
    %c0_i32 = arith.constant 0 : i32
    %c0_i32_0 = arith.constant 0 : i32
    %c0_i32_1 = arith.constant 0 : i32
    return %c0_i32, %c0_i32_0 : i32, i32
  }
  func.func @transform_3(%arg0: i32) -> (i32, i32) {
    %c0_i32 = arith.constant 0 : i32
    %c0_i32_0 = arith.constant 0 : i32
    %c0_i32_1 = arith.constant 0 : i32
    return %c0_i32, %c0_i32_0 : i32, i32
  }
  func.func @transform_4(%arg0: i32) -> (i32, i32) {
    %c0_i32 = arith.constant 0 : i32
    %c0_i32_0 = arith.constant 0 : i32
    %c0_i32_1 = arith.constant 0 : i32
    return %c0_i32, %c0_i32_0 : i32, i32
  }
  func.func @transform_5(%arg0: i32) -> (i32, i32) {
    %c0_i32 = arith.constant 0 : i32
    %c0_i32_0 = arith.constant 0 : i32
    %c0_i32_1 = arith.constant 0 : i32
    return %c0_i32, %c0_i32_0 : i32, i32
  }
  func.func @transform_6(%arg0: i32) -> (i32, i32) {
    %c0_i32 = arith.constant 0 : i32
    %c0_i32_0 = arith.constant 0 : i32
    %c0_i32_1 = arith.constant 0 : i32
    return %c0_i32, %c0_i32_0 : i32, i32
  }
  func.func @transform_7(%arg0: i32) -> (i32, i32) {
    %c0_i32 = arith.constant 0 : i32
    %c0_i32_0 = arith.constant 0 : i32
    %c0_i32_1 = arith.constant 0 : i32
    return %c0_i32, %c0_i32_0 : i32, i32
  }
  func.func @transform_8(%arg0: i32) -> (i32, i32, i32) {
    %c0_i32 = arith.constant 0 : i32
    %c0_i32_0 = arith.constant 0 : i32
    %c0_i32_1 = arith.constant 0 : i32
    %c0_i32_2 = arith.constant 0 : i32
    return %c0_i32, %c0_i32_0, %c0_i32_1 : i32, i32, i32
  }
  func.func @transform_9(%arg0: i32) -> (i32, i32, i32) {
    %c0_i32 = arith.constant 0 : i32
    %c0_i32_0 = arith.constant 0 : i32
    %c0_i32_1 = arith.constant 0 : i32
    %c0_i32_2 = arith.constant 0 : i32
    return %c0_i32, %c0_i32_0, %c0_i32_1 : i32, i32, i32
  }
  func.func @transform_10(%arg0: i32) -> (i32, i32, i32) {
    %c0_i32 = arith.constant 0 : i32
    %c0_i32_0 = arith.constant 0 : i32
    %c0_i32_1 = arith.constant 0 : i32
    %c0_i32_2 = arith.constant 0 : i32
    return %c0_i32, %c0_i32_0, %c0_i32_1 : i32, i32, i32
  }
  func.func @transform_11(%arg0: i32) -> (i32, i32, i32) {
    %c0_i32 = arith.constant 0 : i32
    %c0_i32_0 = arith.constant 0 : i32
    %c0_i32_1 = arith.constant 0 : i32
    %c0_i32_2 = arith.constant 0 : i32
    return %c0_i32, %c0_i32_0, %c0_i32_1 : i32, i32, i32
  }
  func.func @transform_12(%arg0: i32) -> (i32, i32) {
    %c0_i32 = arith.constant 0 : i32
    %c0_i32_0 = arith.constant 0 : i32
    %c0_i32_1 = arith.constant 0 : i32
    return %c0_i32, %c0_i32_0 : i32, i32
  }
  func.func @transform_13(%arg0: i32) -> (i32, i32) {
    %c0_i32 = arith.constant 0 : i32
    %c0_i32_0 = arith.constant 0 : i32
    %c0_i32_1 = arith.constant 0 : i32
    return %c0_i32, %c0_i32_0 : i32, i32
  }
  func.func @transform_14(%arg0: i32) -> (i32, i32) {
    %c0_i32 = arith.constant 0 : i32
    %c0_i32_0 = arith.constant 0 : i32
    %c0_i32_1 = arith.constant 0 : i32
    return %c0_i32, %c0_i32_0 : i32, i32
  }
  func.func @transform_15(%arg0: i32) -> (i32, i32) {
    %c0_i32 = arith.constant 0 : i32
    %c0_i32_0 = arith.constant 0 : i32
    %c0_i32_1 = arith.constant 0 : i32
    return %c0_i32, %c0_i32_0 : i32, i32
  }
  func.func @transform_16(%arg0: i32) -> (i32, i32, i32) {
    %c0_i32 = arith.constant 0 : i32
    %c0_i32_0 = arith.constant 0 : i32
    %c0_i32_1 = arith.constant 0 : i32
    return %arg0, %c0_i32, %c0_i32_0 : i32, i32, i32
  }
}

</mosaic_0001>

<bundles_post_ra>
// kernel: tpu_custom_call.1
= control target key start
LH: loop header
LB: loop body
LE: loop exit
PB: predicated region body
PF: predicated region fallthrough
CT: control target
= control target key end

     0   :  { %s11434_s0 = inlined_call_operand.vmem [shape: f32[1,128,2], index: 0, kind: input, shape index: {}]   ;;  %s11435_s1 = inlined_call_operand.hbm [shape: f32[1,2,32,64], index: 1, kind: input, shape index: {}]   ;;  %s11436_s2 = inlined_call_operand.vmem [shape: f32[2,32], index: 2, kind: input, shape index: {}]   ;;  %s11437_s3 = inlined_call_operand.vmem [shape: f32[1,32], index: 3, kind: input, shape index: {}]   ;;  %s11438_s4 = inlined_call_operand.hbm [shape: f32[32,256], index: 4, kind: input, shape index: {}]   ;;  %s11439_s5 = inlined_call_operand.hbm [shape: f32[32,256], index: 5, kind: input, shape index: {}]   ;;  %s11440_s6 = inlined_call_operand.vmem [shape: f32[64,256], index: 6, kind: input, shape index: {}]   ;;  %s11441_s7 = inlined_call_operand.vmem [shape: f32[256,32], index: 7, kind: input, shape index: {}]   ;;  %s11442_s8 = inlined_call_operand.vmem [shape: f32[4,32,32], index: 8, kind: input, shape index: {}]   ;;  %s11443_s9 = inlined_call_operand.vmem [shape: f32[4,1,32], index: 9, kind: input, shape index: {}]   ;;  %s11444_s10 = inlined_call_operand.vmem [shape: f32[4,32,32], index: 10, kind: input, shape index: {}]   ;;  %s11445_s11 = inlined_call_operand.vmem [shape: f32[4,1,32], index: 11, kind: input, shape index: {}]   ;;  %s11446_s12 = inlined_call_operand.hbm [shape: f32[32,128], index: 12, kind: input, shape index: {}]   ;;  %s11447_s13 = inlined_call_operand.vmem [shape: f32[1,128], index: 13, kind: input, shape index: {}]   ;;  %s11448_s14 = inlined_call_operand.vmem [shape: f32[1,128], index: 14, kind: input, shape index: {}]   ;;  %s11449_s15 = inlined_call_operand.<no memory space> [shape: f32[1,1], index: 15, kind: input, shape index: {}]   ;;  %s11450_s16 = inlined_call_operand.hbm [shape: f32[1,1,128], index: 16, kind: output, shape index: {}]  }
   0x1   :  { %11456 = sst [smem:[#allocation17_spill]] %s11434_s0  ;;  %v21_v0 = vstv %s11449_s15 }
   0x2   :  { %22 = vst [vmem:[#allocation2] sm:$0x1] %v21_v0 }
   0x3   :  { %23 = vsyncpa [#allocation4], 0 }
   0x4   :  { %24 = vsyncpa [#allocation7], 0 }
   0x5   :  { %25 = vsyncpa [#allocation10], 0 }
   0x6   :  { %26 = vsyncpa [#allocation5], 0  ;;  %s9363_s23 = smov [#allocation6]  }
   0x7   :  { %s50_s24 = sshll.u32 %s9363_s23, 4  ;;  %s51_s24 = int_to_ptr.vmem [resolvable:$true] %s50_s24 }
   0x8   :  { %s9263_s25 = scalar_lea.vmem %s51_s24, 1024  ;;  %p9268_p1 = scmp.lt.s32.totalorder %s51_s24, %s51_s24 }
   0x9   :  { %p9264_p0 = scmp.ne.s32.totalorder %s51_s24, %s9263_s25  ;;  %p9269_p2 = scmp.lt.s32.totalorder %s9263_s25, %s9263_s25 }
   0xb   :  { %p9270_p3 = por %p9269_p2, %p9268_p1 }
   0xd   :  { %p9271_p4 = pnand %p9270_p3, %p9264_p0 }
   0xf   :  { %9274 = shalt.err (!%p9271_p4)
}
  0x10   :  { %s9364_s26 = smov 256   ;;  %s9365_s27 = smov 16  }
  0x11   :  { %56 = dma.hbm_to_vmem [thread:$0]  %s11438_s4, 1024, %s51_s24, [#allocation7], %s9364_s26, %s9364_s26, %s9365_s27  }
  0x12   :  { %s9366_s29 = smov [#allocation3]  }
  0x13   :  { %s34_s30 = sshll.u32 %s9366_s29, 4  ;;  %s35_s30 = int_to_ptr.vmem [resolvable:$true] %s34_s30 }
  0x14   :  { %s9283_s0 = scalar_lea.vmem %s35_s30, 1024  ;;  %p9288_p6 = scmp.lt.s32.totalorder %s35_s30, %s35_s30 }
  0x15   :  { %p9284_p5 = scmp.ne.s32.totalorder %s35_s30, %s9283_s0  ;;  %p9289_p7 = scmp.lt.s32.totalorder %s9283_s0, %s9283_s0 }
  0x17   :  { %p9290_p8 = por %p9289_p7, %p9288_p6 }
  0x19   :  { %p9291_p9 = pnand %p9290_p8, %p9284_p5 }
  0x1b   :  { %9294 = shalt.err (!%p9291_p9)
}
  0x1c   :  { %s9367_s17 = smov 128   ;;  %s9368_s18 = smov 8  }
  0x1d   :  { %40 = dma.hbm_to_vmem [thread:$0]  %s11435_s1, 1024, %s35_s30, [#allocation4], %s9367_s17, %s9367_s17, %s9368_s18  }
  0x1e   :  { %s9369_s21 = smov [#allocation8]   ;;  %s9370_s23 = smov [#allocation9]  }
  0x1f   :  { %s62_s22 = sshll.u32 %s9369_s21, 4  ;;  %s86_s4 = sshll.u32 %s9370_s23, 4  ;;  %s63_s22 = int_to_ptr.vmem [resolvable:$true] %s62_s22  ;;  %s87_s4 = int_to_ptr.vmem [resolvable:$true] %s86_s4 }
  0x20   :  { %s9303_s24 = scalar_lea.vmem %s63_s22, 1024  ;;  %p9308_p11 = scmp.lt.s32.totalorder %s63_s22, %s63_s22 }
  0x21   :  { %p9304_p10 = scmp.ne.s32.totalorder %s63_s22, %s9303_s24  ;;  %p9309_p12 = scmp.lt.s32.totalorder %s9303_s24, %s9303_s24 }
  0x23   :  { %p9310_p13 = por %p9309_p12, %p9308_p11 }
  0x25   :  { %p9311_p0 = pnand %p9310_p13, %p9304_p10 }
  0x27   :  { %9314 = shalt.err (!%p9311_p0)
}
  0x28   :  { %68 = dma.hbm_to_vmem [thread:$0]  %s11439_s5, 1024, %s63_s22, [#allocation7], %s9364_s26, %s9364_s26, %s9365_s27  }
  0x29   :  { %s9323_s1 = scalar_lea.vmem %s87_s4, 512  ;;  %p9328_p2 = scmp.lt.s32.totalorder %s87_s4, %s87_s4 }
  0x2a   :  { %p9324_p1 = scmp.ne.s32.totalorder %s87_s4, %s9323_s1  ;;  %p9329_p3 = scmp.lt.s32.totalorder %s9323_s1, %s9323_s1 }
  0x2c   :  { %p9330_p4 = por %p9329_p3, %p9328_p2 }
  0x2e   :  { %p9331_p5 = pnand %p9330_p4, %p9324_p1 }
  0x30   :  { %9334 = shalt.err (!%p9331_p5)
}
  0x31   :  { %92 = dma.hbm_to_vmem [thread:$0]  %s11446_s12, 512, %s87_s4, [#allocation10], %s9367_s17, %s9367_s17, %s9368_s18  }
  0x32   :  { %9355 = dma.done.wait [#allocation4], 1024  }
  0x33   :  { %9356 = vsyncadd [#allocation4], 4294966272 }
  0x34   :  { %9357 = dma.done.wait [#allocation7], 2048  }
  0x35   :  { %9358 = vsyncadd [#allocation7], 4294965248 }
  0x36   :  { %9359 = dma.done.wait [#allocation10], 512  }
  0x37   :  { %9360 = vsyncadd [#allocation10], 4294966784  ;;  %v9371_v1 = vmov 0   ;;  %s11457_s27 = sld [smem:[#allocation17_spill]]  ;;  %v9372_v4 = vmov 1   ;;  %v416_v12 = vld [vmem:[#allocation3] sm:$0xff] }
  0x38   :  { %8747 = vset.pattern.permute.xlu1 %v9371_v1  ;;  %8745 = vset.pattern.permute.xlu0 %v9371_v1  ;;  %vm420_vm0 = vcmask 523264   ;;  %v134_v20 = vld [vmem:[#allocation6 + $0x38] sm:$0xff]  ;;  %v133_v21 = vld [vmem:[#allocation6 + $0x30] sm:$0xff]  ;;  %v132_v22 = vld [vmem:[#allocation6 + $0x28] sm:$0xff]  ;;  %vm620_vm1 = vcmask 261120   ;;  %vm6823_vm2 = vcmask 130112  }
  0x39   :  { %8125 = vmatprep.mubr.msk.f32.mxu1 %vm420_vm0, %v416_v12  ;;  %669 = vmatprep.subr.mxu0 %v134_v20  ;;  %v131_v23 = vld [vmem:[#allocation6 + $0x20] sm:$0xff]  ;;  %v130_v24 = vld [vmem:[#allocation6 + $0x18] sm:$0xff]  ;;  %v9536_v26 = vld [vmem:[#allocation3 + $0x28] sm:$0xff]  ;;  %vm6830_vm3 = vcmask 195712   ;;  %vm6837_vm4 = vcmask 261312   ;;  %vm6844_vm5 = vcmask 326912  }
  0x3a   :  { %670 = vmatpush1.msra.mxu0 %v133_v21  ;;  %v9533_v25 = vld [vmem:[#allocation3 + $0x20] sm:$0xff]  ;;  %v9539_v27 = vld [vmem:[#allocation3 + $0x30] sm:$0xff]  ;;  %v9542_v28 = vld [vmem:[#allocation3 + $0x38] sm:$0xff]  ;;  %vm6851_vm6 = vcmask 392512   ;;  %vm6858_vm7 = vcmask 458112   ;;  %vm6865_vm8 = vcmask 523712  }
  0x3b   :  { %671 = vmatprep.subr.mxu0 %v132_v22  ;;  %v9545_v29 = vld [vmem:[#allocation3 + $0x8] sm:$0xff]  ;;  %v9548_v30 = vld [vmem:[#allocation3 + $0x10] sm:$0xff]  ;;  %v9551_v31 = vld [vmem:[#allocation3 + $0x18] sm:$0xff]  ;;  %vm6872_vm9 = vcmask 589312   ;;  %vm6879_vm10 = vcmask 654912   ;;  %vm6886_vm11 = vcmask 720512  }
  0x3c   :  { %672 = vmatpush1.msra.mxu0 %v131_v23  ;;  %v9557_v34 = vld [vmem:[%s11436_s2] ss:$0 sm:$0xff]  ;;  %v9562_v35 = vld [vmem:[%s11436_s2 + $0x1] ss:$0 sm:$0xff]  ;;  %vm6893_vm12 = vcmask 786112   ;;  %vm6900_vm13 = vcmask 851712  }
  0x3d   :  { %v118_v2 = vld [vmem:[%s11457_s27 + $0x38] sm:$0xff]  ;;  %v117_v3 = vld [vmem:[%s11457_s27 + $0x30] sm:$0xff]  ;;  %v116_v5 = vld [vmem:[%s11457_s27 + $0x28] sm:$0xff]  ;;  %673 = vmatprep.subr.mxu0 %v130_v24  ;;  %vm6907_vm14 = vcmask 917312   ;;  %vm6914_vm15 = vcmask 982912  }
  0x3e   :  { %229 = vperm.xlu0 %8745, %v118_v2   ;;  %224 = vperm.xlu1 %8747, %v117_v3   ;;  %v115_v6 = vld [vmem:[%s11457_s27 + $0x20] sm:$0xff]  ;;  %v114_v7 = vld [vmem:[%s11457_s27 + $0x18] sm:$0xff]  ;;  %v113_v8 = vld [vmem:[%s11457_s27 + $0x10] sm:$0xff] }
  0x3f   :  { %v112_v9 = vld [vmem:[%s11457_s27 + $0x8] sm:$0xff]  ;;  %v111_v10 = vld [vmem:[%s11457_s27] sm:$0xff]  ;;  %v126_v11 = vld [vmem:[%s11457_s27 + $0x78] sm:$0xff] }
  0x40   :  { %v125_v13 = vld [vmem:[%s11457_s27 + $0x70] sm:$0xff]  ;;  %v124_v14 = vld [vmem:[%s11457_s27 + $0x68] sm:$0xff]  ;;  %v123_v15 = vld [vmem:[%s11457_s27 + $0x60] sm:$0xff] }
  0x41   :  { %v122_v16 = vld [vmem:[%s11457_s27 + $0x58] sm:$0xff]  ;;  %v121_v17 = vld [vmem:[%s11457_s27 + $0x50] sm:$0xff]  ;;  %v120_v18 = vld [vmem:[%s11457_s27 + $0x48] sm:$0xff] }
  0x42   :  { %8746 = vset.pattern.permute.xlu0 %v9372_v4  ;;  %8748 = vset.pattern.permute.xlu1 %v9372_v4  ;;  %v119_v19 = vld [vmem:[%s11457_s27 + $0x40] sm:$0xff] }
  0x43   :  { %322 = vperm.xlu0 %8746, %v118_v2   ;;  %318 = vperm.xlu1 %8748, %v117_v3   ;;  %v9571_v42 = vld [vmem:[%s11437_s3] ss:$0 sm:$0xff] }
  0x47   :  { %8749 = vset.pattern.permute.xlu1 %v9371_v1  ;;  %314 = vperm.xlu0 %8746, %v116_v5  }
  0x48   :  { %219 = vperm.xlu1 %8749, %v116_v5  }
  0x4b   :  { %310 = vperm.xlu0 %8746, %v115_v6  }
  0x4c   :  { %214 = vperm.xlu1 %8749, %v115_v6  }
  0x4f   :  { %306 = vperm.xlu0 %8746, %v114_v7  }
  0x50   :  { %209 = vperm.xlu1 %8749, %v114_v7  }
  0x53   :  { %302 = vperm.xlu0 %8746, %v113_v8  }
  0x54   :  { %204 = vperm.xlu1 %8749, %v113_v8  }
  0x57   :  { %298 = vperm.xlu0 %8746, %v112_v9  }
  0x58   :  { %199 = vperm.xlu1 %8749, %v112_v9  }
  0x5b   :  { %294 = vperm.xlu0 %8746, %v111_v10  }
  0x5c   :  { %194 = vperm.xlu1 %8749, %v111_v10  }
  0x5f   :  { %354 = vperm.xlu0 %8746, %v126_v11  }
  0x60   :  { %269 = vperm.xlu1 %8749, %v126_v11  }
  0x63   :  { %350 = vperm.xlu0 %8746, %v125_v13  }
  0x64   :  { %264 = vperm.xlu1 %8749, %v125_v13  }
  0x67   :  { %346 = vperm.xlu0 %8746, %v124_v14  }
  0x68   :  { %259 = vperm.xlu1 %8749, %v124_v14  }
  0x6b   :  { %342 = vperm.xlu0 %8746, %v123_v15  }
  0x6c   :  { %254 = vperm.xlu1 %8749, %v123_v15  }
  0x6f   :  { %338 = vperm.xlu0 %8746, %v122_v16  }
  0x70   :  { %249 = vperm.xlu1 %8749, %v122_v16  }
  0x73   :  { %334 = vperm.xlu0 %8746, %v121_v17  }
  0x74   :  { %244 = vperm.xlu1 %8749, %v121_v17  }
  0x77   :  { %330 = vperm.xlu0 %8746, %v120_v18  }
  0x78   :  { %239 = vperm.xlu1 %8749, %v120_v18  }
  0x7b   :  { %326 = vperm.xlu0 %8746, %v119_v19  }
  0x7c   :  { %234 = vperm.xlu1 %8749, %v119_v19  }
  0x99   :  { %1282 = vxpose.xlu0.b32.start [1/4] (short) (narrow) %v9533_v25, 64 }
  0x9d   :  { %1283 = vxpose.xlu0.b32.cont [2/4] (short) (narrow) %v9536_v26, 64 }
  0xa1   :  { %1284 = vxpose.xlu0.b32.cont [3/4] (short) (narrow) %v9539_v27, 64 }
  0xa5   :  { %1117 = vxpose.xlu1.b32.start [1/4] (short) (narrow) %v416_v12, 64  ;;  %1285 = vxpose.xlu0.b32.end [4/4] (short) (narrow) %v9542_v28, 64 }
  0xa9   :  { %1118 = vxpose.xlu1.b32.cont [2/4] (short) (narrow) %v9545_v29, 64 }
  0xad   :  { %1119 = vxpose.xlu1.b32.cont [3/4] (short) (narrow) %v9548_v30, 64 }
  0xb1   :  { %1120 = vxpose.xlu1.b32.end [4/4] (short) (narrow) %v9551_v31, 64 }
  0xb9   :  { %v225_v32 = vpop.permute.xlu1 %224  ;;  %v230_v33 = vpop.permute.xlu0 %229 }
  0xba   :  { %v282_v38 = vmul.f32 %v9557_v34, %v225_v32  ;;  %v283_v39 = vmul.f32 %v9557_v34, %v230_v33 }
  0xbe   :  { %v323_v36 = vpop.permute.xlu0 %322  ;;  %v319_v37 = vpop.permute.xlu1 %318 }
  0xbf   :  { %v368_v40 = vmul.f32 %v9562_v35, %v323_v36  ;;  %v367_v41 = vmul.f32 %v9562_v35, %v319_v37 }
  0xc1   :  { %v384_v43 = vadd.f32 %v368_v40, %v283_v39  ;;  %v383_v44 = vadd.f32 %v367_v41, %v282_v38 }
  0xc2   :  { %v315_v45 = vpop.permute.xlu0 %314 }
  0xc3   :  { %v366_v46 = vmul.f32 %v9562_v35, %v315_v45  ;;  %v220_v47 = vpop.permute.xlu1 %219  ;;  %v9575_v48 = vadd.f32 %v9571_v42, %v384_v43  ;;  %v9580_v50 = vadd.f32 %v9571_v42, %v383_v44 }
  0xc4   :  { %v281_v49 = vmul.f32 %v9557_v34, %v220_v47 }
  0xc5   :  { %8109 = vmatprep.subr.mxu1 %v9575_v48 }
  0xc6   :  { %v382_v51 = vadd.f32 %v366_v46, %v281_v49  ;;  %8110 = vmatpush3.msra.mxu1 %v9575_v48  ;;  %v311_v52 = vpop.permute.xlu0 %310 }
  0xc7   :  { %v365_v53 = vmul.f32 %v9562_v35, %v311_v52  ;;  %8111 = vmatprep.subr.mxu1 %v9580_v50  ;;  %v215_v54 = vpop.permute.xlu1 %214 }
  0xc8   :  { %v280_v55 = vmul.f32 %v9557_v34, %v215_v54  ;;  %8112 = vmatpush3.msra.mxu1 %v9580_v50  ;;  %v9588_v56 = vadd.f32 %v9571_v42, %v382_v51 }
  0xca   :  { %v381_v57 = vadd.f32 %v365_v53, %v280_v55  ;;  %8113 = vmatprep.subr.mxu1 %v9588_v56  ;;  %v307_v58 = vpop.permute.xlu0 %306 }
  0xcb   :  { %v364_v59 = vmul.f32 %v9562_v35, %v307_v58  ;;  %8114 = vmatpush3.msra.mxu1 %v9588_v56  ;;  %v210_v60 = vpop.permute.xlu1 %209 }
  0xcc   :  { %v279_v61 = vmul.f32 %v9557_v34, %v210_v60  ;;  %v9595_v62 = vadd.f32 %v9571_v42, %v381_v57 }
  0xce   :  { %v380_v63 = vadd.f32 %v364_v59, %v279_v61  ;;  %8115 = vmatprep.subr.mxu1 %v9595_v62  ;;  %v303_v0 = vpop.permute.xlu0 %302  ;;  %8750 = vset.pattern.permute.xlu0 %v9371_v1 }
  0xcf   :  { %v363_v2 = vmul.f32 %v9562_v35, %v303_v0  ;;  %8116 = vmatpush3.msra.mxu1 %v9595_v62  ;;  %v205_v3 = vpop.permute.xlu1 %204 }
  0xd0   :  { %v278_v4 = vmul.f32 %v9557_v34, %v205_v3  ;;  %v9603_v5 = vadd.f32 %v9571_v42, %v380_v63 }
  0xd2   :  { %v379_v6 = vadd.f32 %v363_v2, %v278_v4  ;;  %8117 = vmatprep.subr.mxu1 %v9603_v5  ;;  %v299_v7 = vpop.permute.xlu0 %298 }
  0xd3   :  { %v362_v8 = vmul.f32 %v9562_v35, %v299_v7  ;;  %8118 = vmatpush3.msra.mxu1 %v9603_v5  ;;  %v200_v9 = vpop.permute.xlu1 %199 }
  0xd4   :  { %v277_v1 = vmul.f32 %v9557_v34, %v200_v9  ;;  %v9610_v10 = vadd.f32 %v9571_v42, %v379_v6 }
  0xd6   :  { %v378_v11 = vadd.f32 %v362_v8, %v277_v1  ;;  %8119 = vmatprep.subr.mxu1 %v9610_v10  ;;  %v295_v12 = vpop.permute.xlu0 %294 }
  0xd7   :  { %v361_v13 = vmul.f32 %v9562_v35, %v295_v12  ;;  %8120 = vmatpush3.msra.mxu1 %v9610_v10  ;;  %v195_v14 = vpop.permute.xlu1 %194 }
  0xd8   :  { %v276_v15 = vmul.f32 %v9557_v34, %v195_v14  ;;  %v9617_v16 = vadd.f32 %v9571_v42, %v378_v11 }
  0xda   :  { %v377_v17 = vadd.f32 %v361_v13, %v276_v15  ;;  %8121 = vmatprep.subr.mxu1 %v9617_v16  ;;  %v355_v18 = vpop.permute.xlu0 %354  ;;  %v142_v15 = vld [vmem:[#allocation8 + $0x38] sm:$0xff] }
  0xdb   :  { %v376_v19 = vmul.f32 %v9562_v35, %v355_v18  ;;  %8122 = vmatpush3.msra.mxu1 %v9617_v16  ;;  %v270_v20 = vpop.permute.xlu1 %269  ;;  %v138_v18 = vld [vmem:[#allocation8 + $0x18] sm:$0xff] }
  0xdc   :  { %v291_v21 = vmul.f32 %v9557_v34, %v270_v20  ;;  %v9624_v22 = vadd.f32 %v9571_v42, %v377_v17  ;;  %v140_v17 = vld [vmem:[#allocation8 + $0x28] sm:$0xff] }
  0xdd   :  { %v128_v20 = vld [vmem:[#allocation6 + $0x8] sm:$0xff] }
  0xde   :  { %v392_v23 = vadd.f32 %v376_v19, %v291_v21  ;;  %v351_v24 = vpop.permute.xlu0 %350  ;;  %8123 = vmatprep.subr.mxu1 %v9624_v22  ;;  %v137_v19 = vld [vmem:[#allocation8 + $0x10] sm:$0xff]  ;;  %v136_v21 = vld [vmem:[#allocation8 + $0x8] sm:$0xff] }
  0xdf   :  { %v375_v32 = vmul.f32 %v9562_v35, %v351_v24  ;;  %8124 = vmatpush3.msra.mxu1 %v9624_v22  ;;  %v265_v33 = vpop.permute.xlu1 %264 }
  0xe0   :  { %v290_v36 = vmul.f32 %v9557_v34, %v265_v33  ;;  %8126 = vmatmul.mubr.msk.f32.vlgmr.msra.gmra.mxu1 %vm420_vm0, %v9545_v29  ;;  %v9633_v37 = vadd.f32 %v9571_v42, %v392_v23  ;;  %v135_v23 = vld [vmem:[#allocation8] sm:$0xff]  ;;  %v174_v33 = vld [vmem:[%s11441_s7 + $0x78] sm:$0xff] }
  0xe1   :  { %8128 = vmatprep.mubr.msk.f32.mxu1 %vm420_vm0, %v9548_v30 }
  0xe2   :  { %v391_v38 = vadd.f32 %v375_v32, %v290_v36  ;;  %v347_v39 = vpop.permute.xlu0 %346  ;;  %8131 = vmatprep.subr.mxu1 %v9633_v37  ;;  %v189_v36 = vld [vmem:[%s11441_s7 + $0xf0] sm:$0xff] }
  0xe3   :  { %v374_v40 = vmul.f32 %v9562_v35, %v347_v39  ;;  %8132 = vmatpush3.msra.mxu1 %v9633_v37  ;;  %v260_v41 = vpop.permute.xlu1 %259  ;;  %v173_v39 = vld [vmem:[%s11441_s7 + $0x70] sm:$0xff] }
  0xe4   :  { %v289_v43 = vmul.f32 %v9557_v34, %v260_v41  ;;  %8129 = vmatmul.mubr.msk.f32.gmra.mxu1 %vm420_vm0, %v9551_v31  ;;  %v9644_v29 = vadd.f32 %v9571_v42, %v391_v38 }
  0xe5   :  { %8147 = vmatprep.mubr.msk.f32.mxu1 %vm420_vm0, %v9533_v25 }
  0xe6   :  { %v390_v30 = vadd.f32 %v374_v40, %v289_v43  ;;  %v343_v44 = vpop.permute.xlu0 %342  ;;  %8133 = vmatprep.subr.mxu1 %v9644_v29  ;;  %v188_v40 = vld [vmem:[%s11441_s7 + $0xe8] sm:$0xff] }
  0xe7   :  { %v373_v45 = vmul.f32 %v9562_v35, %v343_v44  ;;  %8134 = vmatpush3.msra.mxu1 %v9644_v29  ;;  %v255_v46 = vpop.permute.xlu1 %254  ;;  %v172_v43 = vld [vmem:[%s11441_s7 + $0x68] sm:$0xff]  ;;  %v171_v44 = vld [vmem:[%s11441_s7 + $0x60] sm:$0xff] }
  0xe8   :  { %v288_v47 = vmul.f32 %v9557_v34, %v255_v46  ;;  %v9653_v49 = vadd.f32 %v9571_v42, %v390_v30  ;;  %v187_v30 = vld [vmem:[%s11441_s7 + $0xe0] sm:$0xff]  ;;  %v170_v46 = vld [vmem:[%s11441_s7 + $0x58] sm:$0xff] }
  0xea   :  { %v389_v31 = vadd.f32 %v373_v45, %v288_v47  ;;  %v339_v51 = vpop.permute.xlu0 %338  ;;  %8135 = vmatprep.subr.mxu1 %v9653_v49  ;;  %v186_v45 = vld [vmem:[%s11441_s7 + $0xd8] sm:$0xff]  ;;  %v185_v47 = vld [vmem:[%s11441_s7 + $0xd0] sm:$0xff] }
  0xeb   :  { %v372_v25 = vmul.f32 %v9562_v35, %v339_v51  ;;  %8136 = vmatpush3.msra.mxu1 %v9653_v49  ;;  %v250_v52 = vpop.permute.xlu1 %249  ;;  %v184_v51 = vld [vmem:[%s11441_s7 + $0xc8] sm:$0xff] }
  0xec   :  { %v287_v53 = vmul.f32 %v9557_v34, %v250_v52  ;;  %v9660_v54 = vadd.f32 %v9571_v42, %v389_v31  ;;  %v169_v31 = vld [vmem:[%s11441_s7 + $0x50] sm:$0xff]  ;;  %v183_v52 = vld [vmem:[%s11441_s7 + $0xc0] sm:$0xff] }
  0xee   :  { %v388_v55 = vadd.f32 %v372_v25, %v287_v53  ;;  %v335_v57 = vpop.permute.xlu0 %334  ;;  %8137 = vmatprep.subr.mxu1 %v9660_v54  ;;  %v168_v25 = vld [vmem:[%s11441_s7 + $0x48] sm:$0xff]  ;;  %v167_v53 = vld [vmem:[%s11441_s7 + $0x40] sm:$0xff] }
  0xef   :  { %v371_v58 = vmul.f32 %v9562_v35, %v335_v57  ;;  %8138 = vmatpush3.msra.mxu1 %v9660_v54  ;;  %v245_v59 = vpop.permute.xlu1 %244  ;;  %v166_v57 = vld [vmem:[%s11441_s7 + $0x38] sm:$0xff] }
  0xf0   :  { %v286_v60 = vmul.f32 %v9557_v34, %v245_v59  ;;  %v9667_v61 = vadd.f32 %v9571_v42, %v388_v55  ;;  %v182_v55 = vld [vmem:[%s11441_s7 + $0xb8] sm:$0xff]  ;;  %v165_v59 = vld [vmem:[%s11441_s7 + $0x30] sm:$0xff] }
  0xf2   :  { %v387_v63 = vadd.f32 %v371_v58, %v286_v60  ;;  %v331_v0 = vpop.permute.xlu0 %330  ;;  %8139 = vmatprep.subr.mxu1 %v9667_v61  ;;  %v181_v58 = vld [vmem:[%s11441_s7 + $0xb0] sm:$0xff]  ;;  %v180_v60 = vld [vmem:[%s11441_s7 + $0xa8] sm:$0xff] }
  0xf3   :  { %v370_v2 = vmul.f32 %v9562_v35, %v331_v0  ;;  %8140 = vmatpush3.msra.mxu1 %v9667_v61  ;;  %v240_v3 = vpop.permute.xlu1 %239  ;;  %v179_v0 = vld [vmem:[%s11441_s7 + $0xa0] sm:$0xff] }
  0xf4   :  { %v285_v4 = vmul.f32 %v9557_v34, %v240_v3  ;;  %v9674_v6 = vadd.f32 %v9571_v42, %v387_v63  ;;  %v164_v63 = vld [vmem:[%s11441_s7 + $0x28] sm:$0xff]  ;;  %v178_v3 = vld [vmem:[%s11441_s7 + $0x98] sm:$0xff] }
  0xf6   :  { %v386_v7 = vadd.f32 %v370_v2, %v285_v4  ;;  %v327_v8 = vpop.permute.xlu0 %326  ;;  %8141 = vmatprep.subr.mxu1 %v9674_v6  ;;  %v163_v2 = vld [vmem:[%s11441_s7 + $0x20] sm:$0xff] }
  0xf7   :  { %v369_v9 = vmul.f32 %v9562_v35, %v327_v8  ;;  %8142 = vmatpush3.msra.mxu1 %v9674_v6  ;;  %v235_v1 = vpop.permute.xlu1 %234  ;;  %v141_v35 = vld [vmem:[#allocation8 + $0x30] sm:$0xff] }
  0xf8   :  { %v284_v11 = vmul.f32 %v9557_v34, %v235_v1  ;;  %v9681_v12 = vadd.f32 %v9571_v42, %v386_v7  ;;  %v139_v34 = vld [vmem:[#allocation8 + $0x20] sm:$0xff]  ;;  %v162_v8 = vld [vmem:[%s11441_s7 + $0x18] sm:$0xff] }
  0xfa   :  { %v385_v13 = vadd.f32 %v369_v9, %v284_v11  ;;  %8143 = vmatprep.subr.mxu1 %v9681_v12  ;;  %v177_v11 = vld [vmem:[%s11441_s7 + $0x90] sm:$0xff] }
  0xfb   :  { %8144 = vmatpush3.msra.mxu1 %v9681_v12 }
  0xfc   :  { %v9686_v14 = vadd.f32 %v9571_v42, %v385_v13  ;;  %v129_v42 = vld [vmem:[#allocation6 + $0x10] sm:$0xff] }
  0xfd   :  { %674 = vmatpush1.msra.mxu0 %v129_v42  ;;  %v161_v13 = vld [vmem:[%s11441_s7 + $0x10] sm:$0xff] }
  0xfe   :  { %8145 = vmatprep.subr.mxu1 %v9686_v14  ;;  %675 = vmatprep.subr.mxu0 %v128_v20  ;;  %v143_v20 = vld [vmem:[%s11440_s6] sm:$0xff] }
  0xff   :  { %8146 = vmatpush3.msra.mxu1 %v9686_v14 }
 0x100   :  { %8148 = vmatmul.mubr.msk.f32.vlgmr.msra.gmra.mxu1 %vm420_vm0, %v9536_v26  ;;  %782 = vmatprep.subr.mxu1 %v142_v15  ;;  %v127_v26 = vld [vmem:[#allocation6] sm:$0xff] }
 0x101   :  { %8150 = vmatprep.mubr.msk.f32.mxu1 %vm420_vm0, %v9539_v27  ;;  %783 = vmatpush1.msra.mxu1 %v141_v35  ;;  %v11452_v27 = vmov 0.0   ;;  %v176_v15 = vld [vmem:[%s11441_s7 + $0x88] sm:$0xff] }
 0x102   :  { %784 = vmatprep.subr.mxu1 %v140_v17  ;;  %676 = vmatpush1.msra.mxu0 %v127_v26  ;;  %v160_v35 = vld [vmem:[%s11441_s7 + $0x8] sm:$0xff]  ;;  %v175_v17 = vld [vmem:[%s11441_s7 + $0x80] sm:$0xff] }
 0x103   :  { %785 = vmatpush1.msra.mxu1 %v139_v34  ;;  %709 = vmatprep.mubr.f32.mxu0 %v11452_v27  ;;  %v159_v34 = vld [vmem:[%s11441_s7] sm:$0xff] }
 0x104   :  { %8151 = vmatmul.mubr.msk.f32.gmra.mxu1 %vm420_vm0, %v9542_v28  ;;  %786 = vmatprep.subr.mxu1 %v138_v18  ;;  %v190_v28 = vld [vmem:[%s11441_s7 + $0xf8] sm:$0xff] }
 0x105   :  { %787 = vmatpush1.msra.mxu1 %v137_v19  ;;  %822 = vmatprep.mubr.f32.mxu1 %v11452_v27  ;;  %v144_v19 = vld [vmem:[%s11440_s6 + $0x8] sm:$0xff] }
 0x106   :  { %788 = vmatprep.subr.mxu1 %v136_v21  ;;  %7313 = vmatprep.subr.mxu0 %v190_v28 }
 0x107   :  { %789 = vmatpush1.msra.mxu1 %v135_v23 }
 0x108   :  { %7369 = vmatprep.subr.mxu1 %v190_v28 }
 0x1a0   :  { %v8127_v24 = vpop.f32.mrf.mxu1 }
 0x1a2   :  { %v499_v32 = vpop.f32.mrf.mxu1 }
 0x1a3   :  { %6953 = vmatmul.mubr.msk.f32.vlgmr.msra.gmra.mxu0 %vm620_vm1, %v499_v32  ;;  %6961 = vmatmul.mubr.msk.f32.vlgmr.msra.gmra.mxu1 %vm620_vm1, %v499_v32 }
 0x1a4   :  { %715 = vmatprep.mubr.f32.mxu0 %v11452_v27  ;;  %828 = vmatprep.mubr.f32.mxu1 %v11452_v27  ;;  %v8130_v38 = vpop.f32.mrf.mxu1 }
 0x1a5   :  { %7314 = vmatpush3.msra.mxu0 %v174_v33  ;;  %7370 = vmatpush3.msra.mxu1 %v174_v33 }
 0x1a6   :  { %7315 = vmatprep.subr.mxu0 %v189_v36  ;;  %7371 = vmatprep.subr.mxu1 %v189_v36  ;;  %v509_v41 = vpop.f32.mrf.mxu1 }
 0x1a7   :  { %6954 = vmatmul.mubr.msk.f32.gmra.mxu0 %vm620_vm1, %v8127_v24  ;;  %6962 = vmatmul.mubr.msk.f32.gmra.mxu1 %vm620_vm1, %v8127_v24 }
 0x1a8   :  { %721 = vmatprep.mubr.f32.mxu0 %v11452_v27  ;;  %834 = vmatprep.mubr.f32.mxu1 %v11452_v27 }
 0x1a9   :  { %7316 = vmatpush3.msra.mxu0 %v173_v39  ;;  %7372 = vmatpush3.msra.mxu1 %v173_v39  ;;  %v145_v39 = vld [vmem:[%s11440_s6 + $0x10] sm:$0xff] }
 0x1aa   :  { %7317 = vmatprep.subr.mxu0 %v188_v40  ;;  %7373 = vmatprep.subr.mxu1 %v188_v40 }
 0x1ab   :  { %6955 = vmatmul.mubr.msk.f32.gmra.mxu0 %vm620_vm1, %v509_v41  ;;  %6963 = vmatmul.mubr.msk.f32.gmra.mxu1 %vm620_vm1, %v509_v41 }
 0x1ac   :  { %727 = vmatprep.mubr.f32.mxu0 %v11452_v27  ;;  %840 = vmatprep.mubr.f32.mxu1 %v11452_v27 }
 0x1ad   :  { %7318 = vmatpush3.msra.mxu0 %v172_v43  ;;  %7374 = vmatpush3.msra.mxu1 %v172_v43 }
 0x1ae   :  { %7319 = vmatprep.subr.mxu0 %v187_v30  ;;  %7375 = vmatprep.subr.mxu1 %v187_v30 }
 0x1af   :  { %6956 = vmatmul.mubr.msk.f32.gmra.mxu0 %vm620_vm1, %v8130_v38  ;;  %6964 = vmatmul.mubr.msk.f32.gmra.mxu1 %vm620_vm1, %v8130_v38  ;;  %v146_v38 = vld [vmem:[%s11440_s6 + $0x18] sm:$0xff] }
 0x1b0   :  { %733 = vmatprep.mubr.f32.mxu0 %v11452_v27  ;;  %846 = vmatprep.mubr.f32.mxu1 %v11452_v27 }
 0x1b1   :  { %7320 = vmatpush3.msra.mxu0 %v171_v44  ;;  %7376 = vmatpush3.msra.mxu1 %v171_v44 }
 0x1b2   :  { %7321 = vmatprep.subr.mxu0 %v186_v45  ;;  %7377 = vmatprep.subr.mxu1 %v186_v45 }
 0x1b3   :  { %7322 = vmatpush3.msra.mxu0 %v170_v46  ;;  %7378 = vmatpush3.msra.mxu1 %v170_v46 }
 0x1b4   :  { %7323 = vmatprep.subr.mxu0 %v185_v47  ;;  %7379 = vmatprep.subr.mxu1 %v185_v47 }
 0x1b5   :  { %7324 = vmatpush3.msra.mxu0 %v169_v31  ;;  %7380 = vmatpush3.msra.mxu1 %v169_v31  ;;  %v148_v31 = vld [vmem:[%s11440_s6 + $0x28] sm:$0xff] }
 0x1b6   :  { %7325 = vmatprep.subr.mxu0 %v184_v51  ;;  %7381 = vmatprep.subr.mxu1 %v184_v51  ;;  %v147_v51 = vld [vmem:[%s11440_s6 + $0x20] sm:$0xff] }
 0x1b7   :  { %7326 = vmatpush3.msra.mxu0 %v168_v25  ;;  %7382 = vmatpush3.msra.mxu1 %v168_v25 }
 0x1b8   :  { %7327 = vmatprep.subr.mxu0 %v183_v52  ;;  %7383 = vmatprep.subr.mxu1 %v183_v52 }
 0x1b9   :  { %7328 = vmatpush3.msra.mxu0 %v167_v53  ;;  %7384 = vmatpush3.msra.mxu1 %v167_v53 }
 0x1ba   :  { %7329 = vmatprep.subr.mxu0 %v182_v55  ;;  %7385 = vmatprep.subr.mxu1 %v182_v55 }
 0x1bb   :  { %7330 = vmatpush3.msra.mxu0 %v166_v57  ;;  %7386 = vmatpush3.msra.mxu1 %v166_v57 }
 0x1bc   :  { %7331 = vmatprep.subr.mxu0 %v181_v58  ;;  %7387 = vmatprep.subr.mxu1 %v181_v58 }
 0x1bd   :  { %7332 = vmatpush3.msra.mxu0 %v165_v59  ;;  %7388 = vmatpush3.msra.mxu1 %v165_v59 }
 0x1be   :  { %7333 = vmatprep.subr.mxu0 %v180_v60  ;;  %7389 = vmatprep.subr.mxu1 %v180_v60 }
 0x1bf   :  { %7334 = vmatpush3.msra.mxu0 %v164_v63  ;;  %7390 = vmatpush3.msra.mxu1 %v164_v63  ;;  %v150_v63 = vld [vmem:[%s11440_s6 + $0x38] sm:$0xff] }
 0x1c0   :  { %v8149_v4 = vpop.f32.mrf.mxu1  ;;  %7335 = vmatprep.subr.mxu0 %v179_v0  ;;  %7391 = vmatprep.subr.mxu1 %v179_v0  ;;  %v149_v0 = vld [vmem:[%s11440_s6 + $0x30] sm:$0xff] }
 0x1c1   :  { %7336 = vmatpush3.msra.mxu0 %v163_v2  ;;  %7392 = vmatpush3.msra.mxu1 %v163_v2 }
 0x1c2   :  { %v601_v7 = vpop.f32.mrf.mxu1  ;;  %7337 = vmatprep.subr.mxu0 %v178_v3  ;;  %7393 = vmatprep.subr.mxu1 %v178_v3 }
 0x1c3   :  { %6957 = vmatmul.mubr.msk.f32.gmra.mxu0 %vm620_vm1, %v601_v7  ;;  %6965 = vmatmul.mubr.msk.f32.gmra.mxu1 %vm620_vm1, %v601_v7 }
 0x1c4   :  { %739 = vmatprep.mubr.f32.mxu0 %v11452_v27  ;;  %852 = vmatprep.mubr.f32.mxu1 %v11452_v27  ;;  %v8152_v9 = vpop.f32.mrf.mxu1 }
 0x1c5   :  { %7338 = vmatpush3.msra.mxu0 %v162_v8  ;;  %7394 = vmatpush3.msra.mxu1 %v162_v8 }
 0x1c6   :  { %v611_v1 = vpop.f32.mrf.mxu1  ;;  %7339 = vmatprep.subr.mxu0 %v177_v11  ;;  %7395 = vmatprep.subr.mxu1 %v177_v11 }
 0x1c7   :  { %6958 = vmatmul.mubr.msk.f32.gmra.mxu0 %vm620_vm1, %v8149_v4  ;;  %6966 = vmatmul.mubr.msk.f32.gmra.mxu1 %vm620_vm1, %v8149_v4 }
 0x1c8   :  { %745 = vmatprep.mubr.f32.mxu0 %v11452_v27  ;;  %858 = vmatprep.mubr.f32.mxu1 %v11452_v27 }
 0x1c9   :  { %7340 = vmatpush3.msra.mxu0 %v161_v13  ;;  %7396 = vmatpush3.msra.mxu1 %v161_v13 }
 0x1ca   :  { %7341 = vmatprep.subr.mxu0 %v176_v15  ;;  %7397 = vmatprep.subr.mxu1 %v176_v15  ;;  %v152_v15 = vld [vmem:[%s11440_s6 + $0x48] sm:$0xff] }
 0x1cb   :  { %6959 = vmatmul.mubr.msk.f32.gmra.mxu0 %vm620_vm1, %v611_v1  ;;  %6967 = vmatmul.mubr.msk.f32.gmra.mxu1 %vm620_vm1, %v611_v1  ;;  %v151_v1 = vld [vmem:[%s11440_s6 + $0x40] sm:$0xff] }
 0x1cc   :  { %751 = vmatprep.mubr.f32.mxu0 %v11452_v27  ;;  %864 = vmatprep.mubr.f32.mxu1 %v11452_v27 }
 0x1cd   :  { %7342 = vmatpush3.msra.mxu0 %v160_v35  ;;  %7398 = vmatpush3.msra.mxu1 %v160_v35 }
 0x1ce   :  { %7343 = vmatprep.subr.mxu0 %v175_v17  ;;  %7399 = vmatprep.subr.mxu1 %v175_v17 }
 0x1cf   :  { %6960 = vmatmul.mubr.msk.f32.gmra.mxu0 %vm620_vm1, %v8152_v9  ;;  %6968 = vmatmul.mubr.msk.f32.gmra.mxu1 %vm620_vm1, %v8152_v9 }
 0x1d0   :  { %7344 = vmatpush3.msra.mxu0 %v159_v34  ;;  %7400 = vmatpush3.msra.mxu1 %v159_v34 }
 0x263   :  { %v711_v18 = vpop.f32.mrf.mxu0  ;;  %v824_v42 = vpop.f32.mrf.mxu1 }
 0x264   :  { %v871_v24 = vmul.f32 %v711_v18, %v143_v20  ;;  %v992_v32 = vmul.f32 %v824_v42, %v143_v20  ;;  %v153_v20 = vld [vmem:[%s11440_s6 + $0x50] sm:$0xff] }
 0x265   :  { %v713_v21 = vpop.f32.mrf.mxu0  ;;  %v826_v26 = vpop.f32.mrf.mxu1 }
 0x266   :  { %v872_v23 = vmul.f32 %v713_v21, %v144_v19  ;;  %v993_v28 = vmul.f32 %v826_v26, %v144_v19 }
 0x267   :  { %v717_v33 = vpop.f32.mrf.mxu0  ;;  %v830_v36 = vpop.f32.mrf.mxu1 }
 0x268   :  { %951 = vmatprep.mubr.f32.mxu0 %v872_v23  ;;  %1072 = vmatprep.mubr.f32.mxu1 %v993_v28  ;;  %v873_v44 = vmul.f32 %v717_v33, %v145_v39  ;;  %v994_v45 = vmul.f32 %v830_v36, %v145_v39  ;;  %v154_v23 = vld [vmem:[%s11440_s6 + $0x58] sm:$0xff]  ;;  %v155_v39 = vld [vmem:[%s11440_s6 + $0x60] sm:$0xff] }
 0x269   :  { %v719_v40 = vpop.f32.mrf.mxu0  ;;  %v832_v41 = vpop.f32.mrf.mxu1  ;;  %952 = vmatmul.mubr.f32.vlgmr.msra.gmra.mxu0 %v871_v24  ;;  %1073 = vmatmul.mubr.f32.vlgmr.msra.gmra.mxu1 %v992_v32 }
 0x26a   :  { %v874_v43 = vmul.f32 %v719_v40, %v146_v38  ;;  %v995_v30 = vmul.f32 %v832_v41, %v146_v38 }
 0x26b   :  { %v723_v46 = vpop.f32.mrf.mxu0  ;;  %v836_v47 = vpop.f32.mrf.mxu1 }
 0x26c   :  { %956 = vmatprep.mubr.f32.mxu0 %v874_v43  ;;  %1077 = vmatprep.mubr.f32.mxu1 %v995_v30  ;;  %v875_v57 = vmul.f32 %v723_v46, %v147_v51  ;;  %v996_v58 = vmul.f32 %v836_v47, %v147_v51  ;;  %v156_v43 = vld [vmem:[%s11440_s6 + $0x68] sm:$0xff]  ;;  %v157_v51 = vld [vmem:[%s11440_s6 + $0x70] sm:$0xff] }
 0x26d   :  { %v725_v25 = vpop.f32.mrf.mxu0  ;;  %v838_v52 = vpop.f32.mrf.mxu1  ;;  %957 = vmatmul.mubr.f32.gmra.mxu0 %v873_v44  ;;  %1078 = vmatmul.mubr.f32.gmra.mxu1 %v994_v45 }
 0x26e   :  { %v876_v53 = vmul.f32 %v725_v25, %v148_v31  ;;  %v997_v55 = vmul.f32 %v838_v52, %v148_v31 }
 0x26f   :  { %v729_v59 = vpop.f32.mrf.mxu0  ;;  %v842_v60 = vpop.f32.mrf.mxu1 }
 0x270   :  { %961 = vmatprep.mubr.f32.mxu0 %v876_v53  ;;  %1082 = vmatprep.mubr.f32.mxu1 %v997_v55  ;;  %v877_v8 = vmul.f32 %v729_v59, %v149_v0  ;;  %v998_v9 = vmul.f32 %v842_v60, %v149_v0  ;;  %v158_v53 = vld [vmem:[%s11440_s6 + $0x78] sm:$0xff]  ;;  %v9872_v0 = vpop.trf.xlu1 }
 0x271   :  { %v731_v2 = vpop.f32.mrf.mxu0  ;;  %v844_v3 = vpop.f32.mrf.mxu1  ;;  %962 = vmatmul.mubr.f32.gmra.mxu0 %v875_v57  ;;  %1083 = vmatmul.mubr.f32.gmra.mxu1 %v996_v58 }
 0x272   :  { %v878_v4 = vmul.f32 %v731_v2, %v150_v63  ;;  %v999_v7 = vmul.f32 %v844_v3, %v150_v63  ;;  %v9876_v2 = vpop.trf.xlu0 }
 0x274   :  { %966 = vmatprep.mubr.f32.mxu0 %v878_v4  ;;  %1087 = vmatprep.mubr.f32.mxu1 %v999_v7  ;;  %v9880_v3 = vpop.trf.xlu1 }
 0x275   :  { %967 = vmatmul.mubr.f32.gmra.mxu0 %v877_v8  ;;  %1088 = vmatmul.mubr.f32.gmra.mxu1 %v998_v9 }
 0x283   :  { %v735_v11 = vpop.f32.mrf.mxu0  ;;  %v848_v13 = vpop.f32.mrf.mxu1 }
 0x284   :  { %v879_v35 = vmul.f32 %v735_v11, %v151_v1  ;;  %v1000_v17 = vmul.f32 %v848_v13, %v151_v1  ;;  %v9882_v13 = vpop.trf.xlu1 }
 0x285   :  { %v737_v34 = vpop.f32.mrf.mxu0  ;;  %v850_v18 = vpop.f32.mrf.mxu1 }
 0x286   :  { %v880_v42 = vmul.f32 %v737_v34, %v152_v15  ;;  %v1001_v19 = vmul.f32 %v850_v18, %v152_v15 }
 0x287   :  { %v741_v21 = vpop.f32.mrf.mxu0  ;;  %v854_v26 = vpop.f32.mrf.mxu1 }
 0x288   :  { %971 = vmatprep.mubr.f32.mxu0 %v880_v42  ;;  %1092 = vmatprep.mubr.f32.mxu1 %v1001_v19  ;;  %v881_v28 = vmul.f32 %v741_v21, %v153_v20  ;;  %v1002_v24 = vmul.f32 %v854_v26, %v153_v20  ;;  %v9884_v19 = vpop.trf.xlu1 }
 0x289   :  { %v743_v32 = vpop.f32.mrf.mxu0  ;;  %v856_v33 = vpop.f32.mrf.mxu1  ;;  %972 = vmatmul.mubr.f32.gmra.mxu0 %v879_v35  ;;  %1093 = vmatmul.mubr.f32.gmra.mxu1 %v1000_v17 }
 0x28a   :  { %v882_v36 = vmul.f32 %v743_v32, %v154_v23  ;;  %v1003_v38 = vmul.f32 %v856_v33, %v154_v23 }
 0x28b   :  { %v747_v40 = vpop.f32.mrf.mxu0  ;;  %v860_v41 = vpop.f32.mrf.mxu1 }
 0x28c   :  { %976 = vmatprep.mubr.f32.mxu0 %v882_v36  ;;  %1097 = vmatprep.mubr.f32.mxu1 %v1003_v38  ;;  %v883_v30 = vmul.f32 %v747_v40, %v155_v39  ;;  %v1004_v44 = vmul.f32 %v860_v41, %v155_v39  ;;  %v9886_v39 = vpop.trf.xlu1 }
 0x28d   :  { %v749_v45 = vpop.f32.mrf.mxu0  ;;  %v862_v46 = vpop.f32.mrf.mxu1  ;;  %977 = vmatmul.mubr.f32.gmra.mxu0 %v881_v28  ;;  %1098 = vmatmul.mubr.f32.gmra.mxu1 %v1002_v24 }
 0x28e   :  { %v884_v47 = vmul.f32 %v749_v45, %v156_v43  ;;  %v1005_v31 = vmul.f32 %v862_v46, %v156_v43 }
 0x28f   :  { %v753_v25 = vpop.f32.mrf.mxu0  ;;  %v866_v52 = vpop.f32.mrf.mxu1 }
 0x290   :  { %981 = vmatprep.mubr.f32.mxu0 %v884_v47  ;;  %1102 = vmatprep.mubr.f32.mxu1 %v1005_v31  ;;  %v885_v55 = vmul.f32 %v753_v25, %v157_v51  ;;  %v1006_v57 = vmul.f32 %v866_v52, %v157_v51  ;;  %v9888_v46 = vpop.trf.xlu1  ;;  %v1446_v47 = vld [vmem:[%s11442_s8 + $0x18] sm:$0xff]  ;;  %v1445_v31 = vld [vmem:[%s11442_s8 + $0x10] sm:$0xff]  ;;  %v9904_v25 = vpop.trf.xlu0 }
 0x291   :  { %v755_v58 = vpop.f32.mrf.mxu0  ;;  %v868_v59 = vpop.f32.mrf.mxu1  ;;  %982 = vmatmul.mubr.f32.gmra.mxu0 %v883_v30  ;;  %1103 = vmatmul.mubr.f32.gmra.mxu1 %v1004_v44 }
 0x292   :  { %v886_v60 = vmul.f32 %v755_v58, %v158_v53  ;;  %v1007_v63 = vmul.f32 %v868_v59, %v158_v53 }
 0x294   :  { %986 = vmatprep.mubr.f32.mxu0 %v886_v60  ;;  %1107 = vmatprep.mubr.f32.mxu1 %v1007_v63  ;;  %v9900_v51 = vpop.trf.xlu1  ;;  %v9914_v63 = vpop.trf.xlu0 }
 0x295   :  { %987 = vmatmul.mubr.f32.gmra.mxu0 %v885_v55  ;;  %1108 = vmatmul.mubr.f32.gmra.mxu1 %v1006_v57 }
 0x296   :  { %8161 = vmatprep.mubr.msk.f32.mxu0 %vm620_vm1, %v9872_v0  ;;  %8181 = vmatprep.mubr.msk.f32.mxu1 %vm620_vm1, %v9876_v2 }
 0x298   :  { %v9910_v58 = vpop.trf.xlu1 }
 0x329   :  { %v7345_v4 = vpop.f32.mrf.mxu0  ;;  %v7401_v7 = vpop.f32.mrf.mxu1 }
 0x32b   :  { %v7346_v8 = vpop.f32.mrf.mxu0  ;;  %v7402_v9 = vpop.f32.mrf.mxu1 }
 0x32c   :  { %v7403_v40 = vadd.f32 %v7402_v9, %v7401_v7  ;;  %v7347_v30 = vadd.f32 %v7346_v8, %v7345_v4 }
 0x32d   :  { %v7348_v1 = vpop.f32.mrf.mxu0  ;;  %v7404_v11 = vpop.f32.mrf.mxu1 }
 0x32f   :  { %v7349_v15 = vpop.f32.mrf.mxu0  ;;  %v7405_v35 = vpop.f32.mrf.mxu1 }
 0x330   :  { %v7350_v33 = vadd.f32 %v7349_v15, %v7348_v1  ;;  %v7406_v41 = vadd.f32 %v7405_v35, %v7404_v11  ;;  %v9918_v15 = vpop.trf.xlu0 }
 0x331   :  { %v7351_v17 = vpop.f32.mrf.mxu0  ;;  %v7407_v34 = vpop.f32.mrf.mxu1 }
 0x332   :  { %v1114_v44 = vadd.f32 %v7403_v40, %v7350_v33  ;;  %v1113_v45 = vsub.f32 %v7347_v30, %v7406_v41 }
 0x333   :  { %v7352_v18 = vpop.f32.mrf.mxu0  ;;  %v7408_v42 = vpop.f32.mrf.mxu1 }
 0x334   :  { %v7409_v28 = vadd.f32 %v7408_v42, %v7407_v34  ;;  %v7353_v36 = vadd.f32 %v7352_v18, %v7351_v17 }
 0x335   :  { %v7354_v20 = vpop.f32.mrf.mxu0  ;;  %v7410_v21 = vpop.f32.mrf.mxu1 }
 0x337   :  { %v7355_v26 = vpop.f32.mrf.mxu0  ;;  %v7411_v23 = vpop.f32.mrf.mxu1 }
 0x338   :  { %v7356_v24 = vadd.f32 %v7355_v26, %v7354_v20  ;;  %v7412_v32 = vadd.f32 %v7411_v23, %v7410_v21 }
 0x33a   :  { %v1116_v38 = vadd.f32 %v7409_v28, %v7356_v24  ;;  %v1115_v43 = vsub.f32 %v7353_v36, %v7412_v32  ;;  %v9920_v24 = vpop.trf.xlu0 }
 0x33c   :  { %8153 = vmatprep.subr.mxu0 %v1116_v38 }
 0x33d   :  { %8154 = vmatpush3.msra.mxu0 %v1116_v38 }
 0x33e   :  { %8155 = vmatprep.subr.mxu0 %v1115_v43 }
 0x33f   :  { %8156 = vmatpush3.msra.mxu0 %v1115_v43  ;;  %v9922_v43 = vpop.trf.xlu0 }
 0x340   :  { %8157 = vmatprep.subr.mxu0 %v1114_v44 }
 0x341   :  { %8158 = vmatpush3.msra.mxu0 %v1114_v44 }
 0x342   :  { %8159 = vmatprep.subr.mxu0 %v1113_v45 }
 0x343   :  { %8160 = vmatpush3.msra.mxu0 %v1113_v45  ;;  %v9928_v30 = vpop.trf.xlu0  ;;  %v1444_v45 = vld [vmem:[%s11442_s8 + $0x8] sm:$0xff] }
 0x344   :  { %8162 = vmatmul.mubr.msk.f32.vlgmr.msra.gmra.mxu0 %vm620_vm1, %v9880_v3  ;;  %8193 = vmatprep.subr.mxu0 %v1446_v47 }
 0x345   :  { %8164 = vmatprep.mubr.msk.f32.mxu0 %vm620_vm1, %v9882_v13  ;;  %8194 = vmatpush3.msra.mxu0 %v1446_v47  ;;  %v1443_v47 = vld [vmem:[%s11442_s8] sm:$0xff] }
 0x346   :  { %8195 = vmatprep.subr.mxu0 %v1445_v31 }
 0x347   :  { %8196 = vmatpush3.msra.mxu0 %v1445_v31  ;;  %v9936_v44 = vpop.trf.xlu0 }
 0x348   :  { %8165 = vmatmul.mubr.msk.f32.gmra.mxu0 %vm620_vm1, %v9884_v19  ;;  %11458 = vst [vmem:[#allocation16_spill] sm:$0xff] %v9936_v44  ;;  %8197 = vmatprep.subr.mxu0 %v1444_v45 }
 0x349   :  { %v7357_v52 = vpop.f32.mrf.mxu0  ;;  %v7413_v53 = vpop.f32.mrf.mxu1  ;;  %8167 = vmatprep.mubr.msk.f32.mxu0 %vm620_vm1, %v9886_v39  ;;  %8198 = vmatpush3.msra.mxu0 %v1444_v45 }
 0x34a   :  { %8199 = vmatprep.subr.mxu0 %v1443_v47 }
 0x34b   :  { %v7358_v55 = vpop.f32.mrf.mxu0  ;;  %v7414_v57 = vpop.f32.mrf.mxu1  ;;  %8200 = vmatpush3.msra.mxu0 %v1443_v47 }
 0x34c   :  { %8168 = vmatmul.mubr.msk.f32.gmra.mxu0 %vm620_vm1, %v9888_v46  ;;  %v7415_v32 = vadd.f32 %v7414_v57, %v7413_v53  ;;  %v7359_v38 = vadd.f32 %v7358_v55, %v7357_v52 }
 0x34d   :  { %v7360_v59 = vpop.f32.mrf.mxu0  ;;  %v7416_v60 = vpop.f32.mrf.mxu1  ;;  %8170 = vmatprep.mubr.msk.f32.mxu0 %vm620_vm1, %v9900_v51 }
 0x34f   :  { %v7361_v4 = vpop.f32.mrf.mxu0  ;;  %v7417_v7 = vpop.f32.mrf.mxu1 }
 0x350   :  { %8171 = vmatmul.mubr.msk.f32.gmra.mxu0 %vm620_vm1, %v9910_v58  ;;  %v7362_v26 = vadd.f32 %v7361_v4, %v7360_v59  ;;  %v7418_v33 = vadd.f32 %v7417_v7, %v7416_v60 }
 0x351   :  { %v7363_v8 = vpop.f32.mrf.mxu0  ;;  %v7419_v9 = vpop.f32.mrf.mxu1 }
 0x352   :  { %v1279_v40 = vadd.f32 %v7415_v32, %v7362_v26  ;;  %v1278_v41 = vsub.f32 %v7359_v38, %v7418_v33  ;;  %v1727_v26 = vld [vmem:[%s11444_s10] sm:$0xff] }
 0x353   :  { %v7364_v1 = vpop.f32.mrf.mxu0  ;;  %v7420_v11 = vpop.f32.mrf.mxu1 }
 0x354   :  { %v7421_v42 = vadd.f32 %v7420_v11, %v7419_v9  ;;  %v7365_v23 = vadd.f32 %v7364_v1, %v7363_v8 }
 0x355   :  { %v7366_v35 = vpop.f32.mrf.mxu0  ;;  %v7422_v17 = vpop.f32.mrf.mxu1 }
 0x357   :  { %v7367_v34 = vpop.f32.mrf.mxu0  ;;  %v7423_v18 = vpop.f32.mrf.mxu1 }
 0x358   :  { %v7368_v20 = vadd.f32 %v7367_v34, %v7366_v35  ;;  %v7424_v21 = vadd.f32 %v7423_v18, %v7422_v17  ;;  %v9039_v18 = vld [vmem:[#allocation3] sm:$0xff] }
 0x35a   :  { %v1281_v28 = vadd.f32 %v7421_v42, %v7368_v20  ;;  %v1280_v36 = vsub.f32 %v7365_v23, %v7424_v21  ;;  %v1730_v42 = vld [vmem:[%s11444_s10 + $0x18] sm:$0xff]  ;;  %v1729_v20 = vld [vmem:[%s11444_s10 + $0x10] sm:$0xff]  ;;  %v1728_v21 = vld [vmem:[%s11444_s10 + $0x8] sm:$0xff] }
 0x35b   :  { %v9980_v23 = vld [vmem:[%s11443_s9] ss:$0 sm:$0xff] }
 0x35c   :  { %8173 = vmatprep.subr.mxu1 %v1281_v28 }
 0x35d   :  { %8174 = vmatpush3.msra.mxu1 %v1281_v28 }
 0x35e   :  { %8175 = vmatprep.subr.mxu1 %v1280_v36 }
 0x35f   :  { %8176 = vmatpush3.msra.mxu1 %v1280_v36 }
 0x360   :  { %8177 = vmatprep.subr.mxu1 %v1279_v40 }
 0x361   :  { %8178 = vmatpush3.msra.mxu1 %v1279_v40 }
 0x362   :  { %8179 = vmatprep.subr.mxu1 %v1278_v41 }
 0x363   :  { %8180 = vmatpush3.msra.mxu1 %v1278_v41 }
 0x364   :  { %8182 = vmatmul.mubr.msk.f32.vlgmr.msra.gmra.mxu1 %vm620_vm1, %v9904_v25  ;;  %8225 = vmatprep.subr.mxu1 %v1730_v42 }
 0x365   :  { %8184 = vmatprep.mubr.msk.f32.mxu1 %vm620_vm1, %v9914_v63  ;;  %8226 = vmatpush3.msra.mxu1 %v1730_v42 }
 0x366   :  { %8227 = vmatprep.subr.mxu1 %v1729_v20 }
 0x367   :  { %8228 = vmatpush3.msra.mxu1 %v1729_v20 }
 0x368   :  { %8185 = vmatmul.mubr.msk.f32.gmra.mxu1 %vm620_vm1, %v9918_v15  ;;  %8229 = vmatprep.subr.mxu1 %v1728_v21 }
 0x369   :  { %8187 = vmatprep.mubr.msk.f32.mxu1 %vm620_vm1, %v9920_v24  ;;  %8230 = vmatpush3.msra.mxu1 %v1728_v21 }
 0x36a   :  { %8231 = vmatprep.subr.mxu1 %v1727_v26 }
 0x36b   :  { %8232 = vmatpush3.msra.mxu1 %v1727_v26 }
 0x36c   :  { %8188 = vmatmul.mubr.msk.f32.gmra.mxu1 %vm620_vm1, %v9922_v43 }
 0x36d   :  { %8190 = vmatprep.mubr.msk.f32.mxu1 %vm620_vm1, %v9928_v30 }
 0x370   :  { %8191 = vmatmul.mubr.msk.f32.gmra.mxu1 %vm620_vm1, %v9936_v44 }
 0x404   :  { %v8163_v31 = vpop.f32.mrf.mxu0 }
 0x406   :  { %v1239_v52 = vpop.f32.mrf.mxu0 }
 0x407   :  { %8201 = vmatprep.mubr.msk.f32.mxu0 %vm620_vm1, %v1239_v52 }
 0x408   :  { %v8166_v53 = vpop.f32.mrf.mxu0  ;;  %8202 = vmatmul.mubr.msk.f32.vlgmr.msra.gmra.mxu0 %vm620_vm1, %v8163_v31 }
 0x40a   :  { %v1249_v55 = vpop.f32.mrf.mxu0 }
 0x40b   :  { %8204 = vmatprep.mubr.msk.f32.mxu0 %vm620_vm1, %v1249_v55 }
 0x40c   :  { %v8169_v57 = vpop.f32.mrf.mxu0  ;;  %8205 = vmatmul.mubr.msk.f32.gmra.mxu0 %vm620_vm1, %v8166_v53 }
 0x40e   :  { %v1259_v59 = vpop.f32.mrf.mxu0 }
 0x40f   :  { %8207 = vmatprep.mubr.msk.f32.mxu0 %vm620_vm1, %v1259_v59 }
 0x410   :  { %v8172_v60 = vpop.f32.mrf.mxu0  ;;  %8208 = vmatmul.mubr.msk.f32.gmra.mxu0 %vm620_vm1, %v8169_v57 }
 0x412   :  { %v1269_v4 = vpop.f32.mrf.mxu0 }
 0x413   :  { %8210 = vmatprep.mubr.msk.f32.mxu0 %vm620_vm1, %v1269_v4 }
 0x414   :  { %8211 = vmatmul.mubr.msk.f32.gmra.mxu0 %vm620_vm1, %v8172_v60 }
 0x424   :  { %v8183_v7 = vpop.f32.mrf.mxu1 }
 0x426   :  { %v1404_v8 = vpop.f32.mrf.mxu1 }
 0x427   :  { %8213 = vmatprep.mubr.msk.f32.mxu0 %vm620_vm1, %v1404_v8 }
 0x428   :  { %v8186_v9 = vpop.f32.mrf.mxu1  ;;  %8214 = vmatmul.mubr.msk.f32.gmra.mxu0 %vm620_vm1, %v8183_v7 }
 0x42a   :  { %v1414_v1 = vpop.f32.mrf.mxu1 }
 0x42b   :  { %8216 = vmatprep.mubr.msk.f32.mxu0 %vm620_vm1, %v1414_v1 }
 0x42c   :  { %v8189_v11 = vpop.f32.mrf.mxu1  ;;  %8217 = vmatmul.mubr.msk.f32.gmra.mxu0 %vm620_vm1, %v8186_v9 }
 0x42e   :  { %v1424_v35 = vpop.f32.mrf.mxu1 }
 0x42f   :  { %8219 = vmatprep.mubr.msk.f32.mxu0 %vm620_vm1, %v1424_v35 }
 0x430   :  { %v8192_v17 = vpop.f32.mrf.mxu1  ;;  %8220 = vmatmul.mubr.msk.f32.gmra.mxu0 %vm620_vm1, %v8189_v11 }
 0x432   :  { %v1434_v34 = vpop.f32.mrf.mxu1 }
 0x433   :  { %8222 = vmatprep.mubr.msk.f32.mxu0 %vm620_vm1, %v1434_v34 }
 0x434   :  { %8223 = vmatmul.mubr.msk.f32.gmra.mxu0 %vm620_vm1, %v8192_v17 }
 0x435   :  { %8273 = vmatprep.mubr.msk.f32.mxu0 %vm420_vm0, %v9039_v18 }
 0x4c8   :  { %v8203_v28 = vpop.f32.mrf.mxu0 }
 0x4c9   :  { %v1574_v32 = vadd.f32 %v8203_v28, %v9980_v23 }
 0x4ca   :  { %v1568_v33 = vpop.f32.mrf.mxu0 }
 0x4cb   :  { %v1664_v36 = vmul.f32 0.70710677, %v1574_v32  ;;  %v1569_v38 = vadd.f32 %v9980_v23, %v1568_v33  ;;  %v1648_v28 = vmul.f32 0.5, %v1574_v32 }
 0x4cc   :  { %v8206_v40 = vpop.f32.mrf.mxu0 }
 0x4cd   :  { %8751 = verf.f32 %v1664_v36  ;;  %v1663_v41 = vmul.f32 0.70710677, %v1569_v38  ;;  %v1584_v45 = vadd.f32 %v8206_v40, %v9980_v23  ;;  %v1647_v20 = vmul.f32 0.5, %v1569_v38 }
 0x4ce   :  { %v1578_v47 = vpop.f32.mrf.mxu0 }
 0x4cf   :  { %8753 = verf.f32 %v1663_v41  ;;  %v1666_v31 = vmul.f32 0.70710677, %v1584_v45  ;;  %v1579_v52 = vadd.f32 %v9980_v23, %v1578_v47 }
 0x4d0   :  { %v8209_v53 = vpop.f32.mrf.mxu0 }
 0x4d1   :  { %8755 = verf.f32 %v1666_v31  ;;  %v1665_v55 = vmul.f32 0.70710677, %v1579_v52  ;;  %v1594_v57 = vadd.f32 %v8209_v53, %v9980_v23  ;;  %v1649_v47 = vmul.f32 0.5, %v1579_v52 }
 0x4d2   :  { %v1588_v59 = vpop.f32.mrf.mxu0 }
 0x4d3   :  { %8757 = verf.f32 %v1665_v55  ;;  %v1668_v60 = vmul.f32 0.70710677, %v1594_v57  ;;  %v1589_v4 = vadd.f32 %v9980_v23, %v1588_v59  ;;  %v1650_v55 = vmul.f32 0.5, %v1584_v45 }
 0x4d4   :  { %v8212_v7 = vpop.f32.mrf.mxu0 }
 0x4d5   :  { %8759 = verf.f32 %v1668_v60  ;;  %v1667_v8 = vmul.f32 0.70710677, %v1589_v4  ;;  %v1604_v9 = vadd.f32 %v8212_v7, %v9980_v23  ;;  %v1651_v38 = vmul.f32 0.5, %v1589_v4 }
 0x4d6   :  { %v1598_v1 = vpop.f32.mrf.mxu0 }
 0x4d7   :  { %8761 = verf.f32 %v1667_v8  ;;  %v1670_v11 = vmul.f32 0.70710677, %v1604_v9  ;;  %v1599_v35 = vadd.f32 %v9980_v23, %v1598_v1 }
 0x4d9   :  { %8763 = verf.f32 %v1670_v11  ;;  %v1669_v17 = vmul.f32 0.70710677, %v1599_v35  ;;  %v1652_v11 = vmul.f32 0.5, %v1594_v57  ;;  %v1653_v45 = vmul.f32 0.5, %v1599_v35 }
 0x4da   :  { %v8752_v34 = vpop.eup %8751 }
 0x4db   :  { %8765 = verf.f32 %v1669_v17  ;;  %v1696_v42 = vadd.f32 1.0, %v8752_v34 }
 0x4dc   :  { %v8754_v18 = vpop.eup %8753 }
 0x4dd   :  { %v1695_v21 = vadd.f32 1.0, %v8754_v18  ;;  %v1712_v40 = vmul.f32 %v1696_v42, %v1648_v28 }
 0x4de   :  { %v8756_v26 = vpop.eup %8755 }
 0x4df   :  { %v1711_v33 = vmul.f32 %v1695_v21, %v1647_v20  ;;  %v1698_v41 = vadd.f32 1.0, %v8756_v26  ;;  %v1654_v26 = vmul.f32 0.5, %v1604_v9 }
 0x4e0   :  { %v8758_v36 = vpop.eup %8757 }
 0x4e1   :  { %v1697_v31 = vadd.f32 1.0, %v8758_v36  ;;  %8233 = vmatprep.mubr.msk.f32.mxu1 %vm620_vm1, %v1711_v33  ;;  %v1714_v7 = vmul.f32 %v1698_v41, %v1650_v55 }
 0x4e2   :  { %v8760_v53 = vpop.eup %8759  ;;  %8234 = vmatmul.mubr.msk.f32.vlgmr.msra.gmra.mxu1 %vm620_vm1, %v1712_v40 }
 0x4e3   :  { %v1713_v59 = vmul.f32 %v1697_v31, %v1649_v47  ;;  %v1700_v8 = vadd.f32 1.0, %v8760_v53 }
 0x4e4   :  { %v8762_v60 = vpop.eup %8761 }
 0x4e5   :  { %v1699_v1 = vadd.f32 1.0, %v8762_v60  ;;  %8236 = vmatprep.mubr.msk.f32.mxu1 %vm620_vm1, %v1713_v59  ;;  %v1716_v34 = vmul.f32 %v1700_v8, %v1652_v11 }
 0x4e6   :  { %v8764_v32 = vpop.eup %8763  ;;  %8237 = vmatmul.mubr.msk.f32.gmra.mxu1 %vm620_vm1, %v1714_v7 }
 0x4e7   :  { %v1715_v52 = vmul.f32 %v1699_v1, %v1651_v38  ;;  %v1702_v18 = vadd.f32 1.0, %v8764_v32 }
 0x4e8   :  { %v8766_v17 = vpop.eup %8765  ;;  %v8215_v42 = vpop.f32.mrf.mxu0 }
 0x4e9   :  { %v1701_v20 = vadd.f32 1.0, %v8766_v17  ;;  %v1614_v21 = vadd.f32 %v8215_v42, %v9980_v23  ;;  %8239 = vmatprep.mubr.msk.f32.mxu1 %vm620_vm1, %v1715_v52  ;;  %v1718_v36 = vmul.f32 %v1702_v18, %v1654_v26 }
 0x4ea   :  { %v1608_v4 = vpop.f32.mrf.mxu0  ;;  %8240 = vmatmul.mubr.msk.f32.gmra.mxu1 %vm620_vm1, %v1716_v34 }
 0x4eb   :  { %v1717_v28 = vmul.f32 %v1701_v20, %v1653_v45  ;;  %v1672_v33 = vmul.f32 0.70710677, %v1614_v21  ;;  %v1609_v57 = vadd.f32 %v9980_v23, %v1608_v4 }
 0x4ec   :  { %v8218_v40 = vpop.f32.mrf.mxu0 }
 0x4ed   :  { %8767 = verf.f32 %v1672_v33  ;;  %v1671_v41 = vmul.f32 0.70710677, %v1609_v57  ;;  %v1624_v47 = vadd.f32 %v8218_v40, %v9980_v23  ;;  %8242 = vmatprep.mubr.msk.f32.mxu1 %vm620_vm1, %v1717_v28  ;;  %v1655_v20 = vmul.f32 0.5, %v1609_v57 }
 0x4ee   :  { %v1618_v35 = vpop.f32.mrf.mxu0  ;;  %8243 = vmatmul.mubr.msk.f32.gmra.mxu1 %vm620_vm1, %v1718_v36  ;;  %v1656_v28 = vmul.f32 0.5, %v1614_v21 }
 0x4ef   :  { %8769 = verf.f32 %v1671_v41  ;;  %v1674_v9 = vmul.f32 0.70710677, %v1624_v47  ;;  %v1619_v31 = vadd.f32 %v9980_v23, %v1618_v35 }
 0x4f0   :  { %v8221_v53 = vpop.f32.mrf.mxu0 }
 0x4f1   :  { %8771 = verf.f32 %v1674_v9  ;;  %v1673_v55 = vmul.f32 0.70710677, %v1619_v31  ;;  %v1634_v59 = vadd.f32 %v8221_v53, %v9980_v23  ;;  %v1657_v35 = vmul.f32 0.5, %v1619_v31 }
 0x4f2   :  { %v1628_v60 = vpop.f32.mrf.mxu0 }
 0x4f3   :  { %8773 = verf.f32 %v1673_v55  ;;  %v1676_v7 = vmul.f32 0.70710677, %v1634_v59  ;;  %v1629_v8 = vadd.f32 %v9980_v23, %v1628_v60 }
 0x4f4   :  { %v8224_v38 = vpop.f32.mrf.mxu0 }
 0x4f5   :  { %8775 = verf.f32 %v1676_v7  ;;  %v1675_v1 = vmul.f32 0.70710677, %v1629_v8  ;;  %v1644_v32 = vadd.f32 %v8224_v38, %v9980_v23  ;;  %v1659_v57 = vmul.f32 0.5, %v1629_v8 }
 0x4f6   :  { %v1638_v11 = vpop.f32.mrf.mxu0 }
 0x4f7   :  { %8777 = verf.f32 %v1675_v1  ;;  %v1678_v52 = vmul.f32 0.70710677, %v1644_v32  ;;  %v1639_v17 = vadd.f32 %v9980_v23, %v1638_v11  ;;  %v1658_v23 = vmul.f32 0.5, %v1624_v47 }
 0x4f8   :  { %v1660_v11 = vmul.f32 0.5, %v1634_v59  ;;  %v9040_v59 = vld [vmem:[#allocation3 + $0x20] sm:$0xff] }
 0x4f9   :  { %8779 = verf.f32 %v1678_v52  ;;  %v1677_v34 = vmul.f32 0.70710677, %v1639_v17 }
 0x4fa   :  { %v8768_v18 = vpop.eup %8767 }
 0x4fb   :  { %8781 = verf.f32 %v1677_v34  ;;  %v1704_v45 = vadd.f32 1.0, %v8768_v18 }
 0x4fc   :  { %v8770_v42 = vpop.eup %8769 }
 0x4fd   :  { %v1703_v26 = vadd.f32 1.0, %v8770_v42  ;;  %v1720_v40 = vmul.f32 %v1704_v45, %v1656_v28  ;;  %v1661_v42 = vmul.f32 0.5, %v1639_v17  ;;  %v1662_v45 = vmul.f32 0.5, %v1644_v32  ;;  %v10018_v17 = vld [vmem:[%s11445_s11] ss:$0 sm:$0xff] }
 0x4fe   :  { %v8772_v4 = vpop.eup %8771 }
 0x4ff   :  { %v1719_v33 = vmul.f32 %v1703_v26, %v1655_v20  ;;  %v1706_v41 = vadd.f32 1.0, %v8772_v4 }
 0x500   :  { %v8774_v36 = vpop.eup %8773 }
 0x501   :  { %v1705_v9 = vadd.f32 1.0, %v8774_v36  ;;  %8245 = vmatprep.mubr.msk.f32.mxu1 %vm620_vm1, %v1719_v33  ;;  %v1722_v7 = vmul.f32 %v1706_v41, %v1658_v23 }
 0x502   :  { %v8776_v53 = vpop.eup %8775  ;;  %8246 = vmatmul.mubr.msk.f32.gmra.mxu1 %vm620_vm1, %v1720_v40 }
 0x503   :  { %v1721_v55 = vmul.f32 %v1705_v9, %v1657_v35  ;;  %v1708_v38 = vadd.f32 1.0, %v8776_v53 }
 0x504   :  { %v8778_v60 = vpop.eup %8777 }
 0x505   :  { %v1707_v1 = vadd.f32 1.0, %v8778_v60  ;;  %8248 = vmatprep.mubr.msk.f32.mxu1 %vm620_vm1, %v1721_v55  ;;  %v1724_v34 = vmul.f32 %v1708_v38, %v1660_v11 }
 0x506   :  { %v8780_v21 = vpop.eup %8779  ;;  %8249 = vmatmul.mubr.msk.f32.gmra.mxu1 %vm620_vm1, %v1722_v7 }
 0x507   :  { %v1723_v31 = vmul.f32 %v1707_v1, %v1659_v57  ;;  %v1710_v18 = vadd.f32 1.0, %v8780_v21 }
 0x508   :  { %v8782_v52 = vpop.eup %8781 }
 0x509   :  { %v1709_v47 = vadd.f32 1.0, %v8782_v52  ;;  %8251 = vmatprep.mubr.msk.f32.mxu1 %vm620_vm1, %v1723_v31  ;;  %v1726_v8 = vmul.f32 %v1710_v18, %v1662_v45 }
 0x50a   :  { %8252 = vmatmul.mubr.msk.f32.gmra.mxu1 %vm620_vm1, %v1724_v34 }
 0x50b   :  { %v1725_v20 = vmul.f32 %v1709_v47, %v1661_v42 }
 0x50d   :  { %8254 = vmatprep.mubr.msk.f32.mxu1 %vm620_vm1, %v1725_v20 }
 0x50e   :  { %8255 = vmatmul.mubr.msk.f32.gmra.mxu1 %vm620_vm1, %v1726_v8 }
 0x50f   :  { %8295 = vmatprep.mubr.msk.f32.mxu1 %vm420_vm0, %v9040_v59 }
 0x5a2   :  { %v8235_v26 = vpop.f32.mrf.mxu1 }
 0x5a3   :  { %v1858_v1 = vadd.f32 %v8235_v26, %v10018_v17 }
 0x5a4   :  { %v1852_v4 = vpop.f32.mrf.mxu1 }
 0x5a5   :  { %v1853_v31 = vadd.f32 %v10018_v17, %v1852_v4  ;;  %v1948_v34 = vmul.f32 0.70710677, %v1858_v1 }
 0x5a6   :  { %v8238_v28 = vpop.f32.mrf.mxu1 }
 0x5a7   :  { %v1868_v35 = vadd.f32 %v8238_v28, %v10018_v17  ;;  %v1947_v18 = vmul.f32 0.70710677, %v1853_v31 }
 0x5a8   :  { %v1862_v33 = vpop.f32.mrf.mxu1 }
 0x5a9   :  { %v1863_v55 = vadd.f32 %v10018_v17, %v1862_v33  ;;  %v1950_v21 = vmul.f32 0.70710677, %v1868_v35 }
 0x5aa   :  { %v8241_v32 = vpop.f32.mrf.mxu1 }
 0x5ab   :  { %v1878_v36 = vadd.f32 %v8241_v32, %v10018_v17  ;;  %v1949_v52 = vmul.f32 0.70710677, %v1863_v55 }
 0x5ac   :  { %v1872_v40 = vpop.f32.mrf.mxu1 }
 0x5ad   :  { %v1873_v41 = vadd.f32 %v10018_v17, %v1872_v40  ;;  %v1952_v9 = vmul.f32 0.70710677, %v1878_v36 }
 0x5ae   :  { %v8244_v53 = vpop.f32.mrf.mxu1 }
 0x5af   :  { %v1888_v23 = vadd.f32 %v8244_v53, %v10018_v17  ;;  %v1951_v60 = vmul.f32 0.70710677, %v1873_v41  ;;  %8783 = verf.f32 %v1952_v9  ;;  %v1936_v9 = vmul.f32 0.5, %v1878_v36 }
 0x5b0   :  { %v1882_v7 = vpop.f32.mrf.mxu1 }
 0x5b1   :  { %v1954_v38 = vmul.f32 0.70710677, %v1888_v23  ;;  %v1883_v57 = vadd.f32 %v10018_v17, %v1882_v7  ;;  %v1938_v20 = vmul.f32 0.5, %v1888_v23 }
 0x5b3   :  { %8785 = verf.f32 %v1954_v38  ;;  %v1953_v11 = vmul.f32 0.70710677, %v1883_v57  ;;  %v1937_v4 = vmul.f32 0.5, %v1883_v57 }
 0x5b4   :  { %8787 = verf.f32 %v1951_v60 }
 0x5b5   :  { %8789 = verf.f32 %v1953_v11 }
 0x5b6   :  { %8791 = verf.f32 %v1950_v21 }
 0x5b7   :  { %8793 = verf.f32 %v1949_v52  ;;  %v1935_v52 = vmul.f32 0.5, %v1873_v41  ;;  %v1933_v41 = vmul.f32 0.5, %v1863_v55 }
 0x5b8   :  { %8795 = verf.f32 %v1948_v34 }
 0x5b9   :  { %8797 = verf.f32 %v1947_v18 }
 0x5bc   :  { %v8784_v42 = vpop.eup %8783 }
 0x5bd   :  { %v1984_v26 = vadd.f32 1.0, %v8784_v42 }
 0x5bf   :  { %v2000_v11 = vmul.f32 %v1984_v26, %v1936_v9  ;;  %v1931_v9 = vmul.f32 0.5, %v1853_v31 }
 0x5c0   :  { %v8786_v47 = vpop.eup %8785 }
 0x5c1   :  { %v8788_v45 = vpop.eup %8787  ;;  %v1986_v8 = vadd.f32 1.0, %v8786_v47  ;;  %v1934_v47 = vmul.f32 0.5, %v1868_v35  ;;  %v1932_v35 = vmul.f32 0.5, %v1858_v1 }
 0x5c2   :  { %v8790_v59 = vpop.eup %8789  ;;  %v8247_v28 = vpop.f32.mrf.mxu1  ;;  %v1983_v53 = vadd.f32 1.0, %v8788_v45 }
 0x5c3   :  { %v8792_v33 = vpop.eup %8791  ;;  %v2002_v32 = vmul.f32 %v1986_v8, %v1938_v20  ;;  %v1985_v40 = vadd.f32 1.0, %v8790_v59  ;;  %v10038_v59 = vadd.f32 %v2000_v11, %v9588_v56 }
 0x5c4   :  { %v1892_v60 = vpop.f32.mrf.mxu1  ;;  %v8794_v7 = vpop.eup %8793  ;;  %v1982_v21 = vadd.f32 1.0, %v8792_v33  ;;  %v1999_v27 = vmul.f32 %v1983_v53, %v1935_v52 }
 0x5c5   :  { %v2001_v38 = vmul.f32 %v1985_v40, %v1937_v4  ;;  %v10029_v18 = vadd.f32 %v2002_v32, %v9575_v48  ;;  %v8796_v23 = vpop.eup %8795  ;;  %v1981_v42 = vadd.f32 1.0, %v8794_v7 }
 0x5c6   :  { %v8250_v34 = vpop.f32.mrf.mxu1  ;;  %v8798_v45 = vpop.eup %8797  ;;  %v1980_v20 = vadd.f32 1.0, %v8796_v23  ;;  %v1998_v8 = vmul.f32 %v1982_v21, %v1934_v47  ;;  %v10049_v4 = vadd.f32 %v1999_v27, %v9595_v62 }
 0x5c7   :  { %8257 = vmatprep.subr.mxu0 %v10029_v18  ;;  %v10033_v36 = vadd.f32 %v2001_v38, %v9580_v50  ;;  %v1979_v50 = vadd.f32 1.0, %v8798_v45  ;;  %v1997_v33 = vmul.f32 %v1981_v42, %v1933_v41  ;;  %v10045_v32 = vadd.f32 %v8250_v34, %v10018_v17  ;;  %v9046_v41 = vld [vmem:[#allocation6 + $0x20] sm:$0xff] }
 0x5c8   :  { %v1902_v57 = vpop.f32.mrf.mxu1  ;;  %8258 = vmatpush3.msra.mxu0 %v10029_v18  ;;  %v1996_v40 = vmul.f32 %v1980_v20, %v1932_v35  ;;  %v10058_v7 = vadd.f32 %v1998_v8, %v9603_v5  ;;  %v10072_v5 = vadd.f32 %v8247_v28, %v10018_v17  ;;  %v10081_v42 = vadd.f32 %v10018_v17, %v1892_v60  ;;  %v9042_v60 = vld [vmem:[#allocation6 + $0x38] sm:$0xff]  ;;  %v9044_v20 = vld [vmem:[#allocation6 + $0x30] sm:$0xff]  ;;  %v9045_v8 = vld [vmem:[#allocation6 + $0x28] sm:$0xff] }
 0x5c9   :  { %8259 = vmatprep.subr.mxu0 %v10033_v36  ;;  %v10061_v38 = vadd.f32 %v10018_v17, %v1902_v57  ;;  %v1995_v21 = vmul.f32 %v1979_v50, %v1931_v9  ;;  %v1958_v11 = vmul.f32 0.70710677, %v10045_v32  ;;  %v10069_v52 = vadd.f32 %v1997_v33, %v9610_v10  ;;  %v9048_v35 = vld [vmem:[#allocation6 + $0x18] sm:$0xff]  ;;  %v9049_v50 = vld [vmem:[#allocation6 + $0x10] sm:$0xff]  ;;  %v9051_v9 = vld [vmem:[#allocation6] sm:$0xff] }
 0x5ca   :  { %v8253_v48 = vpop.f32.mrf.mxu1  ;;  %8260 = vmatpush3.msra.mxu0 %v10033_v36  ;;  %v10078_v47 = vadd.f32 %v1996_v40, %v9617_v16  ;;  %v1956_v45 = vmul.f32 0.70710677, %v10072_v5  ;;  %v1955_v16 = vmul.f32 0.70710677, %v10081_v42  ;;  %v11459_v33 = vmov 0.0  }
 0x5cb   :  { %v10041_v26 = vadd.f32 %v8253_v48, %v10018_v17  ;;  %8261 = vmatprep.subr.mxu0 %v10038_v59  ;;  %v1957_v10 = vmul.f32 0.70710677, %v10061_v38  ;;  %v10087_v57 = vadd.f32 %v1995_v21, %v9624_v22  ;;  %v9043_v22 = vld [vmem:[#allocation3 + $0x10] sm:$0xff]  ;;  %v9047_v48 = vld [vmem:[#allocation3 + $0x18] sm:$0xff] }
 0x5cc   :  { %v1912_v55 = vpop.f32.mrf.mxu1  ;;  %8262 = vmatpush3.msra.mxu0 %v10038_v59 }
 0x5cd   :  { %v1960_v56 = vmul.f32 0.70710677, %v10041_v26  ;;  %v10053_v1 = vadd.f32 %v10018_v17, %v1912_v55  ;;  %8263 = vmatprep.subr.mxu0 %v10049_v4 }
 0x5ce   :  { %v8256_v53 = vpop.f32.mrf.mxu1  ;;  %8264 = vmatpush3.msra.mxu0 %v10049_v4 }
 0x5cf   :  { %v1959_v62 = vmul.f32 0.70710677, %v10053_v1  ;;  %v1928_v27 = vadd.f32 %v8256_v53, %v10018_v17  ;;  %8265 = vmatprep.subr.mxu0 %v10058_v7  ;;  %8799 = verf.f32 %v1960_v56  ;;  %v9050_v56 = vld [vmem:[#allocation6 + $0x8] sm:$0xff] }
 0x5d0   :  { %v1922_v31 = vpop.f32.mrf.mxu1  ;;  %8266 = vmatpush3.msra.mxu0 %v10058_v7 }
 0x5d1   :  { %v1962_v34 = vmul.f32 0.70710677, %v1928_v27  ;;  %v1923_v23 = vadd.f32 %v10018_v17, %v1922_v31  ;;  %8801 = verf.f32 %v1959_v62  ;;  %8267 = vmatprep.subr.mxu0 %v10069_v52  ;;  %v9041_v17 = vld [vmem:[#allocation3 + $0x8] sm:$0xff]  ;;  %v10101_v62 = vld [vmem:[%s11441_s7 + $0xf8] sm:$0xff]  ;;  %v1946_v31 = vmul.f32 0.5, %v1928_v27 }
 0x5d2   :  { %8268 = vmatpush3.msra.mxu0 %v10069_v52  ;;  %v1942_v27 = vmul.f32 0.5, %v10045_v32  ;;  %v1940_v32 = vmul.f32 0.5, %v10072_v5 }
 0x5d3   :  { %8803 = verf.f32 %v1962_v34  ;;  %v1961_v28 = vmul.f32 0.70710677, %v1923_v23  ;;  %8269 = vmatprep.subr.mxu0 %v10078_v47 }
 0x5d4   :  { %8805 = verf.f32 %v1958_v11  ;;  %8270 = vmatpush3.msra.mxu0 %v10078_v47 }
 0x5d5   :  { %8807 = verf.f32 %v1961_v28  ;;  %8271 = vmatprep.subr.mxu0 %v10087_v57  ;;  %v1944_v28 = vmul.f32 0.5, %v10041_v26 }
 0x5d6   :  { %8809 = verf.f32 %v1957_v10  ;;  %8272 = vmatpush3.msra.mxu0 %v10087_v57 }
 0x5d7   :  { %8274 = vmatmul.mubr.msk.f32.vlgmr.msra.gmra.mxu0 %vm420_vm0, %v9041_v17  ;;  %2245 = vmatprep.subr.mxu0 %v9042_v60  ;;  %8811 = verf.f32 %v1956_v45  ;;  %v1945_v17 = vmul.f32 0.5, %v1923_v23 }
 0x5d8   :  { %8276 = vmatprep.mubr.msk.f32.mxu0 %vm420_vm0, %v9043_v22  ;;  %2246 = vmatpush1.msra.mxu0 %v9044_v20  ;;  %8813 = verf.f32 %v1955_v16  ;;  %v1943_v20 = vmul.f32 0.5, %v10053_v1 }
 0x5d9   :  { %2247 = vmatprep.subr.mxu0 %v9045_v8 }
 0x5da   :  { %2248 = vmatpush1.msra.mxu0 %v9046_v41 }
 0x5db   :  { %8277 = vmatmul.mubr.msk.f32.gmra.mxu0 %vm420_vm0, %v9047_v48  ;;  %2249 = vmatprep.subr.mxu0 %v9048_v35 }
 0x5dc   :  { %2250 = vmatpush1.msra.mxu0 %v9049_v50  ;;  %2285 = vmatprep.mubr.f32.mxu0 %v11459_v33  ;;  %v8800_v55 = vpop.eup %8799 }
 0x5dd   :  { %2251 = vmatprep.subr.mxu0 %v9050_v56  ;;  %v1992_v11 = vadd.f32 1.0, %v8800_v55 }
 0x5de   :  { %v8802_v40 = vpop.eup %8801  ;;  %2252 = vmatpush1.msra.mxu0 %v9051_v9  ;;  %v1941_v9 = vmul.f32 0.5, %v10061_v38  ;;  %v1939_v38 = vmul.f32 0.5, %v10081_v42  ;;  %v9054_v42 = vld [vmem:[#allocation8 + $0x38] sm:$0xff] }
 0x5df   :  { %7513 = vmatprep.subr.mxu0 %v10101_v62  ;;  %v1991_v45 = vadd.f32 1.0, %v8802_v40  ;;  %v2008_v41 = vmul.f32 %v1992_v11, %v1944_v28  ;;  %v9059_v28 = vld [vmem:[#allocation3 + $0x38] sm:$0xff] }
 0x5e0   :  { %v8804_v53 = vpop.eup %8803 }
 0x5e1   :  { %v8806_v21 = vpop.eup %8805  ;;  %v1994_v34 = vadd.f32 1.0, %v8804_v53  ;;  %v2007_v56 = vmul.f32 %v1991_v45, %v1943_v20  ;;  %v9060_v45 = vld [vmem:[#allocation8 + $0x18] sm:$0xff] }
 0x5e2   :  { %v8808_v10 = vpop.eup %8807  ;;  %v1990_v8 = vadd.f32 1.0, %v8806_v21 }
 0x5e3   :  { %v2010_v16 = vmul.f32 %v1994_v34, %v1946_v31  ;;  %v1993_v60 = vadd.f32 1.0, %v8808_v10  ;;  %v8810_v22 = vpop.eup %8809  ;;  %v9056_v34 = vld [vmem:[#allocation8 + $0x30] sm:$0xff]  ;;  %v9057_v10 = vld [vmem:[#allocation8 + $0x28] sm:$0xff] }
 0x5e4   :  { %v8812_v50 = vpop.eup %8811  ;;  %v1989_v55 = vadd.f32 1.0, %v8810_v22  ;;  %v2006_v40 = vmul.f32 %v1990_v8, %v1942_v27  ;;  %v9064_v8 = vld [vmem:[%s11441_s7 + $0x78] sm:$0xff]  ;;  %v9067_v27 = vld [vmem:[%s11441_s7 + $0xe8] sm:$0xff] }
 0x5e5   :  { %v2009_v48 = vmul.f32 %v1993_v60, %v1945_v17  ;;  %v10107_v35 = vadd.f32 %v2010_v16, %v9633_v37  ;;  %v8814_v23 = vpop.eup %8813  ;;  %v1988_v1 = vadd.f32 1.0, %v8812_v50  ;;  %v10118_v37 = vadd.f32 %v2008_v41, %v9653_v49  ;;  %v9061_v16 = vld [vmem:[#allocation8 + $0x10] sm:$0xff]  ;;  %v9062_v17 = vld [vmem:[#allocation8 + $0x8] sm:$0xff]  ;;  %v9063_v60 = vld [vmem:[#allocation8] sm:$0xff] }
 0x5e6   :  { %v1987_v53 = vadd.f32 1.0, %v8814_v23  ;;  %v2005_v21 = vmul.f32 %v1989_v55, %v1941_v9  ;;  %v10130_v49 = vadd.f32 %v2006_v40, %v9667_v61  ;;  %v9068_v55 = vld [vmem:[%s11441_s7 + $0x68] sm:$0xff]  ;;  %v9070_v23 = vld [vmem:[%s11441_s7 + $0x60] sm:$0xff]  ;;  %v9072_v40 = vld [vmem:[%s11441_s7 + $0x58] sm:$0xff] }
 0x5e7   :  { %8279 = vmatprep.subr.mxu1 %v10107_v35  ;;  %v10112_v26 = vadd.f32 %v2009_v48, %v9644_v29  ;;  %v10124_v29 = vadd.f32 %v2007_v56, %v9660_v54  ;;  %v2004_v11 = vmul.f32 %v1988_v1, %v1940_v32  ;;  %v9066_v48 = vld [vmem:[%s11441_s7 + $0x70] sm:$0xff]  ;;  %v9069_v56 = vld [vmem:[%s11441_s7 + $0xe0] sm:$0xff]  ;;  %v9071_v1 = vld [vmem:[%s11441_s7 + $0xd8] sm:$0xff] }
 0x5e8   :  { %8280 = vmatpush3.msra.mxu1 %v10107_v35  ;;  %v2003_v5 = vmul.f32 %v1987_v53, %v1939_v38  ;;  %v10135_v31 = vadd.f32 %v2005_v21, %v9674_v6  ;;  %v9053_v6 = vld [vmem:[#allocation3 + $0x28] sm:$0xff]  ;;  %v9078_v38 = vld [vmem:[%s11441_s7 + $0x40] sm:$0xff] }
 0x5e9   :  { %8281 = vmatprep.subr.mxu1 %v10112_v26  ;;  %v10140_v54 = vadd.f32 %v2004_v11, %v9681_v12  ;;  %v9055_v12 = vld [vmem:[#allocation3 + $0x30] sm:$0xff]  ;;  %v9075_v53 = vld [vmem:[%s11441_s7 + $0xc8] sm:$0xff]  ;;  %v9077_v11 = vld [vmem:[%s11441_s7 + $0xc0] sm:$0xff] }
 0x5ea   :  { %8282 = vmatpush3.msra.mxu1 %v10112_v26  ;;  %v10145_v61 = vadd.f32 %v2003_v5, %v9686_v14  ;;  %v9058_v14 = vld [vmem:[#allocation8 + $0x20] sm:$0xff]  ;;  %v9073_v9 = vld [vmem:[%s11441_s7 + $0xd0] sm:$0xff]  ;;  %v9079_v5 = vld [vmem:[%s11441_s7 + $0xb8] sm:$0xff] }
 0x5eb   :  { %8283 = vmatprep.subr.mxu1 %v10118_v37  ;;  %v9074_v32 = vld [vmem:[%s11441_s7 + $0x50] sm:$0xff]  ;;  %v9076_v21 = vld [vmem:[%s11441_s7 + $0x48] sm:$0xff] }
 0x5ec   :  { %8284 = vmatpush3.msra.mxu1 %v10118_v37 }
 0x5ed   :  { %8285 = vmatprep.subr.mxu1 %v10124_v29 }
 0x5ee   :  { %8286 = vmatpush3.msra.mxu1 %v10124_v29 }
 0x5ef   :  { %8287 = vmatprep.subr.mxu1 %v10130_v49 }
 0x5f0   :  { %8288 = vmatpush3.msra.mxu1 %v10130_v49 }
 0x5f1   :  { %8289 = vmatprep.subr.mxu1 %v10135_v31 }
 0x5f2   :  { %8290 = vmatpush3.msra.mxu1 %v10135_v31 }
 0x5f3   :  { %8291 = vmatprep.subr.mxu1 %v10140_v54 }
 0x5f4   :  { %8292 = vmatpush3.msra.mxu1 %v10140_v54 }
 0x5f5   :  { %8293 = vmatprep.subr.mxu1 %v10145_v61 }
 0x5f6   :  { %8294 = vmatpush3.msra.mxu1 %v10145_v61 }
 0x5f7   :  { %8296 = vmatmul.mubr.msk.f32.vlgmr.msra.gmra.mxu1 %vm420_vm0, %v9053_v6  ;;  %2358 = vmatprep.subr.mxu1 %v9054_v42  ;;  %v9080_v6 = vld [vmem:[%s11441_s7 + $0x38] sm:$0xff]  ;;  %v9081_v42 = vld [vmem:[%s11441_s7 + $0xb0] sm:$0xff] }
 0x5f8   :  { %8298 = vmatprep.mubr.msk.f32.mxu1 %vm420_vm0, %v9055_v12  ;;  %2359 = vmatpush1.msra.mxu1 %v9056_v34  ;;  %v9082_v12 = vld [vmem:[%s11441_s7 + $0x30] sm:$0xff]  ;;  %v9083_v34 = vld [vmem:[%s11441_s7 + $0xa8] sm:$0xff] }
 0x5f9   :  { %2360 = vmatprep.subr.mxu1 %v9057_v10 }
 0x5fa   :  { %2361 = vmatpush1.msra.mxu1 %v9058_v14  ;;  %v9084_v14 = vld [vmem:[%s11441_s7 + $0x28] sm:$0xff] }
 0x5fb   :  { %8299 = vmatmul.mubr.msk.f32.gmra.mxu1 %vm420_vm0, %v9059_v28  ;;  %2362 = vmatprep.subr.mxu1 %v9060_v45  ;;  %v9085_v28 = vld [vmem:[%s11441_s7 + $0xa0] sm:$0xff] }
 0x5fc   :  { %2363 = vmatpush1.msra.mxu1 %v9061_v16  ;;  %2398 = vmatprep.mubr.f32.mxu1 %v11459_v33  ;;  %v9086_v16 = vld [vmem:[%s11441_s7 + $0x20] sm:$0xff] }
 0x5fd   :  { %2364 = vmatprep.subr.mxu1 %v9062_v17 }
 0x5fe   :  { %2365 = vmatpush1.msra.mxu1 %v9063_v60  ;;  %v9087_v60 = vld [vmem:[%s11441_s7 + $0x98] sm:$0xff] }
 0x5ff   :  { %7569 = vmatprep.subr.mxu1 %v10101_v62  ;;  %v9065_v62 = vld [vmem:[%s11441_s7 + $0xf0] sm:$0xff] }
 0x697   :  { %v8275_v22 = vpop.f32.mrf.mxu0 }
 0x699   :  { %v2093_v20 = vpop.f32.mrf.mxu0 }
 0x69a   :  { %7027 = vmatmul.mubr.msk.f32.vlgmr.msra.gmra.mxu0 %vm620_vm1, %v2093_v20  ;;  %7035 = vmatmul.mubr.msk.f32.vlgmr.msra.gmra.mxu1 %vm620_vm1, %v2093_v20 }
 0x69b   :  { %2291 = vmatprep.mubr.f32.mxu0 %v11459_v33  ;;  %2404 = vmatprep.mubr.f32.mxu1 %v11459_v33  ;;  %v8278_v41 = vpop.f32.mrf.mxu0 }
 0x69c   :  { %7514 = vmatpush3.msra.mxu0 %v9064_v8  ;;  %7570 = vmatpush3.msra.mxu1 %v9064_v8  ;;  %v9089_v8 = vld [vmem:[%s11441_s7 + $0x90] sm:$0xff] }
 0x69d   :  { %7515 = vmatprep.subr.mxu0 %v9065_v62  ;;  %7571 = vmatprep.subr.mxu1 %v9065_v62  ;;  %v2103_v50 = vpop.f32.mrf.mxu0  ;;  %v9091_v62 = vld [vmem:[%s11441_s7 + $0x88] sm:$0xff] }
 0x69e   :  { %7028 = vmatmul.mubr.msk.f32.gmra.mxu0 %vm620_vm1, %v8275_v22  ;;  %7036 = vmatmul.mubr.msk.f32.gmra.mxu1 %vm620_vm1, %v8275_v22  ;;  %v9088_v22 = vld [vmem:[%s11441_s7 + $0x18] sm:$0xff] }
 0x69f   :  { %2297 = vmatprep.mubr.f32.mxu0 %v11459_v33  ;;  %2410 = vmatprep.mubr.f32.mxu1 %v11459_v33 }
 0x6a0   :  { %7516 = vmatpush3.msra.mxu0 %v9066_v48  ;;  %7572 = vmatpush3.msra.mxu1 %v9066_v48  ;;  %v9092_v48 = vld [vmem:[%s11441_s7 + $0x8] sm:$0xff] }
 0x6a1   :  { %7517 = vmatprep.subr.mxu0 %v9067_v27  ;;  %7573 = vmatprep.subr.mxu1 %v9067_v27  ;;  %v9094_v27 = vld [vmem:[%s11441_s7] sm:$0xff] }
 0x6a2   :  { %7029 = vmatmul.mubr.msk.f32.gmra.mxu0 %vm620_vm1, %v2103_v50  ;;  %7037 = vmatmul.mubr.msk.f32.gmra.mxu1 %vm620_vm1, %v2103_v50  ;;  %v9093_v50 = vld [vmem:[%s11441_s7 + $0x80] sm:$0xff] }
 0x6a3   :  { %2303 = vmatprep.mubr.f32.mxu0 %v11459_v33  ;;  %2416 = vmatprep.mubr.f32.mxu1 %v11459_v33 }
 0x6a4   :  { %7518 = vmatpush3.msra.mxu0 %v9068_v55  ;;  %7574 = vmatpush3.msra.mxu1 %v9068_v55 }
 0x6a5   :  { %7519 = vmatprep.subr.mxu0 %v9069_v56  ;;  %7575 = vmatprep.subr.mxu1 %v9069_v56 }
 0x6a6   :  { %7030 = vmatmul.mubr.msk.f32.gmra.mxu0 %vm620_vm1, %v8278_v41  ;;  %7038 = vmatmul.mubr.msk.f32.gmra.mxu1 %vm620_vm1, %v8278_v41  ;;  %v9090_v41 = vld [vmem:[%s11441_s7 + $0x10] sm:$0xff] }
 0x6a7   :  { %2309 = vmatprep.mubr.f32.mxu0 %v11459_v33  ;;  %2422 = vmatprep.mubr.f32.mxu1 %v11459_v33 }
 0x6a8   :  { %7520 = vmatpush3.msra.mxu0 %v9070_v23  ;;  %7576 = vmatpush3.msra.mxu1 %v9070_v23 }
 0x6a9   :  { %7521 = vmatprep.subr.mxu0 %v9071_v1  ;;  %7577 = vmatprep.subr.mxu1 %v9071_v1 }
 0x6aa   :  { %7522 = vmatpush3.msra.mxu0 %v9072_v40  ;;  %7578 = vmatpush3.msra.mxu1 %v9072_v40  ;;  %v9095_v40 = vld [vmem:[%s11440_s6 + $0x8] sm:$0xff] }
 0x6ab   :  { %7523 = vmatprep.subr.mxu0 %v9073_v9  ;;  %7579 = vmatprep.subr.mxu1 %v9073_v9 }
 0x6ac   :  { %7524 = vmatpush3.msra.mxu0 %v9074_v32  ;;  %7580 = vmatpush3.msra.mxu1 %v9074_v32 }
 0x6ad   :  { %7525 = vmatprep.subr.mxu0 %v9075_v53  ;;  %7581 = vmatprep.subr.mxu1 %v9075_v53  ;;  %v9096_v53 = vld [vmem:[%s11440_s6] sm:$0xff] }
 0x6ae   :  { %7526 = vmatpush3.msra.mxu0 %v9076_v21  ;;  %7582 = vmatpush3.msra.mxu1 %v9076_v21 }
 0x6af   :  { %7527 = vmatprep.subr.mxu0 %v9077_v11  ;;  %7583 = vmatprep.subr.mxu1 %v9077_v11 }
 0x6b0   :  { %7528 = vmatpush3.msra.mxu0 %v9078_v38  ;;  %7584 = vmatpush3.msra.mxu1 %v9078_v38 }
 0x6b1   :  { %7529 = vmatprep.subr.mxu0 %v9079_v5  ;;  %7585 = vmatprep.subr.mxu1 %v9079_v5 }
 0x6b2   :  { %7530 = vmatpush3.msra.mxu0 %v9080_v6  ;;  %7586 = vmatpush3.msra.mxu1 %v9080_v6 }
 0x6b3   :  { %7531 = vmatprep.subr.mxu0 %v9081_v42  ;;  %7587 = vmatprep.subr.mxu1 %v9081_v42 }
 0x6b4   :  { %7532 = vmatpush3.msra.mxu0 %v9082_v12  ;;  %7588 = vmatpush3.msra.mxu1 %v9082_v12  ;;  %v9097_v12 = vld [vmem:[%s11440_s6 + $0x18] sm:$0xff] }
 0x6b5   :  { %7533 = vmatprep.subr.mxu0 %v9083_v34  ;;  %7589 = vmatprep.subr.mxu1 %v9083_v34 }
 0x6b6   :  { %7534 = vmatpush3.msra.mxu0 %v9084_v14  ;;  %7590 = vmatpush3.msra.mxu1 %v9084_v14  ;;  %v9098_v14 = vld [vmem:[%s11440_s6 + $0x10] sm:$0xff] }
 0x6b7   :  { %v8297_v10 = vpop.f32.mrf.mxu1  ;;  %7535 = vmatprep.subr.mxu0 %v9085_v28  ;;  %7591 = vmatprep.subr.mxu1 %v9085_v28 }
 0x6b8   :  { %7536 = vmatpush3.msra.mxu0 %v9086_v16  ;;  %7592 = vmatpush3.msra.mxu1 %v9086_v16 }
 0x6b9   :  { %v2178_v45 = vpop.f32.mrf.mxu1  ;;  %7537 = vmatprep.subr.mxu0 %v9087_v60  ;;  %7593 = vmatprep.subr.mxu1 %v9087_v60 }
 0x6ba   :  { %7031 = vmatmul.mubr.msk.f32.gmra.mxu0 %vm620_vm1, %v2178_v45  ;;  %7039 = vmatmul.mubr.msk.f32.gmra.mxu1 %vm620_vm1, %v2178_v45 }
 0x6bb   :  { %2315 = vmatprep.mubr.f32.mxu0 %v11459_v33  ;;  %2428 = vmatprep.mubr.f32.mxu1 %v11459_v33  ;;  %v8300_v17 = vpop.f32.mrf.mxu1 }
 0x6bc   :  { %7538 = vmatpush3.msra.mxu0 %v9088_v22  ;;  %7594 = vmatpush3.msra.mxu1 %v9088_v22 }
 0x6bd   :  { %v2188_v20 = vpop.f32.mrf.mxu1  ;;  %7539 = vmatprep.subr.mxu0 %v9089_v8  ;;  %7595 = vmatprep.subr.mxu1 %v9089_v8 }
 0x6be   :  { %7032 = vmatmul.mubr.msk.f32.gmra.mxu0 %vm620_vm1, %v8297_v10  ;;  %7040 = vmatmul.mubr.msk.f32.gmra.mxu1 %vm620_vm1, %v8297_v10 }
 0x6bf   :  { %2321 = vmatprep.mubr.f32.mxu0 %v11459_v33  ;;  %2434 = vmatprep.mubr.f32.mxu1 %v11459_v33 }
 0x6c0   :  { %7540 = vmatpush3.msra.mxu0 %v9090_v41  ;;  %7596 = vmatpush3.msra.mxu1 %v9090_v41 }
 0x6c1   :  { %7541 = vmatprep.subr.mxu0 %v9091_v62  ;;  %7597 = vmatprep.subr.mxu1 %v9091_v62  ;;  %v9100_v62 = vld [vmem:[%s11440_s6 + $0x20] sm:$0xff] }
 0x6c2   :  { %7033 = vmatmul.mubr.msk.f32.gmra.mxu0 %vm620_vm1, %v2188_v20  ;;  %7041 = vmatmul.mubr.msk.f32.gmra.mxu1 %vm620_vm1, %v2188_v20  ;;  %v9099_v20 = vld [vmem:[%s11440_s6 + $0x28] sm:$0xff] }
 0x6c3   :  { %2327 = vmatprep.mubr.f32.mxu0 %v11459_v33  ;;  %2440 = vmatprep.mubr.f32.mxu1 %v11459_v33 }
 0x6c4   :  { %7542 = vmatpush3.msra.mxu0 %v9092_v48  ;;  %7598 = vmatpush3.msra.mxu1 %v9092_v48 }
 0x6c5   :  { %7543 = vmatprep.subr.mxu0 %v9093_v50  ;;  %7599 = vmatprep.subr.mxu1 %v9093_v50 }
 0x6c6   :  { %7034 = vmatmul.mubr.msk.f32.gmra.mxu0 %vm620_vm1, %v8300_v17  ;;  %7042 = vmatmul.mubr.msk.f32.gmra.mxu1 %vm620_vm1, %v8300_v17 }
 0x6c7   :  { %7544 = vmatpush3.msra.mxu0 %v9094_v27  ;;  %7600 = vmatpush3.msra.mxu1 %v9094_v27 }
 0x75a   :  { %v2287_v55 = vpop.f32.mrf.mxu0  ;;  %v2400_v56 = vpop.f32.mrf.mxu1 }
 0x75b   :  { %v2447_v21 = vmul.f32 %v9096_v53, %v2287_v55  ;;  %v2568_v11 = vmul.f32 %v9096_v53, %v2400_v56 }
 0x75c   :  { %v2289_v23 = vpop.f32.mrf.mxu0  ;;  %v2402_v1 = vpop.f32.mrf.mxu1 }
 0x75d   :  { %v2448_v9 = vmul.f32 %v9095_v40, %v2289_v23  ;;  %v2569_v32 = vmul.f32 %v9095_v40, %v2402_v1  ;;  %v9101_v1 = vld [vmem:[%s11440_s6 + $0x38] sm:$0xff] }
 0x75e   :  { %v2293_v38 = vpop.f32.mrf.mxu0  ;;  %v2406_v5 = vpop.f32.mrf.mxu1 }
 0x75f   :  { %2527 = vmatprep.mubr.f32.mxu0 %v2448_v9  ;;  %2648 = vmatprep.mubr.f32.mxu1 %v2569_v32  ;;  %v2449_v28 = vmul.f32 %v9098_v14, %v2293_v38  ;;  %v2570_v45 = vmul.f32 %v9098_v14, %v2406_v5  ;;  %v9102_v32 = vld [vmem:[%s11440_s6 + $0x30] sm:$0xff]  ;;  %v9103_v5 = vld [vmem:[%s11440_s6 + $0x40] sm:$0xff] }
 0x760   :  { %v2295_v6 = vpop.f32.mrf.mxu0  ;;  %v2408_v42 = vpop.f32.mrf.mxu1  ;;  %2528 = vmatmul.mubr.f32.vlgmr.msra.gmra.mxu0 %v2447_v21  ;;  %2649 = vmatmul.mubr.f32.vlgmr.msra.gmra.mxu1 %v2568_v11 }
 0x761   :  { %v2450_v34 = vmul.f32 %v9097_v12, %v2295_v6  ;;  %v2571_v10 = vmul.f32 %v9097_v12, %v2408_v42 }
 0x762   :  { %v2299_v16 = vpop.f32.mrf.mxu0  ;;  %v2412_v17 = vpop.f32.mrf.mxu1 }
 0x763   :  { %2532 = vmatprep.mubr.f32.mxu0 %v2450_v34  ;;  %2653 = vmatprep.mubr.f32.mxu1 %v2571_v10  ;;  %v2451_v48 = vmul.f32 %v9100_v62, %v2299_v16  ;;  %v2572_v50 = vmul.f32 %v9100_v62, %v2412_v17  ;;  %v9104_v10 = vld [vmem:[%s11440_s6 + $0x48] sm:$0xff]  ;;  %v9105_v17 = vld [vmem:[%s11440_s6 + $0x50] sm:$0xff] }
 0x764   :  { %v2301_v60 = vpop.f32.mrf.mxu0  ;;  %v2414_v22 = vpop.f32.mrf.mxu1  ;;  %2533 = vmatmul.mubr.f32.gmra.mxu0 %v2449_v28  ;;  %2654 = vmatmul.mubr.f32.gmra.mxu1 %v2570_v45 }
 0x765   :  { %v2452_v8 = vmul.f32 %v9099_v20, %v2301_v60  ;;  %v2573_v41 = vmul.f32 %v9099_v20, %v2414_v22 }
 0x766   :  { %v2305_v27 = vpop.f32.mrf.mxu0  ;;  %v2418_v55 = vpop.f32.mrf.mxu1 }
 0x767   :  { %2537 = vmatprep.mubr.f32.mxu0 %v2452_v8  ;;  %2658 = vmatprep.mubr.f32.mxu1 %v2573_v41  ;;  %v2453_v53 = vmul.f32 %v9102_v32, %v2305_v27  ;;  %v2574_v21 = vmul.f32 %v9102_v32, %v2418_v55  ;;  %v9106_v41 = vld [vmem:[%s11440_s6 + $0x58] sm:$0xff]  ;;  %v9107_v55 = vld [vmem:[%s11440_s6 + $0x60] sm:$0xff] }
 0x768   :  { %v2307_v56 = vpop.f32.mrf.mxu0  ;;  %v2420_v23 = vpop.f32.mrf.mxu1  ;;  %2538 = vmatmul.mubr.f32.gmra.mxu0 %v2451_v48  ;;  %2659 = vmatmul.mubr.f32.gmra.mxu1 %v2572_v50 }
 0x769   :  { %v2454_v40 = vmul.f32 %v9101_v1, %v2307_v56  ;;  %v2575_v9 = vmul.f32 %v9101_v1, %v2420_v23 }
 0x76b   :  { %2542 = vmatprep.mubr.f32.mxu0 %v2454_v40  ;;  %2663 = vmatprep.mubr.f32.mxu1 %v2575_v9  ;;  %v9108_v9 = vld [vmem:[%s11440_s6 + $0x68] sm:$0xff] }
 0x76c   :  { %2543 = vmatmul.mubr.f32.gmra.mxu0 %v2453_v53  ;;  %2664 = vmatmul.mubr.f32.gmra.mxu1 %v2574_v21 }
 0x77a   :  { %v2311_v11 = vpop.f32.mrf.mxu0  ;;  %v2424_v38 = vpop.f32.mrf.mxu1 }
 0x77b   :  { %v2455_v6 = vmul.f32 %v9103_v5, %v2311_v11  ;;  %v2576_v42 = vmul.f32 %v9103_v5, %v2424_v38  ;;  %v9109_v38 = vld [vmem:[%s11440_s6 + $0x70] sm:$0xff] }
 0x77c   :  { %v2313_v12 = vpop.f32.mrf.mxu0  ;;  %v2426_v34 = vpop.f32.mrf.mxu1 }
 0x77d   :  { %v2456_v14 = vmul.f32 %v9104_v10, %v2313_v12  ;;  %v2577_v28 = vmul.f32 %v9104_v10, %v2426_v34  ;;  %v9110_v34 = vld [vmem:[%s11440_s6 + $0x78] sm:$0xff] }
 0x77e   :  { %v2317_v45 = vpop.f32.mrf.mxu0  ;;  %v2430_v16 = vpop.f32.mrf.mxu1 }
 0x77f   :  { %2547 = vmatprep.mubr.f32.mxu0 %v2456_v14  ;;  %2668 = vmatprep.mubr.f32.mxu1 %v2577_v28  ;;  %v2457_v60 = vmul.f32 %v9105_v17, %v2317_v45  ;;  %v2578_v22 = vmul.f32 %v9105_v17, %v2430_v16 }
 0x780   :  { %v2319_v20 = vpop.f32.mrf.mxu0  ;;  %v2432_v8 = vpop.f32.mrf.mxu1  ;;  %2548 = vmatmul.mubr.f32.gmra.mxu0 %v2455_v6  ;;  %2669 = vmatmul.mubr.f32.gmra.mxu1 %v2576_v42 }
 0x781   :  { %v2458_v62 = vmul.f32 %v9106_v41, %v2319_v20  ;;  %v2579_v48 = vmul.f32 %v9106_v41, %v2432_v8 }
 0x782   :  { %v2323_v50 = vpop.f32.mrf.mxu0  ;;  %v2436_v27 = vpop.f32.mrf.mxu1 }
 0x783   :  { %2552 = vmatprep.mubr.f32.mxu0 %v2458_v62  ;;  %2673 = vmatprep.mubr.f32.mxu1 %v2579_v48  ;;  %v2459_v56 = vmul.f32 %v9107_v55, %v2323_v50  ;;  %v2580_v23 = vmul.f32 %v9107_v55, %v2436_v27 }
 0x784   :  { %v2325_v1 = vpop.f32.mrf.mxu0  ;;  %v2438_v40 = vpop.f32.mrf.mxu1  ;;  %2553 = vmatmul.mubr.f32.gmra.mxu0 %v2457_v60  ;;  %2674 = vmatmul.mubr.f32.gmra.mxu1 %v2578_v22 }
 0x785   :  { %v2460_v32 = vmul.f32 %v9108_v9, %v2325_v1  ;;  %v2581_v53 = vmul.f32 %v9108_v9, %v2438_v40 }
 0x786   :  { %v2329_v21 = vpop.f32.mrf.mxu0  ;;  %v2442_v11 = vpop.f32.mrf.mxu1 }
 0x787   :  { %2557 = vmatprep.mubr.f32.mxu0 %v2460_v32  ;;  %2678 = vmatprep.mubr.f32.mxu1 %v2581_v53  ;;  %v2461_v5 = vmul.f32 %v9109_v38, %v2329_v21  ;;  %v2582_v6 = vmul.f32 %v9109_v38, %v2442_v11 }
 0x788   :  { %v2331_v42 = vpop.f32.mrf.mxu0  ;;  %v2444_v12 = vpop.f32.mrf.mxu1  ;;  %2558 = vmatmul.mubr.f32.gmra.mxu0 %v2459_v56  ;;  %2679 = vmatmul.mubr.f32.gmra.mxu1 %v2580_v23 }
 0x789   :  { %v2462_v10 = vmul.f32 %v9110_v34, %v2331_v42  ;;  %v2583_v14 = vmul.f32 %v9110_v34, %v2444_v12  ;;  %v7062_v34 = vld [vmem:[%s11442_s8 + $0x38] sm:$0xff] }
 0x78b   :  { %2562 = vmatprep.mubr.f32.mxu0 %v2462_v10  ;;  %2683 = vmatprep.mubr.f32.mxu1 %v2583_v14  ;;  %v7061_v10 = vld [vmem:[%s11442_s8 + $0x30] sm:$0xff] }
 0x78c   :  { %2563 = vmatmul.mubr.f32.gmra.mxu0 %v2461_v5  ;;  %2684 = vmatmul.mubr.f32.gmra.mxu1 %v2582_v6 }
 0x78d   :  { %8309 = vmatprep.mubr.msk.f32.mxu0 %vm620_vm1, %v9872_v0  ;;  %8329 = vmatprep.mubr.msk.f32.mxu1 %vm620_vm1, %v9876_v2 }
 0x820   :  { %v7545_v28 = vpop.f32.mrf.mxu0  ;;  %v7601_v45 = vpop.f32.mrf.mxu1 }
 0x822   :  { %v7546_v16 = vpop.f32.mrf.mxu0  ;;  %v7602_v17 = vpop.f32.mrf.mxu1 }
 0x823   :  { %v7603_v11 = vadd.f32 %v7602_v17, %v7601_v45  ;;  %v7547_v6 = vadd.f32 %v7546_v16, %v7545_v28 }
 0x824   :  { %v7548_v60 = vpop.f32.mrf.mxu0  ;;  %v7604_v22 = vpop.f32.mrf.mxu1 }
 0x826   :  { %v7549_v20 = vpop.f32.mrf.mxu0  ;;  %v7605_v8 = vpop.f32.mrf.mxu1 }
 0x827   :  { %v7550_v32 = vadd.f32 %v7549_v20, %v7548_v60  ;;  %v7606_v38 = vadd.f32 %v7605_v8, %v7604_v22 }
 0x828   :  { %v7551_v41 = vpop.f32.mrf.mxu0  ;;  %v7607_v62 = vpop.f32.mrf.mxu1 }
 0x829   :  { %v2690_v42 = vadd.f32 %v7603_v11, %v7550_v32  ;;  %v2689_v12 = vsub.f32 %v7547_v6, %v7606_v38 }
 0x82a   :  { %v7552_v48 = vpop.f32.mrf.mxu0  ;;  %v7608_v50 = vpop.f32.mrf.mxu1 }
 0x82b   :  { %v7609_v1 = vadd.f32 %v7608_v50, %v7607_v62  ;;  %v7553_v53 = vadd.f32 %v7552_v48, %v7551_v41 }
 0x82c   :  { %v7554_v27 = vpop.f32.mrf.mxu0  ;;  %v7610_v55 = vpop.f32.mrf.mxu1 }
 0x82e   :  { %v7555_v56 = vpop.f32.mrf.mxu0  ;;  %v7611_v23 = vpop.f32.mrf.mxu1 }
 0x82f   :  { %v7556_v40 = vadd.f32 %v7555_v56, %v7554_v27  ;;  %v7612_v9 = vadd.f32 %v7611_v23, %v7610_v55 }
 0x831   :  { %v2692_v21 = vadd.f32 %v7609_v1, %v7556_v40  ;;  %v2691_v5 = vsub.f32 %v7553_v53, %v7612_v9 }
 0x833   :  { %8301 = vmatprep.subr.mxu0 %v2692_v21 }
 0x834   :  { %8302 = vmatpush3.msra.mxu0 %v2692_v21 }
 0x835   :  { %8303 = vmatprep.subr.mxu0 %v2691_v5 }
 0x836   :  { %8304 = vmatpush3.msra.mxu0 %v2691_v5 }
 0x837   :  { %8305 = vmatprep.subr.mxu0 %v2690_v42 }
 0x838   :  { %8306 = vmatpush3.msra.mxu0 %v2690_v42 }
 0x839   :  { %8307 = vmatprep.subr.mxu0 %v2689_v12 }
 0x83a   :  { %8308 = vmatpush3.msra.mxu0 %v2689_v12  ;;  %v7060_v12 = vld [vmem:[%s11442_s8 + $0x28] sm:$0xff] }
 0x83b   :  { %8310 = vmatmul.mubr.msk.f32.vlgmr.msra.gmra.mxu0 %vm620_vm1, %v9880_v3  ;;  %8341 = vmatprep.subr.mxu0 %v7062_v34 }
 0x83c   :  { %8312 = vmatprep.mubr.msk.f32.mxu0 %vm620_vm1, %v9882_v13  ;;  %8342 = vmatpush3.msra.mxu0 %v7062_v34  ;;  %v7059_v34 = vld [vmem:[%s11442_s8 + $0x20] sm:$0xff] }
 0x83d   :  { %8343 = vmatprep.subr.mxu0 %v7061_v10 }
 0x83e   :  { %8344 = vmatpush3.msra.mxu0 %v7061_v10 }
 0x83f   :  { %8313 = vmatmul.mubr.msk.f32.gmra.mxu0 %vm620_vm1, %v9884_v19  ;;  %8345 = vmatprep.subr.mxu0 %v7060_v12 }
 0x840   :  { %v7557_v14 = vpop.f32.mrf.mxu0  ;;  %v7613_v28 = vpop.f32.mrf.mxu1  ;;  %8315 = vmatprep.mubr.msk.f32.mxu0 %vm620_vm1, %v9886_v39  ;;  %8346 = vmatpush3.msra.mxu0 %v7060_v12 }
 0x841   :  { %8347 = vmatprep.subr.mxu0 %v7059_v34 }
 0x842   :  { %v7558_v45 = vpop.f32.mrf.mxu0  ;;  %v7614_v16 = vpop.f32.mrf.mxu1  ;;  %8348 = vmatpush3.msra.mxu0 %v7059_v34 }
 0x843   :  { %8316 = vmatmul.mubr.msk.f32.gmra.mxu0 %vm620_vm1, %v9888_v46  ;;  %v7615_v21 = vadd.f32 %v7614_v16, %v7613_v28  ;;  %v7559_v5 = vadd.f32 %v7558_v45, %v7557_v14 }
 0x844   :  { %v7560_v17 = vpop.f32.mrf.mxu0  ;;  %v7616_v60 = vpop.f32.mrf.mxu1  ;;  %8318 = vmatprep.mubr.msk.f32.mxu0 %vm620_vm1, %v9900_v51 }
 0x846   :  { %v7561_v22 = vpop.f32.mrf.mxu0  ;;  %v7617_v20 = vpop.f32.mrf.mxu1 }
 0x847   :  { %8319 = vmatmul.mubr.msk.f32.gmra.mxu0 %vm620_vm1, %v9910_v58  ;;  %v7562_v9 = vadd.f32 %v7561_v22, %v7560_v17  ;;  %v7618_v11 = vadd.f32 %v7617_v20, %v7616_v60 }
 0x848   :  { %v7563_v8 = vpop.f32.mrf.mxu0  ;;  %v7619_v41 = vpop.f32.mrf.mxu1 }
 0x849   :  { %v2799_v6 = vadd.f32 %v7615_v21, %v7562_v9  ;;  %v2798_v42 = vsub.f32 %v7559_v5, %v7618_v11  ;;  %v7081_v9 = vld [vmem:[%s11444_s10 + $0x20] sm:$0xff] }
 0x84a   :  { %v7564_v62 = vpop.f32.mrf.mxu0  ;;  %v7620_v48 = vpop.f32.mrf.mxu1 }
 0x84b   :  { %v7621_v23 = vadd.f32 %v7620_v48, %v7619_v41  ;;  %v7565_v32 = vadd.f32 %v7564_v62, %v7563_v8 }
 0x84c   :  { %v7566_v50 = vpop.f32.mrf.mxu0  ;;  %v7622_v27 = vpop.f32.mrf.mxu1 }
 0x84e   :  { %v7567_v55 = vpop.f32.mrf.mxu0  ;;  %v7623_v56 = vpop.f32.mrf.mxu1 }
 0x84f   :  { %v7568_v1 = vadd.f32 %v7567_v55, %v7566_v50  ;;  %v7624_v40 = vadd.f32 %v7623_v56, %v7622_v27  ;;  %v9111_v56 = vld [vmem:[#allocation3] sm:$0xff] }
 0x851   :  { %v2801_v53 = vadd.f32 %v7621_v23, %v7568_v1  ;;  %v2800_v38 = vsub.f32 %v7565_v32, %v7624_v40  ;;  %v7084_v23 = vld [vmem:[%s11444_s10 + $0x38] sm:$0xff]  ;;  %v7083_v1 = vld [vmem:[%s11444_s10 + $0x30] sm:$0xff]  ;;  %v7082_v40 = vld [vmem:[%s11444_s10 + $0x28] sm:$0xff] }
 0x852   :  { %v10402_v32 = vld [vmem:[%s11443_s9 + $0x1] ss:$0 sm:$0xff] }
 0x853   :  { %8321 = vmatprep.subr.mxu1 %v2801_v53 }
 0x854   :  { %8322 = vmatpush3.msra.mxu1 %v2801_v53 }
 0x855   :  { %8323 = vmatprep.subr.mxu1 %v2800_v38 }
 0x856   :  { %8324 = vmatpush3.msra.mxu1 %v2800_v38 }
 0x857   :  { %8325 = vmatprep.subr.mxu1 %v2799_v6 }
 0x858   :  { %8326 = vmatpush3.msra.mxu1 %v2799_v6 }
 0x859   :  { %8327 = vmatprep.subr.mxu1 %v2798_v42 }
 0x85a   :  { %8328 = vmatpush3.msra.mxu1 %v2798_v42 }
 0x85b   :  { %8330 = vmatmul.mubr.msk.f32.vlgmr.msra.gmra.mxu1 %vm620_vm1, %v9904_v25  ;;  %8373 = vmatprep.subr.mxu1 %v7084_v23 }
 0x85c   :  { %8332 = vmatprep.mubr.msk.f32.mxu1 %vm620_vm1, %v9914_v63  ;;  %8374 = vmatpush3.msra.mxu1 %v7084_v23 }
 0x85d   :  { %8375 = vmatprep.subr.mxu1 %v7083_v1 }
 0x85e   :  { %8376 = vmatpush3.msra.mxu1 %v7083_v1 }
 0x85f   :  { %8333 = vmatmul.mubr.msk.f32.gmra.mxu1 %vm620_vm1, %v9918_v15  ;;  %8377 = vmatprep.subr.mxu1 %v7082_v40 }
 0x860   :  { %8335 = vmatprep.mubr.msk.f32.mxu1 %vm620_vm1, %v9920_v24  ;;  %8378 = vmatpush3.msra.mxu1 %v7082_v40 }
 0x861   :  { %8379 = vmatprep.subr.mxu1 %v7081_v9 }
 0x862   :  { %8380 = vmatpush3.msra.mxu1 %v7081_v9 }
 0x863   :  { %8336 = vmatmul.mubr.msk.f32.gmra.mxu1 %vm620_vm1, %v9922_v43 }
 0x864   :  { %8338 = vmatprep.mubr.msk.f32.mxu1 %vm620_vm1, %v9928_v30 }
 0x867   :  { %8339 = vmatmul.mubr.msk.f32.gmra.mxu1 %vm620_vm1, %v9936_v44 }
 0x8fb   :  { %v8311_v10 = vpop.f32.mrf.mxu0 }
 0x8fd   :  { %v2759_v14 = vpop.f32.mrf.mxu0 }
 0x8fe   :  { %8349 = vmatprep.mubr.msk.f32.mxu0 %vm620_vm1, %v2759_v14 }
 0x8ff   :  { %v8314_v28 = vpop.f32.mrf.mxu0  ;;  %8350 = vmatmul.mubr.msk.f32.vlgmr.msra.gmra.mxu0 %vm620_vm1, %v8311_v10 }
 0x901   :  { %v2769_v45 = vpop.f32.mrf.mxu0 }
 0x902   :  { %8352 = vmatprep.mubr.msk.f32.mxu0 %vm620_vm1, %v2769_v45 }
 0x903   :  { %v8317_v16 = vpop.f32.mrf.mxu0  ;;  %8353 = vmatmul.mubr.msk.f32.gmra.mxu0 %vm620_vm1, %v8314_v28 }
 0x905   :  { %v2779_v17 = vpop.f32.mrf.mxu0 }
 0x906   :  { %8355 = vmatprep.mubr.msk.f32.mxu0 %vm620_vm1, %v2779_v17 }
 0x907   :  { %v8320_v60 = vpop.f32.mrf.mxu0  ;;  %8356 = vmatmul.mubr.msk.f32.gmra.mxu0 %vm620_vm1, %v8317_v16 }
 0x909   :  { %v2789_v22 = vpop.f32.mrf.mxu0 }
 0x90a   :  { %8358 = vmatprep.mubr.msk.f32.mxu0 %vm620_vm1, %v2789_v22 }
 0x90b   :  { %8359 = vmatmul.mubr.msk.f32.gmra.mxu0 %vm620_vm1, %v8320_v60 }
 0x91b   :  { %v8331_v20 = vpop.f32.mrf.mxu1 }
 0x91d   :  { %v2868_v8 = vpop.f32.mrf.mxu1 }
 0x91e   :  { %8361 = vmatprep.mubr.msk.f32.mxu0 %vm620_vm1, %v2868_v8 }
 0x91f   :  { %v8334_v41 = vpop.f32.mrf.mxu1  ;;  %8362 = vmatmul.mubr.msk.f32.gmra.mxu0 %vm620_vm1, %v8331_v20 }
 0x921   :  { %v2878_v62 = vpop.f32.mrf.mxu1 }
 0x922   :  { %8364 = vmatprep.mubr.msk.f32.mxu0 %vm620_vm1, %v2878_v62 }
 0x923   :  { %v8337_v48 = vpop.f32.mrf.mxu1  ;;  %8365 = vmatmul.mubr.msk.f32.gmra.mxu0 %vm620_vm1, %v8334_v41 }
 0x925   :  { %v2888_v50 = vpop.f32.mrf.mxu1 }
 0x926   :  { %8367 = vmatprep.mubr.msk.f32.mxu0 %vm620_vm1, %v2888_v50 }
 0x927   :  { %v8340_v27 = vpop.f32.mrf.mxu1  ;;  %8368 = vmatmul.mubr.msk.f32.gmra.mxu0 %vm620_vm1, %v8337_v48 }
 0x929   :  { %v2898_v55 = vpop.f32.mrf.mxu1 }
 0x92a   :  { %8370 = vmatprep.mubr.msk.f32.mxu0 %vm620_vm1, %v2898_v55 }
 0x92b   :  { %8371 = vmatmul.mubr.msk.f32.gmra.mxu0 %vm620_vm1, %v8340_v27 }
 0x92c   :  { %8421 = vmatprep.mubr.msk.f32.mxu0 %vm420_vm0, %v9111_v56 }
 0x9bf   :  { %v8351_v53 = vpop.f32.mrf.mxu0 }
 0x9c0   :  { %v3040_v21 = vadd.f32 %v8351_v53, %v10402_v32 }
 0x9c1   :  { %v3034_v11 = vpop.f32.mrf.mxu0 }
 0x9c2   :  { %v3130_v38 = vmul.f32 0.70710677, %v3040_v21  ;;  %v3035_v5 = vadd.f32 %v10402_v32, %v3034_v11  ;;  %v3114_v53 = vmul.f32 0.5, %v3040_v21 }
 0x9c3   :  { %v8354_v6 = vpop.f32.mrf.mxu0 }
 0x9c4   :  { %8815 = verf.f32 %v3130_v38  ;;  %v3129_v42 = vmul.f32 0.70710677, %v3035_v5  ;;  %v3050_v12 = vadd.f32 %v8354_v6, %v10402_v32  ;;  %v3113_v1 = vmul.f32 0.5, %v3035_v5 }
 0x9c5   :  { %v3044_v34 = vpop.f32.mrf.mxu0 }
 0x9c6   :  { %8817 = verf.f32 %v3129_v42  ;;  %v3132_v10 = vmul.f32 0.70710677, %v3050_v12  ;;  %v3045_v14 = vadd.f32 %v10402_v32, %v3044_v34 }
 0x9c7   :  { %v8357_v28 = vpop.f32.mrf.mxu0 }
 0x9c8   :  { %8819 = verf.f32 %v3132_v10  ;;  %v3131_v45 = vmul.f32 0.70710677, %v3045_v14  ;;  %v3060_v16 = vadd.f32 %v8357_v28, %v10402_v32  ;;  %v3115_v34 = vmul.f32 0.5, %v3045_v14 }
 0x9c9   :  { %v3054_v17 = vpop.f32.mrf.mxu0 }
 0x9ca   :  { %8821 = verf.f32 %v3131_v45  ;;  %v3134_v60 = vmul.f32 0.70710677, %v3060_v16  ;;  %v3055_v22 = vadd.f32 %v10402_v32, %v3054_v17  ;;  %v3116_v45 = vmul.f32 0.5, %v3050_v12 }
 0x9cb   :  { %v8360_v20 = vpop.f32.mrf.mxu0 }
 0x9cc   :  { %8823 = verf.f32 %v3134_v60  ;;  %v3133_v8 = vmul.f32 0.70710677, %v3055_v22  ;;  %v3070_v41 = vadd.f32 %v8360_v20, %v10402_v32  ;;  %v3117_v5 = vmul.f32 0.5, %v3055_v22 }
 0x9cd   :  { %v3064_v62 = vpop.f32.mrf.mxu0 }
 0x9ce   :  { %8825 = verf.f32 %v3133_v8  ;;  %v3136_v48 = vmul.f32 0.70710677, %v3070_v41  ;;  %v3065_v50 = vadd.f32 %v10402_v32, %v3064_v62  ;;  %v3120_v22 = vmul.f32 0.5, %v3070_v41 }
 0x9d0   :  { %8827 = verf.f32 %v3136_v48  ;;  %v3135_v27 = vmul.f32 0.70710677, %v3065_v50  ;;  %v3118_v48 = vmul.f32 0.5, %v3060_v16 }
 0x9d1   :  { %v8816_v55 = vpop.eup %8815 }
 0x9d2   :  { %8829 = verf.f32 %v3135_v27  ;;  %v3162_v23 = vadd.f32 1.0, %v8816_v55 }
 0x9d3   :  { %v8818_v56 = vpop.eup %8817 }
 0x9d4   :  { %v3161_v40 = vadd.f32 1.0, %v8818_v56  ;;  %v3178_v6 = vmul.f32 %v3162_v23, %v3114_v53 }
 0x9d5   :  { %v8820_v9 = vpop.eup %8819 }
 0x9d6   :  { %v3177_v11 = vmul.f32 %v3161_v40, %v3113_v1  ;;  %v3164_v42 = vadd.f32 1.0, %v8820_v9  ;;  %v3119_v1 = vmul.f32 0.5, %v3065_v50 }
 0x9d7   :  { %v8822_v38 = vpop.eup %8821 }
 0x9d8   :  { %v3163_v10 = vadd.f32 1.0, %v8822_v38  ;;  %8381 = vmatprep.mubr.msk.f32.mxu1 %vm620_vm1, %v3177_v11  ;;  %v3180_v20 = vmul.f32 %v3164_v42, %v3116_v45 }
 0x9d9   :  { %v8824_v28 = vpop.eup %8823  ;;  %8382 = vmatmul.mubr.msk.f32.vlgmr.msra.gmra.mxu1 %vm620_vm1, %v3178_v6 }
 0x9da   :  { %v3179_v17 = vmul.f32 %v3163_v10, %v3115_v34  ;;  %v3166_v8 = vadd.f32 1.0, %v8824_v28 }
 0x9db   :  { %v8826_v60 = vpop.eup %8825 }
 0x9dc   :  { %v3165_v62 = vadd.f32 1.0, %v8826_v60  ;;  %8384 = vmatprep.mubr.msk.f32.mxu1 %vm620_vm1, %v3179_v17  ;;  %v3182_v56 = vmul.f32 %v3166_v8, %v3118_v48 }
 0x9dd   :  { %v8828_v21 = vpop.eup %8827  ;;  %8385 = vmatmul.mubr.msk.f32.gmra.mxu1 %vm620_vm1, %v3180_v20 }
 0x9de   :  { %v3181_v14 = vmul.f32 %v3165_v62, %v3117_v5  ;;  %v3168_v23 = vadd.f32 1.0, %v8828_v21 }
 0x9df   :  { %v8363_v27 = vpop.f32.mrf.mxu0  ;;  %v8830_v55 = vpop.eup %8829 }
 0x9e0   :  { %v3080_v12 = vadd.f32 %v8363_v27, %v10402_v32  ;;  %v3167_v40 = vadd.f32 1.0, %v8830_v55  ;;  %8387 = vmatprep.mubr.msk.f32.mxu1 %vm620_vm1, %v3181_v14  ;;  %v3184_v6 = vmul.f32 %v3168_v23, %v3120_v22 }
 0x9e1   :  { %v3074_v9 = vpop.f32.mrf.mxu0  ;;  %8388 = vmatmul.mubr.msk.f32.gmra.mxu1 %vm620_vm1, %v3182_v56 }
 0x9e2   :  { %v3138_v53 = vmul.f32 0.70710677, %v3080_v12  ;;  %v3075_v11 = vadd.f32 %v10402_v32, %v3074_v9  ;;  %v3183_v16 = vmul.f32 %v3167_v40, %v3119_v1 }
 0x9e3   :  { %v8366_v38 = vpop.f32.mrf.mxu0 }
 0x9e4   :  { %8831 = verf.f32 %v3138_v53  ;;  %v3137_v42 = vmul.f32 0.70710677, %v3075_v11  ;;  %v3090_v34 = vadd.f32 %v8366_v38, %v10402_v32  ;;  %8390 = vmatprep.mubr.msk.f32.mxu1 %vm620_vm1, %v3183_v16  ;;  %v3121_v40 = vmul.f32 0.5, %v3075_v11 }
 0x9e5   :  { %v3084_v50 = vpop.f32.mrf.mxu0  ;;  %8391 = vmatmul.mubr.msk.f32.gmra.mxu1 %vm620_vm1, %v3184_v6  ;;  %v3122_v53 = vmul.f32 0.5, %v3080_v12 }
 0x9e6   :  { %8833 = verf.f32 %v3137_v42  ;;  %v3140_v10 = vmul.f32 0.70710677, %v3090_v34  ;;  %v3085_v28 = vadd.f32 %v10402_v32, %v3084_v50 }
 0x9e7   :  { %v8369_v41 = vpop.f32.mrf.mxu0 }
 0x9e8   :  { %8835 = verf.f32 %v3140_v10  ;;  %v3139_v45 = vmul.f32 0.70710677, %v3085_v28  ;;  %v3100_v17 = vadd.f32 %v8369_v41, %v10402_v32  ;;  %v3123_v50 = vmul.f32 0.5, %v3085_v28 }
 0x9e9   :  { %v3094_v60 = vpop.f32.mrf.mxu0 }
 0x9ea   :  { %8837 = verf.f32 %v3139_v45  ;;  %v3142_v20 = vmul.f32 0.70710677, %v3100_v17  ;;  %v3095_v8 = vadd.f32 %v10402_v32, %v3094_v60 }
 0x9eb   :  { %v8372_v5 = vpop.f32.mrf.mxu0 }
 0x9ec   :  { %8839 = verf.f32 %v3142_v20  ;;  %v3141_v62 = vmul.f32 0.70710677, %v3095_v8  ;;  %v3110_v21 = vadd.f32 %v8372_v5, %v10402_v32  ;;  %v3125_v11 = vmul.f32 0.5, %v3095_v8 }
 0x9ed   :  { %v3104_v48 = vpop.f32.mrf.mxu0 }
 0x9ee   :  { %8841 = verf.f32 %v3141_v62  ;;  %v3144_v14 = vmul.f32 0.70710677, %v3110_v21  ;;  %v3105_v27 = vadd.f32 %v10402_v32, %v3104_v48  ;;  %v3124_v32 = vmul.f32 0.5, %v3090_v34 }
 0x9ef   :  { %v3126_v48 = vmul.f32 0.5, %v3100_v17  ;;  %v9112_v17 = vld [vmem:[#allocation3 + $0x20] sm:$0xff] }
 0x9f0   :  { %8843 = verf.f32 %v3144_v14  ;;  %v3143_v55 = vmul.f32 0.70710677, %v3105_v27 }
 0x9f1   :  { %v8832_v56 = vpop.eup %8831 }
 0x9f2   :  { %8845 = verf.f32 %v3143_v55  ;;  %v3170_v1 = vadd.f32 1.0, %v8832_v56 }
 0x9f3   :  { %v8834_v23 = vpop.eup %8833 }
 0x9f4   :  { %v3169_v9 = vadd.f32 1.0, %v8834_v23  ;;  %v3186_v6 = vmul.f32 %v3170_v1, %v3122_v53  ;;  %v3127_v23 = vmul.f32 0.5, %v3105_v27  ;;  %v3128_v1 = vmul.f32 0.5, %v3110_v21  ;;  %v10440_v27 = vld [vmem:[%s11445_s11 + $0x1] ss:$0 sm:$0xff] }
 0x9f5   :  { %v8836_v22 = vpop.eup %8835 }
 0x9f6   :  { %v3185_v16 = vmul.f32 %v3169_v9, %v3121_v40  ;;  %v3172_v42 = vadd.f32 1.0, %v8836_v22 }
 0x9f7   :  { %v8838_v38 = vpop.eup %8837 }
 0x9f8   :  { %v3171_v10 = vadd.f32 1.0, %v8838_v38  ;;  %8393 = vmatprep.mubr.msk.f32.mxu1 %vm620_vm1, %v3185_v16  ;;  %v3188_v20 = vmul.f32 %v3172_v42, %v3124_v32 }
 0x9f9   :  { %v8840_v41 = vpop.eup %8839  ;;  %8394 = vmatmul.mubr.msk.f32.gmra.mxu1 %vm620_vm1, %v3186_v6 }
 0x9fa   :  { %v3187_v45 = vmul.f32 %v3171_v10, %v3123_v50  ;;  %v3174_v5 = vadd.f32 1.0, %v8840_v41 }
 0x9fb   :  { %v8842_v60 = vpop.eup %8841 }
 0x9fc   :  { %v3173_v62 = vadd.f32 1.0, %v8842_v60  ;;  %8396 = vmatprep.mubr.msk.f32.mxu1 %vm620_vm1, %v3187_v45  ;;  %v3190_v55 = vmul.f32 %v3174_v5, %v3126_v48 }
 0x9fd   :  { %v8844_v12 = vpop.eup %8843  ;;  %8397 = vmatmul.mubr.msk.f32.gmra.mxu1 %vm620_vm1, %v3188_v20 }
 0x9fe   :  { %v3189_v28 = vmul.f32 %v3173_v62, %v3125_v11  ;;  %v3176_v56 = vadd.f32 1.0, %v8844_v12 }
 0x9ff   :  { %v8846_v14 = vpop.eup %8845 }
 0xa00   :  { %v3175_v34 = vadd.f32 1.0, %v8846_v14  ;;  %8399 = vmatprep.mubr.msk.f32.mxu1 %vm620_vm1, %v3189_v28  ;;  %v3192_v8 = vmul.f32 %v3176_v56, %v3128_v1 }
 0xa01   :  { %8400 = vmatmul.mubr.msk.f32.gmra.mxu1 %vm620_vm1, %v3190_v55 }
 0xa02   :  { %v3191_v40 = vmul.f32 %v3175_v34, %v3127_v23 }
 0xa04   :  { %8402 = vmatprep.mubr.msk.f32.mxu1 %vm620_vm1, %v3191_v40 }
 0xa05   :  { %8403 = vmatmul.mubr.msk.f32.gmra.mxu1 %vm620_vm1, %v3192_v8 }
 0xa06   :  { %8443 = vmatprep.mubr.msk.f32.mxu1 %vm420_vm0, %v9112_v17 }
 0xa99   :  { %v8383_v9 = vpop.f32.mrf.mxu1 }
 0xa9a   :  { %v3326_v11 = vadd.f32 %v8383_v9, %v10440_v27 }
 0xa9b   :  { %v3320_v22 = vpop.f32.mrf.mxu1 }
 0xa9c   :  { %v3321_v48 = vadd.f32 %v10440_v27, %v3320_v22  ;;  %v3416_v55 = vmul.f32 0.70710677, %v3326_v11 }
 0xa9d   :  { %v8386_v53 = vpop.f32.mrf.mxu1 }
 0xa9e   :  { %v3336_v6 = vadd.f32 %v8386_v53, %v10440_v27  ;;  %v3415_v56 = vmul.f32 0.70710677, %v3321_v48 }
 0xa9f   :  { %v3330_v16 = vpop.f32.mrf.mxu1 }
 0xaa0   :  { %v3331_v32 = vadd.f32 %v10440_v27, %v3330_v16  ;;  %v3418_v20 = vmul.f32 0.70710677, %v3336_v6 }
 0xaa1   :  { %v8389_v21 = vpop.f32.mrf.mxu1 }
 0xaa2   :  { %v3346_v38 = vadd.f32 %v8389_v21, %v10440_v27  ;;  %v3417_v28 = vmul.f32 0.70710677, %v3331_v32 }
 0xaa3   :  { %v3340_v42 = vpop.f32.mrf.mxu1 }
 0xaa4   :  { %v3420_v50 = vmul.f32 0.70710677, %v3346_v38  ;;  %v3341_v10 = vadd.f32 %v10440_v27, %v3340_v42  ;;  %v3404_v22 = vmul.f32 0.5, %v3346_v38 }
 0xaa5   :  { %v8392_v41 = vpop.f32.mrf.mxu1 }
 0xaa6   :  { %v3419_v45 = vmul.f32 0.70710677, %v3341_v10  ;;  %v3356_v60 = vadd.f32 %v8392_v41, %v10440_v27  ;;  %8847 = verf.f32 %v3420_v50 }
 0xaa7   :  { %v3350_v5 = vpop.f32.mrf.mxu1 }
 0xaa8   :  { %v3422_v62 = vmul.f32 0.70710677, %v3356_v60  ;;  %v3351_v12 = vadd.f32 %v10440_v27, %v3350_v5  ;;  %8849 = verf.f32 %v3419_v45  ;;  %v3406_v17 = vmul.f32 0.5, %v3356_v60 }
 0xaa9   :  { %v3403_v5 = vmul.f32 0.5, %v3341_v10  ;;  %v3402_v60 = vmul.f32 0.5, %v3336_v6  ;;  %v3400_v6 = vmul.f32 0.5, %v3326_v11 }
 0xaaa   :  { %8851 = verf.f32 %v3422_v62  ;;  %v3421_v14 = vmul.f32 0.70710677, %v3351_v12  ;;  %v3405_v50 = vmul.f32 0.5, %v3351_v12 }
 0xaab   :  { %8853 = verf.f32 %v3418_v20 }
 0xaac   :  { %8855 = verf.f32 %v3421_v14 }
 0xaad   :  { %8857 = verf.f32 %v3417_v28 }
 0xaae   :  { %8859 = verf.f32 %v3416_v55 }
 0xaaf   :  { %8861 = verf.f32 %v3415_v56 }
 0xab3   :  { %v8848_v23 = vpop.eup %8847 }
 0xab4   :  { %v3452_v8 = vadd.f32 1.0, %v8848_v23 }
 0xab5   :  { %v8850_v34 = vpop.eup %8849 }
 0xab6   :  { %v3451_v21 = vadd.f32 1.0, %v8850_v34  ;;  %v3468_v28 = vmul.f32 %v3452_v8, %v3404_v22  ;;  %v3401_v8 = vmul.f32 0.5, %v3331_v32 }
 0xab7   :  { %v8852_v1 = vpop.eup %8851 }
 0xab8   :  { %v8854_v40 = vpop.eup %8853  ;;  %v3454_v9 = vadd.f32 1.0, %v8852_v1  ;;  %v3467_v44 = vmul.f32 %v3451_v21, %v3403_v5 }
 0xab9   :  { %v8395_v53 = vpop.f32.mrf.mxu1  ;;  %v8856_v16 = vpop.eup %8855  ;;  %v3450_v62 = vadd.f32 1.0, %v8854_v40 }
 0xaba   :  { %v3470_v42 = vmul.f32 %v3454_v9, %v3406_v17  ;;  %v3453_v41 = vadd.f32 1.0, %v8856_v16  ;;  %v8858_v20 = vpop.eup %8857  ;;  %v10460_v17 = vadd.f32 %v3468_v28, %v10038_v59  ;;  %v10471_v21 = vadd.f32 %v3467_v44, %v10049_v4 }
 0xabb   :  { %v3360_v45 = vpop.f32.mrf.mxu1  ;;  %v8860_v23 = vpop.eup %8859  ;;  %v3449_v1 = vadd.f32 1.0, %v8858_v20  ;;  %v3466_v40 = vmul.f32 %v3450_v62, %v3402_v60 }
 0xabc   :  { %v3469_v14 = vmul.f32 %v3453_v41, %v3405_v50  ;;  %v10451_v56 = vadd.f32 %v3470_v42, %v10029_v18  ;;  %v8862_v34 = vpop.eup %8861  ;;  %v3448_v10 = vadd.f32 1.0, %v8860_v23  ;;  %v3399_v50 = vmul.f32 0.5, %v3321_v48 }
 0xabd   :  { %v8398_v55 = vpop.f32.mrf.mxu1  ;;  %v3465_v16 = vmul.f32 %v3449_v1, %v3401_v8  ;;  %v10480_v20 = vadd.f32 %v3466_v40, %v10058_v7  ;;  %v10494_v7 = vadd.f32 %v8395_v53, %v10440_v27  ;;  %v10503_v1 = vadd.f32 %v10440_v27, %v3360_v45  ;;  %v9114_v45 = vld [vmem:[#allocation6 + $0x38] sm:$0xff]  ;;  %v9117_v40 = vld [vmem:[#allocation6 + $0x28] sm:$0xff]  ;;  %v9118_v8 = vld [vmem:[#allocation6 + $0x20] sm:$0xff] }
 0xabe   :  { %8405 = vmatprep.subr.mxu0 %v10451_v56  ;;  %v10455_v12 = vadd.f32 %v3469_v14, %v10033_v36  ;;  %v3447_v36 = vadd.f32 1.0, %v8862_v34  ;;  %v10467_v22 = vadd.f32 %v8398_v55, %v10440_v27  ;;  %v3464_v42 = vmul.f32 %v3448_v10, %v3400_v6  ;;  %v9116_v10 = vld [vmem:[#allocation6 + $0x30] sm:$0xff]  ;;  %v9120_v6 = vld [vmem:[#allocation6 + $0x18] sm:$0xff] }
 0xabf   :  { %v3370_v38 = vpop.f32.mrf.mxu1  ;;  %8406 = vmatpush3.msra.mxu0 %v10451_v56  ;;  %v10491_v14 = vadd.f32 %v3465_v16, %v10069_v52  ;;  %v3424_v34 = vmul.f32 0.70710677, %v10494_v7 }
 0xac0   :  { %8407 = vmatprep.subr.mxu0 %v10455_v12  ;;  %v10483_v5 = vadd.f32 %v10440_v27, %v3370_v38  ;;  %v3463_v62 = vmul.f32 %v3447_v36, %v3399_v50  ;;  %v3426_v28 = vmul.f32 0.70710677, %v10467_v22  ;;  %v10500_v60 = vadd.f32 %v3464_v42, %v10078_v47  ;;  %v9121_v36 = vld [vmem:[#allocation6 + $0x10] sm:$0xff]  ;;  %v9123_v42 = vld [vmem:[#allocation6] sm:$0xff] }
 0xac1   :  { %v8401_v18 = vpop.f32.mrf.mxu1  ;;  %8408 = vmatpush3.msra.mxu0 %v10455_v12  ;;  %v3423_v47 = vmul.f32 0.70710677, %v10503_v1 }
 0xac2   :  { %v10463_v9 = vadd.f32 %v8401_v18, %v10440_v27  ;;  %8409 = vmatprep.subr.mxu0 %v10460_v17  ;;  %v3425_v52 = vmul.f32 0.70710677, %v10483_v5  ;;  %v10509_v38 = vadd.f32 %v3463_v62, %v10087_v57  ;;  %v9115_v57 = vld [vmem:[#allocation3 + $0x10] sm:$0xff]  ;;  %v9119_v18 = vld [vmem:[#allocation3 + $0x18] sm:$0xff] }
 0xac3   :  { %v3380_v32 = vpop.f32.mrf.mxu1  ;;  %8410 = vmatpush3.msra.mxu0 %v10460_v17 }
 0xac4   :  { %v3428_v59 = vmul.f32 0.70710677, %v10463_v9  ;;  %v10475_v11 = vadd.f32 %v10440_v27, %v3380_v32  ;;  %8411 = vmatprep.subr.mxu0 %v10471_v21  ;;  %v9122_v32 = vld [vmem:[#allocation6 + $0x8] sm:$0xff] }
 0xac5   :  { %v8404_v41 = vpop.f32.mrf.mxu1  ;;  %8412 = vmatpush3.msra.mxu0 %v10471_v21 }
 0xac6   :  { %v3427_v44 = vmul.f32 0.70710677, %v10475_v11  ;;  %v3396_v4 = vadd.f32 %v8404_v41, %v10440_v27  ;;  %8413 = vmatprep.subr.mxu0 %v10480_v20  ;;  %8863 = verf.f32 %v3428_v59  ;;  %v10523_v41 = vld [vmem:[%s11441_s7 + $0xf8] sm:$0xff] }
 0xac7   :  { %v3390_v48 = vpop.f32.mrf.mxu1  ;;  %8414 = vmatpush3.msra.mxu0 %v10480_v20 }
 0xac8   :  { %v3430_v55 = vmul.f32 0.70710677, %v3396_v4  ;;  %v3391_v23 = vadd.f32 %v10440_v27, %v3390_v48  ;;  %8865 = verf.f32 %v3427_v44  ;;  %8415 = vmatprep.subr.mxu0 %v10491_v14  ;;  %v9113_v27 = vld [vmem:[#allocation3 + $0x8] sm:$0xff] }
 0xac9   :  { %8416 = vmatpush3.msra.mxu0 %v10491_v14 }
 0xaca   :  { %8867 = verf.f32 %v3430_v55  ;;  %v3429_v53 = vmul.f32 0.70710677, %v3391_v23  ;;  %8417 = vmatprep.subr.mxu0 %v10500_v60 }
 0xacb   :  { %8869 = verf.f32 %v3426_v28  ;;  %8418 = vmatpush3.msra.mxu0 %v10500_v60  ;;  %v3414_v28 = vmul.f32 0.5, %v3396_v4  ;;  %v3410_v4 = vmul.f32 0.5, %v10467_v22  ;;  %v3408_v22 = vmul.f32 0.5, %v10494_v7 }
 0xacc   :  { %8871 = verf.f32 %v3429_v53  ;;  %8419 = vmatprep.subr.mxu0 %v10509_v38 }
 0xacd   :  { %8873 = verf.f32 %v3425_v52  ;;  %8420 = vmatpush3.msra.mxu0 %v10509_v38  ;;  %v3412_v52 = vmul.f32 0.5, %v10463_v9 }
 0xace   :  { %8422 = vmatmul.mubr.msk.f32.vlgmr.msra.gmra.mxu0 %vm420_vm0, %v9113_v27  ;;  %3713 = vmatprep.subr.mxu0 %v9114_v45  ;;  %8875 = verf.f32 %v3424_v34 }
 0xacf   :  { %8424 = vmatprep.mubr.msk.f32.mxu0 %vm420_vm0, %v9115_v57  ;;  %3714 = vmatpush1.msra.mxu0 %v9116_v10  ;;  %8877 = verf.f32 %v3423_v47  ;;  %v3413_v47 = vmul.f32 0.5, %v3391_v23  ;;  %v3411_v57 = vmul.f32 0.5, %v10475_v11 }
 0xad0   :  { %3715 = vmatprep.subr.mxu0 %v9117_v40 }
 0xad1   :  { %3716 = vmatpush1.msra.mxu0 %v9118_v8 }
 0xad2   :  { %8425 = vmatmul.mubr.msk.f32.gmra.mxu0 %vm420_vm0, %v9119_v18  ;;  %3717 = vmatprep.subr.mxu0 %v9120_v6 }
 0xad3   :  { %3718 = vmatpush1.msra.mxu0 %v9121_v36  ;;  %3753 = vmatprep.mubr.f32.mxu0 %v11459_v33  ;;  %v8864_v16 = vpop.eup %8863 }
 0xad4   :  { %3719 = vmatprep.subr.mxu0 %v9122_v32  ;;  %v3460_v62 = vadd.f32 1.0, %v8864_v16 }
 0xad5   :  { %v8866_v59 = vpop.eup %8865  ;;  %3720 = vmatpush1.msra.mxu0 %v9123_v42 }
 0xad6   :  { %7713 = vmatprep.subr.mxu0 %v10523_v41  ;;  %v3459_v53 = vadd.f32 1.0, %v8866_v59  ;;  %v3476_v40 = vmul.f32 %v3460_v62, %v3412_v52  ;;  %v3409_v59 = vmul.f32 0.5, %v10483_v5  ;;  %v3407_v5 = vmul.f32 0.5, %v10503_v1  ;;  %v9126_v1 = vld [vmem:[#allocation8 + $0x38] sm:$0xff] }
 0xad7   :  { %v8868_v50 = vpop.eup %8867  ;;  %v9132_v52 = vld [vmem:[#allocation8 + $0x18] sm:$0xff] }
 0xad8   :  { %v8870_v44 = vpop.eup %8869  ;;  %v3462_v48 = vadd.f32 1.0, %v8868_v50  ;;  %v3475_v16 = vmul.f32 %v3459_v53, %v3411_v57  ;;  %v9133_v53 = vld [vmem:[#allocation8 + $0x10] sm:$0xff] }
 0xad9   :  { %v8872_v55 = vpop.eup %8871  ;;  %v3458_v10 = vadd.f32 1.0, %v8870_v44  ;;  %v9136_v57 = vld [vmem:[%s11441_s7 + $0x78] sm:$0xff] }
 0xada   :  { %v3478_v34 = vmul.f32 %v3462_v48, %v3414_v28  ;;  %v3461_v27 = vadd.f32 1.0, %v8872_v55  ;;  %v8874_v45 = vpop.eup %8873  ;;  %v9128_v28 = vld [vmem:[#allocation8 + $0x30] sm:$0xff]  ;;  %v9129_v48 = vld [vmem:[#allocation8 + $0x28] sm:$0xff]  ;;  %v9131_v55 = vld [vmem:[#allocation3 + $0x38] sm:$0xff] }
 0xadb   :  { %v8876_v6 = vpop.eup %8875  ;;  %v3457_v36 = vadd.f32 1.0, %v8874_v45  ;;  %v3474_v32 = vmul.f32 %v3458_v10, %v3410_v4  ;;  %v9140_v4 = vld [vmem:[%s11441_s7 + $0x68] sm:$0xff] }
 0xadc   :  { %v3477_v8 = vmul.f32 %v3461_v27, %v3413_v47  ;;  %v10529_v18 = vadd.f32 %v3478_v34, %v10107_v35  ;;  %v8878_v23 = vpop.eup %8877  ;;  %v3456_v11 = vadd.f32 1.0, %v8876_v6  ;;  %v10540_v35 = vadd.f32 %v3476_v40, %v10118_v37  ;;  %v9134_v34 = vld [vmem:[#allocation8 + $0x8] sm:$0xff]  ;;  %v9135_v47 = vld [vmem:[#allocation8] sm:$0xff] }
 0xadd   :  { %v3455_v42 = vadd.f32 1.0, %v8878_v23  ;;  %v3473_v50 = vmul.f32 %v3457_v36, %v3409_v59  ;;  %v10552_v37 = vadd.f32 %v3474_v32, %v10130_v49  ;;  %v9138_v40 = vld [vmem:[%s11441_s7 + $0x70] sm:$0xff]  ;;  %v9139_v6 = vld [vmem:[%s11441_s7 + $0xe8] sm:$0xff]  ;;  %v9141_v36 = vld [vmem:[%s11441_s7 + $0xe0] sm:$0xff] }
 0xade   :  { %8427 = vmatprep.subr.mxu1 %v10529_v18  ;;  %v10534_v9 = vadd.f32 %v3477_v8, %v10112_v26  ;;  %v10546_v26 = vadd.f32 %v3475_v16, %v10124_v29  ;;  %v3472_v44 = vmul.f32 %v3456_v11, %v3408_v22  ;;  %v9142_v16 = vld [vmem:[%s11441_s7 + $0x60] sm:$0xff]  ;;  %v9143_v23 = vld [vmem:[%s11441_s7 + $0xd8] sm:$0xff]  ;;  %v9145_v32 = vld [vmem:[%s11441_s7 + $0xd0] sm:$0xff] }
 0xadf   :  { %8428 = vmatpush3.msra.mxu1 %v10529_v18  ;;  %v3471_v7 = vmul.f32 %v3455_v42, %v3407_v5  ;;  %v10557_v62 = vadd.f32 %v3473_v50, %v10135_v31  ;;  %v9125_v31 = vld [vmem:[#allocation3 + $0x28] sm:$0xff]  ;;  %v9144_v11 = vld [vmem:[%s11441_s7 + $0x58] sm:$0xff]  ;;  %v9149_v50 = vld [vmem:[%s11441_s7 + $0xc0] sm:$0xff] }
 0xae0   :  { %8429 = vmatprep.subr.mxu1 %v10534_v9  ;;  %v10562_v29 = vadd.f32 %v3472_v44, %v10140_v54  ;;  %v9127_v54 = vld [vmem:[#allocation3 + $0x30] sm:$0xff]  ;;  %v9147_v22 = vld [vmem:[%s11441_s7 + $0xc8] sm:$0xff]  ;;  %v9150_v44 = vld [vmem:[%s11441_s7 + $0x40] sm:$0xff] }
 0xae1   :  { %8430 = vmatpush3.msra.mxu1 %v10534_v9  ;;  %v10567_v49 = vadd.f32 %v3471_v7, %v10145_v61  ;;  %v9130_v61 = vld [vmem:[#allocation8 + $0x20] sm:$0xff]  ;;  %v9146_v59 = vld [vmem:[%s11441_s7 + $0x50] sm:$0xff]  ;;  %v9151_v5 = vld [vmem:[%s11441_s7 + $0xb8] sm:$0xff] }
 0xae2   :  { %8431 = vmatprep.subr.mxu1 %v10540_v35  ;;  %v9148_v42 = vld [vmem:[%s11441_s7 + $0x48] sm:$0xff]  ;;  %v9152_v7 = vld [vmem:[%s11441_s7 + $0x38] sm:$0xff] }
 0xae3   :  { %8432 = vmatpush3.msra.mxu1 %v10540_v35 }
 0xae4   :  { %8433 = vmatprep.subr.mxu1 %v10546_v26 }
 0xae5   :  { %8434 = vmatpush3.msra.mxu1 %v10546_v26 }
 0xae6   :  { %8435 = vmatprep.subr.mxu1 %v10552_v37 }
 0xae7   :  { %8436 = vmatpush3.msra.mxu1 %v10552_v37 }
 0xae8   :  { %8437 = vmatprep.subr.mxu1 %v10557_v62 }
 0xae9   :  { %8438 = vmatpush3.msra.mxu1 %v10557_v62 }
 0xaea   :  { %8439 = vmatprep.subr.mxu1 %v10562_v29 }
 0xaeb   :  { %8440 = vmatpush3.msra.mxu1 %v10562_v29 }
 0xaec   :  { %8441 = vmatprep.subr.mxu1 %v10567_v49 }
 0xaed   :  { %8442 = vmatpush3.msra.mxu1 %v10567_v49 }
 0xaee   :  { %8444 = vmatmul.mubr.msk.f32.vlgmr.msra.gmra.mxu1 %vm420_vm0, %v9125_v31  ;;  %3826 = vmatprep.subr.mxu1 %v9126_v1  ;;  %v9153_v31 = vld [vmem:[%s11441_s7 + $0xb0] sm:$0xff] }
 0xaef   :  { %8446 = vmatprep.mubr.msk.f32.mxu1 %vm420_vm0, %v9127_v54  ;;  %3827 = vmatpush1.msra.mxu1 %v9128_v28  ;;  %v9154_v1 = vld [vmem:[%s11441_s7 + $0x30] sm:$0xff]  ;;  %v9155_v54 = vld [vmem:[%s11441_s7 + $0xa8] sm:$0xff] }
 0xaf0   :  { %3828 = vmatprep.subr.mxu1 %v9129_v48  ;;  %v9156_v48 = vld [vmem:[%s11441_s7 + $0x28] sm:$0xff] }
 0xaf1   :  { %3829 = vmatpush1.msra.mxu1 %v9130_v61  ;;  %v9157_v61 = vld [vmem:[%s11441_s7 + $0xa0] sm:$0xff] }
 0xaf2   :  { %8447 = vmatmul.mubr.msk.f32.gmra.mxu1 %vm420_vm0, %v9131_v55  ;;  %3830 = vmatprep.subr.mxu1 %v9132_v52  ;;  %v9158_v52 = vld [vmem:[%s11441_s7 + $0x20] sm:$0xff] }
 0xaf3   :  { %3831 = vmatpush1.msra.mxu1 %v9133_v53  ;;  %3866 = vmatprep.mubr.f32.mxu1 %v11459_v33 }
 0xaf4   :  { %3832 = vmatprep.subr.mxu1 %v9134_v34  ;;  %v9159_v34 = vld [vmem:[%s11441_s7 + $0x98] sm:$0xff] }
 0xaf5   :  { %3833 = vmatpush1.msra.mxu1 %v9135_v47  ;;  %v9160_v47 = vld [vmem:[%s11441_s7 + $0x18] sm:$0xff] }
 0xaf6   :  { %7769 = vmatprep.subr.mxu1 %v10523_v41  ;;  %v9137_v41 = vld [vmem:[%s11441_s7 + $0xf0] sm:$0xff] }
 0xb8e   :  { %v8423_v27 = vpop.f32.mrf.mxu0 }
 0xb90   :  { %v3561_v45 = vpop.f32.mrf.mxu0 }
 0xb91   :  { %7111 = vmatmul.mubr.msk.f32.vlgmr.msra.gmra.mxu0 %vm620_vm1, %v3561_v45  ;;  %7119 = vmatmul.mubr.msk.f32.vlgmr.msra.gmra.mxu1 %vm620_vm1, %v3561_v45  ;;  %v9161_v45 = vld [vmem:[%s11441_s7 + $0x90] sm:$0xff] }
 0xb92   :  { %3759 = vmatprep.mubr.f32.mxu0 %v11459_v33  ;;  %3872 = vmatprep.mubr.f32.mxu1 %v11459_v33  ;;  %v8426_v10 = vpop.f32.mrf.mxu0 }
 0xb93   :  { %7714 = vmatpush3.msra.mxu0 %v9136_v57  ;;  %7770 = vmatpush3.msra.mxu1 %v9136_v57  ;;  %v9162_v57 = vld [vmem:[%s11441_s7 + $0x10] sm:$0xff] }
 0xb94   :  { %7715 = vmatprep.subr.mxu0 %v9137_v41  ;;  %7771 = vmatprep.subr.mxu1 %v9137_v41  ;;  %v3571_v8 = vpop.f32.mrf.mxu0  ;;  %v9164_v41 = vld [vmem:[%s11441_s7 + $0x8] sm:$0xff] }
 0xb95   :  { %7112 = vmatmul.mubr.msk.f32.gmra.mxu0 %vm620_vm1, %v8423_v27  ;;  %7120 = vmatmul.mubr.msk.f32.gmra.mxu1 %vm620_vm1, %v8423_v27 }
 0xb96   :  { %3765 = vmatprep.mubr.f32.mxu0 %v11459_v33  ;;  %3878 = vmatprep.mubr.f32.mxu1 %v11459_v33 }
 0xb97   :  { %7716 = vmatpush3.msra.mxu0 %v9138_v40  ;;  %7772 = vmatpush3.msra.mxu1 %v9138_v40  ;;  %v9165_v40 = vld [vmem:[%s11441_s7 + $0x80] sm:$0xff] }
 0xb98   :  { %7717 = vmatprep.subr.mxu0 %v9139_v6  ;;  %7773 = vmatprep.subr.mxu1 %v9139_v6 }
 0xb99   :  { %7113 = vmatmul.mubr.msk.f32.gmra.mxu0 %vm620_vm1, %v3571_v8  ;;  %7121 = vmatmul.mubr.msk.f32.gmra.mxu1 %vm620_vm1, %v3571_v8  ;;  %v9166_v8 = vld [vmem:[%s11441_s7] sm:$0xff] }
 0xb9a   :  { %3771 = vmatprep.mubr.f32.mxu0 %v11459_v33  ;;  %3884 = vmatprep.mubr.f32.mxu1 %v11459_v33 }
 0xb9b   :  { %7718 = vmatpush3.msra.mxu0 %v9140_v4  ;;  %7774 = vmatpush3.msra.mxu1 %v9140_v4 }
 0xb9c   :  { %7719 = vmatprep.subr.mxu0 %v9141_v36  ;;  %7775 = vmatprep.subr.mxu1 %v9141_v36 }
 0xb9d   :  { %7114 = vmatmul.mubr.msk.f32.gmra.mxu0 %vm620_vm1, %v8426_v10  ;;  %7122 = vmatmul.mubr.msk.f32.gmra.mxu1 %vm620_vm1, %v8426_v10  ;;  %v9163_v10 = vld [vmem:[%s11441_s7 + $0x88] sm:$0xff] }
 0xb9e   :  { %3777 = vmatprep.mubr.f32.mxu0 %v11459_v33  ;;  %3890 = vmatprep.mubr.f32.mxu1 %v11459_v33 }
 0xb9f   :  { %7720 = vmatpush3.msra.mxu0 %v9142_v16  ;;  %7776 = vmatpush3.msra.mxu1 %v9142_v16 }
 0xba0   :  { %7721 = vmatprep.subr.mxu0 %v9143_v23  ;;  %7777 = vmatprep.subr.mxu1 %v9143_v23  ;;  %v9167_v23 = vld [vmem:[%s11440_s6 + $0x8] sm:$0xff] }
 0xba1   :  { %7722 = vmatpush3.msra.mxu0 %v9144_v11  ;;  %7778 = vmatpush3.msra.mxu1 %v9144_v11 }
 0xba2   :  { %7723 = vmatprep.subr.mxu0 %v9145_v32  ;;  %7779 = vmatprep.subr.mxu1 %v9145_v32 }
 0xba3   :  { %7724 = vmatpush3.msra.mxu0 %v9146_v59  ;;  %7780 = vmatpush3.msra.mxu1 %v9146_v59  ;;  %v9168_v59 = vld [vmem:[%s11440_s6] sm:$0xff] }
 0xba4   :  { %7725 = vmatprep.subr.mxu0 %v9147_v22  ;;  %7781 = vmatprep.subr.mxu1 %v9147_v22 }
 0xba5   :  { %7726 = vmatpush3.msra.mxu0 %v9148_v42  ;;  %7782 = vmatpush3.msra.mxu1 %v9148_v42 }
 0xba6   :  { %7727 = vmatprep.subr.mxu0 %v9149_v50  ;;  %7783 = vmatprep.subr.mxu1 %v9149_v50 }
 0xba7   :  { %7728 = vmatpush3.msra.mxu0 %v9150_v44  ;;  %7784 = vmatpush3.msra.mxu1 %v9150_v44 }
 0xba8   :  { %7729 = vmatprep.subr.mxu0 %v9151_v5  ;;  %7785 = vmatprep.subr.mxu1 %v9151_v5 }
 0xba9   :  { %7730 = vmatpush3.msra.mxu0 %v9152_v7  ;;  %7786 = vmatpush3.msra.mxu1 %v9152_v7 }
 0xbaa   :  { %7731 = vmatprep.subr.mxu0 %v9153_v31  ;;  %7787 = vmatprep.subr.mxu1 %v9153_v31  ;;  %v9169_v31 = vld [vmem:[%s11440_s6 + $0x18] sm:$0xff] }
 0xbab   :  { %7732 = vmatpush3.msra.mxu0 %v9154_v1  ;;  %7788 = vmatpush3.msra.mxu1 %v9154_v1 }
 0xbac   :  { %7733 = vmatprep.subr.mxu0 %v9155_v54  ;;  %7789 = vmatprep.subr.mxu1 %v9155_v54 }
 0xbad   :  { %7734 = vmatpush3.msra.mxu0 %v9156_v48  ;;  %7790 = vmatpush3.msra.mxu1 %v9156_v48 }
 0xbae   :  { %v8445_v28 = vpop.f32.mrf.mxu1  ;;  %7735 = vmatprep.subr.mxu0 %v9157_v61  ;;  %7791 = vmatprep.subr.mxu1 %v9157_v61 }
 0xbaf   :  { %7736 = vmatpush3.msra.mxu0 %v9158_v52  ;;  %7792 = vmatpush3.msra.mxu1 %v9158_v52 }
 0xbb0   :  { %v3646_v55 = vpop.f32.mrf.mxu1  ;;  %7737 = vmatprep.subr.mxu0 %v9159_v34  ;;  %7793 = vmatprep.subr.mxu1 %v9159_v34 }
 0xbb1   :  { %7115 = vmatmul.mubr.msk.f32.gmra.mxu0 %vm620_vm1, %v3646_v55  ;;  %7123 = vmatmul.mubr.msk.f32.gmra.mxu1 %vm620_vm1, %v3646_v55 }
 0xbb2   :  { %3783 = vmatprep.mubr.f32.mxu0 %v11459_v33  ;;  %3896 = vmatprep.mubr.f32.mxu1 %v11459_v33  ;;  %v8448_v53 = vpop.f32.mrf.mxu1 }
 0xbb3   :  { %7738 = vmatpush3.msra.mxu0 %v9160_v47  ;;  %7794 = vmatpush3.msra.mxu1 %v9160_v47  ;;  %v9171_v47 = vld [vmem:[%s11440_s6 + $0x28] sm:$0xff] }
 0xbb4   :  { %v3656_v27 = vpop.f32.mrf.mxu1  ;;  %7739 = vmatprep.subr.mxu0 %v9161_v45  ;;  %7795 = vmatprep.subr.mxu1 %v9161_v45 }
 0xbb5   :  { %7116 = vmatmul.mubr.msk.f32.gmra.mxu0 %vm620_vm1, %v8445_v28  ;;  %7124 = vmatmul.mubr.msk.f32.gmra.mxu1 %vm620_vm1, %v8445_v28  ;;  %v9170_v28 = vld [vmem:[%s11440_s6 + $0x10] sm:$0xff] }
 0xbb6   :  { %3789 = vmatprep.mubr.f32.mxu0 %v11459_v33  ;;  %3902 = vmatprep.mubr.f32.mxu1 %v11459_v33 }
 0xbb7   :  { %7740 = vmatpush3.msra.mxu0 %v9162_v57  ;;  %7796 = vmatpush3.msra.mxu1 %v9162_v57  ;;  %v9172_v57 = vld [vmem:[%s11440_s6 + $0x20] sm:$0xff] }
 0xbb8   :  { %7741 = vmatprep.subr.mxu0 %v9163_v10  ;;  %7797 = vmatprep.subr.mxu1 %v9163_v10 }
 0xbb9   :  { %7117 = vmatmul.mubr.msk.f32.gmra.mxu0 %vm620_vm1, %v3656_v27  ;;  %7125 = vmatmul.mubr.msk.f32.gmra.mxu1 %vm620_vm1, %v3656_v27 }
 0xbba   :  { %3795 = vmatprep.mubr.f32.mxu0 %v11459_v33  ;;  %3908 = vmatprep.mubr.f32.mxu1 %v11459_v33 }
 0xbbb   :  { %7742 = vmatpush3.msra.mxu0 %v9164_v41  ;;  %7798 = vmatpush3.msra.mxu1 %v9164_v41 }
 0xbbc   :  { %7743 = vmatprep.subr.mxu0 %v9165_v40  ;;  %7799 = vmatprep.subr.mxu1 %v9165_v40 }
 0xbbd   :  { %7118 = vmatmul.mubr.msk.f32.gmra.mxu0 %vm620_vm1, %v8448_v53  ;;  %7126 = vmatmul.mubr.msk.f32.gmra.mxu1 %vm620_vm1, %v8448_v53 }
 0xbbe   :  { %7744 = vmatpush3.msra.mxu0 %v9166_v8  ;;  %7800 = vmatpush3.msra.mxu1 %v9166_v8 }
 0xc51   :  { %v3755_v6 = vpop.f32.mrf.mxu0  ;;  %v3868_v4 = vpop.f32.mrf.mxu1 }
 0xc52   :  { %v3915_v22 = vmul.f32 %v9168_v59, %v3755_v6  ;;  %v4036_v42 = vmul.f32 %v9168_v59, %v3868_v4 }
 0xc53   :  { %v3757_v36 = vpop.f32.mrf.mxu0  ;;  %v3870_v16 = vpop.f32.mrf.mxu1 }
 0xc54   :  { %v3916_v11 = vmul.f32 %v9167_v23, %v3757_v36  ;;  %v4037_v32 = vmul.f32 %v9167_v23, %v3870_v16  ;;  %v9173_v36 = vld [vmem:[%s11440_s6 + $0x38] sm:$0xff] }
 0xc55   :  { %v3761_v50 = vpop.f32.mrf.mxu0  ;;  %v3874_v44 = vpop.f32.mrf.mxu1 }
 0xc56   :  { %3995 = vmatprep.mubr.f32.mxu0 %v3916_v11  ;;  %4116 = vmatprep.mubr.f32.mxu1 %v4037_v32  ;;  %v3917_v48 = vmul.f32 %v9170_v28, %v3761_v50  ;;  %v4038_v61 = vmul.f32 %v9170_v28, %v3874_v44  ;;  %v9174_v11 = vld [vmem:[%s11440_s6 + $0x30] sm:$0xff]  ;;  %v9175_v50 = vld [vmem:[%s11440_s6 + $0x40] sm:$0xff] }
 0xc57   :  { %v3763_v5 = vpop.f32.mrf.mxu0  ;;  %v3876_v7 = vpop.f32.mrf.mxu1  ;;  %3996 = vmatmul.mubr.f32.vlgmr.msra.gmra.mxu0 %v3915_v22  ;;  %4117 = vmatmul.mubr.f32.vlgmr.msra.gmra.mxu1 %v4036_v42 }
 0xc58   :  { %v3918_v1 = vmul.f32 %v9169_v31, %v3763_v5  ;;  %v4039_v54 = vmul.f32 %v9169_v31, %v3876_v7 }
 0xc59   :  { %v3767_v55 = vpop.f32.mrf.mxu0  ;;  %v3880_v52 = vpop.f32.mrf.mxu1 }
 0xc5a   :  { %4000 = vmatprep.mubr.f32.mxu0 %v3918_v1  ;;  %4121 = vmatprep.mubr.f32.mxu1 %v4039_v54  ;;  %v3919_v10 = vmul.f32 %v9172_v57, %v3767_v55  ;;  %v4040_v41 = vmul.f32 %v9172_v57, %v3880_v52  ;;  %v9176_v1 = vld [vmem:[%s11440_s6 + $0x48] sm:$0xff]  ;;  %v9177_v55 = vld [vmem:[%s11440_s6 + $0x50] sm:$0xff] }
 0xc5b   :  { %v3769_v53 = vpop.f32.mrf.mxu0  ;;  %v3882_v34 = vpop.f32.mrf.mxu1  ;;  %4001 = vmatmul.mubr.f32.gmra.mxu0 %v3917_v48  ;;  %4122 = vmatmul.mubr.f32.gmra.mxu1 %v4038_v61 }
 0xc5c   :  { %v3920_v27 = vmul.f32 %v9171_v47, %v3769_v53  ;;  %v4041_v45 = vmul.f32 %v9171_v47, %v3882_v34 }
 0xc5d   :  { %v3773_v40 = vpop.f32.mrf.mxu0  ;;  %v3886_v8 = vpop.f32.mrf.mxu1 }
 0xc5e   :  { %4005 = vmatprep.mubr.f32.mxu0 %v3920_v27  ;;  %4126 = vmatprep.mubr.f32.mxu1 %v4041_v45  ;;  %v3921_v32 = vmul.f32 %v9174_v11, %v3773_v40  ;;  %v4042_v59 = vmul.f32 %v9174_v11, %v3886_v8  ;;  %v9178_v27 = vld [vmem:[%s11440_s6 + $0x58] sm:$0xff]  ;;  %v9179_v40 = vld [vmem:[%s11440_s6 + $0x60] sm:$0xff] }
 0xc5f   :  { %v3775_v6 = vpop.f32.mrf.mxu0  ;;  %v3888_v4 = vpop.f32.mrf.mxu1  ;;  %4006 = vmatmul.mubr.f32.gmra.mxu0 %v3919_v10  ;;  %4127 = vmatmul.mubr.f32.gmra.mxu1 %v4040_v41 }
 0xc60   :  { %v3922_v16 = vmul.f32 %v9173_v36, %v3775_v6  ;;  %v4043_v23 = vmul.f32 %v9173_v36, %v3888_v4 }
 0xc62   :  { %4010 = vmatprep.mubr.f32.mxu0 %v3922_v16  ;;  %4131 = vmatprep.mubr.f32.mxu1 %v4043_v23  ;;  %v9180_v16 = vld [vmem:[%s11440_s6 + $0x68] sm:$0xff] }
 0xc63   :  { %4011 = vmatmul.mubr.f32.gmra.mxu0 %v3921_v32  ;;  %4132 = vmatmul.mubr.f32.gmra.mxu1 %v4042_v59 }
 0xc71   :  { %v3779_v22 = vpop.f32.mrf.mxu0  ;;  %v3892_v42 = vpop.f32.mrf.mxu1 }
 0xc72   :  { %v3923_v44 = vmul.f32 %v9175_v50, %v3779_v22  ;;  %v4044_v5 = vmul.f32 %v9175_v50, %v3892_v42  ;;  %v9181_v22 = vld [vmem:[%s11440_s6 + $0x70] sm:$0xff] }
 0xc73   :  { %v3781_v7 = vpop.f32.mrf.mxu0  ;;  %v3894_v31 = vpop.f32.mrf.mxu1 }
 0xc74   :  { %v3924_v54 = vmul.f32 %v9176_v1, %v3781_v7  ;;  %v4045_v28 = vmul.f32 %v9176_v1, %v3894_v31  ;;  %v9182_v7 = vld [vmem:[%s11440_s6 + $0x78] sm:$0xff] }
 0xc75   :  { %v3785_v48 = vpop.f32.mrf.mxu0  ;;  %v3898_v61 = vpop.f32.mrf.mxu1 }
 0xc76   :  { %4015 = vmatprep.mubr.f32.mxu0 %v3924_v54  ;;  %4136 = vmatprep.mubr.f32.mxu1 %v4045_v28  ;;  %v3925_v52 = vmul.f32 %v9177_v55, %v3785_v48  ;;  %v4046_v53 = vmul.f32 %v9177_v55, %v3898_v61 }
 0xc77   :  { %v3787_v34 = vpop.f32.mrf.mxu0  ;;  %v3900_v47 = vpop.f32.mrf.mxu1  ;;  %4016 = vmatmul.mubr.f32.gmra.mxu0 %v3923_v44  ;;  %4137 = vmatmul.mubr.f32.gmra.mxu1 %v4044_v5 }
 0xc78   :  { %v3926_v45 = vmul.f32 %v9178_v27, %v3787_v34  ;;  %v4047_v57 = vmul.f32 %v9178_v27, %v3900_v47 }
 0xc79   :  { %v3791_v10 = vpop.f32.mrf.mxu0  ;;  %v3904_v41 = vpop.f32.mrf.mxu1 }
 0xc7a   :  { %4020 = vmatprep.mubr.f32.mxu0 %v3926_v45  ;;  %4141 = vmatprep.mubr.f32.mxu1 %v4047_v57  ;;  %v3927_v8 = vmul.f32 %v9179_v40, %v3791_v10  ;;  %v4048_v6 = vmul.f32 %v9179_v40, %v3904_v41 }
 0xc7b   :  { %v3793_v4 = vpop.f32.mrf.mxu0  ;;  %v3906_v36 = vpop.f32.mrf.mxu1  ;;  %4021 = vmatmul.mubr.f32.gmra.mxu0 %v3925_v52  ;;  %4142 = vmatmul.mubr.f32.gmra.mxu1 %v4046_v53 }
 0xc7c   :  { %v3928_v23 = vmul.f32 %v9180_v16, %v3793_v4  ;;  %v4049_v11 = vmul.f32 %v9180_v16, %v3906_v36 }
 0xc7d   :  { %v3797_v32 = vpop.f32.mrf.mxu0  ;;  %v3910_v59 = vpop.f32.mrf.mxu1 }
 0xc7e   :  { %4025 = vmatprep.mubr.f32.mxu0 %v3928_v23  ;;  %4146 = vmatprep.mubr.f32.mxu1 %v4049_v11  ;;  %v3929_v42 = vmul.f32 %v9181_v22, %v3797_v32  ;;  %v4050_v50 = vmul.f32 %v9181_v22, %v3910_v59 }
 0xc7f   :  { %v3799_v44 = vpop.f32.mrf.mxu0  ;;  %v3912_v5 = vpop.f32.mrf.mxu1  ;;  %4026 = vmatmul.mubr.f32.gmra.mxu0 %v3927_v8  ;;  %4147 = vmatmul.mubr.f32.gmra.mxu1 %v4048_v6 }
 0xc80   :  { %v3930_v31 = vmul.f32 %v9182_v7, %v3799_v44  ;;  %v4051_v1 = vmul.f32 %v9182_v7, %v3912_v5  ;;  %v7146_v5 = vld [vmem:[%s11442_s8 + $0x58] sm:$0xff]  ;;  %v7145_v7 = vld [vmem:[%s11442_s8 + $0x50] sm:$0xff] }
 0xc82   :  { %4030 = vmatprep.mubr.f32.mxu0 %v3930_v31  ;;  %4151 = vmatprep.mubr.f32.mxu1 %v4051_v1 }
 0xc83   :  { %4031 = vmatmul.mubr.f32.gmra.mxu0 %v3929_v42  ;;  %4152 = vmatmul.mubr.f32.gmra.mxu1 %v4050_v50 }
 0xc84   :  { %8457 = vmatprep.mubr.msk.f32.mxu0 %vm620_vm1, %v9872_v0  ;;  %8477 = vmatprep.mubr.msk.f32.mxu1 %vm620_vm1, %v9876_v2 }
 0xd17   :  { %v7745_v54 = vpop.f32.mrf.mxu0  ;;  %v7801_v28 = vpop.f32.mrf.mxu1 }
 0xd19   :  { %v7746_v48 = vpop.f32.mrf.mxu0  ;;  %v7802_v61 = vpop.f32.mrf.mxu1 }
 0xd1a   :  { %v7803_v32 = vadd.f32 %v7802_v61, %v7801_v28  ;;  %v7747_v42 = vadd.f32 %v7746_v48, %v7745_v54 }
 0xd1b   :  { %v7748_v55 = vpop.f32.mrf.mxu0  ;;  %v7804_v52 = vpop.f32.mrf.mxu1 }
 0xd1d   :  { %v7749_v53 = vpop.f32.mrf.mxu0  ;;  %v7805_v34 = vpop.f32.mrf.mxu1 }
 0xd1e   :  { %v7750_v16 = vadd.f32 %v7749_v53, %v7748_v55  ;;  %v7806_v59 = vadd.f32 %v7805_v34, %v7804_v52 }
 0xd1f   :  { %v7751_v47 = vpop.f32.mrf.mxu0  ;;  %v7807_v27 = vpop.f32.mrf.mxu1 }
 0xd20   :  { %v4158_v50 = vadd.f32 %v7803_v32, %v7750_v16  ;;  %v4157_v44 = vsub.f32 %v7747_v42, %v7806_v59 }
 0xd21   :  { %v7752_v45 = vpop.f32.mrf.mxu0  ;;  %v7808_v57 = vpop.f32.mrf.mxu1 }
 0xd22   :  { %v7809_v6 = vadd.f32 %v7808_v57, %v7807_v27  ;;  %v7753_v23 = vadd.f32 %v7752_v45, %v7751_v47 }
 0xd23   :  { %v7754_v10 = vpop.f32.mrf.mxu0  ;;  %v7810_v41 = vpop.f32.mrf.mxu1 }
 0xd25   :  { %v7755_v40 = vpop.f32.mrf.mxu0  ;;  %v7811_v8 = vpop.f32.mrf.mxu1 }
 0xd26   :  { %v7756_v4 = vadd.f32 %v7755_v40, %v7754_v10  ;;  %v7812_v36 = vadd.f32 %v7811_v8, %v7810_v41 }
 0xd28   :  { %v4160_v11 = vadd.f32 %v7809_v6, %v7756_v4  ;;  %v4159_v22 = vsub.f32 %v7753_v23, %v7812_v36 }
 0xd2a   :  { %8449 = vmatprep.subr.mxu0 %v4160_v11 }
 0xd2b   :  { %8450 = vmatpush3.msra.mxu0 %v4160_v11 }
 0xd2c   :  { %8451 = vmatprep.subr.mxu0 %v4159_v22 }
 0xd2d   :  { %8452 = vmatpush3.msra.mxu0 %v4159_v22 }
 0xd2e   :  { %8453 = vmatprep.subr.mxu0 %v4158_v50 }
 0xd2f   :  { %8454 = vmatpush3.msra.mxu0 %v4158_v50  ;;  %v11460_v50 = vld [vmem:[#allocation16_spill] sm:$0xff] }
 0xd30   :  { %8455 = vmatprep.subr.mxu0 %v4157_v44 }
 0xd31   :  { %8456 = vmatpush3.msra.mxu0 %v4157_v44  ;;  %v7144_v44 = vld [vmem:[%s11442_s8 + $0x48] sm:$0xff] }
 0xd32   :  { %8458 = vmatmul.mubr.msk.f32.vlgmr.msra.gmra.mxu0 %vm620_vm1, %v9880_v3  ;;  %8489 = vmatprep.subr.mxu0 %v7146_v5 }
 0xd33   :  { %8460 = vmatprep.mubr.msk.f32.mxu0 %vm620_vm1, %v9882_v13  ;;  %8490 = vmatpush3.msra.mxu0 %v7146_v5  ;;  %v7143_v5 = vld [vmem:[%s11442_s8 + $0x40] sm:$0xff] }
 0xd34   :  { %8491 = vmatprep.subr.mxu0 %v7145_v7 }
 0xd35   :  { %8492 = vmatpush3.msra.mxu0 %v7145_v7 }
 0xd36   :  { %8461 = vmatmul.mubr.msk.f32.gmra.mxu0 %vm620_vm1, %v9884_v19  ;;  %8493 = vmatprep.subr.mxu0 %v7144_v44 }
 0xd37   :  { %v7757_v31 = vpop.f32.mrf.mxu0  ;;  %v7813_v1 = vpop.f32.mrf.mxu1  ;;  %8463 = vmatprep.mubr.msk.f32.mxu0 %vm620_vm1, %v9886_v39  ;;  %8494 = vmatpush3.msra.mxu0 %v7144_v44 }
 0xd38   :  { %8495 = vmatprep.subr.mxu0 %v7143_v5 }
 0xd39   :  { %v7758_v54 = vpop.f32.mrf.mxu0  ;;  %v7814_v28 = vpop.f32.mrf.mxu1  ;;  %8496 = vmatpush3.msra.mxu0 %v7143_v5 }
 0xd3a   :  { %8464 = vmatmul.mubr.msk.f32.gmra.mxu0 %vm620_vm1, %v9888_v46  ;;  %v7815_v23 = vadd.f32 %v7814_v28, %v7813_v1  ;;  %v7759_v59 = vadd.f32 %v7758_v54, %v7757_v31 }
 0xd3b   :  { %v7760_v48 = vpop.f32.mrf.mxu0  ;;  %v7816_v61 = vpop.f32.mrf.mxu1  ;;  %8466 = vmatprep.mubr.msk.f32.mxu0 %vm620_vm1, %v9900_v51 }
 0xd3d   :  { %v7761_v55 = vpop.f32.mrf.mxu0  ;;  %v7817_v52 = vpop.f32.mrf.mxu1 }
 0xd3e   :  { %8467 = vmatmul.mubr.msk.f32.gmra.mxu0 %vm620_vm1, %v9910_v58  ;;  %v7762_v4 = vadd.f32 %v7761_v55, %v7760_v48  ;;  %v7818_v11 = vadd.f32 %v7817_v52, %v7816_v61 }
 0xd3f   :  { %v7763_v53 = vpop.f32.mrf.mxu0  ;;  %v7819_v34 = vpop.f32.mrf.mxu1 }
 0xd40   :  { %v4267_v22 = vadd.f32 %v7815_v23, %v7762_v4  ;;  %v4266_v42 = vsub.f32 %v7759_v59, %v7818_v11  ;;  %v7165_v4 = vld [vmem:[%s11444_s10 + $0x40] sm:$0xff] }
 0xd41   :  { %v7764_v47 = vpop.f32.mrf.mxu0  ;;  %v7820_v27 = vpop.f32.mrf.mxu1 }
 0xd42   :  { %v7821_v40 = vadd.f32 %v7820_v27, %v7819_v34  ;;  %v7765_v36 = vadd.f32 %v7764_v47, %v7763_v53 }
 0xd43   :  { %v7766_v45 = vpop.f32.mrf.mxu0  ;;  %v7822_v57 = vpop.f32.mrf.mxu1 }
 0xd45   :  { %v7767_v10 = vpop.f32.mrf.mxu0  ;;  %v7823_v41 = vpop.f32.mrf.mxu1 }
 0xd46   :  { %v7768_v8 = vadd.f32 %v7767_v10, %v7766_v45  ;;  %v7824_v6 = vadd.f32 %v7823_v41, %v7822_v57  ;;  %v9183_v41 = vld [vmem:[#allocation3] sm:$0xff] }
 0xd48   :  { %v4269_v16 = vadd.f32 %v7821_v40, %v7768_v8  ;;  %v4268_v32 = vsub.f32 %v7765_v36, %v7824_v6  ;;  %v7168_v40 = vld [vmem:[%s11444_s10 + $0x58] sm:$0xff]  ;;  %v7167_v8 = vld [vmem:[%s11444_s10 + $0x50] sm:$0xff]  ;;  %v7166_v6 = vld [vmem:[%s11444_s10 + $0x48] sm:$0xff] }
 0xd49   :  { %v10824_v36 = vld [vmem:[%s11443_s9 + $0x2] ss:$0 sm:$0xff] }
 0xd4a   :  { %8469 = vmatprep.subr.mxu1 %v4269_v16 }
 0xd4b   :  { %8470 = vmatpush3.msra.mxu1 %v4269_v16 }
 0xd4c   :  { %8471 = vmatprep.subr.mxu1 %v4268_v32 }
 0xd4d   :  { %8472 = vmatpush3.msra.mxu1 %v4268_v32 }
 0xd4e   :  { %8473 = vmatprep.subr.mxu1 %v4267_v22 }
 0xd4f   :  { %8474 = vmatpush3.msra.mxu1 %v4267_v22 }
 0xd50   :  { %8475 = vmatprep.subr.mxu1 %v4266_v42 }
 0xd51   :  { %8476 = vmatpush3.msra.mxu1 %v4266_v42 }
 0xd52   :  { %8478 = vmatmul.mubr.msk.f32.vlgmr.msra.gmra.mxu1 %vm620_vm1, %v9904_v25  ;;  %8521 = vmatprep.subr.mxu1 %v7168_v40 }
 0xd53   :  { %8480 = vmatprep.mubr.msk.f32.mxu1 %vm620_vm1, %v9914_v63  ;;  %8522 = vmatpush3.msra.mxu1 %v7168_v40 }
 0xd54   :  { %8523 = vmatprep.subr.mxu1 %v7167_v8 }
 0xd55   :  { %8524 = vmatpush3.msra.mxu1 %v7167_v8 }
 0xd56   :  { %8481 = vmatmul.mubr.msk.f32.gmra.mxu1 %vm620_vm1, %v9918_v15  ;;  %8525 = vmatprep.subr.mxu1 %v7166_v6 }
 0xd57   :  { %8483 = vmatprep.mubr.msk.f32.mxu1 %vm620_vm1, %v9920_v24  ;;  %8526 = vmatpush3.msra.mxu1 %v7166_v6 }
 0xd58   :  { %8527 = vmatprep.subr.mxu1 %v7165_v4 }
 0xd59   :  { %8528 = vmatpush3.msra.mxu1 %v7165_v4 }
 0xd5a   :  { %8484 = vmatmul.mubr.msk.f32.gmra.mxu1 %vm620_vm1, %v9922_v43 }
 0xd5b   :  { %8486 = vmatprep.mubr.msk.f32.mxu1 %vm620_vm1, %v9928_v30 }
 0xd5e   :  { %8487 = vmatmul.mubr.msk.f32.gmra.mxu1 %vm620_vm1, %v11460_v50 }
 0xdf2   :  { %v8459_v7 = vpop.f32.mrf.mxu0 }
 0xdf4   :  { %v4227_v31 = vpop.f32.mrf.mxu0 }
 0xdf5   :  { %8497 = vmatprep.mubr.msk.f32.mxu0 %vm620_vm1, %v4227_v31 }
 0xdf6   :  { %v8462_v1 = vpop.f32.mrf.mxu0  ;;  %8498 = vmatmul.mubr.msk.f32.vlgmr.msra.gmra.mxu0 %vm620_vm1, %v8459_v7 }
 0xdf8   :  { %v4237_v54 = vpop.f32.mrf.mxu0 }
 0xdf9   :  { %8500 = vmatprep.mubr.msk.f32.mxu0 %vm620_vm1, %v4237_v54 }
 0xdfa   :  { %v8465_v28 = vpop.f32.mrf.mxu0  ;;  %8501 = vmatmul.mubr.msk.f32.gmra.mxu0 %vm620_vm1, %v8462_v1 }
 0xdfc   :  { %v4247_v48 = vpop.f32.mrf.mxu0 }
 0xdfd   :  { %8503 = vmatprep.mubr.msk.f32.mxu0 %vm620_vm1, %v4247_v48 }
 0xdfe   :  { %v8468_v61 = vpop.f32.mrf.mxu0  ;;  %8504 = vmatmul.mubr.msk.f32.gmra.mxu0 %vm620_vm1, %v8465_v28 }
 0xe00   :  { %v4257_v55 = vpop.f32.mrf.mxu0 }
 0xe01   :  { %8506 = vmatprep.mubr.msk.f32.mxu0 %vm620_vm1, %v4257_v55 }
 0xe02   :  { %8507 = vmatmul.mubr.msk.f32.gmra.mxu0 %vm620_vm1, %v8468_v61 }
 0xe12   :  { %v8479_v52 = vpop.f32.mrf.mxu1 }
 0xe14   :  { %v4336_v53 = vpop.f32.mrf.mxu1 }
 0xe15   :  { %8509 = vmatprep.mubr.msk.f32.mxu0 %vm620_vm1, %v4336_v53 }
 0xe16   :  { %v8482_v34 = vpop.f32.mrf.mxu1  ;;  %8510 = vmatmul.mubr.msk.f32.gmra.mxu0 %vm620_vm1, %v8479_v52 }
 0xe18   :  { %v4346_v47 = vpop.f32.mrf.mxu1 }
 0xe19   :  { %8512 = vmatprep.mubr.msk.f32.mxu0 %vm620_vm1, %v4346_v47 }
 0xe1a   :  { %v8485_v27 = vpop.f32.mrf.mxu1  ;;  %8513 = vmatmul.mubr.msk.f32.gmra.mxu0 %vm620_vm1, %v8482_v34 }
 0xe1c   :  { %v4356_v45 = vpop.f32.mrf.mxu1 }
 0xe1d   :  { %8515 = vmatprep.mubr.msk.f32.mxu0 %vm620_vm1, %v4356_v45 }
 0xe1e   :  { %v8488_v57 = vpop.f32.mrf.mxu1  ;;  %8516 = vmatmul.mubr.msk.f32.gmra.mxu0 %vm620_vm1, %v8485_v27 }
 0xe20   :  { %v4366_v10 = vpop.f32.mrf.mxu1 }
 0xe21   :  { %8518 = vmatprep.mubr.msk.f32.mxu0 %vm620_vm1, %v4366_v10 }
 0xe22   :  { %8519 = vmatmul.mubr.msk.f32.gmra.mxu0 %vm620_vm1, %v8488_v57 }
 0xe23   :  { %8569 = vmatprep.mubr.msk.f32.mxu0 %vm420_vm0, %v9183_v41 }
 0xeb6   :  { %v8499_v16 = vpop.f32.mrf.mxu0 }
 0xeb7   :  { %v4508_v23 = vadd.f32 %v8499_v16, %v10824_v36 }
 0xeb8   :  { %v4502_v11 = vpop.f32.mrf.mxu0 }
 0xeb9   :  { %v4598_v32 = vmul.f32 0.70710677, %v4508_v23  ;;  %v4503_v59 = vadd.f32 %v10824_v36, %v4502_v11  ;;  %v4582_v16 = vmul.f32 0.5, %v4508_v23 }
 0xeba   :  { %v8502_v22 = vpop.f32.mrf.mxu0 }
 0xebb   :  { %8879 = verf.f32 %v4598_v32  ;;  %v4597_v42 = vmul.f32 0.70710677, %v4503_v59  ;;  %v4518_v44 = vadd.f32 %v8502_v22, %v10824_v36  ;;  %v4581_v8 = vmul.f32 0.5, %v4503_v59 }
 0xebc   :  { %v4512_v5 = vpop.f32.mrf.mxu0 }
 0xebd   :  { %8881 = verf.f32 %v4597_v42  ;;  %v4600_v7 = vmul.f32 0.70710677, %v4518_v44  ;;  %v4513_v31 = vadd.f32 %v10824_v36, %v4512_v5 }
 0xebe   :  { %v8505_v1 = vpop.f32.mrf.mxu0 }
 0xebf   :  { %8883 = verf.f32 %v4600_v7  ;;  %v4599_v54 = vmul.f32 0.70710677, %v4513_v31  ;;  %v4528_v28 = vadd.f32 %v8505_v1, %v10824_v36  ;;  %v4583_v5 = vmul.f32 0.5, %v4513_v31 }
 0xec0   :  { %v4522_v48 = vpop.f32.mrf.mxu0 }
 0xec1   :  { %8885 = verf.f32 %v4599_v54  ;;  %v4602_v61 = vmul.f32 0.70710677, %v4528_v28  ;;  %v4523_v55 = vadd.f32 %v10824_v36, %v4522_v48  ;;  %v4584_v54 = vmul.f32 0.5, %v4518_v44 }
 0xec2   :  { %v8508_v52 = vpop.f32.mrf.mxu0 }
 0xec3   :  { %8887 = verf.f32 %v4602_v61  ;;  %v4601_v53 = vmul.f32 0.70710677, %v4523_v55  ;;  %v4538_v34 = vadd.f32 %v8508_v52, %v10824_v36  ;;  %v4585_v59 = vmul.f32 0.5, %v4523_v55 }
 0xec4   :  { %v4532_v47 = vpop.f32.mrf.mxu0 }
 0xec5   :  { %8889 = verf.f32 %v4601_v53  ;;  %v4604_v27 = vmul.f32 0.70710677, %v4538_v34  ;;  %v4533_v45 = vadd.f32 %v10824_v36, %v4532_v47  ;;  %v4588_v55 = vmul.f32 0.5, %v4538_v34 }
 0xec7   :  { %8891 = verf.f32 %v4604_v27  ;;  %v4603_v57 = vmul.f32 0.70710677, %v4533_v45  ;;  %v4586_v27 = vmul.f32 0.5, %v4528_v28 }
 0xec8   :  { %v8880_v10 = vpop.eup %8879 }
 0xec9   :  { %8893 = verf.f32 %v4603_v57  ;;  %v4630_v40 = vadd.f32 1.0, %v8880_v10 }
 0xeca   :  { %v8882_v41 = vpop.eup %8881 }
 0xecb   :  { %v4629_v6 = vadd.f32 1.0, %v8882_v41  ;;  %v4646_v22 = vmul.f32 %v4630_v40, %v4582_v16 }
 0xecc   :  { %v8884_v4 = vpop.eup %8883 }
 0xecd   :  { %v4645_v11 = vmul.f32 %v4629_v6, %v4581_v8  ;;  %v4632_v42 = vadd.f32 1.0, %v8884_v4  ;;  %v4587_v8 = vmul.f32 0.5, %v4533_v45 }
 0xece   :  { %v8886_v32 = vpop.eup %8885 }
 0xecf   :  { %v4631_v7 = vadd.f32 1.0, %v8886_v32  ;;  %8529 = vmatprep.mubr.msk.f32.mxu1 %vm620_vm1, %v4645_v11  ;;  %v4648_v52 = vmul.f32 %v4632_v42, %v4584_v54 }
 0xed0   :  { %v8888_v1 = vpop.eup %8887  ;;  %8530 = vmatmul.mubr.msk.f32.vlgmr.msra.gmra.mxu1 %vm620_vm1, %v4646_v22 }
 0xed1   :  { %v4647_v48 = vmul.f32 %v4631_v7, %v4583_v5  ;;  %v4634_v53 = vadd.f32 1.0, %v8888_v1 }
 0xed2   :  { %v8890_v61 = vpop.eup %8889 }
 0xed3   :  { %v4633_v47 = vadd.f32 1.0, %v8890_v61  ;;  %8532 = vmatprep.mubr.msk.f32.mxu1 %vm620_vm1, %v4647_v48  ;;  %v4650_v41 = vmul.f32 %v4634_v53, %v4586_v27 }
 0xed4   :  { %v8892_v23 = vpop.eup %8891  ;;  %8533 = vmatmul.mubr.msk.f32.gmra.mxu1 %vm620_vm1, %v4648_v52 }
 0xed5   :  { %v4649_v31 = vmul.f32 %v4633_v47, %v4585_v59  ;;  %v4636_v40 = vadd.f32 1.0, %v8892_v23 }
 0xed6   :  { %v8511_v57 = vpop.f32.mrf.mxu0  ;;  %v8894_v10 = vpop.eup %8893 }
 0xed7   :  { %v4548_v44 = vadd.f32 %v8511_v57, %v10824_v36  ;;  %v4635_v6 = vadd.f32 1.0, %v8894_v10  ;;  %8535 = vmatprep.mubr.msk.f32.mxu1 %vm620_vm1, %v4649_v31  ;;  %v4652_v22 = vmul.f32 %v4636_v40, %v4588_v55 }
 0xed8   :  { %v4542_v4 = vpop.f32.mrf.mxu0  ;;  %8536 = vmatmul.mubr.msk.f32.gmra.mxu1 %vm620_vm1, %v4650_v41 }
 0xed9   :  { %v4606_v16 = vmul.f32 0.70710677, %v4548_v44  ;;  %v4543_v11 = vadd.f32 %v10824_v36, %v4542_v4  ;;  %v4651_v28 = vmul.f32 %v4635_v6, %v4587_v8 }
 0xeda   :  { %v8514_v32 = vpop.f32.mrf.mxu0 }
 0xedb   :  { %8895 = verf.f32 %v4606_v16  ;;  %v4605_v42 = vmul.f32 0.70710677, %v4543_v11  ;;  %v4558_v5 = vadd.f32 %v8514_v32, %v10824_v36  ;;  %8538 = vmatprep.mubr.msk.f32.mxu1 %vm620_vm1, %v4651_v28  ;;  %v4589_v6 = vmul.f32 0.5, %v4543_v11 }
 0xedc   :  { %v4552_v45 = vpop.f32.mrf.mxu0  ;;  %8539 = vmatmul.mubr.msk.f32.gmra.mxu1 %vm620_vm1, %v4652_v22  ;;  %v4590_v16 = vmul.f32 0.5, %v4548_v44 }
 0xedd   :  { %8897 = verf.f32 %v4605_v42  ;;  %v4608_v7 = vmul.f32 0.70710677, %v4558_v5  ;;  %v4553_v1 = vadd.f32 %v10824_v36, %v4552_v45 }
 0xede   :  { %v8517_v34 = vpop.f32.mrf.mxu0 }
 0xedf   :  { %8899 = verf.f32 %v4608_v7  ;;  %v4607_v54 = vmul.f32 0.70710677, %v4553_v1  ;;  %v4568_v48 = vadd.f32 %v8517_v34, %v10824_v36  ;;  %v4591_v45 = vmul.f32 0.5, %v4553_v1 }
 0xee0   :  { %v4562_v61 = vpop.f32.mrf.mxu0 }
 0xee1   :  { %8901 = verf.f32 %v4607_v54  ;;  %v4610_v52 = vmul.f32 0.70710677, %v4568_v48  ;;  %v4563_v53 = vadd.f32 %v10824_v36, %v4562_v61 }
 0xee2   :  { %v8520_v59 = vpop.f32.mrf.mxu0 }
 0xee3   :  { %8903 = verf.f32 %v4610_v52  ;;  %v4609_v47 = vmul.f32 0.70710677, %v4563_v53  ;;  %v4578_v23 = vadd.f32 %v8520_v59, %v10824_v36  ;;  %v4593_v11 = vmul.f32 0.5, %v4563_v53 }
 0xee4   :  { %v4572_v27 = vpop.f32.mrf.mxu0 }
 0xee5   :  { %8905 = verf.f32 %v4609_v47  ;;  %v4612_v31 = vmul.f32 0.70710677, %v4578_v23  ;;  %v4573_v57 = vadd.f32 %v10824_v36, %v4572_v27  ;;  %v4592_v36 = vmul.f32 0.5, %v4558_v5 }
 0xee6   :  { %v4594_v27 = vmul.f32 0.5, %v4568_v48  ;;  %v9184_v48 = vld [vmem:[#allocation3 + $0x20] sm:$0xff] }
 0xee7   :  { %8907 = verf.f32 %v4612_v31  ;;  %v4611_v10 = vmul.f32 0.70710677, %v4573_v57 }
 0xee8   :  { %v8896_v41 = vpop.eup %8895 }
 0xee9   :  { %8909 = verf.f32 %v4611_v10  ;;  %v4638_v8 = vadd.f32 1.0, %v8896_v41 }
 0xeea   :  { %v8898_v40 = vpop.eup %8897 }
 0xeeb   :  { %v4637_v4 = vadd.f32 1.0, %v8898_v40  ;;  %v4654_v22 = vmul.f32 %v4638_v8, %v4590_v16  ;;  %v4595_v40 = vmul.f32 0.5, %v4573_v57  ;;  %v4596_v8 = vmul.f32 0.5, %v4578_v23  ;;  %v10862_v57 = vld [vmem:[%s11445_s11 + $0x2] ss:$0 sm:$0xff] }
 0xeec   :  { %v8900_v55 = vpop.eup %8899 }
 0xeed   :  { %v4653_v28 = vmul.f32 %v4637_v4, %v4589_v6  ;;  %v4640_v42 = vadd.f32 1.0, %v8900_v55 }
 0xeee   :  { %v8902_v32 = vpop.eup %8901 }
 0xeef   :  { %v4639_v7 = vadd.f32 1.0, %v8902_v32  ;;  %8541 = vmatprep.mubr.msk.f32.mxu1 %vm620_vm1, %v4653_v28  ;;  %v4656_v52 = vmul.f32 %v4640_v42, %v4592_v36 }
 0xef0   :  { %v8904_v34 = vpop.eup %8903  ;;  %8542 = vmatmul.mubr.msk.f32.gmra.mxu1 %vm620_vm1, %v4654_v22 }
 0xef1   :  { %v4655_v54 = vmul.f32 %v4639_v7, %v4591_v45  ;;  %v4642_v59 = vadd.f32 1.0, %v8904_v34 }
 0xef2   :  { %v8906_v61 = vpop.eup %8905 }
 0xef3   :  { %v4641_v47 = vadd.f32 1.0, %v8906_v61  ;;  %8544 = vmatprep.mubr.msk.f32.mxu1 %vm620_vm1, %v4655_v54  ;;  %v4658_v10 = vmul.f32 %v4642_v59, %v4594_v27 }
 0xef4   :  { %v8908_v44 = vpop.eup %8907  ;;  %8545 = vmatmul.mubr.msk.f32.gmra.mxu1 %vm620_vm1, %v4656_v52 }
 0xef5   :  { %v4657_v1 = vmul.f32 %v4641_v47, %v4593_v11  ;;  %v4644_v41 = vadd.f32 1.0, %v8908_v44 }
 0xef6   :  { %v8910_v31 = vpop.eup %8909 }
 0xef7   :  { %v4643_v5 = vadd.f32 1.0, %v8910_v31  ;;  %8547 = vmatprep.mubr.msk.f32.mxu1 %vm620_vm1, %v4657_v1  ;;  %v4660_v53 = vmul.f32 %v4644_v41, %v4596_v8 }
 0xef8   :  { %8548 = vmatmul.mubr.msk.f32.gmra.mxu1 %vm620_vm1, %v4658_v10 }
 0xef9   :  { %v4659_v6 = vmul.f32 %v4643_v5, %v4595_v40 }
 0xefb   :  { %8550 = vmatprep.mubr.msk.f32.mxu1 %vm620_vm1, %v4659_v6 }
 0xefc   :  { %8551 = vmatmul.mubr.msk.f32.gmra.mxu1 %vm620_vm1, %v4660_v53 }
 0xefd   :  { %8591 = vmatprep.mubr.msk.f32.mxu1 %vm420_vm0, %v9184_v48 }
 0xf90   :  { %v8531_v4 = vpop.f32.mrf.mxu1 }
 0xf91   :  { %v4794_v11 = vadd.f32 %v8531_v4, %v10862_v57 }
 0xf92   :  { %v4788_v55 = vpop.f32.mrf.mxu1 }
 0xf93   :  { %v4789_v27 = vadd.f32 %v10862_v57, %v4788_v55  ;;  %v4884_v10 = vmul.f32 0.70710677, %v4794_v11 }
 0xf94   :  { %v8534_v16 = vpop.f32.mrf.mxu1 }
 0xf95   :  { %v4804_v22 = vadd.f32 %v8534_v16, %v10862_v57  ;;  %v4883_v41 = vmul.f32 0.70710677, %v4789_v27 }
 0xf96   :  { %v4798_v28 = vpop.f32.mrf.mxu1 }
 0xf97   :  { %v4799_v36 = vadd.f32 %v10862_v57, %v4798_v28  ;;  %v4886_v52 = vmul.f32 0.70710677, %v4804_v22 }
 0xf98   :  { %v8537_v23 = vpop.f32.mrf.mxu1 }
 0xf99   :  { %v4814_v32 = vadd.f32 %v8537_v23, %v10862_v57  ;;  %v4885_v1 = vmul.f32 0.70710677, %v4799_v36 }
 0xf9a   :  { %v4808_v42 = vpop.f32.mrf.mxu1 }
 0xf9b   :  { %v4888_v45 = vmul.f32 0.70710677, %v4814_v32  ;;  %v4809_v7 = vadd.f32 %v10862_v57, %v4808_v42  ;;  %v4872_v55 = vmul.f32 0.5, %v4814_v32 }
 0xf9c   :  { %v8540_v34 = vpop.f32.mrf.mxu1 }
 0xf9d   :  { %v4887_v54 = vmul.f32 0.70710677, %v4809_v7  ;;  %v4824_v61 = vadd.f32 %v8540_v34, %v10862_v57  ;;  %8911 = verf.f32 %v4888_v45 }
 0xf9e   :  { %v4818_v59 = vpop.f32.mrf.mxu1 }
 0xf9f   :  { %v4890_v47 = vmul.f32 0.70710677, %v4824_v61  ;;  %v4819_v44 = vadd.f32 %v10862_v57, %v4818_v59  ;;  %8913 = verf.f32 %v4887_v54  ;;  %v4874_v48 = vmul.f32 0.5, %v4824_v61 }
 0xfa0   :  { %v4871_v59 = vmul.f32 0.5, %v4809_v7  ;;  %v4870_v61 = vmul.f32 0.5, %v4804_v22  ;;  %v4868_v22 = vmul.f32 0.5, %v4794_v11 }
 0xfa1   :  { %8915 = verf.f32 %v4890_v47  ;;  %v4889_v31 = vmul.f32 0.70710677, %v4819_v44  ;;  %v4873_v45 = vmul.f32 0.5, %v4819_v44 }
 0xfa2   :  { %8917 = verf.f32 %v4886_v52 }
 0xfa3   :  { %8919 = verf.f32 %v4889_v31 }
 0xfa4   :  { %8921 = verf.f32 %v4885_v1 }
 0xfa5   :  { %8923 = verf.f32 %v4884_v10 }
 0xfa6   :  { %8925 = verf.f32 %v4883_v41 }
 0xfaa   :  { %v8912_v40 = vpop.eup %8911 }
 0xfab   :  { %v4920_v53 = vadd.f32 1.0, %v8912_v40 }
 0xfac   :  { %v8914_v5 = vpop.eup %8913 }
 0xfad   :  { %v4919_v23 = vadd.f32 1.0, %v8914_v5  ;;  %v4936_v1 = vmul.f32 %v4920_v53, %v4872_v55  ;;  %v4869_v53 = vmul.f32 0.5, %v4799_v36 }
 0xfae   :  { %v8916_v8 = vpop.eup %8915 }
 0xfaf   :  { %v8918_v6 = vpop.eup %8917  ;;  %v4922_v4 = vadd.f32 1.0, %v8916_v8  ;;  %v4935_v50 = vmul.f32 %v4919_v23, %v4871_v59 }
 0xfb0   :  { %v8543_v16 = vpop.f32.mrf.mxu1  ;;  %v8920_v28 = vpop.eup %8919  ;;  %v4918_v47 = vadd.f32 1.0, %v8918_v6 }
 0xfb1   :  { %v4938_v42 = vmul.f32 %v4922_v4, %v4874_v48  ;;  %v4921_v34 = vadd.f32 1.0, %v8920_v28  ;;  %v8922_v52 = vpop.eup %8921  ;;  %v10882_v48 = vadd.f32 %v4936_v1, %v10460_v17  ;;  %v10893_v23 = vadd.f32 %v4935_v50, %v10471_v21 }
 0xfb2   :  { %v4828_v54 = vpop.f32.mrf.mxu1  ;;  %v8924_v40 = vpop.eup %8923  ;;  %v4917_v8 = vadd.f32 1.0, %v8922_v52  ;;  %v4934_v6 = vmul.f32 %v4918_v47, %v4870_v61 }
 0xfb3   :  { %v4937_v31 = vmul.f32 %v4921_v34, %v4873_v45  ;;  %v10873_v41 = vadd.f32 %v4938_v42, %v10451_v56  ;;  %v8926_v5 = vpop.eup %8925  ;;  %v4916_v7 = vadd.f32 1.0, %v8924_v40  ;;  %v4867_v45 = vmul.f32 0.5, %v4789_v27 }
 0xfb4   :  { %v8546_v10 = vpop.f32.mrf.mxu1  ;;  %v4933_v28 = vmul.f32 %v4917_v8, %v4869_v53  ;;  %v10902_v52 = vadd.f32 %v4934_v6, %v10480_v20  ;;  %v10916_v20 = vadd.f32 %v8543_v16, %v10862_v57  ;;  %v10925_v8 = vadd.f32 %v10862_v57, %v4828_v54  ;;  %v9186_v54 = vld [vmem:[#allocation6 + $0x38] sm:$0xff]  ;;  %v9189_v6 = vld [vmem:[#allocation6 + $0x28] sm:$0xff]  ;;  %v9190_v53 = vld [vmem:[#allocation6 + $0x20] sm:$0xff] }
 0xfb5   :  { %8553 = vmatprep.subr.mxu0 %v10873_v41  ;;  %v10877_v44 = vadd.f32 %v4937_v31, %v10455_v12  ;;  %v4915_v12 = vadd.f32 1.0, %v8926_v5  ;;  %v10889_v55 = vadd.f32 %v8546_v10, %v10862_v57  ;;  %v4932_v42 = vmul.f32 %v4916_v7, %v4868_v22  ;;  %v9188_v7 = vld [vmem:[#allocation6 + $0x30] sm:$0xff]  ;;  %v9192_v22 = vld [vmem:[#allocation6 + $0x18] sm:$0xff] }
 0xfb6   :  { %v4838_v32 = vpop.f32.mrf.mxu1  ;;  %8554 = vmatpush3.msra.mxu0 %v10873_v41  ;;  %v10913_v31 = vadd.f32 %v4933_v28, %v10491_v14  ;;  %v4892_v5 = vmul.f32 0.70710677, %v10916_v20 }
 0xfb7   :  { %8555 = vmatprep.subr.mxu0 %v10877_v44  ;;  %v10905_v59 = vadd.f32 %v10862_v57, %v4838_v32  ;;  %v4931_v47 = vmul.f32 %v4915_v12, %v4867_v45  ;;  %v4894_v1 = vmul.f32 0.70710677, %v10889_v55  ;;  %v10922_v61 = vadd.f32 %v4932_v42, %v10500_v60  ;;  %v9193_v12 = vld [vmem:[#allocation6 + $0x10] sm:$0xff]  ;;  %v9195_v42 = vld [vmem:[#allocation6] sm:$0xff] }
 0xfb8   :  { %v8549_v56 = vpop.f32.mrf.mxu1  ;;  %8556 = vmatpush3.msra.mxu0 %v10877_v44  ;;  %v4891_v60 = vmul.f32 0.70710677, %v10925_v8 }
 0xfb9   :  { %v10885_v4 = vadd.f32 %v8549_v56, %v10862_v57  ;;  %8557 = vmatprep.subr.mxu0 %v10882_v48  ;;  %v4893_v14 = vmul.f32 0.70710677, %v10905_v59  ;;  %v10931_v32 = vadd.f32 %v4931_v47, %v10509_v38  ;;  %v9187_v38 = vld [vmem:[#allocation3 + $0x10] sm:$0xff]  ;;  %v9191_v56 = vld [vmem:[#allocation3 + $0x18] sm:$0xff] }
 0xfba   :  { %v4848_v36 = vpop.f32.mrf.mxu1  ;;  %8558 = vmatpush3.msra.mxu0 %v10882_v48 }
 0xfbb   :  { %v4896_v17 = vmul.f32 0.70710677, %v10885_v4  ;;  %v10897_v11 = vadd.f32 %v10862_v57, %v4848_v36  ;;  %8559 = vmatprep.subr.mxu0 %v10893_v23  ;;  %v9194_v36 = vld [vmem:[#allocation6 + $0x8] sm:$0xff] }
 0xfbc   :  { %v8552_v34 = vpop.f32.mrf.mxu1  ;;  %8560 = vmatpush3.msra.mxu0 %v10893_v23 }
 0xfbd   :  { %v4895_v21 = vmul.f32 0.70710677, %v10897_v11  ;;  %v4864_v50 = vadd.f32 %v8552_v34, %v10862_v57  ;;  %8561 = vmatprep.subr.mxu0 %v10902_v52  ;;  %8927 = verf.f32 %v4896_v17  ;;  %v10945_v34 = vld [vmem:[%s11441_s7 + $0xf8] sm:$0xff] }
 0xfbe   :  { %v4858_v27 = vpop.f32.mrf.mxu1  ;;  %8562 = vmatpush3.msra.mxu0 %v10902_v52 }
 0xfbf   :  { %v4898_v10 = vmul.f32 0.70710677, %v4864_v50  ;;  %v4859_v40 = vadd.f32 %v10862_v57, %v4858_v27  ;;  %8929 = verf.f32 %v4895_v21  ;;  %8563 = vmatprep.subr.mxu0 %v10913_v31  ;;  %v9185_v57 = vld [vmem:[#allocation3 + $0x8] sm:$0xff] }
 0xfc0   :  { %8564 = vmatpush3.msra.mxu0 %v10913_v31 }
 0xfc1   :  { %8931 = verf.f32 %v4898_v10  ;;  %v4897_v16 = vmul.f32 0.70710677, %v4859_v40  ;;  %8565 = vmatprep.subr.mxu0 %v10922_v61 }
 0xfc2   :  { %8933 = verf.f32 %v4894_v1  ;;  %8566 = vmatpush3.msra.mxu0 %v10922_v61  ;;  %v4882_v1 = vmul.f32 0.5, %v4864_v50  ;;  %v4878_v50 = vmul.f32 0.5, %v10889_v55  ;;  %v4876_v55 = vmul.f32 0.5, %v10916_v20 }
 0xfc3   :  { %8935 = verf.f32 %v4897_v16  ;;  %8567 = vmatprep.subr.mxu0 %v10931_v32 }
 0xfc4   :  { %8937 = verf.f32 %v4893_v14  ;;  %8568 = vmatpush3.msra.mxu0 %v10931_v32  ;;  %v4880_v14 = vmul.f32 0.5, %v10885_v4 }
 0xfc5   :  { %8570 = vmatmul.mubr.msk.f32.vlgmr.msra.gmra.mxu0 %vm420_vm0, %v9185_v57  ;;  %5181 = vmatprep.subr.mxu0 %v9186_v54  ;;  %8939 = verf.f32 %v4892_v5 }
 0xfc6   :  { %8572 = vmatprep.mubr.msk.f32.mxu0 %vm420_vm0, %v9187_v38  ;;  %5182 = vmatpush1.msra.mxu0 %v9188_v7  ;;  %8941 = verf.f32 %v4891_v60  ;;  %v4881_v60 = vmul.f32 0.5, %v4859_v40  ;;  %v4879_v38 = vmul.f32 0.5, %v10897_v11 }
 0xfc7   :  { %5183 = vmatprep.subr.mxu0 %v9189_v6 }
 0xfc8   :  { %5184 = vmatpush1.msra.mxu0 %v9190_v53 }
 0xfc9   :  { %8573 = vmatmul.mubr.msk.f32.gmra.mxu0 %vm420_vm0, %v9191_v56  ;;  %5185 = vmatprep.subr.mxu0 %v9192_v22 }
 0xfca   :  { %5186 = vmatpush1.msra.mxu0 %v9193_v12  ;;  %5221 = vmatprep.mubr.f32.mxu0 %v11459_v33  ;;  %v8928_v28 = vpop.eup %8927 }
 0xfcb   :  { %5187 = vmatprep.subr.mxu0 %v9194_v36  ;;  %v4928_v47 = vadd.f32 1.0, %v8928_v28 }
 0xfcc   :  { %v8930_v17 = vpop.eup %8929  ;;  %5188 = vmatpush1.msra.mxu0 %v9195_v42 }
 0xfcd   :  { %7913 = vmatprep.subr.mxu0 %v10945_v34  ;;  %v4927_v16 = vadd.f32 1.0, %v8930_v17  ;;  %v4944_v6 = vmul.f32 %v4928_v47, %v4880_v14  ;;  %v4877_v17 = vmul.f32 0.5, %v10905_v59  ;;  %v4875_v59 = vmul.f32 0.5, %v10925_v8  ;;  %v9198_v8 = vld [vmem:[#allocation8 + $0x38] sm:$0xff] }
 0xfce   :  { %v8932_v45 = vpop.eup %8931  ;;  %v9204_v14 = vld [vmem:[#allocation8 + $0x18] sm:$0xff] }
 0xfcf   :  { %v8934_v21 = vpop.eup %8933  ;;  %v4930_v27 = vadd.f32 1.0, %v8932_v45  ;;  %v4943_v28 = vmul.f32 %v4927_v16, %v4879_v38  ;;  %v9205_v16 = vld [vmem:[#allocation8 + $0x10] sm:$0xff] }
 0xfd0   :  { %v8936_v10 = vpop.eup %8935  ;;  %v4926_v7 = vadd.f32 1.0, %v8934_v21  ;;  %v9208_v38 = vld [vmem:[%s11441_s7 + $0x78] sm:$0xff] }
 0xfd1   :  { %v4946_v5 = vmul.f32 %v4930_v27, %v4882_v1  ;;  %v4929_v57 = vadd.f32 1.0, %v8936_v10  ;;  %v8938_v54 = vpop.eup %8937  ;;  %v9200_v1 = vld [vmem:[#allocation8 + $0x30] sm:$0xff]  ;;  %v9201_v27 = vld [vmem:[#allocation8 + $0x28] sm:$0xff]  ;;  %v9203_v10 = vld [vmem:[#allocation3 + $0x38] sm:$0xff] }
 0xfd2   :  { %v8940_v22 = vpop.eup %8939  ;;  %v4925_v12 = vadd.f32 1.0, %v8938_v54  ;;  %v4942_v36 = vmul.f32 %v4926_v7, %v4878_v50  ;;  %v9212_v50 = vld [vmem:[%s11441_s7 + $0x68] sm:$0xff] }
 0xfd3   :  { %v4945_v53 = vmul.f32 %v4929_v57, %v4881_v60  ;;  %v10951_v56 = vadd.f32 %v4946_v5, %v10529_v18  ;;  %v8942_v40 = vpop.eup %8941  ;;  %v4924_v11 = vadd.f32 1.0, %v8940_v22  ;;  %v10962_v18 = vadd.f32 %v4944_v6, %v10540_v35  ;;  %v9206_v5 = vld [vmem:[#allocation8 + $0x8] sm:$0xff]  ;;  %v9207_v60 = vld [vmem:[#allocation8] sm:$0xff] }
 0xfd4   :  { %v4923_v42 = vadd.f32 1.0, %v8942_v40  ;;  %v4941_v45 = vmul.f32 %v4925_v12, %v4877_v17  ;;  %v10974_v35 = vadd.f32 %v4942_v36, %v10552_v37  ;;  %v9210_v6 = vld [vmem:[%s11441_s7 + $0x70] sm:$0xff]  ;;  %v9211_v22 = vld [vmem:[%s11441_s7 + $0xe8] sm:$0xff]  ;;  %v9213_v12 = vld [vmem:[%s11441_s7 + $0xe0] sm:$0xff] }
 0xfd5   :  { %8575 = vmatprep.subr.mxu1 %v10951_v56  ;;  %v10956_v4 = vadd.f32 %v4945_v53, %v10534_v9  ;;  %v10968_v9 = vadd.f32 %v4943_v28, %v10546_v26  ;;  %v4940_v21 = vmul.f32 %v4924_v11, %v4876_v55  ;;  %v9214_v28 = vld [vmem:[%s11441_s7 + $0x60] sm:$0xff]  ;;  %v9215_v40 = vld [vmem:[%s11441_s7 + $0xd8] sm:$0xff]  ;;  %v9217_v36 = vld [vmem:[%s11441_s7 + $0xd0] sm:$0xff] }
 0xfd6   :  { %8576 = vmatpush3.msra.mxu1 %v10951_v56  ;;  %v4939_v20 = vmul.f32 %v4923_v42, %v4875_v59  ;;  %v10979_v47 = vadd.f32 %v4941_v45, %v10557_v62  ;;  %v9197_v62 = vld [vmem:[#allocation3 + $0x28] sm:$0xff]  ;;  %v9216_v11 = vld [vmem:[%s11441_s7 + $0x58] sm:$0xff]  ;;  %v9221_v45 = vld [vmem:[%s11441_s7 + $0xc0] sm:$0xff] }
 0xfd7   :  { %8577 = vmatprep.subr.mxu1 %v10956_v4  ;;  %v10984_v26 = vadd.f32 %v4940_v21, %v10562_v29  ;;  %v9199_v29 = vld [vmem:[#allocation3 + $0x30] sm:$0xff]  ;;  %v9219_v55 = vld [vmem:[%s11441_s7 + $0xc8] sm:$0xff]  ;;  %v9222_v21 = vld [vmem:[%s11441_s7 + $0x40] sm:$0xff] }
 0xfd8   :  { %8578 = vmatpush3.msra.mxu1 %v10956_v4  ;;  %v10989_v37 = vadd.f32 %v4939_v20, %v10567_v49  ;;  %v9202_v49 = vld [vmem:[#allocation8 + $0x20] sm:$0xff]  ;;  %v9218_v17 = vld [vmem:[%s11441_s7 + $0x50] sm:$0xff]  ;;  %v9223_v59 = vld [vmem:[%s11441_s7 + $0xb8] sm:$0xff] }
 0xfd9   :  { %8579 = vmatprep.subr.mxu1 %v10962_v18  ;;  %v9220_v42 = vld [vmem:[%s11441_s7 + $0x48] sm:$0xff]  ;;  %v9224_v20 = vld [vmem:[%s11441_s7 + $0x38] sm:$0xff] }
 0xfda   :  { %8580 = vmatpush3.msra.mxu1 %v10962_v18 }
 0xfdb   :  { %8581 = vmatprep.subr.mxu1 %v10968_v9 }
 0xfdc   :  { %8582 = vmatpush3.msra.mxu1 %v10968_v9 }
 0xfdd   :  { %8583 = vmatprep.subr.mxu1 %v10974_v35 }
 0xfde   :  { %8584 = vmatpush3.msra.mxu1 %v10974_v35 }
 0xfdf   :  { %8585 = vmatprep.subr.mxu1 %v10979_v47 }
 0xfe0   :  { %8586 = vmatpush3.msra.mxu1 %v10979_v47 }
 0xfe1   :  { %8587 = vmatprep.subr.mxu1 %v10984_v26 }
 0xfe2   :  { %8588 = vmatpush3.msra.mxu1 %v10984_v26 }
 0xfe3   :  { %8589 = vmatprep.subr.mxu1 %v10989_v37 }
 0xfe4   :  { %8590 = vmatpush3.msra.mxu1 %v10989_v37 }
 0xfe5   :  { %8592 = vmatmul.mubr.msk.f32.vlgmr.msra.gmra.mxu1 %vm420_vm0, %v9197_v62  ;;  %5294 = vmatprep.subr.mxu1 %v9198_v8  ;;  %v9225_v62 = vld [vmem:[%s11441_s7 + $0xb0] sm:$0xff] }
 0xfe6   :  { %8594 = vmatprep.mubr.msk.f32.mxu1 %vm420_vm0, %v9199_v29  ;;  %5295 = vmatpush1.msra.mxu1 %v9200_v1  ;;  %v9226_v8 = vld [vmem:[%s11441_s7 + $0x30] sm:$0xff]  ;;  %v9227_v29 = vld [vmem:[%s11441_s7 + $0xa8] sm:$0xff] }
 0xfe7   :  { %5296 = vmatprep.subr.mxu1 %v9201_v27  ;;  %v9228_v27 = vld [vmem:[%s11441_s7 + $0x28] sm:$0xff] }
 0xfe8   :  { %5297 = vmatpush1.msra.mxu1 %v9202_v49  ;;  %v9229_v49 = vld [vmem:[%s11441_s7 + $0xa0] sm:$0xff] }
 0xfe9   :  { %8595 = vmatmul.mubr.msk.f32.gmra.mxu1 %vm420_vm0, %v9203_v10  ;;  %5298 = vmatprep.subr.mxu1 %v9204_v14  ;;  %v9230_v14 = vld [vmem:[%s11441_s7 + $0x20] sm:$0xff]  ;;  %vm6921_vm0 = vcmask 1048512  }
 0xfea   :  { %5299 = vmatpush1.msra.mxu1 %v9205_v16  ;;  %5334 = vmatprep.mubr.f32.mxu1 %v11459_v33 }
 0xfeb   :  { %5300 = vmatprep.subr.mxu1 %v9206_v5  ;;  %v9231_v5 = vld [vmem:[%s11441_s7 + $0x98] sm:$0xff] }
 0xfec   :  { %5301 = vmatpush1.msra.mxu1 %v9207_v60  ;;  %v9232_v60 = vld [vmem:[%s11441_s7 + $0x18] sm:$0xff] }
 0xfed   :  { %7969 = vmatprep.subr.mxu1 %v10945_v34  ;;  %v9209_v34 = vld [vmem:[%s11441_s7 + $0xf0] sm:$0xff] }
0x1085   :  { %v8571_v57 = vpop.f32.mrf.mxu0 }
0x1087   :  { %v5029_v54 = vpop.f32.mrf.mxu0 }
0x1088   :  { %7195 = vmatmul.mubr.msk.f32.vlgmr.msra.gmra.mxu0 %vm620_vm1, %v5029_v54  ;;  %7203 = vmatmul.mubr.msk.f32.vlgmr.msra.gmra.mxu1 %vm620_vm1, %v5029_v54  ;;  %v9233_v54 = vld [vmem:[%s11441_s7 + $0x90] sm:$0xff] }
0x1089   :  { %5227 = vmatprep.mubr.f32.mxu0 %v11459_v33  ;;  %5340 = vmatprep.mubr.f32.mxu1 %v11459_v33  ;;  %v8574_v7 = vpop.f32.mrf.mxu0 }
0x108a   :  { %7914 = vmatpush3.msra.mxu0 %v9208_v38  ;;  %7970 = vmatpush3.msra.mxu1 %v9208_v38  ;;  %v9234_v38 = vld [vmem:[%s11441_s7 + $0x10] sm:$0xff] }
0x108b   :  { %7915 = vmatprep.subr.mxu0 %v9209_v34  ;;  %7971 = vmatprep.subr.mxu1 %v9209_v34  ;;  %v5039_v53 = vpop.f32.mrf.mxu0  ;;  %v9236_v34 = vld [vmem:[%s11441_s7 + $0x8] sm:$0xff] }
0x108c   :  { %7196 = vmatmul.mubr.msk.f32.gmra.mxu0 %vm620_vm1, %v8571_v57  ;;  %7204 = vmatmul.mubr.msk.f32.gmra.mxu1 %vm620_vm1, %v8571_v57 }
0x108d   :  { %5233 = vmatprep.mubr.f32.mxu0 %v11459_v33  ;;  %5346 = vmatprep.mubr.f32.mxu1 %v11459_v33 }
0x108e   :  { %7916 = vmatpush3.msra.mxu0 %v9210_v6  ;;  %7972 = vmatpush3.msra.mxu1 %v9210_v6  ;;  %v9238_v6 = vld [vmem:[%s11441_s7] sm:$0xff] }
0x108f   :  { %7917 = vmatprep.subr.mxu0 %v9211_v22  ;;  %7973 = vmatprep.subr.mxu1 %v9211_v22 }
0x1090   :  { %7197 = vmatmul.mubr.msk.f32.gmra.mxu0 %vm620_vm1, %v5039_v53  ;;  %7205 = vmatmul.mubr.msk.f32.gmra.mxu1 %vm620_vm1, %v5039_v53 }
0x1091   :  { %5239 = vmatprep.mubr.f32.mxu0 %v11459_v33  ;;  %5352 = vmatprep.mubr.f32.mxu1 %v11459_v33 }
0x1092   :  { %7918 = vmatpush3.msra.mxu0 %v9212_v50  ;;  %7974 = vmatpush3.msra.mxu1 %v9212_v50 }
0x1093   :  { %7919 = vmatprep.subr.mxu0 %v9213_v12  ;;  %7975 = vmatprep.subr.mxu1 %v9213_v12 }
0x1094   :  { %7198 = vmatmul.mubr.msk.f32.gmra.mxu0 %vm620_vm1, %v8574_v7  ;;  %7206 = vmatmul.mubr.msk.f32.gmra.mxu1 %vm620_vm1, %v8574_v7  ;;  %v9235_v7 = vld [vmem:[%s11441_s7 + $0x88] sm:$0xff] }
0x1095   :  { %5245 = vmatprep.mubr.f32.mxu0 %v11459_v33  ;;  %5358 = vmatprep.mubr.f32.mxu1 %v11459_v33 }
0x1096   :  { %7920 = vmatpush3.msra.mxu0 %v9214_v28  ;;  %7976 = vmatpush3.msra.mxu1 %v9214_v28  ;;  %v9239_v28 = vld [vmem:[%s11440_s6 + $0x8] sm:$0xff] }
0x1097   :  { %7921 = vmatprep.subr.mxu0 %v9215_v40  ;;  %7977 = vmatprep.subr.mxu1 %v9215_v40 }
0x1098   :  { %7922 = vmatpush3.msra.mxu0 %v9216_v11  ;;  %7978 = vmatpush3.msra.mxu1 %v9216_v11 }
0x1099   :  { %7923 = vmatprep.subr.mxu0 %v9217_v36  ;;  %7979 = vmatprep.subr.mxu1 %v9217_v36  ;;  %v9240_v36 = vld [vmem:[%s11440_s6] sm:$0xff] }
0x109a   :  { %7924 = vmatpush3.msra.mxu0 %v9218_v17  ;;  %7980 = vmatpush3.msra.mxu1 %v9218_v17 }
0x109b   :  { %7925 = vmatprep.subr.mxu0 %v9219_v55  ;;  %7981 = vmatprep.subr.mxu1 %v9219_v55 }
0x109c   :  { %7926 = vmatpush3.msra.mxu0 %v9220_v42  ;;  %7982 = vmatpush3.msra.mxu1 %v9220_v42 }
0x109d   :  { %7927 = vmatprep.subr.mxu0 %v9221_v45  ;;  %7983 = vmatprep.subr.mxu1 %v9221_v45 }
0x109e   :  { %7928 = vmatpush3.msra.mxu0 %v9222_v21  ;;  %7984 = vmatpush3.msra.mxu1 %v9222_v21 }
0x109f   :  { %7929 = vmatprep.subr.mxu0 %v9223_v59  ;;  %7985 = vmatprep.subr.mxu1 %v9223_v59 }
0x10a0   :  { %7930 = vmatpush3.msra.mxu0 %v9224_v20  ;;  %7986 = vmatpush3.msra.mxu1 %v9224_v20  ;;  %v9241_v20 = vld [vmem:[%s11440_s6 + $0x18] sm:$0xff] }
0x10a1   :  { %7931 = vmatprep.subr.mxu0 %v9225_v62  ;;  %7987 = vmatprep.subr.mxu1 %v9225_v62 }
0x10a2   :  { %7932 = vmatpush3.msra.mxu0 %v9226_v8  ;;  %7988 = vmatpush3.msra.mxu1 %v9226_v8 }
0x10a3   :  { %7933 = vmatprep.subr.mxu0 %v9227_v29  ;;  %7989 = vmatprep.subr.mxu1 %v9227_v29  ;;  %v9242_v29 = vld [vmem:[%s11440_s6 + $0x10] sm:$0xff] }
0x10a4   :  { %7934 = vmatpush3.msra.mxu0 %v9228_v27  ;;  %7990 = vmatpush3.msra.mxu1 %v9228_v27 }
0x10a5   :  { %v8593_v1 = vpop.f32.mrf.mxu1  ;;  %7935 = vmatprep.subr.mxu0 %v9229_v49  ;;  %7991 = vmatprep.subr.mxu1 %v9229_v49 }
0x10a6   :  { %7936 = vmatpush3.msra.mxu0 %v9230_v14  ;;  %7992 = vmatpush3.msra.mxu1 %v9230_v14 }
0x10a7   :  { %v5114_v10 = vpop.f32.mrf.mxu1  ;;  %7937 = vmatprep.subr.mxu0 %v9231_v5  ;;  %7993 = vmatprep.subr.mxu1 %v9231_v5  ;;  %v9243_v5 = vld [vmem:[%s11440_s6 + $0x28] sm:$0xff] }
0x10a8   :  { %7199 = vmatmul.mubr.msk.f32.gmra.mxu0 %vm620_vm1, %v5114_v10  ;;  %7207 = vmatmul.mubr.msk.f32.gmra.mxu1 %vm620_vm1, %v5114_v10 }
0x10a9   :  { %5251 = vmatprep.mubr.f32.mxu0 %v11459_v33  ;;  %5364 = vmatprep.mubr.f32.mxu1 %v11459_v33  ;;  %v8596_v16 = vpop.f32.mrf.mxu1 }
0x10aa   :  { %7938 = vmatpush3.msra.mxu0 %v9232_v60  ;;  %7994 = vmatpush3.msra.mxu1 %v9232_v60 }
0x10ab   :  { %v5124_v57 = vpop.f32.mrf.mxu1  ;;  %7939 = vmatprep.subr.mxu0 %v9233_v54  ;;  %7995 = vmatprep.subr.mxu1 %v9233_v54  ;;  %v9244_v54 = vld [vmem:[%s11440_s6 + $0x20] sm:$0xff] }
0x10ac   :  { %7200 = vmatmul.mubr.msk.f32.gmra.mxu0 %vm620_vm1, %v8593_v1  ;;  %7208 = vmatmul.mubr.msk.f32.gmra.mxu1 %vm620_vm1, %v8593_v1 }
0x10ad   :  { %5257 = vmatprep.mubr.f32.mxu0 %v11459_v33  ;;  %5370 = vmatprep.mubr.f32.mxu1 %v11459_v33 }
0x10ae   :  { %7940 = vmatpush3.msra.mxu0 %v9234_v38  ;;  %7996 = vmatpush3.msra.mxu1 %v9234_v38 }
0x10af   :  { %7941 = vmatprep.subr.mxu0 %v9235_v7  ;;  %7997 = vmatprep.subr.mxu1 %v9235_v7 }
0x10b0   :  { %7201 = vmatmul.mubr.msk.f32.gmra.mxu0 %vm620_vm1, %v5124_v57  ;;  %7209 = vmatmul.mubr.msk.f32.gmra.mxu1 %vm620_vm1, %v5124_v57 }
0x10b1   :  { %5263 = vmatprep.mubr.f32.mxu0 %v11459_v33  ;;  %5376 = vmatprep.mubr.f32.mxu1 %v11459_v33  ;;  %v9237_v33 = vld [vmem:[%s11441_s7 + $0x80] sm:$0xff] }
0x10b2   :  { %7942 = vmatpush3.msra.mxu0 %v9236_v34  ;;  %7998 = vmatpush3.msra.mxu1 %v9236_v34 }
0x10b3   :  { %7943 = vmatprep.subr.mxu0 %v9237_v33  ;;  %7999 = vmatprep.subr.mxu1 %v9237_v33 }
0x10b4   :  { %7202 = vmatmul.mubr.msk.f32.gmra.mxu0 %vm620_vm1, %v8596_v16  ;;  %7210 = vmatmul.mubr.msk.f32.gmra.mxu1 %vm620_vm1, %v8596_v16 }
0x10b5   :  { %7944 = vmatpush3.msra.mxu0 %v9238_v6  ;;  %8000 = vmatpush3.msra.mxu1 %v9238_v6 }
0x1148   :  { %v5223_v53 = vpop.f32.mrf.mxu0  ;;  %v5336_v22 = vpop.f32.mrf.mxu1 }
0x1149   :  { %v5383_v17 = vmul.f32 %v9240_v36, %v5223_v53  ;;  %v5504_v55 = vmul.f32 %v9240_v36, %v5336_v22  ;;  %v9245_v22 = vld [vmem:[%s11440_s6 + $0x38] sm:$0xff] }
0x114a   :  { %v5225_v50 = vpop.f32.mrf.mxu0  ;;  %v5338_v12 = vpop.f32.mrf.mxu1 }
0x114b   :  { %v5384_v40 = vmul.f32 %v9239_v28, %v5225_v50  ;;  %v5505_v11 = vmul.f32 %v9239_v28, %v5338_v12  ;;  %v9246_v28 = vld [vmem:[%s11440_s6 + $0x30] sm:$0xff] }
0x114c   :  { %v5229_v42 = vpop.f32.mrf.mxu0  ;;  %v5342_v45 = vpop.f32.mrf.mxu1 }
0x114d   :  { %5463 = vmatprep.mubr.f32.mxu0 %v5384_v40  ;;  %5584 = vmatprep.mubr.f32.mxu1 %v5505_v11  ;;  %v5385_v1 = vmul.f32 %v9242_v29, %v5229_v42  ;;  %v5506_v27 = vmul.f32 %v9242_v29, %v5342_v45 }
0x114e   :  { %v5231_v21 = vpop.f32.mrf.mxu0  ;;  %v5344_v59 = vpop.f32.mrf.mxu1  ;;  %5464 = vmatmul.mubr.f32.vlgmr.msra.gmra.mxu0 %v5383_v17  ;;  %5585 = vmatmul.mubr.f32.vlgmr.msra.gmra.mxu1 %v5504_v55  ;;  %v9247_v55 = vld [vmem:[%s11440_s6 + $0x40] sm:$0xff] }
0x114f   :  { %v5386_v62 = vmul.f32 %v9241_v20, %v5231_v21  ;;  %v5507_v8 = vmul.f32 %v9241_v20, %v5344_v59  ;;  %v9248_v20 = vld [vmem:[%s11440_s6 + $0x48] sm:$0xff] }
0x1150   :  { %v5235_v49 = vpop.f32.mrf.mxu0  ;;  %v5348_v10 = vpop.f32.mrf.mxu1 }
0x1151   :  { %5468 = vmatprep.mubr.f32.mxu0 %v5386_v62  ;;  %5589 = vmatprep.mubr.f32.mxu1 %v5507_v8  ;;  %v5387_v38 = vmul.f32 %v9244_v54, %v5235_v49  ;;  %v5508_v7 = vmul.f32 %v9244_v54, %v5348_v10 }
0x1152   :  { %v5237_v14 = vpop.f32.mrf.mxu0  ;;  %v5350_v16 = vpop.f32.mrf.mxu1  ;;  %5469 = vmatmul.mubr.f32.gmra.mxu0 %v5385_v1  ;;  %5590 = vmatmul.mubr.f32.gmra.mxu1 %v5506_v27  ;;  %v9249_v27 = vld [vmem:[%s11440_s6 + $0x50] sm:$0xff] }
0x1153   :  { %v5388_v60 = vmul.f32 %v9243_v5, %v5237_v14  ;;  %v5509_v57 = vmul.f32 %v9243_v5, %v5350_v16  ;;  %v9250_v5 = vld [vmem:[%s11440_s6 + $0x58] sm:$0xff] }
0x1154   :  { %v5241_v34 = vpop.f32.mrf.mxu0  ;;  %v5354_v33 = vpop.f32.mrf.mxu1 }
0x1155   :  { %5473 = vmatprep.mubr.f32.mxu0 %v5388_v60  ;;  %5594 = vmatprep.mubr.f32.mxu1 %v5509_v57  ;;  %v5389_v40 = vmul.f32 %v9246_v28, %v5241_v34  ;;  %v5510_v11 = vmul.f32 %v9246_v28, %v5354_v33 }
0x1156   :  { %v5243_v6 = vpop.f32.mrf.mxu0  ;;  %v5356_v53 = vpop.f32.mrf.mxu1  ;;  %5474 = vmatmul.mubr.f32.gmra.mxu0 %v5387_v38  ;;  %5595 = vmatmul.mubr.f32.gmra.mxu1 %v5508_v7  ;;  %v9251_v7 = vld [vmem:[%s11440_s6 + $0x60] sm:$0xff] }
0x1157   :  { %v5390_v50 = vmul.f32 %v9245_v22, %v5243_v6  ;;  %v5511_v12 = vmul.f32 %v9245_v22, %v5356_v53  ;;  %v9252_v22 = vld [vmem:[%s11440_s6 + $0x68] sm:$0xff] }
0x1159   :  { %5478 = vmatprep.mubr.f32.mxu0 %v5390_v50  ;;  %5599 = vmatprep.mubr.f32.mxu1 %v5511_v12 }
0x115a   :  { %5479 = vmatmul.mubr.f32.gmra.mxu0 %v5389_v40  ;;  %5600 = vmatmul.mubr.f32.gmra.mxu1 %v5510_v11  ;;  %v9253_v11 = vld [vmem:[%s11440_s6 + $0x70] sm:$0xff] }
0x1168   :  { %v5247_v36 = vpop.f32.mrf.mxu0  ;;  %v5360_v17 = vpop.f32.mrf.mxu1 }
0x1169   :  { %v5391_v42 = vmul.f32 %v9247_v55, %v5247_v36  ;;  %v5512_v45 = vmul.f32 %v9247_v55, %v5360_v17 }
0x116a   :  { %v5249_v21 = vpop.f32.mrf.mxu0  ;;  %v5362_v59 = vpop.f32.mrf.mxu1 }
0x116b   :  { %v5392_v62 = vmul.f32 %v9248_v20, %v5249_v21  ;;  %v5513_v8 = vmul.f32 %v9248_v20, %v5362_v59 }
0x116c   :  { %v5253_v29 = vpop.f32.mrf.mxu0  ;;  %v5366_v1 = vpop.f32.mrf.mxu1 }
0x116d   :  { %5483 = vmatprep.mubr.f32.mxu0 %v5392_v62  ;;  %5604 = vmatprep.mubr.f32.mxu1 %v5513_v8  ;;  %v5393_v49 = vmul.f32 %v9249_v27, %v5253_v29  ;;  %v5514_v10 = vmul.f32 %v9249_v27, %v5366_v1 }
0x116e   :  { %v5255_v14 = vpop.f32.mrf.mxu0  ;;  %v5368_v16 = vpop.f32.mrf.mxu1  ;;  %5484 = vmatmul.mubr.f32.gmra.mxu0 %v5391_v42  ;;  %5605 = vmatmul.mubr.f32.gmra.mxu1 %v5512_v45  ;;  %v9254_v45 = vld [vmem:[%s11440_s6 + $0x78] sm:$0xff] }
0x116f   :  { %v5394_v60 = vmul.f32 %v9250_v5, %v5255_v14  ;;  %v5515_v57 = vmul.f32 %v9250_v5, %v5368_v16 }
0x1170   :  { %v5259_v54 = vpop.f32.mrf.mxu0  ;;  %v5372_v38 = vpop.f32.mrf.mxu1 }
0x1171   :  { %5488 = vmatprep.mubr.f32.mxu0 %v5394_v60  ;;  %5609 = vmatprep.mubr.f32.mxu1 %v5515_v57  ;;  %v5395_v34 = vmul.f32 %v9251_v7, %v5259_v54  ;;  %v5516_v33 = vmul.f32 %v9251_v7, %v5372_v38 }
0x1172   :  { %v5261_v6 = vpop.f32.mrf.mxu0  ;;  %v5374_v53 = vpop.f32.mrf.mxu1  ;;  %5489 = vmatmul.mubr.f32.gmra.mxu0 %v5393_v49  ;;  %5610 = vmatmul.mubr.f32.gmra.mxu1 %v5514_v10 }
0x1173   :  { %v5396_v50 = vmul.f32 %v9252_v22, %v5261_v6  ;;  %v5517_v12 = vmul.f32 %v9252_v22, %v5374_v53 }
0x1174   :  { %v5265_v28 = vpop.f32.mrf.mxu0  ;;  %v5378_v40 = vpop.f32.mrf.mxu1 }
0x1175   :  { %5493 = vmatprep.mubr.f32.mxu0 %v5396_v50  ;;  %5614 = vmatprep.mubr.f32.mxu1 %v5517_v12  ;;  %v5397_v36 = vmul.f32 %v9253_v11, %v5265_v28  ;;  %v5518_v17 = vmul.f32 %v9253_v11, %v5378_v40 }
0x1176   :  { %v5267_v55 = vpop.f32.mrf.mxu0  ;;  %v5380_v42 = vpop.f32.mrf.mxu1  ;;  %5494 = vmatmul.mubr.f32.gmra.mxu0 %v5395_v34  ;;  %5615 = vmatmul.mubr.f32.gmra.mxu1 %v5516_v33 }
0x1177   :  { %v5398_v21 = vmul.f32 %v9254_v45, %v5267_v55  ;;  %v5519_v59 = vmul.f32 %v9254_v45, %v5380_v42 }
0x1179   :  { %5498 = vmatprep.mubr.f32.mxu0 %v5398_v21  ;;  %5619 = vmatprep.mubr.f32.mxu1 %v5519_v59 }
0x117a   :  { %5499 = vmatmul.mubr.f32.gmra.mxu0 %v5397_v36  ;;  %5620 = vmatmul.mubr.f32.gmra.mxu1 %v5518_v17  ;;  %v7230_v36 = vld [vmem:[%s11442_s8 + $0x78] sm:$0xff]  ;;  %v7229_v17 = vld [vmem:[%s11442_s8 + $0x70] sm:$0xff] }
0x117b   :  { %8605 = vmatprep.mubr.msk.f32.mxu0 %vm620_vm1, %v9872_v0  ;;  %8625 = vmatprep.mubr.msk.f32.mxu1 %vm620_vm1, %v9876_v2 }
0x120e   :  { %v7945_v20 = vpop.f32.mrf.mxu0  ;;  %v8001_v62 = vpop.f32.mrf.mxu1 }
0x1210   :  { %v7946_v8 = vpop.f32.mrf.mxu0  ;;  %v8002_v29 = vpop.f32.mrf.mxu1 }
0x1211   :  { %v8003_v22 = vadd.f32 %v8002_v29, %v8001_v62  ;;  %v7947_v28 = vadd.f32 %v7946_v8, %v7945_v20 }
0x1212   :  { %v7948_v1 = vpop.f32.mrf.mxu0  ;;  %v8004_v27 = vpop.f32.mrf.mxu1 }
0x1214   :  { %v7949_v49 = vpop.f32.mrf.mxu0  ;;  %v8005_v10 = vpop.f32.mrf.mxu1 }
0x1215   :  { %v7950_v2 = vadd.f32 %v7949_v49, %v7948_v1  ;;  %v8006_v50 = vadd.f32 %v8005_v10, %v8004_v27 }
0x1216   :  { %v7951_v14 = vpop.f32.mrf.mxu0  ;;  %v8007_v16 = vpop.f32.mrf.mxu1 }
0x1217   :  { %v5626_v40 = vadd.f32 %v8003_v22, %v7950_v2  ;;  %v5625_v11 = vsub.f32 %v7947_v28, %v8006_v50 }
0x1218   :  { %v7952_v5 = vpop.f32.mrf.mxu0  ;;  %v8008_v60 = vpop.f32.mrf.mxu1 }
0x1219   :  { %v8009_v0 = vadd.f32 %v8008_v60, %v8007_v16  ;;  %v7953_v6 = vadd.f32 %v7952_v5, %v7951_v14 }
0x121a   :  { %v7954_v57 = vpop.f32.mrf.mxu0  ;;  %v8010_v54 = vpop.f32.mrf.mxu1 }
0x121c   :  { %v7955_v38 = vpop.f32.mrf.mxu0  ;;  %v8011_v7 = vpop.f32.mrf.mxu1 }
0x121d   :  { %v7956_v34 = vadd.f32 %v7955_v38, %v7954_v57  ;;  %v8012_v33 = vadd.f32 %v8011_v7, %v8010_v54 }
0x121f   :  { %v5628_v53 = vadd.f32 %v8009_v0, %v7956_v34  ;;  %v5627_v12 = vsub.f32 %v7953_v6, %v8012_v33  ;;  %v11461_v0 = vld [vmem:[#allocation16_spill] sm:$0xff] }
0x1221   :  { %8597 = vmatprep.subr.mxu0 %v5628_v53 }
0x1222   :  { %8598 = vmatpush3.msra.mxu0 %v5628_v53 }
0x1223   :  { %8599 = vmatprep.subr.mxu0 %v5627_v12 }
0x1224   :  { %8600 = vmatpush3.msra.mxu0 %v5627_v12 }
0x1225   :  { %8601 = vmatprep.subr.mxu0 %v5626_v40 }
0x1226   :  { %8602 = vmatpush3.msra.mxu0 %v5626_v40 }
0x1227   :  { %8603 = vmatprep.subr.mxu0 %v5625_v11 }
0x1228   :  { %8604 = vmatpush3.msra.mxu0 %v5625_v11 }
0x1229   :  { %8606 = vmatmul.mubr.msk.f32.vlgmr.msra.gmra.mxu0 %vm620_vm1, %v9880_v3  ;;  %8637 = vmatprep.subr.mxu0 %v7230_v36 }
0x122a   :  { %8608 = vmatprep.mubr.msk.f32.mxu0 %vm620_vm1, %v9882_v13  ;;  %8638 = vmatpush3.msra.mxu0 %v7230_v36 }
0x122b   :  { %8639 = vmatprep.subr.mxu0 %v7229_v17 }
0x122c   :  { %8640 = vmatpush3.msra.mxu0 %v7229_v17  ;;  %v7252_v17 = vld [vmem:[%s11444_s10 + $0x78] sm:$0xff] }
0x122d   :  { %8609 = vmatmul.mubr.msk.f32.gmra.mxu0 %vm620_vm1, %v9884_v19 }
0x122e   :  { %v7957_v55 = vpop.f32.mrf.mxu0  ;;  %v8013_v42 = vpop.f32.mrf.mxu1  ;;  %8611 = vmatprep.mubr.msk.f32.mxu0 %vm620_vm1, %v9886_v39 }
0x1230   :  { %v7958_v45 = vpop.f32.mrf.mxu0  ;;  %v8014_v21 = vpop.f32.mrf.mxu1 }
0x1231   :  { %8612 = vmatmul.mubr.msk.f32.gmra.mxu0 %vm620_vm1, %v9888_v46 }
0x1232   :  { %v7960_v3 = vpop.f32.mrf.mxu0  ;;  %v8016_v59 = vpop.f32.mrf.mxu1  ;;  %8614 = vmatprep.mubr.msk.f32.mxu0 %vm620_vm1, %v9900_v51  ;;  %v8015_v51 = vadd.f32 %v8014_v21, %v8013_v42  ;;  %v7250_v42 = vld [vmem:[%s11444_s10 + $0x68] sm:$0xff]  ;;  %v11245_v21 = vld [vmem:[%s11443_s9 + $0x3] ss:$0 sm:$0xff] }
0x1234   :  { %v7961_v13 = vpop.f32.mrf.mxu0  ;;  %v8017_v20 = vpop.f32.mrf.mxu1 }
0x1235   :  { %8615 = vmatmul.mubr.msk.f32.gmra.mxu0 %vm620_vm1, %v9910_v58  ;;  %v7962_v16 = vadd.f32 %v7961_v13, %v7960_v3  ;;  %v8018_v57 = vadd.f32 %v8017_v20, %v8016_v59  ;;  %v7959_v58 = vadd.f32 %v7958_v45, %v7957_v55  ;;  %v7251_v55 = vld [vmem:[%s11444_s10 + $0x70] sm:$0xff]  ;;  %v7249_v45 = vld [vmem:[%s11444_s10 + $0x60] sm:$0xff] }
0x1236   :  { %v7963_v19 = vpop.f32.mrf.mxu0  ;;  %v8019_v62 = vpop.f32.mrf.mxu1 }
0x1237   :  { %v5735_v38 = vadd.f32 %v8015_v51, %v7962_v16  ;;  %v5734_v7 = vsub.f32 %v7959_v58, %v8018_v57 }
0x1238   :  { %v7964_v8 = vpop.f32.mrf.mxu0  ;;  %v8020_v29 = vpop.f32.mrf.mxu1 }
0x1239   :  { %v8021_v10 = vadd.f32 %v8020_v29, %v8019_v62  ;;  %v7965_v5 = vadd.f32 %v7964_v8, %v7963_v19 }
0x123a   :  { %v7966_v39 = vpop.f32.mrf.mxu0  ;;  %v8022_v1 = vpop.f32.mrf.mxu1 }
0x123c   :  { %v7967_v27 = vpop.f32.mrf.mxu0  ;;  %v8023_v49 = vpop.f32.mrf.mxu1 }
0x123d   :  { %v7968_v46 = vadd.f32 %v7967_v27, %v7966_v39  ;;  %v8024_v14 = vadd.f32 %v8023_v49, %v8022_v1 }
0x123f   :  { %v5737_v60 = vadd.f32 %v8021_v10, %v7968_v46  ;;  %v5736_v54 = vsub.f32 %v7965_v5, %v8024_v14 }
0x1241   :  { %8617 = vmatprep.subr.mxu1 %v5737_v60 }
0x1242   :  { %8618 = vmatpush3.msra.mxu1 %v5737_v60 }
0x1243   :  { %8619 = vmatprep.subr.mxu1 %v5736_v54 }
0x1244   :  { %8620 = vmatpush3.msra.mxu1 %v5736_v54 }
0x1245   :  { %8621 = vmatprep.subr.mxu1 %v5735_v38 }
0x1246   :  { %8622 = vmatpush3.msra.mxu1 %v5735_v38 }
0x1247   :  { %8623 = vmatprep.subr.mxu1 %v5734_v7 }
0x1248   :  { %8624 = vmatpush3.msra.mxu1 %v5734_v7 }
0x1249   :  { %8626 = vmatmul.mubr.msk.f32.vlgmr.msra.gmra.mxu1 %vm620_vm1, %v9904_v25  ;;  %v7228_v25 = vld [vmem:[%s11442_s8 + $0x68] sm:$0xff]  ;;  %8669 = vmatprep.subr.mxu1 %v7252_v17 }
0x124a   :  { %8628 = vmatprep.mubr.msk.f32.mxu1 %vm620_vm1, %v9914_v63  ;;  %8641 = vmatprep.subr.mxu0 %v7228_v25  ;;  %v7227_v63 = vld [vmem:[%s11442_s8 + $0x60] sm:$0xff] }
0x124b   :  { %8642 = vmatpush3.msra.mxu0 %v7228_v25  ;;  %8670 = vmatpush3.msra.mxu1 %v7252_v17 }
0x124c   :  { %8643 = vmatprep.subr.mxu0 %v7227_v63  ;;  %8671 = vmatprep.subr.mxu1 %v7251_v55 }
0x124d   :  { %8629 = vmatmul.mubr.msk.f32.gmra.mxu1 %vm620_vm1, %v9918_v15  ;;  %8644 = vmatpush3.msra.mxu0 %v7227_v63 }
0x124e   :  { %8631 = vmatprep.mubr.msk.f32.mxu1 %vm620_vm1, %v9920_v24  ;;  %8672 = vmatpush3.msra.mxu1 %v7251_v55 }
0x124f   :  { %8673 = vmatprep.subr.mxu1 %v7250_v42 }
0x1250   :  { %8674 = vmatpush3.msra.mxu1 %v7250_v42 }
0x1251   :  { %8632 = vmatmul.mubr.msk.f32.gmra.mxu1 %vm620_vm1, %v9922_v43  ;;  %8675 = vmatprep.subr.mxu1 %v7249_v45 }
0x1252   :  { %8634 = vmatprep.mubr.msk.f32.mxu1 %vm620_vm1, %v9928_v30  ;;  %8676 = vmatpush3.msra.mxu1 %v7249_v45 }
0x1255   :  { %8635 = vmatmul.mubr.msk.f32.gmra.mxu1 %vm620_vm1, %v11461_v0 }
0x12e9   :  { %v8607_v15 = vpop.f32.mrf.mxu0 }
0x12eb   :  { %v5695_v24 = vpop.f32.mrf.mxu0 }
0x12ec   :  { %8645 = vmatprep.mubr.msk.f32.mxu0 %vm620_vm1, %v5695_v24 }
0x12ed   :  { %v8610_v43 = vpop.f32.mrf.mxu0  ;;  %8646 = vmatmul.mubr.msk.f32.vlgmr.msra.gmra.mxu0 %vm620_vm1, %v8607_v15 }
0x12ef   :  { %v5705_v30 = vpop.f32.mrf.mxu0 }
0x12f0   :  { %8648 = vmatprep.mubr.msk.f32.mxu0 %vm620_vm1, %v5705_v30 }
0x12f1   :  { %v8613_v34 = vpop.f32.mrf.mxu0  ;;  %8649 = vmatmul.mubr.msk.f32.gmra.mxu0 %vm620_vm1, %v8610_v43 }
0x12f3   :  { %v5715_v33 = vpop.f32.mrf.mxu0 }
0x12f4   :  { %8651 = vmatprep.mubr.msk.f32.mxu0 %vm620_vm1, %v5715_v33 }
0x12f5   :  { %v8616_v2 = vpop.f32.mrf.mxu0  ;;  %8652 = vmatmul.mubr.msk.f32.gmra.mxu0 %vm620_vm1, %v8613_v34 }
0x12f7   :  { %v5725_v6 = vpop.f32.mrf.mxu0 }
0x12f8   :  { %8654 = vmatprep.mubr.msk.f32.mxu0 %vm620_vm1, %v5725_v6 }
0x12f9   :  { %8655 = vmatmul.mubr.msk.f32.gmra.mxu0 %vm620_vm1, %v8616_v2 }
0x1309   :  { %v8627_v53 = vpop.f32.mrf.mxu1 }
0x130b   :  { %v5804_v22 = vpop.f32.mrf.mxu1 }
0x130c   :  { %8657 = vmatprep.mubr.msk.f32.mxu0 %vm620_vm1, %v5804_v22 }
0x130d   :  { %v8630_v50 = vpop.f32.mrf.mxu1  ;;  %8658 = vmatmul.mubr.msk.f32.gmra.mxu0 %vm620_vm1, %v8627_v53 }
0x130f   :  { %v5814_v12 = vpop.f32.mrf.mxu1 }
0x1310   :  { %8660 = vmatprep.mubr.msk.f32.mxu0 %vm620_vm1, %v5814_v12 }
0x1311   :  { %v8633_v28 = vpop.f32.mrf.mxu1  ;;  %8661 = vmatmul.mubr.msk.f32.gmra.mxu0 %vm620_vm1, %v8630_v50 }
0x1313   :  { %v5824_v40 = vpop.f32.mrf.mxu1 }
0x1314   :  { %8663 = vmatprep.mubr.msk.f32.mxu0 %vm620_vm1, %v5824_v40 }
0x1315   :  { %v8636_v11 = vpop.f32.mrf.mxu1  ;;  %8664 = vmatmul.mubr.msk.f32.gmra.mxu0 %vm620_vm1, %v8633_v28 }
0x1317   :  { %v5834_v36 = vpop.f32.mrf.mxu1 }
0x1318   :  { %8666 = vmatprep.mubr.msk.f32.mxu0 %vm620_vm1, %v5834_v36 }
0x1319   :  { %8667 = vmatmul.mubr.msk.f32.gmra.mxu0 %vm620_vm1, %v8636_v11 }
0x13ad   :  { %v8647_v3 = vpop.f32.mrf.mxu0 }
0x13ae   :  { %v5976_v59 = vadd.f32 %v8647_v3, %v11245_v21 }
0x13af   :  { %v5970_v13 = vpop.f32.mrf.mxu0 }
0x13b0   :  { %v6066_v20 = vmul.f32 0.70710677, %v5976_v59  ;;  %v5971_v19 = vadd.f32 %v11245_v21, %v5970_v13  ;;  %v6050_v30 = vmul.f32 0.5, %v5976_v59 }
0x13b1   :  { %v8650_v62 = vpop.f32.mrf.mxu0 }
0x13b2   :  { %8943 = verf.f32 %v6066_v20  ;;  %v6065_v8 = vmul.f32 0.70710677, %v5971_v19  ;;  %v5986_v29 = vadd.f32 %v8650_v62, %v11245_v21  ;;  %v6049_v15 = vmul.f32 0.5, %v5971_v19 }
0x13b3   :  { %v5980_v39 = vpop.f32.mrf.mxu0 }
0x13b4   :  { %8945 = verf.f32 %v6065_v8  ;;  %v6068_v1 = vmul.f32 0.70710677, %v5986_v29  ;;  %v5981_v27 = vadd.f32 %v11245_v21, %v5980_v39  ;;  %v6052_v12 = vmul.f32 0.5, %v5986_v29 }
0x13b5   :  { %v8653_v49 = vpop.f32.mrf.mxu0 }
0x13b6   :  { %8947 = verf.f32 %v6068_v1  ;;  %v6067_v10 = vmul.f32 0.70710677, %v5981_v27  ;;  %v5996_v46 = vadd.f32 %v8653_v49, %v11245_v21  ;;  %v6051_v53 = vmul.f32 0.5, %v5981_v27 }
0x13b7   :  { %v5990_v14 = vpop.f32.mrf.mxu0 }
0x13b8   :  { %8949 = verf.f32 %v6067_v10  ;;  %v6070_v16 = vmul.f32 0.70710677, %v5996_v46  ;;  %v5991_v5 = vadd.f32 %v11245_v21, %v5990_v14  ;;  %v6054_v45 = vmul.f32 0.5, %v5996_v46 }
0x13b9   :  { %v8656_v60 = vpop.f32.mrf.mxu0 }
0x13ba   :  { %8951 = verf.f32 %v6070_v16  ;;  %v6069_v51 = vmul.f32 0.70710677, %v5991_v5  ;;  %v6006_v57 = vadd.f32 %v8656_v60, %v11245_v21  ;;  %v6053_v17 = vmul.f32 0.5, %v5991_v5 }
0x13bb   :  { %v6000_v54 = vpop.f32.mrf.mxu0 }
0x13bc   :  { %8953 = verf.f32 %v6069_v51  ;;  %v6072_v58 = vmul.f32 0.70710677, %v6006_v57  ;;  %v6001_v38 = vadd.f32 %v11245_v21, %v6000_v54  ;;  %v6056_v1 = vmul.f32 0.5, %v6006_v57 }
0x13be   :  { %8955 = verf.f32 %v6072_v58  ;;  %v6071_v7 = vmul.f32 0.70710677, %v6001_v38  ;;  %v6055_v8 = vmul.f32 0.5, %v6001_v38 }
0x13bf   :  { %v8944_v0 = vpop.eup %8943 }
0x13c0   :  { %8957 = verf.f32 %v6071_v7  ;;  %v6098_v63 = vadd.f32 1.0, %v8944_v0 }
0x13c1   :  { %v8946_v25 = vpop.eup %8945 }
0x13c2   :  { %v6097_v24 = vadd.f32 1.0, %v8946_v25  ;;  %v6114_v2 = vmul.f32 %v6098_v63, %v6050_v30 }
0x13c3   :  { %v8948_v43 = vpop.eup %8947 }
0x13c4   :  { %v6113_v34 = vmul.f32 %v6097_v24, %v6049_v15  ;;  %v6100_v6 = vadd.f32 1.0, %v8948_v43 }
0x13c5   :  { %v8950_v33 = vpop.eup %8949 }
0x13c6   :  { %v6099_v22 = vadd.f32 1.0, %v8950_v33  ;;  %8677 = vmatprep.mubr.msk.f32.mxu1 %vm620_vm1, %v6113_v34  ;;  %v6116_v11 = vmul.f32 %v6100_v6, %v6052_v12 }
0x13c7   :  { %v8952_v50 = vpop.eup %8951  ;;  %8678 = vmatmul.mubr.msk.f32.vlgmr.msra.gmra.mxu1 %vm620_vm1, %v6114_v2 }
0x13c8   :  { %v6115_v28 = vmul.f32 %v6099_v22, %v6051_v53  ;;  %v6102_v36 = vadd.f32 1.0, %v8952_v50 }
0x13c9   :  { %v8954_v40 = vpop.eup %8953 }
0x13ca   :  { %v6101_v55 = vadd.f32 1.0, %v8954_v40  ;;  %8680 = vmatprep.mubr.msk.f32.mxu1 %vm620_vm1, %v6115_v28  ;;  %v6118_v20 = vmul.f32 %v6102_v36, %v6054_v45 }
0x13cb   :  { %v8956_v42 = vpop.eup %8955  ;;  %8681 = vmatmul.mubr.msk.f32.gmra.mxu1 %vm620_vm1, %v6116_v11 }
0x13cc   :  { %v6117_v3 = vmul.f32 %v6101_v55, %v6053_v17  ;;  %v6104_v19 = vadd.f32 1.0, %v8956_v42 }
0x13cd   :  { %v8659_v59 = vpop.f32.mrf.mxu0  ;;  %v8958_v13 = vpop.eup %8957 }
0x13ce   :  { %v6016_v62 = vadd.f32 %v8659_v59, %v11245_v21  ;;  %v6103_v29 = vadd.f32 1.0, %v8958_v13  ;;  %8683 = vmatprep.mubr.msk.f32.mxu1 %vm620_vm1, %v6117_v3  ;;  %v6120_v14 = vmul.f32 %v6104_v19, %v6056_v1 }
0x13cf   :  { %v6010_v39 = vpop.f32.mrf.mxu0  ;;  %8684 = vmatmul.mubr.msk.f32.gmra.mxu1 %vm620_vm1, %v6118_v20 }
0x13d0   :  { %v6074_v27 = vmul.f32 0.70710677, %v6016_v62  ;;  %v6011_v49 = vadd.f32 %v11245_v21, %v6010_v39  ;;  %v6119_v10 = vmul.f32 %v6103_v29, %v6055_v8  ;;  %v6058_v28 = vmul.f32 0.5, %v6016_v62 }
0x13d1   :  { %v8662_v46 = vpop.f32.mrf.mxu0 }
0x13d2   :  { %8959 = verf.f32 %v6074_v27  ;;  %v6073_v16 = vmul.f32 0.70710677, %v6011_v49  ;;  %v6026_v5 = vadd.f32 %v8662_v46, %v11245_v21  ;;  %8686 = vmatprep.mubr.msk.f32.mxu1 %vm620_vm1, %v6119_v10  ;;  %v6057_v22 = vmul.f32 0.5, %v6011_v49 }
0x13d3   :  { %v6020_v60 = vpop.f32.mrf.mxu0  ;;  %8687 = vmatmul.mubr.msk.f32.gmra.mxu1 %vm620_vm1, %v6120_v14 }
0x13d4   :  { %8961 = verf.f32 %v6073_v16  ;;  %v6076_v51 = vmul.f32 0.70710677, %v6026_v5  ;;  %v6021_v54 = vadd.f32 %v11245_v21, %v6020_v60  ;;  %v6434_v60 = vld [vmem:[#allocation9 + $0x18] sm:$0xff] }
0x13d5   :  { %v8665_v57 = vpop.f32.mrf.mxu0  ;;  %8701 = vmatprep.subr.mxu0 %v6434_v60 }
0x13d6   :  { %8963 = verf.f32 %v6076_v51  ;;  %v6075_v58 = vmul.f32 0.70710677, %v6021_v54  ;;  %v6036_v38 = vadd.f32 %v8665_v57, %v11245_v21  ;;  %v6059_v55 = vmul.f32 0.5, %v6021_v54  ;;  %8702 = vmatpush3.msra.mxu0 %v6434_v60  ;;  %v6433_v51 = vld [vmem:[#allocation9 + $0x10] sm:$0xff]  ;;  %v6432_v54 = vld [vmem:[#allocation9 + $0x8] sm:$0xff]  ;;  %v6431_v57 = vld [vmem:[#allocation9] sm:$0xff] }
0x13d7   :  { %v6030_v7 = vpop.f32.mrf.mxu0  ;;  %8703 = vmatprep.subr.mxu0 %v6433_v51 }
0x13d8   :  { %8965 = verf.f32 %v6075_v58  ;;  %v6078_v0 = vmul.f32 0.70710677, %v6036_v38  ;;  %v6031_v25 = vadd.f32 %v11245_v21, %v6030_v7  ;;  %v6062_v29 = vmul.f32 0.5, %v6036_v38  ;;  %8704 = vmatpush3.msra.mxu0 %v6433_v51  ;;  %v11282_v58 = vld [vmem:[%s11445_s11 + $0x3] ss:$0 sm:$0xff] }
0x13d9   :  { %v8668_v63 = vpop.f32.mrf.mxu0  ;;  %8705 = vmatprep.subr.mxu0 %v6432_v54 }
0x13da   :  { %8967 = verf.f32 %v6078_v0  ;;  %v6077_v15 = vmul.f32 0.70710677, %v6031_v25  ;;  %v6046_v24 = vadd.f32 %v8668_v63, %v11245_v21  ;;  %v6061_v19 = vmul.f32 0.5, %v6031_v25  ;;  %8706 = vmatpush3.msra.mxu0 %v6432_v54 }
0x13db   :  { %v6040_v43 = vpop.f32.mrf.mxu0  ;;  %8707 = vmatprep.subr.mxu0 %v6431_v57 }
0x13dc   :  { %8969 = verf.f32 %v6077_v15  ;;  %v6080_v30 = vmul.f32 0.70710677, %v6046_v24  ;;  %v6041_v34 = vadd.f32 %v11245_v21, %v6040_v43  ;;  %v6060_v21 = vmul.f32 0.5, %v6026_v5  ;;  %8708 = vmatpush3.msra.mxu0 %v6431_v57 }
0x13dd   :  { %v6064_v14 = vmul.f32 0.5, %v6046_v24 }
0x13de   :  { %8971 = verf.f32 %v6080_v30  ;;  %v6079_v33 = vmul.f32 0.70710677, %v6041_v34  ;;  %v6063_v10 = vmul.f32 0.5, %v6041_v34 }
0x13df   :  { %v8960_v2 = vpop.eup %8959 }
0x13e0   :  { %8973 = verf.f32 %v6079_v33  ;;  %v6106_v53 = vadd.f32 1.0, %v8960_v2 }
0x13e1   :  { %v8962_v6 = vpop.eup %8961 }
0x13e2   :  { %v6105_v50 = vadd.f32 1.0, %v8962_v6  ;;  %v6122_v36 = vmul.f32 %v6106_v53, %v6058_v28 }
0x13e3   :  { %v8964_v12 = vpop.eup %8963 }
0x13e4   :  { %v6121_v40 = vmul.f32 %v6105_v50, %v6057_v22  ;;  %v6108_v17 = vadd.f32 1.0, %v8964_v12 }
0x13e5   :  { %v8966_v11 = vpop.eup %8965 }
0x13e6   :  { %v6107_v42 = vadd.f32 1.0, %v8966_v11  ;;  %8689 = vmatprep.mubr.msk.f32.mxu1 %vm620_vm1, %v6121_v40  ;;  %v6124_v13 = vmul.f32 %v6108_v17, %v6060_v21 }
0x13e7   :  { %v8968_v45 = vpop.eup %8967  ;;  %8690 = vmatmul.mubr.msk.f32.gmra.mxu1 %vm620_vm1, %v6122_v36 }
0x13e8   :  { %v6123_v3 = vmul.f32 %v6107_v42, %v6059_v55  ;;  %v6110_v20 = vadd.f32 1.0, %v8968_v45 }
0x13e9   :  { %v8970_v59 = vpop.eup %8969 }
0x13ea   :  { %v6109_v8 = vadd.f32 1.0, %v8970_v59  ;;  %8692 = vmatprep.mubr.msk.f32.mxu1 %vm620_vm1, %v6123_v3  ;;  %v6126_v27 = vmul.f32 %v6110_v20, %v6062_v29 }
0x13eb   :  { %v8972_v62 = vpop.eup %8971  ;;  %8693 = vmatmul.mubr.msk.f32.gmra.mxu1 %vm620_vm1, %v6124_v13 }
0x13ec   :  { %v6125_v39 = vmul.f32 %v6109_v8, %v6061_v19  ;;  %v6112_v49 = vadd.f32 1.0, %v8972_v62 }
0x13ed   :  { %v8974_v1 = vpop.eup %8973 }
0x13ee   :  { %v6111_v46 = vadd.f32 1.0, %v8974_v1  ;;  %8695 = vmatprep.mubr.msk.f32.mxu1 %vm620_vm1, %v6125_v39  ;;  %v6128_v5 = vmul.f32 %v6112_v49, %v6064_v14 }
0x13ef   :  { %8696 = vmatmul.mubr.msk.f32.gmra.mxu1 %vm620_vm1, %v6126_v27 }
0x13f0   :  { %v6127_v16 = vmul.f32 %v6111_v46, %v6063_v10 }
0x13f2   :  { %8698 = vmatprep.mubr.msk.f32.mxu1 %vm620_vm1, %v6127_v16 }
0x13f3   :  { %8699 = vmatmul.mubr.msk.f32.gmra.mxu1 %vm620_vm1, %v6128_v5 }
0x1487   :  { %v8679_v38 = vpop.f32.mrf.mxu1 }
0x1488   :  { %v6262_v7 = vadd.f32 %v8679_v38, %v11282_v58 }
0x1489   :  { %v6256_v0 = vpop.f32.mrf.mxu1 }
0x148a   :  { %v6352_v25 = vmul.f32 0.70710677, %v6262_v7  ;;  %v6257_v63 = vadd.f32 %v11282_v58, %v6256_v0  ;;  %v6336_v59 = vmul.f32 0.5, %v6262_v7 }
0x148b   :  { %v8682_v15 = vpop.f32.mrf.mxu1 }
0x148c   :  { %8975 = verf.f32 %v6352_v25  ;;  %v6351_v24 = vmul.f32 0.70710677, %v6257_v63  ;;  %v6272_v43 = vadd.f32 %v8682_v15, %v11282_v58  ;;  %v6335_v13 = vmul.f32 0.5, %v6257_v63 }
0x148d   :  { %v6266_v30 = vpop.f32.mrf.mxu1 }
0x148e   :  { %8977 = verf.f32 %v6351_v24  ;;  %v6354_v34 = vmul.f32 0.70710677, %v6272_v43  ;;  %v6267_v33 = vadd.f32 %v11282_v58, %v6266_v30  ;;  %v6338_v1 = vmul.f32 0.5, %v6272_v43 }
0x148f   :  { %v8685_v2 = vpop.f32.mrf.mxu1 }
0x1490   :  { %8979 = verf.f32 %v6354_v34  ;;  %v6353_v6 = vmul.f32 0.70710677, %v6267_v33  ;;  %v6282_v53 = vadd.f32 %v8685_v2, %v11282_v58  ;;  %v6337_v49 = vmul.f32 0.5, %v6267_v33 }
0x1491   :  { %v6276_v22 = vpop.f32.mrf.mxu1 }
0x1492   :  { %8981 = verf.f32 %v6353_v6  ;;  %v6356_v50 = vmul.f32 0.70710677, %v6282_v53  ;;  %v6277_v12 = vadd.f32 %v11282_v58, %v6276_v22  ;;  %v6340_v54 = vmul.f32 0.5, %v6282_v53 }
0x1493   :  { %v8688_v28 = vpop.f32.mrf.mxu1 }
0x1494   :  { %8983 = verf.f32 %v6356_v50  ;;  %v6355_v40 = vmul.f32 0.70710677, %v6277_v12  ;;  %v6292_v11 = vadd.f32 %v8688_v28, %v11282_v58  ;;  %v6339_v38 = vmul.f32 0.5, %v6277_v12 }
0x1495   :  { %v6286_v36 = vpop.f32.mrf.mxu1 }
0x1496   :  { %8985 = verf.f32 %v6355_v40  ;;  %v6358_v17 = vmul.f32 0.70710677, %v6292_v11  ;;  %v6287_v55 = vadd.f32 %v11282_v58, %v6286_v36  ;;  %v6342_v43 = vmul.f32 0.5, %v6292_v11 }
0x1498   :  { %8987 = verf.f32 %v6358_v17  ;;  %v6357_v42 = vmul.f32 0.70710677, %v6287_v55 }
0x1499   :  { %v8976_v45 = vpop.eup %8975 }
0x149a   :  { %v6384_v21 = vadd.f32 1.0, %v8976_v45  ;;  %8989 = verf.f32 %v6357_v42 }
0x149b   :  { %v8978_v3 = vpop.eup %8977 }
0x149c   :  { %v6383_v20 = vadd.f32 1.0, %v8978_v3  ;;  %v6400_v8 = vmul.f32 %v6384_v21, %v6336_v59 }
0x149d   :  { %v8980_v19 = vpop.eup %8979 }
0x149e   :  { %v6399_v62 = vmul.f32 %v6383_v20, %v6335_v13  ;;  %v6386_v29 = vadd.f32 1.0, %v8980_v19  ;;  %v6416_v14 = vadd.f32 %v6400_v8, %v10922_v61 }
0x149f   :  { %v8982_v39 = vpop.eup %8981 }
0x14a0   :  { %v6415_v27 = vadd.f32 %v6399_v62, %v10931_v32  ;;  %v6385_v10 = vadd.f32 1.0, %v8982_v39  ;;  %v6402_v16 = vmul.f32 %v6386_v29, %v6338_v1 }
0x14a1   :  { %v8984_v46 = vpop.eup %8983 }
0x14a2   :  { %v6401_v5 = vmul.f32 %v6385_v10, %v6337_v49  ;;  %v6388_v60 = vadd.f32 1.0, %v8984_v46  ;;  %8709 = vmatprep.mubr.msk.f32.mxu0 %vm620_vm1, %v6415_v27  ;;  %v6418_v32 = vadd.f32 %v6402_v16, %v10902_v52 }
0x14a3   :  { %v8986_v51 = vpop.eup %8985  ;;  %8710 = vmatmul.mubr.msk.f32.vlgmr.msra.gmra.mxu0 %vm620_vm1, %v6416_v14 }
0x14a4   :  { %v6417_v57 = vadd.f32 %v6401_v5, %v10913_v31  ;;  %v6387_v7 = vadd.f32 1.0, %v8986_v51  ;;  %v6404_v25 = vmul.f32 %v6388_v60, %v6340_v54  ;;  %v6341_v31 = vmul.f32 0.5, %v6287_v55 }
0x14a5   :  { %v8988_v0 = vpop.eup %8987 }
0x14a6   :  { %v6403_v63 = vmul.f32 %v6387_v7, %v6339_v38  ;;  %v6390_v15 = vadd.f32 1.0, %v8988_v0  ;;  %8712 = vmatprep.mubr.msk.f32.mxu0 %vm620_vm1, %v6417_v57  ;;  %v6420_v6 = vadd.f32 %v6404_v25, %v10882_v48 }
0x14a7   :  { %v8691_v61 = vpop.f32.mrf.mxu1  ;;  %v8990_v24 = vpop.eup %8989  ;;  %8713 = vmatmul.mubr.msk.f32.gmra.mxu0 %vm620_vm1, %v6418_v32 }
0x14a8   :  { %v6302_v30 = vadd.f32 %v8691_v61, %v11282_v58  ;;  %v6419_v34 = vadd.f32 %v6403_v63, %v10893_v23  ;;  %v6389_v33 = vadd.f32 1.0, %v8990_v24  ;;  %v6406_v52 = vmul.f32 %v6390_v15, %v6342_v43 }
0x14a9   :  { %v6296_v2 = vpop.f32.mrf.mxu1 }
0x14aa   :  { %v6360_v53 = vmul.f32 0.70710677, %v6302_v30  ;;  %v6297_v22 = vadd.f32 %v11282_v58, %v6296_v2  ;;  %v6405_v50 = vmul.f32 %v6389_v33, %v6341_v31  ;;  %8715 = vmatprep.mubr.msk.f32.mxu0 %vm620_vm1, %v6419_v34  ;;  %v6422_v36 = vadd.f32 %v6406_v52, %v10873_v41 }
0x14ab   :  { %v8694_v12 = vpop.f32.mrf.mxu1  ;;  %8716 = vmatmul.mubr.msk.f32.gmra.mxu0 %vm620_vm1, %v6420_v6  ;;  %v6344_v27 = vmul.f32 0.5, %v6302_v30 }
0x14ac   :  { %8991 = verf.f32 %v6360_v53  ;;  %v6359_v28 = vmul.f32 0.70710677, %v6297_v22  ;;  %v6312_v40 = vadd.f32 %v8694_v12, %v11282_v58  ;;  %v6421_v23 = vadd.f32 %v6405_v50, %v10877_v44 }
0x14ad   :  { %v6306_v11 = vpop.f32.mrf.mxu1  ;;  %v6343_v49 = vmul.f32 0.5, %v6297_v22 }
0x14ae   :  { %8993 = verf.f32 %v6359_v28  ;;  %v6362_v48 = vmul.f32 0.70710677, %v6312_v40  ;;  %v6307_v17 = vadd.f32 %v11282_v58, %v6306_v11  ;;  %8718 = vmatprep.mubr.msk.f32.mxu0 %vm620_vm1, %v6421_v23  ;;  %v6346_v51 = vmul.f32 0.5, %v6312_v40 }
0x14af   :  { %v8697_v55 = vpop.f32.mrf.mxu1  ;;  %8719 = vmatmul.mubr.msk.f32.gmra.mxu0 %vm620_vm1, %v6422_v36 }
0x14b0   :  { %8995 = verf.f32 %v6362_v48  ;;  %v6361_v42 = vmul.f32 0.70710677, %v6307_v17  ;;  %v6322_v45 = vadd.f32 %v8697_v55, %v11282_v58  ;;  %v6345_v57 = vmul.f32 0.5, %v6307_v17 }
0x14b1   :  { %v6316_v21 = vpop.f32.mrf.mxu1 }
0x14b2   :  { %8997 = verf.f32 %v6361_v42  ;;  %v6364_v3 = vmul.f32 0.70710677, %v6322_v45  ;;  %v6317_v44 = vadd.f32 %v11282_v58, %v6316_v21  ;;  %v6348_v15 = vmul.f32 0.5, %v6322_v45 }
0x14b3   :  { %v8700_v59 = vpop.f32.mrf.mxu1 }
0x14b4   :  { %8999 = verf.f32 %v6364_v3  ;;  %v6363_v41 = vmul.f32 0.70710677, %v6317_v44  ;;  %v6332_v13 = vadd.f32 %v8700_v59, %v11282_v58  ;;  %v6347_v24 = vmul.f32 0.5, %v6317_v44 }
0x14b5   :  { %v6326_v20 = vpop.f32.mrf.mxu1 }
0x14b6   :  { %9001 = verf.f32 %v6363_v41  ;;  %v6366_v19 = vmul.f32 0.70710677, %v6332_v13  ;;  %v6327_v8 = vadd.f32 %v11282_v58, %v6326_v20  ;;  %v6350_v2 = vmul.f32 0.5, %v6332_v13 }
0x14b8   :  { %9003 = verf.f32 %v6366_v19  ;;  %v6365_v62 = vmul.f32 0.70710677, %v6327_v8  ;;  %v6349_v52 = vmul.f32 0.5, %v6327_v8 }
0x14b9   :  { %v8992_v29 = vpop.eup %8991 }
0x14ba   :  { %v6392_v39 = vadd.f32 1.0, %v8992_v29  ;;  %9005 = verf.f32 %v6365_v62 }
0x14bb   :  { %v8994_v1 = vpop.eup %8993 }
0x14bc   :  { %v6391_v10 = vadd.f32 1.0, %v8994_v1  ;;  %v6408_v14 = vmul.f32 %v6392_v39, %v6344_v27 }
0x14bd   :  { %v8996_v46 = vpop.eup %8995 }
0x14be   :  { %v6407_v16 = vmul.f32 %v6391_v10, %v6343_v49  ;;  %v6394_v5 = vadd.f32 1.0, %v8996_v46  ;;  %v6424_v7 = vadd.f32 %v6408_v14, %v10984_v26  ;;  %v11348_v10 = vld [vmem:[%s11448_s14] ss:$0 sm:$0xff]  ;;  %s9374_s14 = smov [#allocation11]  }
0x14bf   :  { %v8998_v60 = vpop.eup %8997  ;;  %s6931_s7 = sshll.u32 %s9374_s14, 4  ;;  %s6932_s7 = int_to_ptr.vmem [resolvable:$true] %s6931_s7 }
0x14c0   :  { %v6423_v54 = vadd.f32 %v6407_v16, %v10989_v37  ;;  %v6393_v38 = vadd.f32 1.0, %v8998_v60  ;;  %v6410_v0 = vmul.f32 %v6394_v5, %v6346_v51  ;;  %s9335_s1 = scalar_lea.vmem %s6932_s7, 16  ;;  %s9339_s28 = scalar_lea.vmem %s6932_s7, 32 }
0x14c1   :  { %v9000_v58 = vpop.eup %8999  ;;  %p9336_p6 = scmp.ne.s32.totalorder %s6932_s7, %s9335_s1  ;;  %p9340_p7 = scmp.lt.s32.totalorder %s6932_s7, %s6932_s7 }
0x14c2   :  { %v6409_v32 = vmul.f32 %v6393_v38, %v6345_v57  ;;  %v6396_v25 = vadd.f32 1.0, %v9000_v58  ;;  %8721 = vmatprep.mubr.msk.f32.mxu0 %vm620_vm1, %v6423_v54  ;;  %v6426_v37 = vadd.f32 %v6410_v0, %v10974_v35  ;;  %p9341_p8 = scmp.lt.s32.totalorder %s9339_s28, %s9335_s1 }
0x14c3   :  { %v9002_v63 = vpop.eup %9001  ;;  %8722 = vmatmul.mubr.msk.f32.gmra.mxu0 %vm620_vm1, %v6424_v7 }
0x14c4   :  { %v6425_v61 = vadd.f32 %v6409_v32, %v10979_v47  ;;  %v6395_v43 = vadd.f32 1.0, %v9002_v63  ;;  %v6412_v34 = vmul.f32 %v6396_v25, %v6348_v15  ;;  %p9342_p9 = por %p9341_p8, %p9340_p7 }
0x14c5   :  { %v9004_v30 = vpop.eup %9003 }
0x14c6   :  { %v6411_v31 = vmul.f32 %v6395_v43, %v6347_v24  ;;  %v6398_v33 = vadd.f32 1.0, %v9004_v30  ;;  %8724 = vmatprep.mubr.msk.f32.mxu0 %vm620_vm1, %v6425_v61  ;;  %v6428_v47 = vadd.f32 %v6412_v34, %v10962_v18  ;;  %p9343_p10 = pnand %p9342_p9, %p9336_p6 }
0x14c7   :  { %v9006_v26 = vpop.eup %9005  ;;  %8725 = vmatmul.mubr.msk.f32.gmra.mxu0 %vm620_vm1, %v6426_v37 }
0x14c8   :  { %v6427_v6 = vadd.f32 %v6411_v31, %v10968_v9  ;;  %v6397_v53 = vadd.f32 1.0, %v9006_v26  ;;  %v6414_v22 = vmul.f32 %v6398_v33, %v6350_v2  ;;  %v11335_v9 = vld [vmem:[%s11447_s13] ss:$0 sm:$0xff] }
0x14ca   :  { %v6413_v50 = vmul.f32 %v6397_v53, %v6349_v52  ;;  %8727 = vmatprep.mubr.msk.f32.mxu0 %vm620_vm1, %v6427_v6  ;;  %v6430_v12 = vadd.f32 %v6414_v22, %v10951_v56 }
0x14cb   :  { %8728 = vmatmul.mubr.msk.f32.gmra.mxu0 %vm620_vm1, %v6428_v47 }
0x14cc   :  { %v6429_v35 = vadd.f32 %v6413_v50, %v10956_v4 }
0x14ce   :  { %8730 = vmatprep.mubr.msk.f32.mxu0 %vm620_vm1, %v6429_v35 }
0x14cf   :  { %8731 = vmatmul.mubr.msk.f32.gmra.mxu0 %vm620_vm1, %v6430_v12 }
0x1563   :  { %v8711_v18 = vpop.f32.mrf.mxu0 }
0x1564   :  { %v6562_v28 = vadd.f32 %v8711_v18, %v11335_v9 }
0x1565   :  { %v6556_v40 = vpop.f32.mrf.mxu0 }
0x1566   :  { %v6652_v23 = vmul.f32 0.70710677, %v6562_v28  ;;  %v6557_v11 = vadd.f32 %v11335_v9, %v6556_v40  ;;  %v6636_v1 = vmul.f32 0.5, %v6562_v28 }
0x1567   :  { %v8714_v36 = vpop.f32.mrf.mxu0 }
0x1568   :  { %9007 = verf.f32 %v6652_v23  ;;  %v6651_v4 = vmul.f32 0.70710677, %v6557_v11  ;;  %v6572_v56 = vadd.f32 %v8714_v36, %v11335_v9  ;;  %v6635_v46 = vmul.f32 0.5, %v6557_v11 }
0x1569   :  { %v6566_v48 = vpop.f32.mrf.mxu0 }
0x156a   :  { %9009 = verf.f32 %v6651_v4  ;;  %v6654_v17 = vmul.f32 0.70710677, %v6572_v56  ;;  %v6567_v55 = vadd.f32 %v11335_v9, %v6566_v48  ;;  %v6638_v60 = vmul.f32 0.5, %v6572_v56 }
0x156b   :  { %v8717_v42 = vpop.f32.mrf.mxu0 }
0x156c   :  { %9011 = verf.f32 %v6654_v17  ;;  %v6653_v45 = vmul.f32 0.70710677, %v6567_v55  ;;  %v6582_v21 = vadd.f32 %v8717_v42, %v11335_v9  ;;  %v6637_v58 = vmul.f32 0.5, %v6567_v55 }
0x156d   :  { %v6576_v3 = vpop.f32.mrf.mxu0 }
0x156e   :  { %9013 = verf.f32 %v6653_v45  ;;  %v6656_v44 = vmul.f32 0.70710677, %v6582_v21  ;;  %v6577_v59 = vadd.f32 %v11335_v9, %v6576_v3  ;;  %v6640_v63 = vmul.f32 0.5, %v6582_v21 }
0x156f   :  { %v8720_v41 = vpop.f32.mrf.mxu0 }
0x1570   :  { %9015 = verf.f32 %v6656_v44  ;;  %v6655_v13 = vmul.f32 0.70710677, %v6577_v59  ;;  %v6592_v20 = vadd.f32 %v8720_v41, %v11335_v9  ;;  %v6639_v30 = vmul.f32 0.5, %v6577_v59 }
0x1571   :  { %v6586_v19 = vpop.f32.mrf.mxu0 }
0x1572   :  { %9017 = verf.f32 %v6655_v13  ;;  %v6658_v8 = vmul.f32 0.70710677, %v6592_v20  ;;  %v6587_v62 = vadd.f32 %v11335_v9, %v6586_v19  ;;  %v6642_v26 = vmul.f32 0.5, %v6592_v20 }
0x1574   :  { %9019 = verf.f32 %v6658_v8  ;;  %v6657_v29 = vmul.f32 0.70710677, %v6587_v62  ;;  %v6641_v23 = vmul.f32 0.5, %v6587_v62  ;;  %v6770_v62 = vld [vmem:[#allocation2] sm:$0x1] }
0x1575   :  { %v9008_v39 = vpop.eup %9007 }
0x1576   :  { %9021 = verf.f32 %v6657_v29  ;;  %v6684_v27 = vadd.f32 1.0, %v9008_v39 }
0x1577   :  { %v9010_v49 = vpop.eup %9009 }
0x1578   :  { %v6700_v14 = vmul.f32 %v6684_v27, %v6636_v1  ;;  %v6683_v16 = vadd.f32 1.0, %v9010_v49 }
0x1579   :  { %v9012_v5 = vpop.eup %9011 }
0x157a   :  { %v6723_v51 = vmul.f32 %v11348_v10, %v6700_v14  ;;  %v6699_v54 = vmul.f32 %v6683_v16, %v6635_v46  ;;  %v6686_v57 = vadd.f32 1.0, %v9012_v5 }
0x157b   :  { %v9014_v38 = vpop.eup %9013 }
0x157c   :  { %6740 = vadd.xlane.f32.xlu1 %v6723_v51  ;;  %v6722_v7 = vmul.f32 %v11348_v10, %v6699_v54  ;;  %v6702_v0 = vmul.f32 %v6686_v57, %v6638_v60  ;;  %v6685_v32 = vadd.f32 1.0, %v9014_v38 }
0x157d   :  { %v9016_v25 = vpop.eup %9015 }
0x157e   :  { %6738 = vadd.xlane.f32.xlu0 %v6722_v7  ;;  %v6725_v15 = vmul.f32 %v11348_v10, %v6702_v0  ;;  %v6701_v61 = vmul.f32 %v6685_v32, %v6637_v58  ;;  %v6688_v24 = vadd.f32 1.0, %v9016_v25 }
0x157f   :  { %v9018_v43 = vpop.eup %9017 }
0x1580   :  { %6744 = vadd.xlane.f32.xlu1 %v6725_v15  ;;  %v6724_v37 = vmul.f32 %v11348_v10, %v6701_v61  ;;  %v6704_v34 = vmul.f32 %v6688_v24, %v6640_v63  ;;  %v6687_v31 = vadd.f32 1.0, %v9018_v43 }
0x1581   :  { %v9020_v33 = vpop.eup %9019 }
0x1582   :  { %6742 = vadd.xlane.f32.xlu0 %v6724_v37  ;;  %v6727_v6 = vmul.f32 %v11348_v10, %v6704_v34  ;;  %v6703_v52 = vmul.f32 %v6687_v31, %v6639_v30  ;;  %v6690_v53 = vadd.f32 1.0, %v9020_v33 }
0x1583   :  { %v8723_v2 = vpop.f32.mrf.mxu0  ;;  %v9022_v47 = vpop.eup %9021 }
0x1584   :  { %v6602_v22 = vadd.f32 %v8723_v2, %v11335_v9  ;;  %6748 = vadd.xlane.f32.xlu1 %v6727_v6  ;;  %v6726_v35 = vmul.f32 %v11348_v10, %v6703_v52  ;;  %v6706_v12 = vmul.f32 %v6690_v53, %v6642_v26  ;;  %v6689_v18 = vadd.f32 1.0, %v9022_v47 }
0x1585   :  { %v6596_v50 = vpop.f32.mrf.mxu0 }
0x1586   :  { %v6660_v28 = vmul.f32 0.70710677, %v6602_v22  ;;  %v6597_v40 = vadd.f32 %v11335_v9, %v6596_v50  ;;  %6746 = vadd.xlane.f32.xlu0 %v6726_v35  ;;  %v6729_v56 = vmul.f32 %v11348_v10, %v6706_v12  ;;  %v6705_v48 = vmul.f32 %v6689_v18, %v6641_v23 }
0x1587   :  { %v8726_v11 = vpop.f32.mrf.mxu0  ;;  %v6644_v1 = vmul.f32 0.5, %v6602_v22 }
0x1588   :  { %9023 = verf.f32 %v6660_v28  ;;  %v6659_v36 = vmul.f32 0.70710677, %v6597_v40  ;;  %v6728_v3 = vmul.f32 %v11348_v10, %v6705_v48  ;;  %v6643_v14 = vmul.f32 0.5, %v6597_v40 }
0x1589   :  { %v6606_v4 = vpop.f32.mrf.mxu0  ;;  %v6612_v16 = vadd.f32 %v8726_v11, %v11335_v9 }
0x158a   :  { %9025 = verf.f32 %v6659_v36  ;;  %v6607_v17 = vadd.f32 %v11335_v9, %v6606_v4  ;;  %6752 = vadd.xlane.f32.xlu0 %v6729_v56 }
0x158b   :  { %v8729_v55 = vpop.f32.mrf.mxu0  ;;  %v6662_v38 = vmul.f32 0.70710677, %v6612_v16  ;;  %v6646_v18 = vmul.f32 0.5, %v6612_v16 }
0x158c   :  { %v6661_v42 = vmul.f32 0.70710677, %v6607_v17  ;;  %v6622_v45 = vadd.f32 %v8729_v55, %v11335_v9  ;;  %v6645_v58 = vmul.f32 0.5, %v6607_v17  ;;  %v6776_v17 = vlaneseq }
0x158d   :  { %v6616_v21 = vpop.f32.mrf.mxu0 }
0x158e   :  { %9027 = verf.f32 %v6661_v42  ;;  %v6664_v44 = vmul.f32 0.70710677, %v6622_v45  ;;  %v6617_v59 = vadd.f32 %v11335_v9, %v6616_v21  ;;  %6750 = vadd.xlane.f32.xlu0 %v6728_v3  ;;  %v6648_v61 = vmul.f32 0.5, %v6622_v45 }
0x158f   :  { %v8732_v41 = vpop.f32.mrf.mxu0  ;;  %v11374_v45 = vshrl.u32 %v6776_v17, 7  ;;  %v11377_v3 = vand.u32 127, %v6776_v17 }
0x1590   :  { %9029 = verf.f32 %v6664_v44  ;;  %v6663_v13 = vmul.f32 0.70710677, %v6617_v59  ;;  %v6632_v19 = vadd.f32 %v8732_v41, %v11335_v9  ;;  %v6647_v37 = vmul.f32 0.5, %v6617_v59 }
0x1591   :  { %v6626_v20 = vpop.f32.mrf.mxu0  ;;  %v6778_v21 = vsub.s32 0, %v11374_v45  ;;  %v6902_v17 = vadd.s32 4294967192, %v11377_v3 }
0x1592   :  { %9031 = verf.f32 %v6663_v13  ;;  %v6627_v8 = vadd.f32 %v11335_v9, %v6626_v20  ;;  %v6666_v27 = vmul.f32 0.70710677, %v6632_v19  ;;  %v6650_v47 = vmul.f32 0.5, %v6632_v19 }
0x1593   :  { %v6825_v20 = vadd.s32 4294967280, %v11377_v3 }
0x1594   :  { %v6665_v29 = vmul.f32 0.70710677, %v6627_v8  ;;  %v6649_v2 = vmul.f32 0.5, %v6627_v8 }
0x1595   :  { %v9024_v39 = vpop.eup %9023  ;;  %6773 = vperm.xlu1 %8749, %v6770_v62   ;;  %v6816_v62 = vsub.s32 %v11377_v3, %v11374_v45 }
0x1596   :  { %9033 = verf.f32 %v6665_v29  ;;  %v6692_v49 = vadd.f32 1.0, %v9024_v39 }
0x1597   :  { %v9026_v46 = vpop.eup %9025  ;;  %9035 = verf.f32 %v6666_v27  ;;  %v6828_v27 = vsub.s32 %v6825_v20, %v11374_v45 }
0x1598   :  { %v6708_v5 = vmul.f32 %v6692_v49, %v6644_v1  ;;  %v6691_v60 = vadd.f32 1.0, %v9026_v46  ;;  %9037 = verf.f32 %v6662_v38 }
0x159a   :  { %v6731_v51 = vmul.f32 %v11348_v10, %v6708_v5  ;;  %v6707_v54 = vmul.f32 %v6691_v60, %v6643_v14  ;;  %v6832_v14 = vadd.s32 4294967272, %v11377_v3  ;;  %v6839_v5 = vadd.s32 4294967264, %v11377_v3 }
0x159b   :  { %v9028_v57 = vpop.eup %9027 }
0x159c   :  { %6756 = vadd.xlane.f32.xlu0 %v6731_v51  ;;  %v6693_v7 = vadd.f32 1.0, %v9028_v57  ;;  %v6730_v32 = vmul.f32 %v11348_v10, %v6707_v54  ;;  %v6835_v57 = vsub.s32 %v6832_v14, %v11374_v45 }
0x159d   :  { %v9030_v0 = vpop.eup %9029 }
0x159e   :  { %v6709_v25 = vmul.f32 %v6693_v7, %v6645_v58  ;;  %v6696_v63 = vadd.f32 1.0, %v9030_v0  ;;  %v6842_v58 = vsub.s32 %v6839_v5, %v11374_v45  ;;  %v6846_v7 = vadd.s32 4294967256, %v11377_v3 }
0x159f   :  { %v9032_v15 = vpop.eup %9031 }
0x15a0   :  { %6754 = vadd.xlane.f32.xlu0 %v6730_v32  ;;  %v6732_v9 = vmul.f32 %v11348_v10, %v6709_v25  ;;  %v6712_v24 = vmul.f32 %v6696_v63, %v6648_v61  ;;  %v6695_v43 = vadd.f32 1.0, %v9032_v15  ;;  %v6853_v25 = vadd.s32 4294967248, %v11377_v3 }
0x15a2   :  { %v6735_v34 = vmul.f32 %v11348_v10, %v6712_v24  ;;  %v6711_v31 = vmul.f32 %v6695_v43, %v6647_v37  ;;  %v6856_v43 = vsub.s32 %v6853_v25, %v11374_v45  ;;  %v6867_v37 = vadd.s32 4294967232, %v11377_v3 }
0x15a3   :  { %v9034_v30 = vpop.eup %9033 }
0x15a4   :  { %6758 = vadd.xlane.f32.xlu0 %v6732_v9  ;;  %v6697_v33 = vadd.f32 1.0, %v9034_v30  ;;  %v9036_v26 = vpop.eup %9035  ;;  %v6734_v6 = vmul.f32 %v11348_v10, %v6711_v31  ;;  %v6849_v9 = vsub.s32 %v6846_v7, %v11374_v45  ;;  %v6860_v31 = vadd.s32 4294967240, %v11377_v3 }
0x15a5   :  { %v6698_v53 = vadd.f32 1.0, %v9036_v26  ;;  %v9038_v22 = vpop.eup %9037 }
0x15a6   :  { %v6713_v52 = vmul.f32 %v6697_v33, %v6649_v2  ;;  %v6694_v12 = vadd.f32 1.0, %v9038_v22  ;;  %v6874_v2 = vadd.s32 4294967224, %v11377_v3  ;;  %v6863_v22 = vsub.s32 %v6860_v31, %v11374_v45 }
0x15a7   :  { %v6714_v35 = vmul.f32 %v6698_v53, %v6650_v47  ;;  %v6870_v53 = vsub.s32 %v6867_v37, %v11374_v45 }
0x15a8   :  { %6764 = vadd.xlane.f32.xlu0 %v6735_v34  ;;  %v6736_v50 = vmul.f32 %v11348_v10, %v6713_v52  ;;  %v6710_v40 = vmul.f32 %v6694_v12, %v6646_v18  ;;  %v6877_v18 = vsub.s32 %v6874_v2, %v11374_v45 }
0x15a9   :  { %v6737_v28 = vmul.f32 %v11348_v10, %v6714_v35 }
0x15aa   :  { %v6733_v23 = vmul.f32 %v11348_v10, %v6710_v40  ;;  %v6818_v10 = vadd.s32 4294967288, %v11377_v3  ;;  %v6888_v40 = vadd.s32 4294967208, %v11377_v3 }
0x15ac   :  { %6762 = vadd.xlane.f32.xlu0 %v6734_v6  ;;  %v6821_v29 = vsub.s32 %v6818_v10, %v11374_v45  ;;  %v6881_v6 = vadd.s32 4294967216, %v11377_v3 }
0x15b0   :  { %6766 = vadd.xlane.f32.xlu0 %v6736_v50 }
0x15b4   :  { %6768 = vadd.xlane.f32.xlu0 %v6737_v28  ;;  %v6884_v28 = vsub.s32 %v6881_v6, %v11374_v45 }
0x15b9   :  { %6760 = vadd.xlane.f32.xlu1 %v6733_v23 }
0x1605   :  { %v6741_v36 = vpop.xlane.xlu1 %6740 }
0x1607   :  { %v6739_v11 = vpop.xlane.xlu0 %6738 }
0x1609   :  { %v6745_v56 = vpop.xlane.xlu1 %6744 }
0x160b   :  { %v6743_v4 = vpop.xlane.xlu0 %6742 }
0x160d   :  { %v6749_v55 = vpop.xlane.xlu1 %6748 }
0x160f   :  { %v6747_v48 = vpop.xlane.xlu0 %6746 }
0x1611   :  { %v6774_v44 = vpop.permute.xlu1 %6773 }
0x1612   :  { %v11379_v41 = vrot.slane %v6774_v44, %v6778_v21  ;;  %v6891_v44 = vsub.s32 %v6888_v40, %v11374_v45 }
0x1613   :  { %v6753_v42 = vpop.xlane.xlu0 %6752 }
0x1614   :  { %v6780_v19 = vadd.f32 %v11379_v41, %v6739_v11  ;;  %v6781_v8 = vadd.f32 %v11379_v41, %v6741_v36  ;;  %v6782_v1 = vadd.f32 %v11379_v41, %v6743_v4  ;;  %v6783_v51 = vadd.f32 %v11379_v41, %v6745_v56 }
0x1615   :  { %v6784_v0 = vadd.f32 %v11379_v41, %v6747_v48  ;;  %v6785_v15 = vadd.f32 %v11379_v41, %v6749_v55  ;;  %v6787_v50 = vadd.f32 %v11379_v41, %v6753_v42  ;;  %v6895_v4 = vadd.s32 4294967200, %v11377_v3 }
0x1616   :  { %v6817_v49 = vrot.slane %v6780_v19, %v6816_v62  ;;  %v6822_v46 = vrot.slane %v6781_v8, %v6821_v29  ;;  %v6829_v60 = vrot.slane %v6782_v1, %v6828_v27  ;;  %v6836_v63 = vrot.slane %v6783_v51, %v6835_v57 }
0x1617   :  { %v6751_v59 = vpop.xlane.xlu0 %6750  ;;  %v6843_v24 = vrot.slane %v6784_v0, %v6842_v58  ;;  %v6850_v26 = vrot.slane %v6785_v15, %v6849_v9  ;;  %v6864_v56 = vrot.slane %v6787_v50, %v6863_v22  ;;  %v6909_v55 = vadd.s32 4294967184, %v11377_v3 }
0x1618   :  { %v6824_v54 = vsel %vm6823_vm2, %v6822_v46, %v6817_v49  ;;  %v6786_v30 = vadd.f32 %v11379_v41, %v6751_v59  ;;  %v6916_v42 = vadd.s32 4294967176, %v11377_v3  ;;  %v6898_v20 = vsub.s32 %v6895_v4, %v11374_v45 }
0x1619   :  { %v6831_v32 = vsel %vm6830_vm3, %v6829_v60, %v6824_v54  ;;  %v6905_v29 = vsub.s32 %v6902_v17, %v11374_v45  ;;  %v6912_v1 = vsub.s32 %v6909_v55, %v11374_v45 }
0x161a   :  { %v6838_v61 = vsel %vm6837_vm4, %v6836_v63, %v6831_v32  ;;  %v6857_v52 = vrot.slane %v6786_v30, %v6856_v43  ;;  %v6919_v49 = vsub.s32 %v6916_v42, %v11374_v45 }
0x161b   :  { %v6845_v33 = vsel %vm6844_vm5, %v6843_v24, %v6838_v61 }
0x161c   :  { %v6852_v35 = vsel %vm6851_vm6, %v6850_v26, %v6845_v33 }
0x161d   :  { %v6859_v23 = vsel %vm6858_vm7, %v6857_v52, %v6852_v35 }
0x161e   :  { %v6866_v21 = vsel %vm6865_vm8, %v6864_v56, %v6859_v23 }
0x1625   :  { %v6757_v13 = vpop.xlane.xlu0 %6756 }
0x1626   :  { %v6789_v48 = vadd.f32 %v11379_v41, %v6757_v13 }
0x1628   :  { %v6878_v62 = vrot.slane %v6789_v48, %v6877_v18 }
0x1629   :  { %v6755_v39 = vpop.xlane.xlu0 %6754 }
0x162a   :  { %v6788_v47 = vadd.f32 %v11379_v41, %v6755_v39 }
0x162c   :  { %v6871_v11 = vrot.slane %v6788_v47, %v6870_v53 }
0x162d   :  { %v6759_v16 = vpop.xlane.xlu0 %6758 }
0x162e   :  { %v6790_v36 = vadd.f32 %v11379_v41, %v6759_v16  ;;  %v6873_v59 = vsel %vm6872_vm9, %v6871_v11, %v6866_v21 }
0x162f   :  { %v6880_v46 = vsel %vm6879_vm10, %v6878_v62, %v6873_v59 }
0x1630   :  { %v6885_v10 = vrot.slane %v6790_v36, %v6884_v28 }
0x1631   :  { %v6765_v38 = vpop.xlane.xlu0 %6764 }
0x1632   :  { %v6793_v39 = vadd.f32 %v11379_v41, %v6765_v38  ;;  %v6887_v5 = vsel %vm6886_vm11, %v6885_v10, %v6880_v46 }
0x1634   :  { %v6906_v51 = vrot.slane %v6793_v39, %v6905_v29 }
0x1635   :  { %v6763_v34 = vpop.xlane.xlu0 %6762 }
0x1636   :  { %v6792_v19 = vadd.f32 %v11379_v41, %v6763_v34 }
0x1638   :  { %v6899_v60 = vrot.slane %v6792_v19, %v6898_v20 }
0x1639   :  { %v6767_v12 = vpop.xlane.xlu0 %6766 }
0x163a   :  { %v6794_v27 = vadd.f32 %v11379_v41, %v6767_v12 }
0x163c   :  { %v6913_v57 = vrot.slane %v6794_v27, %v6912_v1 }
0x163d   :  { %v6769_v8 = vpop.xlane.xlu0 %6768 }
0x163e   :  { %v6795_v14 = vadd.f32 %v11379_v41, %v6769_v8 }
0x1640   :  { %v6920_v45 = vrot.slane %v6795_v14, %v6919_v49 }
0x1642   :  { %v6761_v13 = vpop.xlane.xlu1 %6760 }
0x1643   :  { %v6791_v3 = vadd.f32 %v11379_v41, %v6761_v13 }
0x1645   :  { %v6892_v16 = vrot.slane %v6791_v3, %v6891_v44 }
0x1647   :  { %v6894_v54 = vsel %vm6893_vm12, %v6892_v16, %v6887_v5 }
0x1648   :  { %v6901_v38 = vsel %vm6900_vm13, %v6899_v60, %v6894_v54 }
0x1649   :  { %v6908_v58 = vsel %vm6907_vm14, %v6906_v51, %v6901_v38 }
0x164a   :  { %v6915_v7 = vsel %vm6914_vm15, %v6913_v57, %v6908_v58 }
0x164b   :  { %v6922_v0 = vsel %vm6921_vm0, %v6920_v45, %v6915_v7 }
0x164c   :  { %6924 = vst [vmem:[#allocation11] sm:$0x1] %v6922_v0 }
0x164d   :  { %9346 = shalt.err (!%p9343_p10)
}
0x164e   :  { %6934 = dma.vmem_to_hbm [thread:$0]  %s6932_s7, 16, %s11450_s16, [#allocation5]  }
0x164f   :  { %9361 = dma.done.wait [#allocation5], 16  }
0x1650   :  { %9362 = vsyncadd [#allocation5], 4294967280 }
0x1651   :  { %6938 = vsyncpa [#allocation4], 1 }
0x1652   :  { %6939 = vsyncpa [#allocation7], 1 }
0x1653   :  { %6940 = vsyncpa [#allocation10], 1 }
0x1654   :  { %6941 = vsyncpa [#allocation5], 1 }

</bundles_post_ra>
